<compile_context>
chip_gen: v5e
topology: v5e:2x2
jax: 0.10.0
libtpu: 0.0.40
codegen_flags: <defaults>
</compile_context>

<pallas_src>
import math
import functools

import numpy as np
import jax
import jax.numpy as jnp
from jax import lax
from jax.experimental import pallas as pl
from jax.experimental.pallas import tpu as pltpu


def _pick_tile(dim, target, align):
    """Largest `align`-multiple divisor of `dim` that is <= `target`.

    Falls back to the full extent only when no aligned divisor exists
    (e.g. dim < align) — never a silent giant block for non-divisible dims.
    """
    if dim <= target:
        return dim
    t = (target // align) * align
    while t >= align:
        if dim % t == 0:
            return t
        t -= align
    return dim


# ----------------------------------------------------------------------------
# Tiled linear projection kernel:  out = x @ W^T + b   (PyTorch Linear layout)
#   x : [M, Din]   W : [Dout, Din] (bf16)   b : [1, Dout] (f32)
# Grid (M//tm, Dout//tn, Din//tk); bf16 MXU operands, f32 VMEM accumulator,
# K (Din) axis is the reduction ("arbitrary").
# ----------------------------------------------------------------------------
def _linear_kernel(x_ref, w_ref, b_ref, o_ref, acc_ref):
    @pl.when(pl.program_id(2) == 0)
    def _init():
        acc_ref[...] = jnp.zeros_like(acc_ref)

    # Contract Din of both operands directly — no materialized weight transpose.
    acc_ref[...] += lax.dot_general(
        x_ref[...].astype(jnp.bfloat16), w_ref[...].astype(jnp.bfloat16),
        dimension_numbers=(((1,), (1,)), ((), ())),
        preferred_element_type=jnp.float32)

    @pl.when(pl.program_id(2) == pl.num_programs(2) - 1)
    def _finalize():
        o_ref[...] = (acc_ref[...] + b_ref[...]).astype(o_ref.dtype)


def linear(x2d, weight, bias, *, out_dtype=None, tm=512, tn=512, tk=1024):
    """x2d: [M, Din], weight: [Dout, Din] (PyTorch layout), bias: [Dout]."""
    m, din = x2d.shape
    dout = weight.shape[0]
    out_dtype = out_dtype if out_dtype is not None else x2d.dtype
    tm = _pick_tile(m, tm, 8)
    tn = _pick_tile(dout, tn, 128)
    tk = _pick_tile(din, tk, 128)
    b2d = bias.reshape(1, dout).astype(jnp.float32)

    cost = pl.CostEstimate(
        flops=2 * m * din * dout,
        transcendentals=0,
        bytes_accessed=int(x2d.size * x2d.dtype.itemsize
                           + weight.size * weight.dtype.itemsize
                           + 4 * dout
                           + m * dout * np.dtype(out_dtype).itemsize))

    return pl.pallas_call(
        _linear_kernel,
        out_shape=jax.ShapeDtypeStruct((m, dout), out_dtype),
        grid_spec=pltpu.PrefetchScalarGridSpec(
            num_scalar_prefetch=0,
            grid=(m // tm, dout // tn, din // tk),
            in_specs=[
                pl.BlockSpec((tm, tk), lambda i, j, k: (i, k)),
                pl.BlockSpec((tn, tk), lambda i, j, k: (j, k)),
                pl.BlockSpec((1, tn), lambda i, j, k: (0, j)),
            ],
            out_specs=pl.BlockSpec((tm, tn), lambda i, j, k: (i, j)),
            scratch_shapes=[pltpu.VMEM((tm, tn), jnp.float32)],
        ),
        compiler_params=pltpu.CompilerParams(
            dimension_semantics=("parallel", "parallel", "arbitrary"),
            # NOTE: cap at <=48 MiB for v7x (64 MiB physical VMEM) builds.
            vmem_limit_bytes=64 * 1024 * 1024),
        cost_estimate=cost,
    )(x2d, weight, b2d)


# ----------------------------------------------------------------------------
# Fused multi-head attention + W0 output projection.
# Grid (batch, query_tile, head); head is the innermost (reduction) axis.
#   q block : [1, tq, dk]    k, v blocks : [1, S, dk]   (per-head, lane-aligned)
#   w0      : [D, D] bf16 (PyTorch layout), b0 : [1, D] f32
#   out     : [1, tq, D]     lane-dense; written once per (batch, q-tile)
# Per-head outputs are staged in a (h, tq, dk) VMEM scratch (dynamic store on
# the leading dim only) and the W0 projection is ONE full-d_model matmul.
# ----------------------------------------------------------------------------
def _mha_w0_kernel(q_ref, k_ref, v_ref, w0_ref, b0_ref, o_ref, oh_ref,
                   *, h, approx_recip):
    head = pl.program_id(2)

    q = q_ref[0]          # (tq, dk) bf16 — 1/sqrt(dk) already folded into WQ
    k = k_ref[0]          # (S,  dk) bf16
    v = v_ref[0]          # (S,  dk) bf16

    # scores = Q @ K^T, contracting the last dims directly (no K transpose copy).
    scores = lax.dot_general(q, k, (((1,), (1,)), ((), ())),
                             preferred_element_type=jnp.float32)      # (tq, S)

    # f32 softmax statistics; normalization deferred until after P @ V so only
    # (tq, dk) elements are divided instead of (tq, S).
    row_max = jnp.max(scores, axis=-1, keepdims=True)
    e = jnp.exp(scores - row_max)
    denom = jnp.sum(e, axis=-1, keepdims=True)

    pv = jnp.dot(e.astype(jnp.bfloat16), v,
                 preferred_element_type=jnp.float32)                   # (tq, dk)
    if approx_recip:
        o_h = pv * pl.reciprocal(denom, approx=True)   # EUP; ~1e-3 rel error
    else:
        o_h = pv / denom                               # exact divide option

    # Stage this head's output.  No init needed: every head slab is rewritten
    # before the finalize read for each (batch, q-tile).
    oh_ref[head] = o_h.astype(oh_ref.dtype)

    # Finalize: ONE full-d_model W0 matmul per (batch, q-tile) instead of h
    # rank-dk updates, then bias add and a single lane-dense store.
    @pl.when(head == h - 1)
    def _finalize():
        o_heads = jnp.concatenate([oh_ref[hh] for hh in range(h)], axis=-1)
        out = lax.dot_general(o_heads, w0_ref[...],
                              (((1,), (1,)), ((), ())),
                              preferred_element_type=jnp.float32)      # (tq, D)
        o_ref[0] = (out + b0_ref[...]).astype(o_ref.dtype)


def fused_attention_w0(qkv, w0, b0, *, h, out_dtype, tq=128, approx_recip=True):
    """qkv: [B, S, 3*D] (Q|K|V column groups; within each group heads are the
    natural contiguous nn.Linear/view(h, dk) layout), w0: [D, D], b0: [D]."""
    b, s, d3 = qkv.shape
    d_model = d3 // 3
    dk = d_model // h
    # NOTE: per-head blocks assume dk is a multiple of 128 (lane dim); for
    # smaller dk pad heads to 128 lanes or fall back to full-width blocks.
    tq = _pick_tile(s, tq, 8)
    nq = s // tq

    kernel = functools.partial(_mha_w0_kernel, h=h, approx_recip=approx_recip)

    cost = pl.CostEstimate(
        flops=int(b * h * 4 * s * s * dk + b * 2 * s * d_model * d_model),
        transcendentals=int(b * h * s * s),
        bytes_accessed=int(b * nq * h * (tq + 2 * s) * dk * qkv.dtype.itemsize
                           + w0.size * w0.dtype.itemsize
                           + 4 * d_model
                           + b * s * d_model * np.dtype(out_dtype).itemsize))

    # The same qkv array is passed three times; the BlockSpecs fetch exactly the
    # per-head Q / K / V column blocks (aligned DMAs, no in-kernel lane slices).
    q_spec = pl.BlockSpec((1, tq, dk), lambda bi, qi, hi: (bi, qi, hi))
    k_spec = pl.BlockSpec((1, s, dk), lambda bi, qi, hi: (bi, 0, h + hi))
    v_spec = pl.BlockSpec((1, s, dk), lambda bi, qi, hi: (bi, 0, 2 * h + hi))

    return pl.pallas_call(
        kernel,
        out_shape=jax.ShapeDtypeStruct((b, s, d_model), out_dtype),
        grid_spec=pltpu.PrefetchScalarGridSpec(
            num_scalar_prefetch=0,
            grid=(b, nq, h),                     # heads innermost = reduction axis
            in_specs=[
                q_spec, k_spec, v_spec,
                pl.BlockSpec((d_model, d_model), lambda bi, qi, hi: (0, 0)),
                pl.BlockSpec((1, d_model), lambda bi, qi, hi: (0, 0)),
            ],
            out_specs=pl.BlockSpec((1, tq, d_model),
                                   lambda bi, qi, hi: (bi, qi, 0)),
            scratch_shapes=[pltpu.VMEM((h, tq, dk), jnp.bfloat16)],
        ),
        compiler_params=pltpu.CompilerParams(
            dimension_semantics=("parallel", "parallel", "arbitrary"),
            vmem_limit_bytes=64 * 1024 * 1024),
        cost_estimate=cost,
    )(qkv, qkv, qkv, w0, b0.reshape(1, d_model).astype(jnp.float32))


# ----------------------------------------------------------------------------
# MultiHeadedAttention forward
# ----------------------------------------------------------------------------
def multi_headed_attention(x, fused_params, h):
    """x: [B, S, d_model]; fused_params contains fused "WQKV" (bf16) and "W0"."""
    b, s, d_model = x.shape

    # Single fused QKV projection (one HBM read of x); bf16 intermediate.
    w_qkv, b_qkv = fused_params["WQKV"]
    qkv = linear(x.reshape(b * s, d_model), w_qkv, b_qkv,
                 out_dtype=jnp.bfloat16).reshape(b, s, 3 * d_model)

    # Attention with W0 fused (no head transposes, no [B,S,D] HBM round trip).
    w0, b0 = fused_params["W0"]
    return fused_attention_w0(qkv, w0, b0, h=h, out_dtype=x.dtype)


def fuse_qkv_params(params, h):
    """One-time (module-init) work: fuse QKV, fold the softmax scale, cast bf16."""
    wq, bq = params["WQ"]
    wk, bk = params["WK"]
    wv, bv = params["WV"]
    w0, b0 = params["W0"]
    d_model = wq.shape[0]
    dk = d_model // h
    scale = 1.0 / math.sqrt(dk)
    # Fold 1/sqrt(dk) into the Q projection weight AND bias — no in-kernel scale.
    w_qkv = jnp.concatenate([wq * scale, wk, wv], axis=0).astype(jnp.bfloat16)
    b_qkv = jnp.concatenate([bq * scale, bk, bv], axis=0).astype(jnp.float32)
    return {
        "WQKV": (w_qkv, b_qkv),
        "W0": (w0.astype(jnp.bfloat16), b0.astype(jnp.float32)),
    }


def init_params(key, d_model):
    """Deterministic Kaiming-uniform-ish init matching nn.Linear shapes (f32)."""
    params = {}
    bound = 1.0 / math.sqrt(d_model)
    for i, name in enumerate(["WQ", "WK", "WV", "W0"]):
        kw, kb = jax.random.split(jax.random.fold_in(key, i))
        w = jax.random.uniform(kw, (d_model, d_model), jnp.float32, -bound, bound)
        bb = jax.random.uniform(kb, (d_model,), jnp.float32, -bound, bound)
        params[name] = (w, bb)
    return params


def ref_forward(x, params, h):
    """Pure-JAX f32 reference matching the PyTorch module (mask=None, eval)."""
    b, s, d = x.shape
    dk = d // h

    def lin(t, w, bias):
        return t @ w.T + bias

    q = lin(x, *params["WQ"]).reshape(b, s, h, dk).transpose(0, 2, 1, 3)
    k = lin(x, *params["WK"]).reshape(b, s, h, dk).transpose(0, 2, 1, 3)
    v = lin(x, *params["WV"]).reshape(b, s, h, dk).transpose(0, 2, 1, 3)
    scores = jnp.einsum("bhqd,bhkd->bhqk", q, k) / math.sqrt(dk)
    p = jax.nn.softmax(scores, axis=-1)
    o = jnp.einsum("bhqk,bhkd->bhqd", p, v)
    o = o.transpose(0, 2, 1, 3).reshape(b, s, d)
    return lin(o, *params["W0"])


if __name__ == "__main__":
    # dk = 128 -> per-head blocks are 128-lane aligned; d_model >= 128 -> the
    # attention output stores are lane-dense (reviewer feedback).
    B, S, D_MODEL, H = 2, 256, 512, 4

    key = jax.random.PRNGKey(0)
    kx, kp = jax.random.split(key)
    x = jax.random.normal(kx, (B, S, D_MODEL), dtype=jnp.float32)
    params = init_params(kp, D_MODEL)
    fused_params = fuse_qkv_params(params, H)   # one-time "module init" work

    out = jax.block_until_ready(multi_headed_attention(x, fused_params, H))

    ref = ref_forward(x, params, H)
    assert out.shape == (B, S, D_MODEL)
    # Tolerance covers bf16 MXU operands + approximate-reciprocal normalization.
    assert jnp.allclose(out, ref, atol=2e-2, rtol=2e-2), "mismatch vs reference"

    print("KERNEL_OK")
</pallas_src>

<mosaic_0001>
module attributes {stable_mosaic.version = 11 : i64} {
  func.func @_linear_kernel(%arg0: i32, %arg1: i32, %arg2: i32, %arg3: memref<512x512xf32, #tpu.memory_space<vmem>>, %arg4: memref<512x512xbf16, #tpu.memory_space<vmem>>, %arg5: memref<1x512xf32, #tpu.memory_space<vmem>>, %arg6: memref<512x512xbf16, #tpu.memory_space<vmem>>, %arg7: memref<512x512xf32, #tpu.memory_space<vmem>>) attributes {dimension_semantics = [#tpu.dimension_semantics<parallel>, #tpu.dimension_semantics<parallel>, #tpu.dimension_semantics<arbitrary>], iteration_bounds = array<i64: 1, 3, 1>, scalar_prefetch = 0 : i64, scratch_operands = 1 : i64, tpu.core_type = #tpu.core_type<tc>, window_params = [{transform_indices = @transform_0, window_bounds = array<i64: 512, 512>}, {transform_indices = @transform_1, window_bounds = array<i64: 512, 512>}, {transform_indices = @transform_2, window_bounds = array<i64: 1, 512>}, {transform_indices = @transform_3, window_bounds = array<i64: 512, 512>}]} {
    %c0_i32 = arith.constant 0 : i32
    %0 = arith.cmpi eq, %arg2, %c0_i32 : i32
    %1 = arith.extui %0 : i1 to i32
    %c0_i32_0 = arith.constant 0 : i32
    %2 = arith.cmpi ne, %1, %c0_i32_0 : i32
    scf.if %2 {
      %cst_10 = arith.constant 0.000000e+00 : f32
      %13 = vector.broadcast %cst_10 : f32 to vector<512x512xf32>
      %c0_11 = arith.constant 0 : index
      %c0_12 = arith.constant 0 : index
      %14 = vector.load %arg7[%c0_11, %c0_12] : memref<512x512xf32, #tpu.memory_space<vmem>>, vector<512x512xf32>
      tpu.vector_store %arg7[%c0_11, %c0_12], %13 {strides = array<i32>} : memref<512x512xf32, #tpu.memory_space<vmem>>, vector<512x512xf32>,
    } else {
    }
    %c0 = arith.constant 0 : index
    %c0_1 = arith.constant 0 : index
    %3 = vector.load %arg7[%c0, %c0_1] : memref<512x512xf32, #tpu.memory_space<vmem>>, vector<512x512xf32>
    %c0_2 = arith.constant 0 : index
    %c0_3 = arith.constant 0 : index
    %4 = vector.load %arg3[%c0_2, %c0_3] : memref<512x512xf32, #tpu.memory_space<vmem>>, vector<512x512xf32>
    %5 = arith.truncf %4 : vector<512x512xf32> to vector<512x512xbf16>
    %c0_4 = arith.constant 0 : index
    %c0_5 = arith.constant 0 : index
    %6 = vector.load %arg4[%c0_4, %c0_5] : memref<512x512xbf16, #tpu.memory_space<vmem>>, vector<512x512xbf16>
    %cst = arith.constant dense<0.000000e+00> : vector<512x512xf32>
    %7 = tpu.matmul %5, %6, %cst {dimension_numbers = #tpu.dot_dimension_numbers<[1], [1], [0], [0], [0, 0, 1, 0], [], []>} : vector<512x512xbf16>, vector<512x512xbf16>, vector<512x512xf32> -> vector<512x512xf32>
    %8 = arith.addf %3, %7 : vector<512x512xf32>
    %c0_6 = arith.constant 0 : index
    %c0_7 = arith.constant 0 : index
    %9 = vector.load %arg7[%c0_6, %c0_7] : memref<512x512xf32, #tpu.memory_space<vmem>>, vector<512x512xf32>
    tpu.vector_store %arg7[%c0_6, %c0_7], %8 {strides = array<i32>} : memref<512x512xf32, #tpu.memory_space<vmem>>, vector<512x512xf32>,
    %c0_i32_8 = arith.constant 0 : i32
    %10 = arith.cmpi eq, %arg2, %c0_i32_8 : i32
    %11 = arith.extui %10 : i1 to i32
    %c0_i32_9 = arith.constant 0 : i32
    %12 = arith.cmpi ne, %11, %c0_i32_9 : i32
    scf.if %12 {
      %c0_10 = arith.constant 0 : index
      %c0_11 = arith.constant 0 : index
      %13 = vector.load %arg7[%c0_10, %c0_11] : memref<512x512xf32, #tpu.memory_space<vmem>>, vector<512x512xf32>
      %c0_12 = arith.constant 0 : index
      %c0_13 = arith.constant 0 : index
      %14 = vector.load %arg5[%c0_12, %c0_13] : memref<1x512xf32, #tpu.memory_space<vmem>>, vector<1x512xf32>
      %15 = vector.broadcast %14 : vector<1x512xf32> to vector<512x512xf32>
      %16 = arith.addf %13, %15 : vector<512x512xf32>
      %17 = arith.truncf %16 : vector<512x512xf32> to vector<512x512xbf16>
      %c0_14 = arith.constant 0 : index
      %c0_15 = arith.constant 0 : index
      %18 = vector.load %arg6[%c0_14, %c0_15] : memref<512x512xbf16, #tpu.memory_space<vmem>>, vector<512x512xbf16>
      tpu.vector_store %arg6[%c0_14, %c0_15], %17 {strides = array<i32>} : memref<512x512xbf16, #tpu.memory_space<vmem>>, vector<512x512xbf16>,
    } else {
    }
    return
  }
  func.func @transform_0(%arg0: i32, %arg1: i32, %arg2: i32) -> (i32, i32) {
    %c0_i32 = arith.constant 0 : i32
    return %arg0, %arg2 : i32, i32
  }
  func.func @transform_1(%arg0: i32, %arg1: i32, %arg2: i32) -> (i32, i32) {
    %c0_i32 = arith.constant 0 : i32
    return %arg1, %arg2 : i32, i32
  }
  func.func @transform_2(%arg0: i32, %arg1: i32, %arg2: i32) -> (i32, i32) {
    %c0_i32 = arith.constant 0 : i32
    %c0_i32_0 = arith.constant 0 : i32
    return %c0_i32, %arg1 : i32, i32
  }
  func.func @transform_3(%arg0: i32, %arg1: i32, %arg2: i32) -> (i32, i32) {
    %c0_i32 = arith.constant 0 : i32
    return %arg0, %arg1 : i32, i32
  }
}

</mosaic_0001>

<bundles_post_ra>
// kernel: tpu_custom_call.1
= control target key start
LH: loop header
LB: loop body
LE: loop exit
PB: predicated region body
PF: predicated region fallthrough
CT: control target
= control target key end

     0   :  { %s9041_s0 = inlined_call_operand.hbm [shape: f32[512,512], index: 0, kind: input, shape index: {}]   ;;  %s9042_s1 = inlined_call_operand.hbm [shape: bf16[1536,512], index: 1, kind: input, shape index: {}]   ;;  %s9043_s2 = inlined_call_operand.hbm [shape: f32[1,1536], index: 2, kind: input, shape index: {}]   ;;  %s9044_s3 = inlined_call_operand.hbm [shape: bf16[512,1536], index: 3, kind: output, shape index: {}]  }
   0x1   :  { %9250 = sst [smem:[#allocation163_spill]] %s9041_s0 }
   0x2   :  { %9251 = sst [smem:[#allocation164_spill]] %s9042_s1 }
   0x3   :  { %8 = vsyncpa [#allocation4], 0 }
   0x4   :  { %9 = vsyncpa [#allocation7], 0 }
   0x5   :  { %11 = vsyncpa [#allocation7 + $0x1], 0 }
   0x6   :  { %12 = vsyncpa [#allocation5], 0 }
   0x7   :  { %14 = vsyncpa [#allocation5 + $0x1], 0  ;;  %s7057_s12 = smov 0   ;;  %s7059_s13 = smov 0  }
   0x8   :  { %s7061_s14 = smov 0   ;;  %s7063_s15 = smov 0  }
   0x9   :  { %s7065_s16 = smov 0   ;;  %s7067_s17 = smov 0  }
   0xa LB: > { %s35_s18 = sadd.s32 1, %s7023_s16  ;;  %s76_s19 = sadd.s32 1, %s7015_s14  ;;  %s7027_s17 = sphi %s7067_s17, %s20_s17   ;;  %s7023_s16 = sphi %s7065_s16, %s9815_s16   ;;  %s7019_s15 = sphi %s7063_s15, %s9814_s15   ;;  %s7015_s14 = sphi %s7061_s14, %s9813_s14   ;;  %s7011_s13 = sphi %s7059_s13, %s9812_s13   ;;  %s7007_s12 = sphi %s7057_s12, %s9811_s12  }
   0xb   : > { %p37_p0 = scmp.ge.s32.totalorder %s35_s18, 3  ;;  %p83_p1 = scmp.ne.s32.totalorder %s7015_s14, %s7011_s13 }
   0xc   : > { %p84_p2 = scmp.eq.s32.totalorder %s7027_s17, 0  ;;  %p6791_p4 = scmp.lt.s32.totalorder %s7027_s17, 3 }
   0xd   : > { %s9817_s18 = smov (%p37_p0, %s35_s18), 0  ;;  %s187_s22 = sand.u32 1, %s7027_s17  }
   0xe   : > { %p7097_p3 = por %p84_p2, %p83_p1  ;;  %s71_s21 = ssub.s32 %s7023_s16, %s9817_s18 }
   0xf   : > { %p74_p5 = scmp.eq.s32.totalorder %s71_s21, 0  ;;  %s189_s23 = sand.u32 1, %s7015_s14  }
  0x10   : > { %s6635_s24 = sshll.u32 %s7023_s16, 10  ;;  %s6106_s26 = sshll.u32 %s189_s23, 10 }
  0x11   : > { %s7108_s25 = scalar_select %p74_p5, %s7015_s14, %s76_s19  }
  0x12   : > { %s9253_s1 = sld [smem:[#allocation164_spill]]  ;;  %s191_s4 = scalar_lea.vmem [#allocation6], %s6106_s26 }
  0x13   : > { %s202_s5 = sshll.u32 %s191_s4, 4  ;;  %p7119_p6 = pnand %p6791_p4, %p7097_p3  ;;  %s203_s5 = int_to_ptr.vmem [resolvable:$true] %s202_s5 }
  0x14   : > { %s7123_s7 = scalar_lea.sflag [#allocation7], %s187_s22  ;;  %s7029_s8 = smov 256  }
  0x15   : > { %s7030_s9 = smov 16   ;;  %s7129_s10 = sadd.s32 4294967295, %s7027_s17  }
  0x16   : > { %s6102_s11 = sadd.s32 4294967294, %s7027_s17   ;;  %p89_p7 = scmp.ne.s32.totalorder %s7011_s13, %s7007_s12 }
  0x17   : > { %p90_p8 = scmp.eq.s32.totalorder %s7129_s10, 0  ;;  %p141_p9 = scmp.eq.s32.totalorder %s7129_s10, 2 }
  0x18   : > { %s199_s29 = scalar_lea.hbm %s9253_s1, %s6635_s24  ;;  %p147_p10 = scmp.eq.s32.totalorder %s6102_s11, 2 }
  0x19   : > { %s200_s30 = sshll.u32 %s199_s29, 4  ;;  %p6103_p11 = scmp.ge.s32.totalorder %s7027_s17, 1  ;;  %s201_s30 = int_to_ptr.hbm [resolvable:$true] %s200_s30 }
  0x1a   : > { %6782 = dma.hbm_to_vmem [thread:$0]  (!%p7119_p6), %s201_s30, 16384, %s203_s5, %s7123_s7, %s7029_s8, %s7029_s8, %s7030_s9  }
  0x1b   : > { %p7139_p12 = por %p90_p8, %p89_p7  ;;  %p7146_p13 = por %p141_p9, %p83_p1 }
  0x1c   : > { %p7150_p0 = por %p147_p10, %p89_p7  ;;  %p154_p2 = scmp.lt.s32.totalorder %s7027_s17, 4 }
  0x1d   : > { %s9258_s0 = sld [smem:[#allocation163_spill]]  ;;  %s7031_s28 = smov [#allocation3]  }
  0x1e   : > { %p7158_p3 = pnand %p6103_p11, %p154_p2  ;;  %s173_s29 = sshll.u32 %s7031_s28, 4  ;;  %s174_s29 = int_to_ptr.vmem [resolvable:$true] %s173_s29 }
  0x1f   : > { %s6110_s30 = sshll.u32 %s189_s23, 2  ;;  %s6111_s4 = sshll.u32 %s7023_s16, 2 }
  0x20   : > { %p6775_p1 = pneg %p7158_p3  ;;  %s220_s9 = scalar_lea.hbm %s9043_s2, %s6111_s4 }
  0x21   : > { %s7032_s11 = smov 512   ;;  %s7033_s22 = smov 32  }
  0x22   : > { %p6776_p4 = pnand %p6775_p1, %p90_p8  ;;  %s222_s24 = sshll.u32 %s220_s9, 4  ;;  %s223_s24 = int_to_ptr.hbm [resolvable:$true] %s222_s24 }
  0x23   : > { %s171_s26 = sshll.u32 %s9258_s0, 4  ;;  %s216_s0 = scalar_lea.vmem [#allocation8], %s6110_s30  ;;  %s172_s26 = int_to_ptr.hbm [resolvable:$true] %s171_s26 }
  0x24   : > { %6778 = dma.hbm_to_vmem [thread:$0]  (!%p6776_p4), %s172_s26, 32768, %s174_s29, [#allocation4], %s7032_s11, %s7032_s11, %s7033_s22  }
  0x25   : > { %s224_s1 = sshll.u32 %s216_s0, 4  ;;  %233 = sbr.rel (%p7158_p3) target bundleno = 2300 (0x8fc), region = 32  ;;  %s225_s1 = int_to_ptr.vmem [resolvable:$true] %s224_s1 }
  0x26   : > { %6785 = dma.hbm_to_vmem [thread:$0]  (!%p7119_p6), %s223_s24, 64, %s225_s1, %s7123_s7  }
  0x2a   : > { %6994 = dma.done.wait (%p90_p8), [#allocation4], 32768  }
  0x2b   : > { %6996 = vsyncadd (%p90_p8), [#allocation4], 4294934528  ;;  %s240_s23 = sand.u32 1, %s7129_s10   ;;  %s7183_s26 = sand.u32 1, %s7011_s13  }
  0x2c   : > { %s6114_s0 = sshll.u32 %s7183_s26, 10  ;;  %s241_s6 = scalar_lea.sflag [#allocation7], %s240_s23 }
  0x2d   : > { %s7188_s1 = scalar_lea.vmem [#allocation6], %s6114_s0 }
  0x2e   : > { %6998 = dma.done.wait (%p7139_p12), %s241_s6, 16448  }
  0x2f   : > { %7000 = vsyncadd (%p7139_p12), %s241_s6, 4294950848  ;;  %v6231_v0 = vld [vmem:[%s7188_s1 + $0xe0] sm:$0xf]  ;;  %v6666_v1 = vld [vmem:[%s7188_s1 + $0xec] sm:$0xf0]  ;;  %s6115_s7 = sshll.u32 %s7183_s26, 2 }
  0x30   : > { %v6664_v2 = vld [vmem:[%s7188_s1 + $0xe4] sm:$0xf]  ;;  %v6232_v3 = vor.u32 %v6666_v1, %v6231_v0  ;;  %v6233_v4 = vld [vmem:[%s7188_s1 + $0xf0] sm:$0xf0]  ;;  %v6239_v5 = vld [vmem:[%s7188_s1 + $0xe8] sm:$0xf] }
  0x31   : > { %v6667_v6 = vld [vmem:[%s7188_s1 + $0xf4] sm:$0xf0]  ;;  %v6236_v7 = vor.u32 %v6664_v2, %v6233_v4  ;;  %v6665_v9 = vld [vmem:[%s7188_s1 + $0xec] sm:$0xf]  ;;  %v6241_v10 = vld [vmem:[%s7188_s1 + $0xf8] sm:$0xf0] }
  0x32   : > { %v6240_v8 = vor.u32 %v6667_v6, %v6239_v5  ;;  %1958 = vmatpush.bf16.xpose.msra.mxu0 %v6232_v3  ;;  %v6244_v11 = vor.u32 %v6665_v9, %v6241_v10  ;;  %v6215_v12 = vld [vmem:[%s7188_s1 + $0xc0] sm:$0xf]  ;;  %v6662_v13 = vld [vmem:[%s7188_s1 + $0xcc] sm:$0xf0]  ;;  %v6660_v14 = vld [vmem:[%s7188_s1 + $0xc4] sm:$0xf] }
  0x33   : > { %2127 = vmatpush.bf16.xpose.msra.mxu1 %v6236_v7  ;;  %v6217_v15 = vld [vmem:[%s7188_s1 + $0xd0] sm:$0xf0]  ;;  %v6223_v16 = vld [vmem:[%s7188_s1 + $0xc8] sm:$0xf]  ;;  %v6663_v17 = vld [vmem:[%s7188_s1 + $0xd4] sm:$0xf0]  ;;  %v6216_v20 = vor.u32 %v6662_v13, %v6215_v12 }
  0x34   : > { %2296 = vmatpush.bf16.xpose.msra.mxu2 %v6240_v8  ;;  %2465 = vmatpush.bf16.xpose.msra.mxu3 %v6244_v11  ;;  %v6661_v18 = vld [vmem:[%s7188_s1 + $0xcc] sm:$0xf]  ;;  %v6225_v19 = vld [vmem:[%s7188_s1 + $0xd8] sm:$0xf0]  ;;  %v6220_v21 = vor.u32 %v6660_v14, %v6217_v15  ;;  %v6224_v22 = vor.u32 %v6663_v17, %v6223_v16  ;;  %v6199_v24 = vld [vmem:[%s7188_s1 + $0xa0] sm:$0xf] }
  0x35   : > { %v6228_v23 = vor.u32 %v6661_v18, %v6225_v19  ;;  %v6658_v25 = vld [vmem:[%s7188_s1 + $0xac] sm:$0xf0]  ;;  %v6656_v26 = vld [vmem:[%s7188_s1 + $0xa4] sm:$0xf]  ;;  %v6201_v27 = vld [vmem:[%s7188_s1 + $0xb0] sm:$0xf0] }
  0x36   : > { %v6207_v28 = vld [vmem:[%s7188_s1 + $0xa8] sm:$0xf]  ;;  %v6659_v29 = vld [vmem:[%s7188_s1 + $0xb4] sm:$0xf0]  ;;  %v6657_v30 = vld [vmem:[%s7188_s1 + $0xac] sm:$0xf]  ;;  %v6200_v32 = vor.u32 %v6658_v25, %v6199_v24  ;;  %v6204_v33 = vor.u32 %v6656_v26, %v6201_v27 }
  0x37   : > { %v6209_v31 = vld [vmem:[%s7188_s1 + $0xb8] sm:$0xf0]  ;;  %v6208_v34 = vor.u32 %v6659_v29, %v6207_v28  ;;  %v6183_v36 = vld [vmem:[%s7188_s1 + $0x80] sm:$0xf]  ;;  %v6654_v37 = vld [vmem:[%s7188_s1 + $0x8c] sm:$0xf0] }
  0x38   : > { %v6212_v35 = vor.u32 %v6657_v30, %v6209_v31  ;;  %v6652_v38 = vld [vmem:[%s7188_s1 + $0x84] sm:$0xf]  ;;  %v6185_v39 = vld [vmem:[%s7188_s1 + $0x90] sm:$0xf0]  ;;  %v6191_v40 = vld [vmem:[%s7188_s1 + $0x88] sm:$0xf]  ;;  %v6184_v44 = vor.u32 %v6654_v37, %v6183_v36 }
  0x39   : > { %v6655_v41 = vld [vmem:[%s7188_s1 + $0x94] sm:$0xf0]  ;;  %v6653_v42 = vld [vmem:[%s7188_s1 + $0x8c] sm:$0xf]  ;;  %v6193_v43 = vld [vmem:[%s7188_s1 + $0x98] sm:$0xf0]  ;;  %v6188_v45 = vor.u32 %v6652_v38, %v6185_v39 }
  0x3a   : > { %1959 = vmatpush.bf16.xpose.msra.mxu0 %v6216_v20  ;;  %v6192_v46 = vor.u32 %v6655_v41, %v6191_v40  ;;  %v6196_v47 = vor.u32 %v6653_v42, %v6193_v43  ;;  %v6167_v48 = vld [vmem:[%s7188_s1 + $0x60] sm:$0xf]  ;;  %v6650_v49 = vld [vmem:[%s7188_s1 + $0x6c] sm:$0xf0]  ;;  %v6648_v50 = vld [vmem:[%s7188_s1 + $0x64] sm:$0xf] }
  0x3b   : > { %2128 = vmatpush.bf16.xpose.msra.mxu1 %v6220_v21  ;;  %v6169_v51 = vld [vmem:[%s7188_s1 + $0x70] sm:$0xf0]  ;;  %v6175_v52 = vld [vmem:[%s7188_s1 + $0x68] sm:$0xf]  ;;  %v6651_v53 = vld [vmem:[%s7188_s1 + $0x74] sm:$0xf0]  ;;  %v6168_v56 = vor.u32 %v6650_v49, %v6167_v48 }
  0x3c   : > { %2297 = vmatpush.bf16.xpose.msra.mxu2 %v6224_v22  ;;  %2466 = vmatpush.bf16.xpose.msra.mxu3 %v6228_v23  ;;  %v6649_v54 = vld [vmem:[%s7188_s1 + $0x6c] sm:$0xf]  ;;  %v6177_v55 = vld [vmem:[%s7188_s1 + $0x78] sm:$0xf0]  ;;  %v6172_v57 = vor.u32 %v6648_v50, %v6169_v51  ;;  %v6176_v58 = vor.u32 %v6651_v53, %v6175_v52  ;;  %v6151_v60 = vld [vmem:[%s7188_s1 + $0x40] sm:$0xf] }
  0x3d   : > { %v6180_v59 = vor.u32 %v6649_v54, %v6177_v55  ;;  %v6646_v61 = vld [vmem:[%s7188_s1 + $0x4c] sm:$0xf0]  ;;  %v6644_v62 = vld [vmem:[%s7188_s1 + $0x44] sm:$0xf]  ;;  %v6153_v63 = vld [vmem:[%s7188_s1 + $0x50] sm:$0xf0] }
  0x3e   : > { %v6159_v0 = vld [vmem:[%s7188_s1 + $0x48] sm:$0xf]  ;;  %v6647_v1 = vld [vmem:[%s7188_s1 + $0x54] sm:$0xf0]  ;;  %v6645_v2 = vld [vmem:[%s7188_s1 + $0x4c] sm:$0xf]  ;;  %v6152_v4 = vor.u32 %v6646_v61, %v6151_v60  ;;  %v6156_v5 = vor.u32 %v6644_v62, %v6153_v63 }
  0x3f   : > { %v6161_v3 = vld [vmem:[%s7188_s1 + $0x58] sm:$0xf0]  ;;  %v6160_v6 = vor.u32 %v6647_v1, %v6159_v0  ;;  %v6135_v8 = vld [vmem:[%s7188_s1 + $0x20] sm:$0xf]  ;;  %v6642_v9 = vld [vmem:[%s7188_s1 + $0x2c] sm:$0xf0] }
  0x40   : > { %v6164_v7 = vor.u32 %v6645_v2, %v6161_v3  ;;  %v6640_v10 = vld [vmem:[%s7188_s1 + $0x24] sm:$0xf]  ;;  %v6137_v11 = vld [vmem:[%s7188_s1 + $0x30] sm:$0xf0]  ;;  %v6143_v12 = vld [vmem:[%s7188_s1 + $0x28] sm:$0xf]  ;;  %v6136_v16 = vor.u32 %v6642_v9, %v6135_v8 }
  0x41   : > { %v6643_v13 = vld [vmem:[%s7188_s1 + $0x34] sm:$0xf0]  ;;  %v6641_v14 = vld [vmem:[%s7188_s1 + $0x2c] sm:$0xf]  ;;  %v6145_v15 = vld [vmem:[%s7188_s1 + $0x38] sm:$0xf0]  ;;  %v6140_v17 = vor.u32 %v6640_v10, %v6137_v11 }
  0x42   : > { %1960 = vmatpush.bf16.xpose.msra.mxu0 %v6200_v32  ;;  %v6144_v18 = vor.u32 %v6643_v13, %v6143_v12  ;;  %v6148_v19 = vor.u32 %v6641_v14, %v6145_v15  ;;  %v6119_v20 = vld [vmem:[%s7188_s1] sm:$0xf]  ;;  %v6638_v21 = vld [vmem:[%s7188_s1 + $0xc] sm:$0xf0]  ;;  %v6636_v22 = vld [vmem:[%s7188_s1 + $0x4] sm:$0xf] }
  0x43   : > { %2129 = vmatpush.bf16.xpose.msra.mxu1 %v6204_v33  ;;  %v6121_v23 = vld [vmem:[%s7188_s1 + $0x10] sm:$0xf0]  ;;  %v6127_v24 = vld [vmem:[%s7188_s1 + $0x8] sm:$0xf]  ;;  %v6639_v25 = vld [vmem:[%s7188_s1 + $0x14] sm:$0xf0]  ;;  %v6120_v31 = vor.u32 %v6638_v21, %v6119_v20 }
  0x44   : > { %2298 = vmatpush.bf16.xpose.msra.mxu2 %v6208_v34  ;;  %2467 = vmatpush.bf16.xpose.msra.mxu3 %v6212_v35  ;;  %v6637_v26 = vld [vmem:[%s7188_s1 + $0xc] sm:$0xf]  ;;  %v6129_v27 = vld [vmem:[%s7188_s1 + $0x18] sm:$0xf0]  ;;  %v6367_v28 = vld [vmem:[%s7188_s1 + $0x1e8] sm:$0xf]  ;;  %v6124_v35 = vor.u32 %v6636_v22, %v6121_v23  ;;  %v6128_v36 = vor.u32 %v6639_v25, %v6127_v24 }
  0x45   : > { %v6699_v29 = vld [vmem:[%s7188_s1 + $0x1f4] sm:$0xf0]  ;;  %v6697_v30 = vld [vmem:[%s7188_s1 + $0x1ec] sm:$0xf]  ;;  %v6369_v32 = vld [vmem:[%s7188_s1 + $0x1f8] sm:$0xf0]  ;;  %v6132_v39 = vor.u32 %v6637_v26, %v6129_v27 }
  0x46   : > { %v6359_v33 = vld [vmem:[%s7188_s1 + $0x1e0] sm:$0xf]  ;;  %v6698_v34 = vld [vmem:[%s7188_s1 + $0x1ec] sm:$0xf0]  ;;  %v6696_v37 = vld [vmem:[%s7188_s1 + $0x1e4] sm:$0xf]  ;;  %v6368_v40 = vor.u32 %v6699_v29, %v6367_v28  ;;  %v6372_v41 = vor.u32 %v6697_v30, %v6369_v32 }
  0x47   : > { %v6361_v38 = vld [vmem:[%s7188_s1 + $0x1f0] sm:$0xf0]  ;;  %v6360_v42 = vor.u32 %v6698_v34, %v6359_v33  ;;  %v806_v43 = vld [vmem:[#allocation3] sm:$0xff]  ;;  %v809_v50 = vld [vmem:[#allocation3 + $0x18] sm:$0xff]  ;;  %s7894_s10 = scalar_lea.vmem [#allocation8], %s6115_s7  ;;  %s7907_s19 = scalar_lea.vmem [#allocation9], %s6114_s0 }
  0x48   : > { %v808_v48 = vld [vmem:[#allocation3 + $0x10] sm:$0xff]  ;;  %v813_v51 = vld [vmem:[#allocation3 + $0x38] sm:$0xff]  ;;  %v6343_v21 = vld [vmem:[%s7188_s1 + $0x1c0] sm:$0xf]  ;;  %s6764_s27 = sshll.u32 %s7019_s15, 4  ;;  %s5971_s4 = sshll.u32 %s7907_s19, 4  ;;  %s5972_s4 = int_to_ptr.vmem [resolvable:$true] %s5971_s4 }
  0x49   : > { %v812_v49 = vld [vmem:[#allocation3 + $0x30] sm:$0xff]  ;;  %v7272_v55 = vpack.c.bf16 %v813_v51, %v809_v50  ;;  %v817_v62 = vld [vmem:[#allocation3 + $0x58] sm:$0xff]  ;;  %v6692_v25 = vld [vmem:[%s7188_s1 + $0x1c4] sm:$0xf]  ;;  %s5970_s30 = scalar_lea.hbm %s9044_s3, %s6764_s27  ;;  %s5956_s15 = scalar_lea.sflag [#allocation5], %s7183_s26 }
  0x4a   : > { %1961 = vmatpush.bf16.xpose.msra.mxu0 %v6184_v44  ;;  %v810_v44 = vld [vmem:[#allocation3 + $0x20] sm:$0xff]  ;;  %v7270_v54 = vpack.c.bf16 %v812_v49, %v808_v48  ;;  %v816_v60 = vld [vmem:[#allocation3 + $0x50] sm:$0xff]  ;;  %v821_v63 = vld [vmem:[#allocation3 + $0x78] sm:$0xff]  ;;  %s5973_s5 = sshll.u32 %s5970_s30, 4  ;;  %s6961_s24 = scalar_lea.hbm %s9044_s3, 3072  ;;  %s5974_s5 = int_to_ptr.hbm [resolvable:$true] %s5973_s5 }
  0x4b   : > { %2130 = vmatpush.bf16.xpose.msra.mxu1 %v6188_v45  ;;  %v807_v45 = vld [vmem:[#allocation3 + $0x8] sm:$0xff]  ;;  %v7266_v52 = vpack.c.bf16 %v810_v44, %v806_v43  ;;  %v820_v61 = vld [vmem:[#allocation3 + $0x70] sm:$0xff]  ;;  %v7284_v3 = vpack.c.bf16 %v821_v63, %v817_v62  ;;  %v825_v10 = vld [vmem:[#allocation3 + $0x98] sm:$0xff]  ;;  %s6955_s8 = sshra.s32 %s5974_s5, 4  ;;  %s6956_s8 = int_to_ptr.hbm [resolvable:$true] %s6955_s8 }
  0x4c   : > { %2299 = vmatpush.bf16.xpose.msra.mxu2 %v6192_v46  ;;  %2468 = vmatpush.bf16.xpose.msra.mxu3 %v6196_v47  ;;  %v6364_v46 = vor.u32 %v6696_v37, %v6361_v38  ;;  %v811_v47 = vld [vmem:[#allocation3 + $0x28] sm:$0xff]  ;;  %v7282_v2 = vpack.c.bf16 %v820_v61, %v816_v60  ;;  %v824_v8 = vld [vmem:[#allocation3 + $0x90] sm:$0xff]  ;;  %v829_v11 = vld [vmem:[#allocation3 + $0xb8] sm:$0xff]  ;;  %s6957_s9 = scalar_lea.hbm %s6956_s8, 1024  ;;  %p6962_p8 = scmp.lt.s32.totalorder %s6956_s8, %s9044_s3 }
  0x4d   : > { %v7268_v53 = vpack.c.bf16 %v811_v47, %v807_v45  ;;  %9261 = vst [vmem:[#allocation14_spill] sm:$0xff] %v7284_v3  ;;  %v828_v9 = vld [vmem:[#allocation3 + $0xb0] sm:$0xff]  ;;  %v7296_v15 = vpack.c.bf16 %v829_v11, %v825_v10  ;;  %v6353_v20 = vld [vmem:[%s7188_s1 + $0x1d8] sm:$0xf0]  ;;  %v830_v28 = vld [vmem:[#allocation3 + $0xc0] sm:$0xff]  ;;  %p6958_p5 = scmp.ne.s32.totalorder %s6956_s8, %s6957_s9  ;;  %p6963_p9 = scmp.lt.s32.totalorder %s6961_s24, %s6957_s9 }
  0x4e   : > { %9260 = vst [vmem:[#allocation13_spill] sm:$0xff] %v7282_v2  ;;  %v7294_v14 = vpack.c.bf16 %v828_v9, %v824_v8  ;;  %v6694_v22 = vld [vmem:[%s7188_s1 + $0x1cc] sm:$0xf0]  ;;  %v6345_v26 = vld [vmem:[%s7188_s1 + $0x1d0] sm:$0xf0]  ;;  %v834_v29 = vld [vmem:[#allocation3 + $0xe0] sm:$0xff] }
  0x4f   : > { %9265 = vst [vmem:[#allocation18_spill] sm:$0xff] %v7296_v15  ;;  %v6344_v24 = vor.u32 %v6694_v22, %v6343_v21  ;;  %v6348_v27 = vor.u32 %v6692_v25, %v6345_v26  ;;  %v831_v30 = vld [vmem:[#allocation3 + $0xc8] sm:$0xff]  ;;  %v832_v32 = vld [vmem:[#allocation3 + $0xd0] sm:$0xff]  ;;  %v833_v34 = vld [vmem:[#allocation3 + $0xd8] sm:$0xff]  ;;  %p6959_p6 = pnand %p6958_p5, %p7146_p13  ;;  %p6964_p10 = por %p6963_p9, %p6962_p8 }
  0x50   : > { %9264 = vst [vmem:[#allocation17_spill] sm:$0xff] %v7294_v14  ;;  %v836_v33 = vld [vmem:[#allocation3 + $0xf0] sm:$0xff]  ;;  %v843_v43 = vld [vmem:[#allocation3 + $0x128] sm:$0xff]  ;;  %v845_v47 = vld [vmem:[#allocation3 + $0x138] sm:$0xff] }
  0x51   : > { %v7314_v38 = vpack.c.bf16 %v836_v33, %v832_v32  ;;  %v840_v44 = vld [vmem:[#allocation3 + $0x110] sm:$0xff]  ;;  %v849_v62 = vld [vmem:[#allocation3 + $0x158] sm:$0xff]  ;;  %v854_v8 = vld [vmem:[#allocation3 + $0x180] sm:$0xff]  ;;  %p6960_p7 = pneg %p6959_p6 }
  0x52   : > { %1962 = vmatpush.bf16.xpose.msra.mxu0 %v6168_v56  ;;  %v814_v56 = vld [vmem:[#allocation3 + $0x40] sm:$0xff]  ;;  %v844_v45 = vld [vmem:[#allocation3 + $0x130] sm:$0xff]  ;;  %v853_v63 = vld [vmem:[#allocation3 + $0x178] sm:$0xff] }
  0x53   : > { %2131 = vmatpush.bf16.xpose.msra.mxu1 %v6172_v57  ;;  %v818_v57 = vld [vmem:[#allocation3 + $0x60] sm:$0xff]  ;;  %v7326_v50 = vpack.c.bf16 %v844_v45, %v840_v44  ;;  %v848_v60 = vld [vmem:[#allocation3 + $0x150] sm:$0xff]  ;;  %v855_v10 = vld [vmem:[#allocation3 + $0x188] sm:$0xff]  ;;  %p6965_p11 = pnand %p6964_p10, %p6960_p7 }
  0x54   : > { %2300 = vmatpush.bf16.xpose.msra.mxu2 %v6176_v58  ;;  %2469 = vmatpush.bf16.xpose.msra.mxu3 %v6180_v59  ;;  %v815_v58 = vld [vmem:[#allocation3 + $0x48] sm:$0xff]  ;;  %v7278_v0 = vpack.c.bf16 %v818_v57, %v814_v56  ;;  %v846_v56 = vld [vmem:[#allocation3 + $0x140] sm:$0xff]  ;;  %v852_v61 = vld [vmem:[#allocation3 + $0x170] sm:$0xff] }
  0x55   : > { %v819_v59 = vld [vmem:[#allocation3 + $0x68] sm:$0xff]  ;;  %v850_v57 = vld [vmem:[#allocation3 + $0x160] sm:$0xff]  ;;  %v6691_v25 = vld [vmem:[%s7188_s1 + $0x1b4] sm:$0xf0] }
  0x56   : > { %v7280_v1 = vpack.c.bf16 %v819_v59, %v815_v58  ;;  %v847_v58 = vld [vmem:[#allocation3 + $0x148] sm:$0xff]  ;;  %v858_v9 = vld [vmem:[#allocation3 + $0x1a0] sm:$0xff]  ;;  %v6329_v44 = vld [vmem:[%s7188_s1 + $0x1b0] sm:$0xf0] }
  0x57   : > { %v851_v59 = vld [vmem:[#allocation3 + $0x168] sm:$0xff]  ;;  %v865_v45 = vld [vmem:[#allocation3 + $0x1d8] sm:$0xff] }
  0x58   : > { %v859_v11 = vld [vmem:[#allocation3 + $0x1a8] sm:$0xff] }
  0x59   : > { %v7348_v21 = vpack.c.bf16 %v859_v11, %v855_v10  ;;  %v6689_v26 = vld [vmem:[%s7188_s1 + $0x1ac] sm:$0xf]  ;;  %v873_v10 = vld [vmem:[#allocation3 + $0x218] sm:$0xff] }
  0x5a   : > { %1963 = vmatpush.bf16.xpose.msra.mxu0 %v6152_v4  ;;  %v822_v4 = vld [vmem:[#allocation3 + $0x80] sm:$0xff]  ;;  %v863_v32 = vld [vmem:[#allocation3 + $0x1c8] sm:$0xff]  ;;  %v877_v11 = vld [vmem:[#allocation3 + $0x238] sm:$0xff] }
  0x5b   : > { %2132 = vmatpush.bf16.xpose.msra.mxu1 %v6156_v5  ;;  %v826_v5 = vld [vmem:[#allocation3 + $0xa0] sm:$0xff]  ;;  %9269 = vst [vmem:[#allocation22_spill] sm:$0xff] %v7348_v21  ;;  %v867_v33 = vld [vmem:[#allocation3 + $0x1e8] sm:$0xff] }
  0x5c   : > { %2301 = vmatpush.bf16.xpose.msra.mxu2 %v6160_v6  ;;  %2470 = vmatpush.bf16.xpose.msra.mxu3 %v6164_v7  ;;  %v823_v6 = vld [vmem:[#allocation3 + $0x88] sm:$0xff]  ;;  %v7290_v12 = vpack.c.bf16 %v826_v5, %v822_v4  ;;  %v7334_v4 = vpack.c.bf16 %v850_v57, %v846_v56  ;;  %v7336_v5 = vpack.c.bf16 %v851_v59, %v847_v58 }
  0x5d   : > { %v827_v7 = vld [vmem:[#allocation3 + $0xa8] sm:$0xff]  ;;  %v7368_v57 = vpack.c.bf16 %v867_v33, %v863_v32 }
  0x5e   : > { %9262 = vst [vmem:[#allocation15_spill] sm:$0xff] %v7290_v12  ;;  %v7292_v13 = vpack.c.bf16 %v827_v7, %v823_v6  ;;  %v7338_v6 = vpack.c.bf16 %v852_v61, %v848_v60  ;;  %v7340_v7 = vpack.c.bf16 %v853_v63, %v849_v62  ;;  %v870_v60 = vld [vmem:[#allocation3 + $0x200] sm:$0xff]  ;;  %v871_v62 = vld [vmem:[#allocation3 + $0x208] sm:$0xff] }
  0x5f   : > { %v874_v61 = vld [vmem:[#allocation3 + $0x220] sm:$0xff]  ;;  %v875_v63 = vld [vmem:[#allocation3 + $0x228] sm:$0xff] }
  0x60   : > { %9263 = vst [vmem:[#allocation16_spill] sm:$0xff] %v7292_v13 }
  0x61   : > { %9266 = vst [vmem:[#allocation19_spill] sm:$0xff] %v7338_v6 }
  0x62   : > { %1964 = vmatpush.bf16.xpose.msra.mxu0 %v6136_v16  ;;  %v6351_v16 = vld [vmem:[%s7188_s1 + $0x1c8] sm:$0xf]  ;;  %9267 = vst [vmem:[#allocation20_spill] sm:$0xff] %v7340_v7 }
  0x63   : > { %2133 = vmatpush.bf16.xpose.msra.mxu1 %v6140_v17  ;;  %v6695_v17 = vld [vmem:[%s7188_s1 + $0x1d4] sm:$0xf0] }
  0x64   : > { %2302 = vmatpush.bf16.xpose.msra.mxu2 %v6144_v18  ;;  %2471 = vmatpush.bf16.xpose.msra.mxu3 %v6148_v19  ;;  %v6693_v18 = vld [vmem:[%s7188_s1 + $0x1cc] sm:$0xf]  ;;  %v6352_v19 = vor.u32 %v6695_v17, %v6351_v16  ;;  %v856_v16 = vld [vmem:[#allocation3 + $0x190] sm:$0xff] }
  0x65   : > { %v6356_v23 = vor.u32 %v6693_v18, %v6353_v20  ;;  %v860_v17 = vld [vmem:[#allocation3 + $0x1b0] sm:$0xff]  ;;  %v857_v18 = vld [vmem:[#allocation3 + $0x198] sm:$0xff]  ;;  %v7346_v20 = vpack.c.bf16 %v858_v9, %v854_v8 }
  0x66   : > { %v7350_v22 = vpack.c.bf16 %v860_v17, %v856_v16  ;;  %v872_v8 = vld [vmem:[#allocation3 + $0x210] sm:$0xff]  ;;  %v7378_v16 = vpack.c.bf16 %v874_v61, %v870_v60 }
  0x67   : > { %9268 = vst [vmem:[#allocation21_spill] sm:$0xff] %v7346_v20  ;;  %v876_v9 = vld [vmem:[#allocation3 + $0x230] sm:$0xff] }
  0x68   : > { %9270 = vst [vmem:[#allocation23_spill] sm:$0xff] %v7350_v22 }
  0x6a   : > { %1965 = vmatpush.bf16.xpose.msra.mxu0 %v6120_v31  ;;  %v835_v31 = vld [vmem:[#allocation3 + $0xe8] sm:$0xff] }
  0x6b   : > { %2134 = vmatpush.bf16.xpose.msra.mxu1 %v6124_v35  ;;  %v837_v35 = vld [vmem:[#allocation3 + $0xf8] sm:$0xff]  ;;  %v7312_v37 = vpack.c.bf16 %v835_v31, %v831_v30  ;;  %v862_v30 = vld [vmem:[#allocation3 + $0x1c0] sm:$0xff] }
  0x6c   : > { %2303 = vmatpush.bf16.xpose.msra.mxu2 %v6128_v36  ;;  %2472 = vmatpush.bf16.xpose.msra.mxu3 %v6132_v39  ;;  %v7310_v36 = vpack.c.bf16 %v834_v29, %v830_v28  ;;  %v7316_v39 = vpack.c.bf16 %v837_v35, %v833_v34  ;;  %v6337_v28 = vld [vmem:[%s7188_s1 + $0x1b8] sm:$0xf0]  ;;  %v866_v31 = vld [vmem:[#allocation3 + $0x1e0] sm:$0xff]  ;;  %v6690_v35 = vld [vmem:[%s7188_s1 + $0x1ac] sm:$0xf0] }
  0x6d   : > { %v6340_v29 = vor.u32 %v6689_v26, %v6337_v28  ;;  %v6327_v34 = vld [vmem:[%s7188_s1 + $0x1a0] sm:$0xf]  ;;  %v7366_v56 = vpack.c.bf16 %v866_v31, %v862_v30 }
  0x71   : > { %1966 = vmatmul.bf16.vlgmr.msra.gmra.mxu0 %v7266_v52 }
  0x72   : > { %2634 = vmatpush.bf16.xpose.msrb.mxu0 %v6360_v42  ;;  %2135 = vmatmul.bf16.vlgmr.msra.gmra.mxu1 %v7268_v53  ;;  %v839_v42 = vld [vmem:[#allocation3 + $0x108] sm:$0xff] }
  0x73   : > { %2803 = vmatpush.bf16.xpose.msrb.mxu1 %v6364_v46  ;;  %2304 = vmatmul.bf16.vlgmr.msra.gmra.mxu2 %v7270_v54  ;;  %v841_v46 = vld [vmem:[#allocation3 + $0x118] sm:$0xff]  ;;  %v7324_v49 = vpack.c.bf16 %v843_v43, %v839_v42  ;;  %v868_v42 = vld [vmem:[#allocation3 + $0x1f0] sm:$0xff]  ;;  %v6328_v43 = vor.u32 %v6690_v35, %v6327_v34  ;;  %v878_v34 = vld [vmem:[#allocation3 + $0x240] sm:$0xff] }
  0x74   : > { %2972 = vmatpush.bf16.xpose.msrb.mxu2 %v6368_v40  ;;  %3141 = vmatpush.bf16.xpose.msrb.mxu3 %v6372_v41  ;;  %v838_v40 = vld [vmem:[#allocation3 + $0x100] sm:$0xff]  ;;  %v7328_v51 = vpack.c.bf16 %v845_v47, %v841_v46  ;;  %v869_v46 = vld [vmem:[#allocation3 + $0x1f8] sm:$0xff] }
  0x75   : > { %2473 = vmatmul.bf16.vlgmr.msra.gmra.mxu3 %v7272_v55  ;;  %v842_v41 = vld [vmem:[#allocation3 + $0x120] sm:$0xff]  ;;  %v7372_v59 = vpack.c.bf16 %v869_v46, %v865_v45  ;;  %v885_v45 = vld [vmem:[#allocation3 + $0x278] sm:$0xff] }
  0x76   : > { %v7322_v48 = vpack.c.bf16 %v842_v41, %v838_v40  ;;  %v6688_v40 = vld [vmem:[%s7188_s1 + $0x1a4] sm:$0xf]  ;;  %v864_v41 = vld [vmem:[#allocation3 + $0x1d0] sm:$0xff] }
  0x77   : > { %v6332_v47 = vor.u32 %v6688_v40, %v6329_v44  ;;  %v7370_v58 = vpack.c.bf16 %v868_v42, %v864_v41  ;;  %v882_v35 = vld [vmem:[#allocation3 + $0x260] sm:$0xff]  ;;  %v879_v40 = vld [vmem:[#allocation3 + $0x248] sm:$0xff]  ;;  %v880_v42 = vld [vmem:[#allocation3 + $0x250] sm:$0xff] }
  0x78   : > { %v883_v41 = vld [vmem:[#allocation3 + $0x268] sm:$0xff]  ;;  %v881_v44 = vld [vmem:[#allocation3 + $0x258] sm:$0xff] }
  0x7a   : > { %2635 = vmatpush.bf16.xpose.msrb.mxu0 %v6344_v24  ;;  %v6335_v24 = vld [vmem:[%s7188_s1 + $0x1a8] sm:$0xf] }
  0x7b   : > { %2804 = vmatpush.bf16.xpose.msrb.mxu1 %v6348_v27  ;;  %v6336_v27 = vor.u32 %v6691_v25, %v6335_v24  ;;  %v7384_v25 = vpack.c.bf16 %v877_v11, %v873_v10  ;;  %v7398_v10 = vpack.c.bf16 %v885_v45, %v881_v44  ;;  %v893_v44 = vld [vmem:[#allocation3 + $0x2b8] sm:$0xff] }
  0x7c   : > { %2973 = vmatpush.bf16.xpose.msrb.mxu2 %v6352_v19  ;;  %3142 = vmatpush.bf16.xpose.msrb.mxu3 %v6356_v23  ;;  %v861_v19 = vld [vmem:[#allocation3 + $0x1b8] sm:$0xff] }
  0x7d   : > { %v7352_v23 = vpack.c.bf16 %v861_v19, %v857_v18  ;;  %v7380_v18 = vpack.c.bf16 %v875_v63, %v871_v62  ;;  %v7382_v19 = vpack.c.bf16 %v876_v9, %v872_v8  ;;  %9273 = vst [vmem:[#allocation26_spill] sm:$0xff] %v7384_v25  ;;  %v7394_v63 = vpack.c.bf16 %v883_v41, %v879_v40  ;;  %v891_v40 = vld [vmem:[#allocation3 + $0x2a8] sm:$0xff]  ;;  %v888_v41 = vld [vmem:[#allocation3 + $0x290] sm:$0xff] }
  0x7e   : > { %9277 = vst [vmem:[#allocation30_spill] sm:$0xff] %v7398_v10 }
  0x7f   : > { %9271 = vst [vmem:[#allocation24_spill] sm:$0xff] %v7352_v23 }
  0x80   : > { %9272 = vst [vmem:[#allocation25_spill] sm:$0xff] %v7382_v19 }
  0x81   : > { %1971 = vmatmul.bf16.gmra.mxu0 %v7278_v0  ;;  %9275 = vst [vmem:[#allocation28_spill] sm:$0xff] %v7394_v63 }
  0x82   : > { %2140 = vmatmul.bf16.gmra.mxu1 %v7280_v1  ;;  %2636 = vmatpush.bf16.xpose.msrb.mxu0 %v6328_v43  ;;  %v884_v43 = vld [vmem:[#allocation3 + $0x270] sm:$0xff] }
  0x83   : > { %2309 = vmatmul.bf16.gmra.mxu2 %v7282_v2  ;;  %2805 = vmatpush.bf16.xpose.msrb.mxu1 %v6332_v47  ;;  %v7392_v47 = vpack.c.bf16 %v882_v35, %v878_v34  ;;  %v7396_v8 = vpack.c.bf16 %v884_v43, %v880_v42  ;;  %v890_v34 = vld [vmem:[#allocation3 + $0x2a0] sm:$0xff]  ;;  %v887_v35 = vld [vmem:[#allocation3 + $0x288] sm:$0xff]  ;;  %v892_v42 = vld [vmem:[#allocation3 + $0x2b0] sm:$0xff] }
  0x84   : > { %2974 = vmatpush.bf16.xpose.msrb.mxu2 %v6336_v27  ;;  %3143 = vmatpush.bf16.xpose.msrb.mxu3 %v6340_v29  ;;  %v889_v43 = vld [vmem:[#allocation3 + $0x298] sm:$0xff] }
  0x85   : > { %2478 = vmatmul.bf16.gmra.mxu3 %v7284_v3  ;;  %9274 = vst [vmem:[#allocation27_spill] sm:$0xff] %v7392_v47 }
  0x86   : > { %9276 = vst [vmem:[#allocation29_spill] sm:$0xff] %v7396_v8 }
  0x91   : > { %1976 = vmatmul.bf16.gmra.mxu0 %v7290_v12 }
  0x92   : > { %2145 = vmatmul.bf16.gmra.mxu1 %v7292_v13 }
  0x93   : > { %2314 = vmatmul.bf16.gmra.mxu2 %v7294_v14 }
  0x95   : > { %2483 = vmatmul.bf16.gmra.mxu3 %v7296_v15 }
  0xa1   : > { %1981 = vmatmul.bf16.gmra.mxu0 %v7310_v36 }
  0xa2   : > { %2150 = vmatmul.bf16.gmra.mxu1 %v7312_v37 }
  0xa3   : > { %2319 = vmatmul.bf16.gmra.mxu2 %v7314_v38 }
  0xa5   : > { %2488 = vmatmul.bf16.gmra.mxu3 %v7316_v39 }
  0xb1   : > { %1986 = vmatmul.bf16.gmra.mxu0 %v7322_v48 }
  0xb2   : > { %2155 = vmatmul.bf16.gmra.mxu1 %v7324_v49 }
  0xb3   : > { %2324 = vmatmul.bf16.gmra.mxu2 %v7326_v50 }
  0xb5   : > { %2493 = vmatmul.bf16.gmra.mxu3 %v7328_v51 }
  0xc1   : > { %1991 = vmatmul.bf16.gmra.mxu0 %v7334_v4 }
  0xc2   : > { %2160 = vmatmul.bf16.gmra.mxu1 %v7336_v5 }
  0xc3   : > { %2329 = vmatmul.bf16.gmra.mxu2 %v7338_v6 }
  0xc5   : > { %2498 = vmatmul.bf16.gmra.mxu3 %v7340_v7 }
  0xd1   : > { %1996 = vmatmul.bf16.gmra.mxu0 %v7346_v20 }
  0xd2   : > { %2165 = vmatmul.bf16.gmra.mxu1 %v7348_v21 }
  0xd3   : > { %2334 = vmatmul.bf16.gmra.mxu2 %v7350_v22 }
  0xd5   : > { %2503 = vmatmul.bf16.gmra.mxu3 %v7352_v23 }
  0xe1   : > { %2001 = vmatmul.bf16.gmra.mxu0 %v7366_v56 }
  0xe2   : > { %2170 = vmatmul.bf16.gmra.mxu1 %v7368_v57 }
  0xe3   : > { %2339 = vmatmul.bf16.gmra.mxu2 %v7370_v58 }
  0xe5   : > { %2508 = vmatmul.bf16.gmra.mxu3 %v7372_v59 }
  0xee   : > { %v1967_v17 = vpop.f32.mrf.mxu0 }
  0xef   : > { %v2136_v24 = vpop.f32.mrf.mxu1 }
  0xf0   : > { %v2137_v26 = vadd.f32 %v2136_v24, %v1967_v17 }
  0xf1   : > { %2006 = vmatmul.bf16.gmra.mxu0 %v7378_v16 }
  0xf2   : > { %2175 = vmatmul.bf16.gmra.mxu1 %v7380_v18 }
  0xf3   : > { %2344 = vmatmul.bf16.gmra.mxu2 %v7382_v19 }
  0xf5   : > { %2513 = vmatmul.bf16.gmra.mxu3 %v7384_v25 }
  0xf6   : > { %v2305_v27 = vpop.f32.mrf.mxu2  ;;  %v1969_v30 = vpop.f32.mrf.mxu0 }
  0xf7   : > { %v2306_v28 = vadd.f32 %v2305_v27, %v2137_v26  ;;  %v2138_v31 = vpop.f32.mrf.mxu1 }
  0xf8   : > { %v2474_v29 = vpop.f32.mrf.mxu3  ;;  %v2139_v33 = vadd.f32 %v2138_v31, %v1969_v30 }
  0xf9   : > { %v7390_v32 = vadd.f32 %v2474_v29, %v2306_v28 }
  0xfe   : > { %v2307_v46 = vpop.f32.mrf.mxu2  ;;  %v1972_v62 = vpop.f32.mrf.mxu0 }
  0xff   : > { %v2308_v60 = vadd.f32 %v2307_v46, %v2139_v33  ;;  %v2141_v9 = vpop.f32.mrf.mxu1  ;;  %v886_v33 = vld [vmem:[#allocation3 + $0x280] sm:$0xff] }
 0x100   : > { %v2476_v61 = vpop.f32.mrf.mxu3  ;;  %v2142_v17 = vadd.f32 %v2141_v9, %v1972_v62  ;;  %v7408_v46 = vpack.c.bf16 %v890_v34, %v886_v33  ;;  %v7410_v9 = vpack.c.bf16 %v891_v40, %v887_v35  ;;  %v6685_v33 = vld [vmem:[%s7188_s1 + $0x18c] sm:$0xf]  ;;  %v6321_v35 = vld [vmem:[%s7188_s1 + $0x198] sm:$0xf0] }
 0x101   : > { %v7400_v11 = vadd.f32 %v2476_v61, %v2308_v60  ;;  %2011 = vmatmul.bf16.gmra.mxu0 %v7392_v47 }
 0x102   : > { %2180 = vmatmul.bf16.gmra.mxu1 %v7394_v63  ;;  %9279 = vst [vmem:[#allocation32_spill] sm:$0xff] %v7408_v46 }
 0x103   : > { %2349 = vmatmul.bf16.gmra.mxu2 %v7396_v8  ;;  %9280 = vst [vmem:[#allocation33_spill] sm:$0xff] %v7410_v9 }
 0x105   : > { %2518 = vmatmul.bf16.gmra.mxu3 %v7398_v10 }
 0x106   : > { %v2310_v24 = vpop.f32.mrf.mxu2  ;;  %v1974_v28 = vpop.f32.mrf.mxu0 }
 0x107   : > { %v2311_v26 = vadd.f32 %v2310_v24, %v2142_v17  ;;  %v2143_v29 = vpop.f32.mrf.mxu1  ;;  %v7412_v17 = vpack.c.bf16 %v892_v42, %v888_v41  ;;  %v6324_v41 = vor.u32 %v6685_v33, %v6321_v35  ;;  %v897_v35 = vld [vmem:[#allocation3 + $0x2d8] sm:$0xff] }
 0x108   : > { %v2479_v27 = vpop.f32.mrf.mxu3  ;;  %v2144_v31 = vadd.f32 %v2143_v29, %v1974_v28  ;;  %v6319_v29 = vld [vmem:[%s7188_s1 + $0x188] sm:$0xf] }
 0x109   : > { %v7406_v30 = vadd.f32 %v2479_v27, %v2311_v26  ;;  %9281 = vst [vmem:[#allocation34_spill] sm:$0xff] %v7412_v17  ;;  %v7414_v26 = vpack.c.bf16 %v893_v44, %v889_v43  ;;  %3144 = vmatpush.bf16.xpose.msrb.mxu3 %v6324_v41 }
 0x10b   : > { %9278 = vst [vmem:[#allocation31_spill] sm:$0xff] %v7406_v30 }
 0x10c   : > { %9282 = vst [vmem:[#allocation35_spill] sm:$0xff] %v7414_v26 }
 0x10e   : > { %v2312_v45 = vpop.f32.mrf.mxu2  ;;  %v1977_v62 = vpop.f32.mrf.mxu0 }
 0x10f   : > { %v2313_v60 = vadd.f32 %v2312_v45, %v2144_v31  ;;  %v2146_v24 = vpop.f32.mrf.mxu1  ;;  %v6687_v31 = vld [vmem:[%s7188_s1 + $0x194] sm:$0xf0] }
 0x110   : > { %v2481_v61 = vpop.f32.mrf.mxu3  ;;  %v2147_v28 = vadd.f32 %v2146_v24, %v1977_v62  ;;  %v6320_v34 = vor.u32 %v6687_v31, %v6319_v29  ;;  %v894_v62 = vld [vmem:[#allocation3 + $0x2c0] sm:$0xff]  ;;  %v899_v29 = vld [vmem:[#allocation3 + $0x2e8] sm:$0xff] }
 0x111   : > { %v7416_v27 = vadd.f32 %v2481_v61, %v2313_v60  ;;  %2016 = vmatmul.bf16.gmra.mxu0 %v7408_v46  ;;  %v898_v24 = vld [vmem:[#allocation3 + $0x2e0] sm:$0xff]  ;;  %v900_v46 = vld [vmem:[#allocation3 + $0x2f0] sm:$0xff] }
 0x112   : > { %2185 = vmatmul.bf16.gmra.mxu1 %v7410_v9  ;;  %2975 = vmatpush.bf16.xpose.msrb.mxu2 %v6320_v34  ;;  %v6311_v31 = vld [vmem:[%s7188_s1 + $0x180] sm:$0xf]  ;;  %v6684_v9 = vld [vmem:[%s7188_s1 + $0x184] sm:$0xf]  ;;  %v7432_v10 = vpack.c.bf16 %v898_v24, %v894_v62 }
 0x113   : > { %9283 = vst [vmem:[#allocation36_spill] sm:$0xff] %v7416_v27  ;;  %2354 = vmatmul.bf16.gmra.mxu2 %v7412_v17  ;;  %v6686_v17 = vld [vmem:[%s7188_s1 + $0x18c] sm:$0xf0]  ;;  %v902_v24 = vld [vmem:[#allocation3 + $0x300] sm:$0xff] }
 0x114   : > { %v896_v27 = vld [vmem:[#allocation3 + $0x2d0] sm:$0xff]  ;;  %v6312_v33 = vor.u32 %v6686_v17, %v6311_v31  ;;  %9285 = vst [vmem:[#allocation38_spill] sm:$0xff] %v7432_v10 }
 0x115   : > { %2523 = vmatmul.bf16.gmra.mxu3 %v7414_v26  ;;  %v895_v26 = vld [vmem:[#allocation3 + $0x2c8] sm:$0xff] }
 0x116   : > { %v2315_v40 = vpop.f32.mrf.mxu2  ;;  %v1979_v44 = vpop.f32.mrf.mxu0  ;;  %2637 = vmatpush.bf16.xpose.msrb.mxu0 %v6312_v33  ;;  %v903_v33 = vld [vmem:[#allocation3 + $0x308] sm:$0xff] }
 0x117   : > { %v2316_v42 = vadd.f32 %v2315_v40, %v2147_v28  ;;  %v2148_v45 = vpop.f32.mrf.mxu1  ;;  %v6313_v28 = vld [vmem:[%s7188_s1 + $0x190] sm:$0xf0]  ;;  %v901_v40 = vld [vmem:[#allocation3 + $0x2f8] sm:$0xff] }
 0x118   : > { %v2484_v43 = vpop.f32.mrf.mxu3  ;;  %v2149_v61 = vadd.f32 %v2148_v45, %v1979_v44  ;;  %v6316_v30 = vor.u32 %v6684_v9, %v6313_v28  ;;  %v7434_v44 = vpack.c.bf16 %v899_v29, %v895_v26  ;;  %v7436_v45 = vpack.c.bf16 %v900_v46, %v896_v27  ;;  %v906_v29 = vld [vmem:[#allocation3 + $0x320] sm:$0xff]  ;;  %v904_v28 = vld [vmem:[#allocation3 + $0x310] sm:$0xff] }
 0x119   : > { %v7426_v60 = vadd.f32 %v2484_v43, %v2316_v42  ;;  %v7438_v8 = vpack.c.bf16 %v901_v40, %v897_v35  ;;  %v908_v35 = vld [vmem:[#allocation3 + $0x330] sm:$0xff]  ;;  %v905_v40 = vld [vmem:[#allocation3 + $0x318] sm:$0xff] }
 0x11a   : > { %9286 = vst [vmem:[#allocation39_spill] sm:$0xff] %v7434_v44  ;;  %2806 = vmatpush.bf16.xpose.msrb.mxu1 %v6316_v30 }
 0x11b   : > { %9284 = vst [vmem:[#allocation37_spill] sm:$0xff] %v7426_v60 }
 0x11c   : > { %9287 = vst [vmem:[#allocation40_spill] sm:$0xff] %v7436_v45 }
 0x11d   : > { %9288 = vst [vmem:[#allocation41_spill] sm:$0xff] %v7438_v8 }
 0x11e   : > { %v2317_v34 = vpop.f32.mrf.mxu2  ;;  %v1982_v43 = vpop.f32.mrf.mxu0 }
 0x11f   : > { %v2318_v41 = vadd.f32 %v2317_v34, %v2149_v61  ;;  %v2151_v60 = vpop.f32.mrf.mxu1  ;;  %v909_v34 = vld [vmem:[#allocation3 + $0x338] sm:$0xff] }
 0x120   : > { %v2486_v42 = vpop.f32.mrf.mxu3  ;;  %v2152_v31 = vadd.f32 %v2151_v60, %v1982_v43  ;;  %v907_v60 = vld [vmem:[#allocation3 + $0x328] sm:$0xff] }
 0x121   : > { %v7440_v17 = vadd.f32 %v2486_v42, %v2318_v41  ;;  %2021 = vmatmul.bf16.gmra.mxu0 %v7432_v10  ;;  %v7448_v42 = vpack.c.bf16 %v906_v29, %v902_v24 }
 0x122   : > { %2190 = vmatmul.bf16.gmra.mxu1 %v7434_v44 }
 0x123   : > { %9289 = vst [vmem:[#allocation42_spill] sm:$0xff] %v7440_v17  ;;  %2359 = vmatmul.bf16.gmra.mxu2 %v7436_v45  ;;  %v7452_v45 = vpack.c.bf16 %v908_v35, %v904_v28 }
 0x124   : > { %9291 = vst [vmem:[#allocation44_spill] sm:$0xff] %v7448_v42 }
 0x125   : > { %2528 = vmatmul.bf16.gmra.mxu3 %v7438_v8  ;;  %9293 = vst [vmem:[#allocation46_spill] sm:$0xff] %v7452_v45 }
 0x126   : > { %v2320_v9 = vpop.f32.mrf.mxu2  ;;  %v1984_v46 = vpop.f32.mrf.mxu0 }
 0x127   : > { %v2321_v26 = vadd.f32 %v2320_v9, %v2152_v31  ;;  %v2153_v27 = vpop.f32.mrf.mxu1  ;;  %v7450_v9 = vpack.c.bf16 %v907_v60, %v903_v33 }
 0x128   : > { %v2489_v61 = vpop.f32.mrf.mxu3  ;;  %v2154_v62 = vadd.f32 %v2153_v27, %v1984_v46 }
 0x129   : > { %v7446_v30 = vadd.f32 %v2489_v61, %v2321_v26  ;;  %9292 = vst [vmem:[#allocation45_spill] sm:$0xff] %v7450_v9  ;;  %v7454_v61 = vpack.c.bf16 %v909_v34, %v905_v40  ;;  %v910_v40 = vld [vmem:[#allocation3 + $0x340] sm:$0xff]  ;;  %v911_v34 = vld [vmem:[#allocation3 + $0x348] sm:$0xff] }
 0x12b   : > { %9290 = vst [vmem:[#allocation43_spill] sm:$0xff] %v7446_v30 }
 0x12c   : > { %9294 = vst [vmem:[#allocation47_spill] sm:$0xff] %v7454_v61 }
 0x12e   : > { %v2322_v41 = vpop.f32.mrf.mxu2  ;;  %v1987_v31 = vpop.f32.mrf.mxu0 }
 0x12f   : > { %v2323_v43 = vadd.f32 %v2322_v41, %v2154_v62  ;;  %v2156_v26 = vpop.f32.mrf.mxu1  ;;  %v915_v41 = vld [vmem:[#allocation3 + $0x368] sm:$0xff] }
 0x130   : > { %v2491_v8 = vpop.f32.mrf.mxu3  ;;  %v2157_v27 = vadd.f32 %v2156_v26, %v1987_v31  ;;  %v916_v31 = vld [vmem:[#allocation3 + $0x370] sm:$0xff]  ;;  %v913_v26 = vld [vmem:[#allocation3 + $0x358] sm:$0xff] }
 0x131   : > { %v7456_v46 = vadd.f32 %v2491_v8, %v2323_v43  ;;  %2026 = vmatmul.bf16.gmra.mxu0 %v7448_v42  ;;  %v914_v8 = vld [vmem:[#allocation3 + $0x360] sm:$0xff]  ;;  %v912_v43 = vld [vmem:[#allocation3 + $0x350] sm:$0xff] }
 0x132   : > { %2195 = vmatmul.bf16.gmra.mxu1 %v7450_v9  ;;  %v917_v9 = vld [vmem:[#allocation3 + $0x378] sm:$0xff]  ;;  %v7468_v30 = vpack.c.bf16 %v916_v31, %v912_v43  ;;  %v918_v43 = vld [vmem:[#allocation3 + $0x380] sm:$0xff]  ;;  %v923_v31 = vld [vmem:[#allocation3 + $0x3a8] sm:$0xff] }
 0x133   : > { %9295 = vst [vmem:[#allocation48_spill] sm:$0xff] %v7456_v46  ;;  %2364 = vmatmul.bf16.gmra.mxu2 %v7452_v45  ;;  %v7464_v45 = vpack.c.bf16 %v914_v8, %v910_v40 }
 0x134   : > { %9299 = vst [vmem:[#allocation52_spill] sm:$0xff] %v7468_v30 }
 0x135   : > { %2533 = vmatmul.bf16.gmra.mxu3 %v7454_v61  ;;  %9297 = vst [vmem:[#allocation50_spill] sm:$0xff] %v7464_v45 }
 0x136   : > { %v2325_v62 = vpop.f32.mrf.mxu2  ;;  %v1989_v33 = vpop.f32.mrf.mxu0 }
 0x137   : > { %v2326_v24 = vadd.f32 %v2325_v62, %v2157_v27  ;;  %v2158_v60 = vpop.f32.mrf.mxu1  ;;  %v7466_v62 = vpack.c.bf16 %v915_v41, %v911_v34 }
 0x138   : > { %v2494_v29 = vpop.f32.mrf.mxu3  ;;  %v2159_v35 = vadd.f32 %v2158_v60, %v1989_v33 }
 0x139   : > { %v7462_v28 = vadd.f32 %v2494_v29, %v2326_v24  ;;  %9298 = vst [vmem:[#allocation51_spill] sm:$0xff] %v7466_v62  ;;  %v7470_v29 = vpack.c.bf16 %v917_v9, %v913_v26  ;;  %v920_v26 = vld [vmem:[#allocation3 + $0x390] sm:$0xff] }
 0x13b   : > { %9296 = vst [vmem:[#allocation49_spill] sm:$0xff] %v7462_v28  ;;  %v932_v28 = vld [vmem:[#allocation3 + $0x3f0] sm:$0xff] }
 0x13c   : > { %9300 = vst [vmem:[#allocation53_spill] sm:$0xff] %v7470_v29 }
 0x13e   : > { %v2327_v46 = vpop.f32.mrf.mxu2  ;;  %v1992_v27 = vpop.f32.mrf.mxu0 }
 0x13f   : > { %v2328_v61 = vadd.f32 %v2327_v46, %v2159_v35  ;;  %v2161_v24 = vpop.f32.mrf.mxu1 }
 0x140   : > { %v2496_v42 = vpop.f32.mrf.mxu3  ;;  %v2162_v60 = vadd.f32 %v2161_v24, %v1992_v27  ;;  %v924_v27 = vld [vmem:[#allocation3 + $0x3b0] sm:$0xff]  ;;  %v921_v24 = vld [vmem:[#allocation3 + $0x398] sm:$0xff] }
 0x141   : > { %v7472_v33 = vadd.f32 %v2496_v42, %v2328_v61  ;;  %2031 = vmatmul.bf16.gmra.mxu0 %v7464_v45  ;;  %v922_v42 = vld [vmem:[#allocation3 + $0x3a0] sm:$0xff]  ;;  %v919_v61 = vld [vmem:[#allocation3 + $0x388] sm:$0xff] }
 0x142   : > { %2200 = vmatmul.bf16.gmra.mxu1 %v7466_v62  ;;  %v925_v62 = vld [vmem:[#allocation3 + $0x3b8] sm:$0xff] }
 0x143   : > { %9301 = vst [vmem:[#allocation54_spill] sm:$0xff] %v7472_v33  ;;  %2369 = vmatmul.bf16.gmra.mxu2 %v7468_v30 }
 0x145   : > { %2538 = vmatmul.bf16.gmra.mxu3 %v7470_v29  ;;  %v7480_v29 = vpack.c.bf16 %v922_v42, %v918_v43  ;;  %v6681_v43 = vld [vmem:[%s7188_s1 + $0x16c] sm:$0xf] }
 0x146   : > { %v2330_v46 = vpop.f32.mrf.mxu2  ;;  %v1994_v8 = vpop.f32.mrf.mxu0 }
 0x147   : > { %v2331_v35 = vadd.f32 %v2330_v46, %v2162_v60  ;;  %v2163_v34 = vpop.f32.mrf.mxu1  ;;  %9303 = vst [vmem:[#allocation56_spill] sm:$0xff] %v7480_v29 }
 0x148   : > { %v2499_v40 = vpop.f32.mrf.mxu3  ;;  %v2164_v9 = vadd.f32 %v2163_v34, %v1994_v8  ;;  %v7484_v8 = vpack.c.bf16 %v924_v27, %v920_v26 }
 0x149   : > { %v7478_v41 = vadd.f32 %v2499_v40, %v2331_v35  ;;  %v7482_v40 = vpack.c.bf16 %v923_v31, %v919_v61  ;;  %v6305_v61 = vld [vmem:[%s7188_s1 + $0x178] sm:$0xf0] }
 0x14a   : > { %9305 = vst [vmem:[#allocation58_spill] sm:$0xff] %v7484_v8  ;;  %v6308_v31 = vor.u32 %v6681_v43, %v6305_v61  ;;  %v929_v61 = vld [vmem:[#allocation3 + $0x3d8] sm:$0xff] }
 0x14b   : > { %9302 = vst [vmem:[#allocation55_spill] sm:$0xff] %v7478_v41  ;;  %v7486_v41 = vpack.c.bf16 %v925_v62, %v921_v24 }
 0x14c   : > { %9304 = vst [vmem:[#allocation57_spill] sm:$0xff] %v7482_v40  ;;  %3145 = vmatpush.bf16.xpose.msrb.mxu3 %v6308_v31 }
 0x14d   : > { %9306 = vst [vmem:[#allocation59_spill] sm:$0xff] %v7486_v41 }
 0x14e   : > { %v2332_v30 = vpop.f32.mrf.mxu2  ;;  %v1997_v35 = vpop.f32.mrf.mxu0 }
 0x14f   : > { %v2333_v60 = vadd.f32 %v2332_v30, %v2164_v9  ;;  %v2166_v34 = vpop.f32.mrf.mxu1  ;;  %v6303_v30 = vld [vmem:[%s7188_s1 + $0x168] sm:$0xf]  ;;  %v6683_v9 = vld [vmem:[%s7188_s1 + $0x174] sm:$0xf0] }
 0x150   : > { %v2501_v46 = vpop.f32.mrf.mxu3  ;;  %v2167_v45 = vadd.f32 %v2166_v34, %v1997_v35  ;;  %v6304_v42 = vor.u32 %v6683_v9, %v6303_v30  ;;  %v926_v34 = vld [vmem:[#allocation3 + $0x3c0] sm:$0xff]  ;;  %v931_v30 = vld [vmem:[#allocation3 + $0x3e8] sm:$0xff] }
 0x151   : > { %v7488_v33 = vadd.f32 %v2501_v46, %v2333_v60  ;;  %2036 = vmatmul.bf16.gmra.mxu0 %v7480_v29  ;;  %v6295_v9 = vld [vmem:[%s7188_s1 + $0x160] sm:$0xf]  ;;  %v928_v29 = vld [vmem:[#allocation3 + $0x3d0] sm:$0xff] }
 0x152   : > { %2205 = vmatmul.bf16.gmra.mxu1 %v7482_v40  ;;  %2976 = vmatpush.bf16.xpose.msrb.mxu2 %v6304_v42  ;;  %v6682_v40 = vld [vmem:[%s7188_s1 + $0x16c] sm:$0xf0] }
 0x153   : > { %9307 = vst [vmem:[#allocation60_spill] sm:$0xff] %v7488_v33  ;;  %2374 = vmatmul.bf16.gmra.mxu2 %v7484_v8  ;;  %v927_v8 = vld [vmem:[#allocation3 + $0x3c8] sm:$0xff]  ;;  %v6680_v33 = vld [vmem:[%s7188_s1 + $0x164] sm:$0xf]  ;;  %v6296_v43 = vor.u32 %v6682_v40, %v6295_v9 }
 0x155   : > { %2543 = vmatmul.bf16.gmra.mxu3 %v7486_v41  ;;  %v930_v41 = vld [vmem:[#allocation3 + $0x3e0] sm:$0xff]  ;;  %2638 = vmatpush.bf16.xpose.msrb.mxu0 %v6296_v43  ;;  %v935_v43 = vld [vmem:[#allocation3 + $0x408] sm:$0xff] }
 0x156   : > { %v2335_v62 = vpop.f32.mrf.mxu2  ;;  %v1999_v24 = vpop.f32.mrf.mxu0  ;;  %v7504_v17 = vpack.c.bf16 %v930_v41, %v926_v34  ;;  %v934_v34 = vld [vmem:[#allocation3 + $0x400] sm:$0xff] }
 0x157   : > { %v2336_v26 = vadd.f32 %v2335_v62, %v2167_v45  ;;  %v2168_v60 = vpop.f32.mrf.mxu1  ;;  %v6297_v45 = vld [vmem:[%s7188_s1 + $0x170] sm:$0xf0]  ;;  %v933_v62 = vld [vmem:[#allocation3 + $0x3f8] sm:$0xff] }
 0x158   : > { %v2504_v27 = vpop.f32.mrf.mxu3  ;;  %v2169_v35 = vadd.f32 %v2168_v60, %v1999_v24  ;;  %v6300_v44 = vor.u32 %v6680_v33, %v6297_v45  ;;  %9309 = vst [vmem:[#allocation62_spill] sm:$0xff] %v7504_v17  ;;  %v7506_v24 = vpack.c.bf16 %v931_v30, %v927_v8  ;;  %v7508_v60 = vpack.c.bf16 %v932_v28, %v928_v29  ;;  %v938_v30 = vld [vmem:[#allocation3 + $0x420] sm:$0xff]  ;;  %v936_v45 = vld [vmem:[#allocation3 + $0x410] sm:$0xff] }
 0x159   : > { %v7498_v46 = vadd.f32 %v2504_v27, %v2336_v26  ;;  %v7510_v10 = vpack.c.bf16 %v933_v62, %v929_v61  ;;  %v940_v61 = vld [vmem:[#allocation3 + $0x430] sm:$0xff]  ;;  %v937_v62 = vld [vmem:[#allocation3 + $0x418] sm:$0xff] }
 0x15a   : > { %9310 = vst [vmem:[#allocation63_spill] sm:$0xff] %v7506_v24  ;;  %2807 = vmatpush.bf16.xpose.msrb.mxu1 %v6300_v44 }
 0x15b   : > { %9308 = vst [vmem:[#allocation61_spill] sm:$0xff] %v7498_v46 }
 0x15c   : > { %9311 = vst [vmem:[#allocation64_spill] sm:$0xff] %v7508_v60 }
 0x15d   : > { %9312 = vst [vmem:[#allocation65_spill] sm:$0xff] %v7510_v10 }
 0x15e   : > { %v2337_v42 = vpop.f32.mrf.mxu2  ;;  %v2002_v27 = vpop.f32.mrf.mxu0 }
 0x15f   : > { %v2338_v31 = vadd.f32 %v2337_v42, %v2169_v35  ;;  %v2171_v46 = vpop.f32.mrf.mxu1  ;;  %v941_v42 = vld [vmem:[#allocation3 + $0x438] sm:$0xff] }
 0x160   : > { %v2506_v26 = vpop.f32.mrf.mxu3  ;;  %v2172_v9 = vadd.f32 %v2171_v46, %v2002_v27  ;;  %v939_v46 = vld [vmem:[#allocation3 + $0x428] sm:$0xff] }
 0x161   : > { %v7512_v40 = vadd.f32 %v2506_v26, %v2338_v31  ;;  %2041 = vmatmul.bf16.gmra.mxu0 %v7504_v17  ;;  %v7520_v26 = vpack.c.bf16 %v938_v30, %v934_v34 }
 0x162   : > { %2210 = vmatmul.bf16.gmra.mxu1 %v7506_v24 }
 0x163   : > { %9313 = vst [vmem:[#allocation66_spill] sm:$0xff] %v7512_v40  ;;  %2379 = vmatmul.bf16.gmra.mxu2 %v7508_v60  ;;  %v7524_v60 = vpack.c.bf16 %v940_v61, %v936_v45 }
 0x164   : > { %9315 = vst [vmem:[#allocation68_spill] sm:$0xff] %v7520_v26 }
 0x165   : > { %2548 = vmatmul.bf16.gmra.mxu3 %v7510_v10  ;;  %9317 = vst [vmem:[#allocation70_spill] sm:$0xff] %v7524_v60 }
 0x166   : > { %v2340_v33 = vpop.f32.mrf.mxu2  ;;  %v2004_v28 = vpop.f32.mrf.mxu0 }
 0x167   : > { %v2341_v41 = vadd.f32 %v2340_v33, %v2172_v9  ;;  %v2173_v29 = vpop.f32.mrf.mxu1  ;;  %v7522_v33 = vpack.c.bf16 %v939_v46, %v935_v43 }
 0x168   : > { %v2509_v8 = vpop.f32.mrf.mxu3  ;;  %v2174_v35 = vadd.f32 %v2173_v29, %v2004_v28 }
 0x169   : > { %v7518_v44 = vadd.f32 %v2509_v8, %v2341_v41  ;;  %9316 = vst [vmem:[#allocation69_spill] sm:$0xff] %v7522_v33  ;;  %v7526_v8 = vpack.c.bf16 %v941_v42, %v937_v62  ;;  %v942_v62 = vld [vmem:[#allocation3 + $0x440] sm:$0xff]  ;;  %v943_v42 = vld [vmem:[#allocation3 + $0x448] sm:$0xff] }
 0x16b   : > { %9314 = vst [vmem:[#allocation67_spill] sm:$0xff] %v7518_v44 }
 0x16c   : > { %9318 = vst [vmem:[#allocation71_spill] sm:$0xff] %v7526_v8 }
 0x16e   : > { %v2342_v31 = vpop.f32.mrf.mxu2  ;;  %v2007_v9 = vpop.f32.mrf.mxu0 }
 0x16f   : > { %v2343_v27 = vadd.f32 %v2342_v31, %v2174_v35  ;;  %v2176_v41 = vpop.f32.mrf.mxu1  ;;  %v947_v31 = vld [vmem:[#allocation3 + $0x468] sm:$0xff] }
 0x170   : > { %v2511_v10 = vpop.f32.mrf.mxu3  ;;  %v2177_v29 = vadd.f32 %v2176_v41, %v2007_v9  ;;  %v948_v9 = vld [vmem:[#allocation3 + $0x470] sm:$0xff]  ;;  %v945_v41 = vld [vmem:[#allocation3 + $0x458] sm:$0xff] }
 0x171   : > { %v7528_v28 = vadd.f32 %v2511_v10, %v2343_v27  ;;  %2046 = vmatmul.bf16.gmra.mxu0 %v7520_v26  ;;  %v946_v10 = vld [vmem:[#allocation3 + $0x460] sm:$0xff]  ;;  %v944_v27 = vld [vmem:[#allocation3 + $0x450] sm:$0xff] }
 0x172   : > { %2215 = vmatmul.bf16.gmra.mxu1 %v7522_v33  ;;  %v949_v33 = vld [vmem:[#allocation3 + $0x478] sm:$0xff]  ;;  %v7540_v44 = vpack.c.bf16 %v948_v9, %v944_v27  ;;  %v950_v27 = vld [vmem:[#allocation3 + $0x480] sm:$0xff]  ;;  %v955_v9 = vld [vmem:[#allocation3 + $0x4a8] sm:$0xff] }
 0x173   : > { %9319 = vst [vmem:[#allocation72_spill] sm:$0xff] %v7528_v28  ;;  %2384 = vmatmul.bf16.gmra.mxu2 %v7524_v60  ;;  %v7536_v60 = vpack.c.bf16 %v946_v10, %v942_v62 }
 0x174   : > { %9323 = vst [vmem:[#allocation76_spill] sm:$0xff] %v7540_v44 }
 0x175   : > { %2553 = vmatmul.bf16.gmra.mxu3 %v7526_v8  ;;  %9321 = vst [vmem:[#allocation74_spill] sm:$0xff] %v7536_v60 }
 0x176   : > { %v2345_v35 = vpop.f32.mrf.mxu2  ;;  %v2009_v43 = vpop.f32.mrf.mxu0 }
 0x177   : > { %v2346_v34 = vadd.f32 %v2345_v35, %v2177_v29  ;;  %v2178_v46 = vpop.f32.mrf.mxu1  ;;  %v7538_v35 = vpack.c.bf16 %v947_v31, %v943_v42 }
 0x178   : > { %v2514_v30 = vpop.f32.mrf.mxu3  ;;  %v2179_v61 = vadd.f32 %v2178_v46, %v2009_v43 }
 0x179   : > { %v7534_v45 = vadd.f32 %v2514_v30, %v2346_v34  ;;  %9322 = vst [vmem:[#allocation75_spill] sm:$0xff] %v7538_v35  ;;  %v7542_v30 = vpack.c.bf16 %v949_v33, %v945_v41  ;;  %v952_v41 = vld [vmem:[#allocation3 + $0x490] sm:$0xff] }
 0x17b   : > { %9320 = vst [vmem:[#allocation73_spill] sm:$0xff] %v7534_v45  ;;  %v964_v45 = vld [vmem:[#allocation3 + $0x4f0] sm:$0xff] }
 0x17c   : > { %9324 = vst [vmem:[#allocation77_spill] sm:$0xff] %v7542_v30 }
 0x17e   : > { %v2347_v28 = vpop.f32.mrf.mxu2  ;;  %v2012_v29 = vpop.f32.mrf.mxu0 }
 0x17f   : > { %v2348_v8 = vadd.f32 %v2347_v28, %v2179_v61  ;;  %v2181_v34 = vpop.f32.mrf.mxu1 }
 0x180   : > { %v2516_v26 = vpop.f32.mrf.mxu3  ;;  %v2182_v46 = vadd.f32 %v2181_v34, %v2012_v29  ;;  %v956_v29 = vld [vmem:[#allocation3 + $0x4b0] sm:$0xff]  ;;  %v953_v34 = vld [vmem:[#allocation3 + $0x498] sm:$0xff] }
 0x181   : > { %v7544_v43 = vadd.f32 %v2516_v26, %v2348_v8  ;;  %2051 = vmatmul.bf16.gmra.mxu0 %v7536_v60  ;;  %v954_v26 = vld [vmem:[#allocation3 + $0x4a0] sm:$0xff]  ;;  %v951_v8 = vld [vmem:[#allocation3 + $0x488] sm:$0xff] }
 0x182   : > { %2220 = vmatmul.bf16.gmra.mxu1 %v7538_v35  ;;  %v957_v35 = vld [vmem:[#allocation3 + $0x4b8] sm:$0xff] }
 0x183   : > { %9325 = vst [vmem:[#allocation78_spill] sm:$0xff] %v7544_v43  ;;  %2389 = vmatmul.bf16.gmra.mxu2 %v7540_v44 }
 0x185   : > { %2558 = vmatmul.bf16.gmra.mxu3 %v7542_v30  ;;  %v7552_v30 = vpack.c.bf16 %v954_v26, %v950_v27  ;;  %v6677_v27 = vld [vmem:[%s7188_s1 + $0x14c] sm:$0xf] }
 0x186   : > { %v2350_v28 = vpop.f32.mrf.mxu2  ;;  %v2014_v10 = vpop.f32.mrf.mxu0 }
 0x187   : > { %v2351_v61 = vadd.f32 %v2350_v28, %v2182_v46  ;;  %v2183_v42 = vpop.f32.mrf.mxu1  ;;  %9327 = vst [vmem:[#allocation80_spill] sm:$0xff] %v7552_v30 }
 0x188   : > { %v2519_v62 = vpop.f32.mrf.mxu3  ;;  %v2184_v33 = vadd.f32 %v2183_v42, %v2014_v10  ;;  %v7556_v10 = vpack.c.bf16 %v956_v29, %v952_v41 }
 0x189   : > { %v7550_v31 = vadd.f32 %v2519_v62, %v2351_v61  ;;  %v7554_v62 = vpack.c.bf16 %v955_v9, %v951_v8  ;;  %v6289_v8 = vld [vmem:[%s7188_s1 + $0x158] sm:$0xf0] }
 0x18a   : > { %9329 = vst [vmem:[#allocation82_spill] sm:$0xff] %v7556_v10  ;;  %v6292_v9 = vor.u32 %v6677_v27, %v6289_v8  ;;  %v961_v8 = vld [vmem:[#allocation3 + $0x4d8] sm:$0xff] }
 0x18b   : > { %9326 = vst [vmem:[#allocation79_spill] sm:$0xff] %v7550_v31  ;;  %v7558_v31 = vpack.c.bf16 %v957_v35, %v953_v34 }
 0x18c   : > { %9328 = vst [vmem:[#allocation81_spill] sm:$0xff] %v7554_v62  ;;  %3146 = vmatpush.bf16.xpose.msrb.mxu3 %v6292_v9 }
 0x18d   : > { %9330 = vst [vmem:[#allocation83_spill] sm:$0xff] %v7558_v31 }
 0x18e   : > { %v2352_v44 = vpop.f32.mrf.mxu2  ;;  %v2017_v61 = vpop.f32.mrf.mxu0 }
 0x18f   : > { %v2353_v46 = vadd.f32 %v2352_v44, %v2184_v33  ;;  %v2186_v42 = vpop.f32.mrf.mxu1  ;;  %v6287_v44 = vld [vmem:[%s7188_s1 + $0x148] sm:$0xf]  ;;  %v6679_v33 = vld [vmem:[%s7188_s1 + $0x154] sm:$0xf0] }
 0x190   : > { %v2521_v28 = vpop.f32.mrf.mxu3  ;;  %v2187_v60 = vadd.f32 %v2186_v42, %v2017_v61  ;;  %v6288_v26 = vor.u32 %v6679_v33, %v6287_v44  ;;  %v958_v42 = vld [vmem:[#allocation3 + $0x4c0] sm:$0xff]  ;;  %v963_v44 = vld [vmem:[#allocation3 + $0x4e8] sm:$0xff] }
 0x191   : > { %v7560_v43 = vadd.f32 %v2521_v28, %v2353_v46  ;;  %2056 = vmatmul.bf16.gmra.mxu0 %v7552_v30  ;;  %v6279_v33 = vld [vmem:[%s7188_s1 + $0x140] sm:$0xf]  ;;  %v960_v30 = vld [vmem:[#allocation3 + $0x4d0] sm:$0xff] }
 0x192   : > { %2225 = vmatmul.bf16.gmra.mxu1 %v7554_v62  ;;  %2977 = vmatpush.bf16.xpose.msrb.mxu2 %v6288_v26  ;;  %v6678_v62 = vld [vmem:[%s7188_s1 + $0x14c] sm:$0xf0] }
 0x193   : > { %9331 = vst [vmem:[#allocation84_spill] sm:$0xff] %v7560_v43  ;;  %2394 = vmatmul.bf16.gmra.mxu2 %v7556_v10  ;;  %v959_v10 = vld [vmem:[#allocation3 + $0x4c8] sm:$0xff]  ;;  %v6676_v43 = vld [vmem:[%s7188_s1 + $0x144] sm:$0xf]  ;;  %v6280_v27 = vor.u32 %v6678_v62, %v6279_v33 }
 0x195   : > { %2563 = vmatmul.bf16.gmra.mxu3 %v7558_v31  ;;  %v962_v31 = vld [vmem:[#allocation3 + $0x4e0] sm:$0xff]  ;;  %2639 = vmatpush.bf16.xpose.msrb.mxu0 %v6280_v27  ;;  %v967_v27 = vld [vmem:[#allocation3 + $0x508] sm:$0xff] }
 0x196   : > { %v2355_v35 = vpop.f32.mrf.mxu2  ;;  %v2019_v34 = vpop.f32.mrf.mxu0  ;;  %v7576_v40 = vpack.c.bf16 %v962_v31, %v958_v42  ;;  %v966_v42 = vld [vmem:[#allocation3 + $0x500] sm:$0xff] }
 0x197   : > { %v2356_v41 = vadd.f32 %v2355_v35, %v2187_v60  ;;  %v2188_v46 = vpop.f32.mrf.mxu1  ;;  %v6281_v60 = vld [vmem:[%s7188_s1 + $0x150] sm:$0xf0]  ;;  %v965_v35 = vld [vmem:[#allocation3 + $0x4f8] sm:$0xff] }
 0x198   : > { %v2524_v29 = vpop.f32.mrf.mxu3  ;;  %v2189_v61 = vadd.f32 %v2188_v46, %v2019_v34  ;;  %v6284_v24 = vor.u32 %v6676_v43, %v6281_v60  ;;  %9333 = vst [vmem:[#allocation86_spill] sm:$0xff] %v7576_v40  ;;  %v7578_v34 = vpack.c.bf16 %v963_v44, %v959_v10  ;;  %v7580_v46 = vpack.c.bf16 %v964_v45, %v960_v30  ;;  %v970_v44 = vld [vmem:[#allocation3 + $0x520] sm:$0xff]  ;;  %v968_v60 = vld [vmem:[#allocation3 + $0x510] sm:$0xff] }
 0x199   : > { %v7570_v28 = vadd.f32 %v2524_v29, %v2356_v41  ;;  %v7582_v17 = vpack.c.bf16 %v965_v35, %v961_v8  ;;  %v972_v8 = vld [vmem:[#allocation3 + $0x530] sm:$0xff]  ;;  %v969_v35 = vld [vmem:[#allocation3 + $0x518] sm:$0xff] }
 0x19a   : > { %9334 = vst [vmem:[#allocation87_spill] sm:$0xff] %v7578_v34  ;;  %2808 = vmatpush.bf16.xpose.msrb.mxu1 %v6284_v24 }
 0x19b   : > { %9332 = vst [vmem:[#allocation85_spill] sm:$0xff] %v7570_v28 }
 0x19c   : > { %9335 = vst [vmem:[#allocation88_spill] sm:$0xff] %v7580_v46 }
 0x19d   : > { %9336 = vst [vmem:[#allocation89_spill] sm:$0xff] %v7582_v17 }
 0x19e   : > { %v2357_v26 = vpop.f32.mrf.mxu2  ;;  %v2022_v29 = vpop.f32.mrf.mxu0 }
 0x19f   : > { %v2358_v9 = vadd.f32 %v2357_v26, %v2189_v61  ;;  %v2191_v28 = vpop.f32.mrf.mxu1  ;;  %v973_v26 = vld [vmem:[#allocation3 + $0x538] sm:$0xff] }
 0x1a0   : > { %v2526_v41 = vpop.f32.mrf.mxu3  ;;  %v2192_v33 = vadd.f32 %v2191_v28, %v2022_v29  ;;  %v971_v28 = vld [vmem:[#allocation3 + $0x528] sm:$0xff] }
 0x1a1   : > { %v7584_v62 = vadd.f32 %v2526_v41, %v2358_v9  ;;  %2061 = vmatmul.bf16.gmra.mxu0 %v7576_v40  ;;  %v7592_v41 = vpack.c.bf16 %v970_v44, %v966_v42 }
 0x1a2   : > { %2230 = vmatmul.bf16.gmra.mxu1 %v7578_v34 }
 0x1a3   : > { %9337 = vst [vmem:[#allocation90_spill] sm:$0xff] %v7584_v62  ;;  %2399 = vmatmul.bf16.gmra.mxu2 %v7580_v46  ;;  %v7596_v46 = vpack.c.bf16 %v972_v8, %v968_v60 }
 0x1a4   : > { %9339 = vst [vmem:[#allocation92_spill] sm:$0xff] %v7592_v41 }
 0x1a5   : > { %2568 = vmatmul.bf16.gmra.mxu3 %v7582_v17  ;;  %9341 = vst [vmem:[#allocation94_spill] sm:$0xff] %v7596_v46 }
 0x1a6   : > { %v2360_v43 = vpop.f32.mrf.mxu2  ;;  %v2024_v45 = vpop.f32.mrf.mxu0 }
 0x1a7   : > { %v2361_v31 = vadd.f32 %v2360_v43, %v2192_v33  ;;  %v2193_v30 = vpop.f32.mrf.mxu1  ;;  %v7594_v43 = vpack.c.bf16 %v971_v28, %v967_v27 }
 0x1a8   : > { %v2529_v10 = vpop.f32.mrf.mxu3  ;;  %v2194_v61 = vadd.f32 %v2193_v30, %v2024_v45 }
 0x1a9   : > { %v7590_v24 = vadd.f32 %v2529_v10, %v2361_v31  ;;  %9340 = vst [vmem:[#allocation93_spill] sm:$0xff] %v7594_v43  ;;  %v7598_v10 = vpack.c.bf16 %v973_v26, %v969_v35  ;;  %v974_v35 = vld [vmem:[#allocation3 + $0x540] sm:$0xff]  ;;  %v975_v26 = vld [vmem:[#allocation3 + $0x548] sm:$0xff] }
 0x1ab   : > { %9338 = vst [vmem:[#allocation91_spill] sm:$0xff] %v7590_v24 }
 0x1ac   : > { %9342 = vst [vmem:[#allocation95_spill] sm:$0xff] %v7598_v10 }
 0x1ae   : > { %v2362_v9 = vpop.f32.mrf.mxu2  ;;  %v2027_v33 = vpop.f32.mrf.mxu0 }
 0x1af   : > { %v2363_v29 = vadd.f32 %v2362_v9, %v2194_v61  ;;  %v2196_v31 = vpop.f32.mrf.mxu1  ;;  %v979_v9 = vld [vmem:[#allocation3 + $0x568] sm:$0xff] }
 0x1b0   : > { %v2531_v17 = vpop.f32.mrf.mxu3  ;;  %v2197_v30 = vadd.f32 %v2196_v31, %v2027_v33  ;;  %v980_v33 = vld [vmem:[#allocation3 + $0x570] sm:$0xff]  ;;  %v977_v31 = vld [vmem:[#allocation3 + $0x558] sm:$0xff] }
 0x1b1   : > { %v7600_v45 = vadd.f32 %v2531_v17, %v2363_v29  ;;  %2066 = vmatmul.bf16.gmra.mxu0 %v7592_v41  ;;  %v978_v17 = vld [vmem:[#allocation3 + $0x560] sm:$0xff]  ;;  %v976_v29 = vld [vmem:[#allocation3 + $0x550] sm:$0xff] }
 0x1b2   : > { %2235 = vmatmul.bf16.gmra.mxu1 %v7594_v43  ;;  %v981_v43 = vld [vmem:[#allocation3 + $0x578] sm:$0xff]  ;;  %v7612_v24 = vpack.c.bf16 %v980_v33, %v976_v29  ;;  %v982_v29 = vld [vmem:[#allocation3 + $0x580] sm:$0xff]  ;;  %v987_v33 = vld [vmem:[#allocation3 + $0x5a8] sm:$0xff] }
 0x1b3   : > { %9343 = vst [vmem:[#allocation96_spill] sm:$0xff] %v7600_v45  ;;  %2404 = vmatmul.bf16.gmra.mxu2 %v7596_v46  ;;  %v7608_v46 = vpack.c.bf16 %v978_v17, %v974_v35 }
 0x1b4   : > { %9347 = vst [vmem:[#allocation100_spill] sm:$0xff] %v7612_v24 }
 0x1b5   : > { %2573 = vmatmul.bf16.gmra.mxu3 %v7598_v10  ;;  %9345 = vst [vmem:[#allocation98_spill] sm:$0xff] %v7608_v46 }
 0x1b6   : > { %v2365_v61 = vpop.f32.mrf.mxu2  ;;  %v2029_v27 = vpop.f32.mrf.mxu0 }
 0x1b7   : > { %v2366_v42 = vadd.f32 %v2365_v61, %v2197_v30  ;;  %v2198_v28 = vpop.f32.mrf.mxu1  ;;  %v7610_v61 = vpack.c.bf16 %v979_v9, %v975_v26 }
 0x1b8   : > { %v2534_v44 = vpop.f32.mrf.mxu3  ;;  %v2199_v8 = vadd.f32 %v2198_v28, %v2029_v27 }
 0x1b9   : > { %v7606_v60 = vadd.f32 %v2534_v44, %v2366_v42  ;;  %9346 = vst [vmem:[#allocation99_spill] sm:$0xff] %v7610_v61  ;;  %v7614_v44 = vpack.c.bf16 %v981_v43, %v977_v31  ;;  %v984_v31 = vld [vmem:[#allocation3 + $0x590] sm:$0xff] }
 0x1bb   : > { %9344 = vst [vmem:[#allocation97_spill] sm:$0xff] %v7606_v60  ;;  %v996_v60 = vld [vmem:[#allocation3 + $0x5f0] sm:$0xff] }
 0x1bc   : > { %9348 = vst [vmem:[#allocation101_spill] sm:$0xff] %v7614_v44 }
 0x1be   : > { %v2367_v45 = vpop.f32.mrf.mxu2  ;;  %v2032_v30 = vpop.f32.mrf.mxu0 }
 0x1bf   : > { %v2368_v10 = vadd.f32 %v2367_v45, %v2199_v8  ;;  %v2201_v42 = vpop.f32.mrf.mxu1 }
 0x1c0   : > { %v2536_v41 = vpop.f32.mrf.mxu3  ;;  %v2202_v28 = vadd.f32 %v2201_v42, %v2032_v30  ;;  %v988_v30 = vld [vmem:[#allocation3 + $0x5b0] sm:$0xff]  ;;  %v985_v42 = vld [vmem:[#allocation3 + $0x598] sm:$0xff] }
 0x1c1   : > { %v7616_v27 = vadd.f32 %v2536_v41, %v2368_v10  ;;  %2071 = vmatmul.bf16.gmra.mxu0 %v7608_v46  ;;  %v986_v41 = vld [vmem:[#allocation3 + $0x5a0] sm:$0xff]  ;;  %v983_v10 = vld [vmem:[#allocation3 + $0x588] sm:$0xff] }
 0x1c2   : > { %2240 = vmatmul.bf16.gmra.mxu1 %v7610_v61  ;;  %v989_v61 = vld [vmem:[#allocation3 + $0x5b8] sm:$0xff] }
 0x1c3   : > { %9349 = vst [vmem:[#allocation102_spill] sm:$0xff] %v7616_v27  ;;  %2409 = vmatmul.bf16.gmra.mxu2 %v7612_v24 }
 0x1c5   : > { %2578 = vmatmul.bf16.gmra.mxu3 %v7614_v44  ;;  %v7624_v44 = vpack.c.bf16 %v986_v41, %v982_v29  ;;  %v6673_v29 = vld [vmem:[%s7188_s1 + $0x12c] sm:$0xf] }
 0x1c6   : > { %v2370_v45 = vpop.f32.mrf.mxu2  ;;  %v2034_v17 = vpop.f32.mrf.mxu0 }
 0x1c7   : > { %v2371_v8 = vadd.f32 %v2370_v45, %v2202_v28  ;;  %v2203_v26 = vpop.f32.mrf.mxu1  ;;  %9351 = vst [vmem:[#allocation104_spill] sm:$0xff] %v7624_v44 }
 0x1c8   : > { %v2539_v35 = vpop.f32.mrf.mxu3  ;;  %v2204_v43 = vadd.f32 %v2203_v26, %v2034_v17  ;;  %v7628_v17 = vpack.c.bf16 %v988_v30, %v984_v31 }
 0x1c9   : > { %v7622_v9 = vadd.f32 %v2539_v35, %v2371_v8  ;;  %v7626_v35 = vpack.c.bf16 %v987_v33, %v983_v10  ;;  %v6273_v10 = vld [vmem:[%s7188_s1 + $0x138] sm:$0xf0] }
 0x1ca   : > { %9353 = vst [vmem:[#allocation106_spill] sm:$0xff] %v7628_v17  ;;  %v6276_v33 = vor.u32 %v6673_v29, %v6273_v10  ;;  %v993_v10 = vld [vmem:[#allocation3 + $0x5d8] sm:$0xff] }
 0x1cb   : > { %9350 = vst [vmem:[#allocation103_spill] sm:$0xff] %v7622_v9  ;;  %v7630_v9 = vpack.c.bf16 %v989_v61, %v985_v42 }
 0x1cc   : > { %9352 = vst [vmem:[#allocation105_spill] sm:$0xff] %v7626_v35  ;;  %3147 = vmatpush.bf16.xpose.msrb.mxu3 %v6276_v33 }
 0x1cd   : > { %9354 = vst [vmem:[#allocation107_spill] sm:$0xff] %v7630_v9 }
 0x1ce   : > { %v2372_v24 = vpop.f32.mrf.mxu2  ;;  %v2037_v8 = vpop.f32.mrf.mxu0 }
 0x1cf   : > { %v2373_v28 = vadd.f32 %v2372_v24, %v2204_v43  ;;  %v2206_v26 = vpop.f32.mrf.mxu1  ;;  %v6271_v24 = vld [vmem:[%s7188_s1 + $0x128] sm:$0xf]  ;;  %v6675_v43 = vld [vmem:[%s7188_s1 + $0x134] sm:$0xf0] }
 0x1d0   : > { %v2541_v45 = vpop.f32.mrf.mxu3  ;;  %v2207_v46 = vadd.f32 %v2206_v26, %v2037_v8  ;;  %v6272_v41 = vor.u32 %v6675_v43, %v6271_v24  ;;  %v990_v26 = vld [vmem:[#allocation3 + $0x5c0] sm:$0xff]  ;;  %v995_v24 = vld [vmem:[#allocation3 + $0x5e8] sm:$0xff] }
 0x1d1   : > { %v7632_v27 = vadd.f32 %v2541_v45, %v2373_v28  ;;  %2076 = vmatmul.bf16.gmra.mxu0 %v7624_v44  ;;  %v6263_v43 = vld [vmem:[%s7188_s1 + $0x120] sm:$0xf]  ;;  %v992_v44 = vld [vmem:[#allocation3 + $0x5d0] sm:$0xff] }
 0x1d2   : > { %2245 = vmatmul.bf16.gmra.mxu1 %v7626_v35  ;;  %2978 = vmatpush.bf16.xpose.msrb.mxu2 %v6272_v41  ;;  %v6674_v35 = vld [vmem:[%s7188_s1 + $0x12c] sm:$0xf0] }
 0x1d3   : > { %9355 = vst [vmem:[#allocation108_spill] sm:$0xff] %v7632_v27  ;;  %2414 = vmatmul.bf16.gmra.mxu2 %v7628_v17  ;;  %v991_v17 = vld [vmem:[#allocation3 + $0x5c8] sm:$0xff]  ;;  %v6672_v27 = vld [vmem:[%s7188_s1 + $0x124] sm:$0xf]  ;;  %v6264_v29 = vor.u32 %v6674_v35, %v6263_v43 }
 0x1d5   : > { %2583 = vmatmul.bf16.gmra.mxu3 %v7630_v9  ;;  %v994_v9 = vld [vmem:[#allocation3 + $0x5e0] sm:$0xff]  ;;  %2640 = vmatpush.bf16.xpose.msrb.mxu0 %v6264_v29  ;;  %v999_v29 = vld [vmem:[#allocation3 + $0x608] sm:$0xff] }
 0x1d6   : > { %v2375_v61 = vpop.f32.mrf.mxu2  ;;  %v2039_v42 = vpop.f32.mrf.mxu0  ;;  %v7648_v62 = vpack.c.bf16 %v994_v9, %v990_v26  ;;  %v998_v26 = vld [vmem:[#allocation3 + $0x600] sm:$0xff] }
 0x1d7   : > { %v2376_v31 = vadd.f32 %v2375_v61, %v2207_v46  ;;  %v2208_v28 = vpop.f32.mrf.mxu1  ;;  %v6265_v46 = vld [vmem:[%s7188_s1 + $0x130] sm:$0xf0]  ;;  %v997_v61 = vld [vmem:[#allocation3 + $0x5f8] sm:$0xff] }
 0x1d8   : > { %v2544_v30 = vpop.f32.mrf.mxu3  ;;  %v2209_v8 = vadd.f32 %v2208_v28, %v2039_v42  ;;  %v6268_v34 = vor.u32 %v6672_v27, %v6265_v46  ;;  %9357 = vst [vmem:[#allocation110_spill] sm:$0xff] %v7648_v62  ;;  %v7650_v42 = vpack.c.bf16 %v995_v24, %v991_v17  ;;  %v7652_v28 = vpack.c.bf16 %v996_v60, %v992_v44  ;;  %v1002_v24 = vld [vmem:[#allocation3 + $0x620] sm:$0xff]  ;;  %v1000_v46 = vld [vmem:[#allocation3 + $0x610] sm:$0xff] }
 0x1d9   : > { %v7642_v45 = vadd.f32 %v2544_v30, %v2376_v31  ;;  %v7654_v40 = vpack.c.bf16 %v997_v61, %v993_v10  ;;  %v1004_v10 = vld [vmem:[#allocation3 + $0x630] sm:$0xff]  ;;  %v1001_v61 = vld [vmem:[#allocation3 + $0x618] sm:$0xff] }
 0x1da   : > { %9358 = vst [vmem:[#allocation111_spill] sm:$0xff] %v7650_v42  ;;  %2809 = vmatpush.bf16.xpose.msrb.mxu1 %v6268_v34 }
 0x1db   : > { %9356 = vst [vmem:[#allocation109_spill] sm:$0xff] %v7642_v45 }
 0x1dc   : > { %9359 = vst [vmem:[#allocation112_spill] sm:$0xff] %v7652_v28 }
 0x1dd   : > { %9360 = vst [vmem:[#allocation113_spill] sm:$0xff] %v7654_v40 }
 0x1de   : > { %v2377_v41 = vpop.f32.mrf.mxu2  ;;  %v2042_v30 = vpop.f32.mrf.mxu0 }
 0x1df   : > { %v2378_v33 = vadd.f32 %v2377_v41, %v2209_v8  ;;  %v2211_v45 = vpop.f32.mrf.mxu1  ;;  %v1005_v41 = vld [vmem:[#allocation3 + $0x638] sm:$0xff] }
 0x1e0   : > { %v2546_v31 = vpop.f32.mrf.mxu3  ;;  %v2212_v43 = vadd.f32 %v2211_v45, %v2042_v30  ;;  %v1003_v45 = vld [vmem:[#allocation3 + $0x628] sm:$0xff] }
 0x1e1   : > { %v7656_v35 = vadd.f32 %v2546_v31, %v2378_v33  ;;  %2081 = vmatmul.bf16.gmra.mxu0 %v7648_v62  ;;  %v7664_v31 = vpack.c.bf16 %v1002_v24, %v998_v26 }
 0x1e2   : > { %2250 = vmatmul.bf16.gmra.mxu1 %v7650_v42 }
 0x1e3   : > { %9361 = vst [vmem:[#allocation114_spill] sm:$0xff] %v7656_v35  ;;  %2419 = vmatmul.bf16.gmra.mxu2 %v7652_v28  ;;  %v7668_v28 = vpack.c.bf16 %v1004_v10, %v1000_v46 }
 0x1e4   : > { %9363 = vst [vmem:[#allocation116_spill] sm:$0xff] %v7664_v31 }
 0x1e5   : > { %2588 = vmatmul.bf16.gmra.mxu3 %v7654_v40  ;;  %9365 = vst [vmem:[#allocation118_spill] sm:$0xff] %v7668_v28 }
 0x1e6   : > { %v2380_v27 = vpop.f32.mrf.mxu2  ;;  %v2044_v60 = vpop.f32.mrf.mxu0 }
 0x1e7   : > { %v2381_v9 = vadd.f32 %v2380_v27, %v2212_v43  ;;  %v2213_v44 = vpop.f32.mrf.mxu1  ;;  %v7666_v27 = vpack.c.bf16 %v1003_v45, %v999_v29 }
 0x1e8   : > { %v2549_v17 = vpop.f32.mrf.mxu3  ;;  %v2214_v8 = vadd.f32 %v2213_v44, %v2044_v60 }
 0x1e9   : > { %v7662_v34 = vadd.f32 %v2549_v17, %v2381_v9  ;;  %9364 = vst [vmem:[#allocation117_spill] sm:$0xff] %v7666_v27  ;;  %v7670_v17 = vpack.c.bf16 %v1005_v41, %v1001_v61  ;;  %v1006_v61 = vld [vmem:[#allocation3 + $0x640] sm:$0xff]  ;;  %v1007_v41 = vld [vmem:[#allocation3 + $0x648] sm:$0xff] }
 0x1eb   : > { %9362 = vst [vmem:[#allocation115_spill] sm:$0xff] %v7662_v34 }
 0x1ec   : > { %9366 = vst [vmem:[#allocation119_spill] sm:$0xff] %v7670_v17 }
 0x1ee   : > { %v2382_v33 = vpop.f32.mrf.mxu2  ;;  %v2047_v43 = vpop.f32.mrf.mxu0 }
 0x1ef   : > { %v2383_v30 = vadd.f32 %v2382_v33, %v2214_v8  ;;  %v2216_v9 = vpop.f32.mrf.mxu1  ;;  %v1011_v33 = vld [vmem:[#allocation3 + $0x668] sm:$0xff] }
 0x1f0   : > { %v2551_v40 = vpop.f32.mrf.mxu3  ;;  %v2217_v44 = vadd.f32 %v2216_v9, %v2047_v43  ;;  %v1012_v43 = vld [vmem:[#allocation3 + $0x670] sm:$0xff]  ;;  %v1009_v9 = vld [vmem:[#allocation3 + $0x658] sm:$0xff] }
 0x1f1   : > { %v7672_v60 = vadd.f32 %v2551_v40, %v2383_v30  ;;  %2086 = vmatmul.bf16.gmra.mxu0 %v7664_v31  ;;  %v1010_v40 = vld [vmem:[#allocation3 + $0x660] sm:$0xff]  ;;  %v1008_v30 = vld [vmem:[#allocation3 + $0x650] sm:$0xff] }
 0x1f2   : > { %2255 = vmatmul.bf16.gmra.mxu1 %v7666_v27  ;;  %v1013_v27 = vld [vmem:[#allocation3 + $0x678] sm:$0xff]  ;;  %v7684_v34 = vpack.c.bf16 %v1012_v43, %v1008_v30  ;;  %v1014_v30 = vld [vmem:[#allocation3 + $0x680] sm:$0xff]  ;;  %v1019_v43 = vld [vmem:[#allocation3 + $0x6a8] sm:$0xff] }
 0x1f3   : > { %9367 = vst [vmem:[#allocation120_spill] sm:$0xff] %v7672_v60  ;;  %2424 = vmatmul.bf16.gmra.mxu2 %v7668_v28  ;;  %v7680_v28 = vpack.c.bf16 %v1010_v40, %v1006_v61 }
 0x1f4   : > { %9371 = vst [vmem:[#allocation124_spill] sm:$0xff] %v7684_v34 }
 0x1f5   : > { %2593 = vmatmul.bf16.gmra.mxu3 %v7670_v17  ;;  %9369 = vst [vmem:[#allocation122_spill] sm:$0xff] %v7680_v28 }
 0x1f6   : > { %v2385_v8 = vpop.f32.mrf.mxu2  ;;  %v2049_v29 = vpop.f32.mrf.mxu0 }
 0x1f7   : > { %v2386_v26 = vadd.f32 %v2385_v8, %v2217_v44  ;;  %v2218_v45 = vpop.f32.mrf.mxu1  ;;  %v7682_v8 = vpack.c.bf16 %v1011_v33, %v1007_v41 }
 0x1f8   : > { %v2554_v24 = vpop.f32.mrf.mxu3  ;;  %v2219_v10 = vadd.f32 %v2218_v45, %v2049_v29 }
 0x1f9   : > { %v7678_v46 = vadd.f32 %v2554_v24, %v2386_v26  ;;  %9370 = vst [vmem:[#allocation123_spill] sm:$0xff] %v7682_v8  ;;  %v7686_v24 = vpack.c.bf16 %v1013_v27, %v1009_v9  ;;  %v1016_v9 = vld [vmem:[#allocation3 + $0x690] sm:$0xff] }
 0x1fb   : > { %9368 = vst [vmem:[#allocation121_spill] sm:$0xff] %v7678_v46  ;;  %v1028_v46 = vld [vmem:[#allocation3 + $0x6f0] sm:$0xff] }
 0x1fc   : > { %9372 = vst [vmem:[#allocation125_spill] sm:$0xff] %v7686_v24 }
 0x1fe   : > { %v2387_v60 = vpop.f32.mrf.mxu2  ;;  %v2052_v44 = vpop.f32.mrf.mxu0 }
 0x1ff   : > { %v2388_v17 = vadd.f32 %v2387_v60, %v2219_v10  ;;  %v2221_v26 = vpop.f32.mrf.mxu1 }
 0x200   : > { %v2556_v31 = vpop.f32.mrf.mxu3  ;;  %v2222_v45 = vadd.f32 %v2221_v26, %v2052_v44  ;;  %v1020_v44 = vld [vmem:[#allocation3 + $0x6b0] sm:$0xff]  ;;  %v1017_v26 = vld [vmem:[#allocation3 + $0x698] sm:$0xff] }
 0x201   : > { %v7688_v29 = vadd.f32 %v2556_v31, %v2388_v17  ;;  %2091 = vmatmul.bf16.gmra.mxu0 %v7680_v28  ;;  %v1018_v31 = vld [vmem:[#allocation3 + $0x6a0] sm:$0xff]  ;;  %v1015_v17 = vld [vmem:[#allocation3 + $0x688] sm:$0xff] }
 0x202   : > { %2260 = vmatmul.bf16.gmra.mxu1 %v7682_v8  ;;  %v1021_v8 = vld [vmem:[#allocation3 + $0x6b8] sm:$0xff] }
 0x203   : > { %9373 = vst [vmem:[#allocation126_spill] sm:$0xff] %v7688_v29  ;;  %2429 = vmatmul.bf16.gmra.mxu2 %v7684_v34 }
 0x205   : > { %2598 = vmatmul.bf16.gmra.mxu3 %v7686_v24  ;;  %v7696_v24 = vpack.c.bf16 %v1018_v31, %v1014_v30  ;;  %v6669_v30 = vld [vmem:[%s7188_s1 + $0x10c] sm:$0xf] }
 0x206   : > { %v2390_v60 = vpop.f32.mrf.mxu2  ;;  %v2054_v40 = vpop.f32.mrf.mxu0 }
 0x207   : > { %v2391_v10 = vadd.f32 %v2390_v60, %v2222_v45  ;;  %v2223_v41 = vpop.f32.mrf.mxu1  ;;  %9375 = vst [vmem:[#allocation128_spill] sm:$0xff] %v7696_v24 }
 0x208   : > { %v2559_v61 = vpop.f32.mrf.mxu3  ;;  %v2224_v27 = vadd.f32 %v2223_v41, %v2054_v40  ;;  %v7700_v40 = vpack.c.bf16 %v1020_v44, %v1016_v9 }
 0x209   : > { %v7694_v33 = vadd.f32 %v2559_v61, %v2391_v10  ;;  %v7698_v61 = vpack.c.bf16 %v1019_v43, %v1015_v17  ;;  %v6257_v17 = vld [vmem:[%s7188_s1 + $0x118] sm:$0xf0] }
 0x20a   : > { %9377 = vst [vmem:[#allocation130_spill] sm:$0xff] %v7700_v40  ;;  %v6260_v43 = vor.u32 %v6669_v30, %v6257_v17  ;;  %v1025_v17 = vld [vmem:[#allocation3 + $0x6d8] sm:$0xff] }
 0x20b   : > { %9374 = vst [vmem:[#allocation127_spill] sm:$0xff] %v7694_v33  ;;  %v7702_v33 = vpack.c.bf16 %v1021_v8, %v1017_v26 }
 0x20c   : > { %9376 = vst [vmem:[#allocation129_spill] sm:$0xff] %v7698_v61  ;;  %3148 = vmatpush.bf16.xpose.msrb.mxu3 %v6260_v43 }
 0x20d   : > { %9378 = vst [vmem:[#allocation131_spill] sm:$0xff] %v7702_v33 }
 0x20e   : > { %v2392_v34 = vpop.f32.mrf.mxu2  ;;  %v2057_v10 = vpop.f32.mrf.mxu0 }
 0x20f   : > { %v2393_v45 = vadd.f32 %v2392_v34, %v2224_v27  ;;  %v2226_v41 = vpop.f32.mrf.mxu1  ;;  %v6255_v34 = vld [vmem:[%s7188_s1 + $0x108] sm:$0xf]  ;;  %v6671_v27 = vld [vmem:[%s7188_s1 + $0x114] sm:$0xf0] }
 0x210   : > { %v2561_v60 = vpop.f32.mrf.mxu3  ;;  %v2227_v28 = vadd.f32 %v2226_v41, %v2057_v10  ;;  %v6256_v31 = vor.u32 %v6671_v27, %v6255_v34  ;;  %v1022_v41 = vld [vmem:[#allocation3 + $0x6c0] sm:$0xff]  ;;  %v1027_v34 = vld [vmem:[#allocation3 + $0x6e8] sm:$0xff] }
 0x211   : > { %v7704_v29 = vadd.f32 %v2561_v60, %v2393_v45  ;;  %2096 = vmatmul.bf16.gmra.mxu0 %v7696_v24  ;;  %v6247_v27 = vld [vmem:[%s7188_s1 + $0x100] sm:$0xf]  ;;  %v1024_v24 = vld [vmem:[#allocation3 + $0x6d0] sm:$0xff] }
 0x212   : > { %2265 = vmatmul.bf16.gmra.mxu1 %v7698_v61  ;;  %2979 = vmatpush.bf16.xpose.msrb.mxu2 %v6256_v31  ;;  %v6670_v61 = vld [vmem:[%s7188_s1 + $0x10c] sm:$0xf0] }
 0x213   : > { %9379 = vst [vmem:[#allocation132_spill] sm:$0xff] %v7704_v29  ;;  %2434 = vmatmul.bf16.gmra.mxu2 %v7700_v40  ;;  %v1023_v40 = vld [vmem:[#allocation3 + $0x6c8] sm:$0xff]  ;;  %v6668_v29 = vld [vmem:[%s7188_s1 + $0x104] sm:$0xf]  ;;  %v6248_v30 = vor.u32 %v6670_v61, %v6247_v27 }
 0x215   : > { %2603 = vmatmul.bf16.gmra.mxu3 %v7702_v33  ;;  %v1026_v33 = vld [vmem:[#allocation3 + $0x6e0] sm:$0xff]  ;;  %2641 = vmatpush.bf16.xpose.msrb.mxu0 %v6248_v30  ;;  %v1031_v30 = vld [vmem:[#allocation3 + $0x708] sm:$0xff] }
 0x216   : > { %v2395_v8 = vpop.f32.mrf.mxu2  ;;  %v2059_v26 = vpop.f32.mrf.mxu0  ;;  %v7720_v35 = vpack.c.bf16 %v1026_v33, %v1022_v41  ;;  %v1030_v41 = vld [vmem:[#allocation3 + $0x700] sm:$0xff] }
 0x217   : > { %v2396_v9 = vadd.f32 %v2395_v8, %v2227_v28  ;;  %v2228_v45 = vpop.f32.mrf.mxu1  ;;  %v6249_v28 = vld [vmem:[%s7188_s1 + $0x110] sm:$0xf0]  ;;  %v1029_v8 = vld [vmem:[#allocation3 + $0x6f8] sm:$0xff] }
 0x218   : > { %v2564_v44 = vpop.f32.mrf.mxu3  ;;  %v2229_v10 = vadd.f32 %v2228_v45, %v2059_v26  ;;  %v6252_v42 = vor.u32 %v6668_v29, %v6249_v28  ;;  %9381 = vst [vmem:[#allocation134_spill] sm:$0xff] %v7720_v35  ;;  %v7722_v26 = vpack.c.bf16 %v1027_v34, %v1023_v40  ;;  %v7724_v45 = vpack.c.bf16 %v1028_v46, %v1024_v24  ;;  %v1034_v34 = vld [vmem:[#allocation3 + $0x720] sm:$0xff]  ;;  %v1032_v28 = vld [vmem:[#allocation3 + $0x710] sm:$0xff] }
 0x219   : > { %v7714_v60 = vadd.f32 %v2564_v44, %v2396_v9  ;;  %v7726_v62 = vpack.c.bf16 %v1029_v8, %v1025_v17  ;;  %v1036_v17 = vld [vmem:[#allocation3 + $0x730] sm:$0xff]  ;;  %v1033_v8 = vld [vmem:[#allocation3 + $0x718] sm:$0xff] }
 0x21a   : > { %9382 = vst [vmem:[#allocation135_spill] sm:$0xff] %v7722_v26  ;;  %2810 = vmatpush.bf16.xpose.msrb.mxu1 %v6252_v42 }
 0x21b   : > { %9380 = vst [vmem:[#allocation133_spill] sm:$0xff] %v7714_v60 }
 0x21c   : > { %9383 = vst [vmem:[#allocation136_spill] sm:$0xff] %v7724_v45 }
 0x21d   : > { %9384 = vst [vmem:[#allocation137_spill] sm:$0xff] %v7726_v62 }
 0x21e   : > { %v2397_v31 = vpop.f32.mrf.mxu2  ;;  %v2062_v44 = vpop.f32.mrf.mxu0 }
 0x21f   : > { %v2398_v43 = vadd.f32 %v2397_v31, %v2229_v10  ;;  %v2231_v60 = vpop.f32.mrf.mxu1  ;;  %v1037_v31 = vld [vmem:[#allocation3 + $0x738] sm:$0xff] }
 0x220   : > { %v2566_v9 = vpop.f32.mrf.mxu3  ;;  %v2232_v27 = vadd.f32 %v2231_v60, %v2062_v44  ;;  %v1035_v60 = vld [vmem:[#allocation3 + $0x728] sm:$0xff] }
 0x221   : > { %v7728_v61 = vadd.f32 %v2566_v9, %v2398_v43  ;;  %2101 = vmatmul.bf16.gmra.mxu0 %v7720_v35  ;;  %v7736_v9 = vpack.c.bf16 %v1034_v34, %v1030_v41 }
 0x222   : > { %2270 = vmatmul.bf16.gmra.mxu1 %v7722_v26 }
 0x223   : > { %9385 = vst [vmem:[#allocation138_spill] sm:$0xff] %v7728_v61  ;;  %2439 = vmatmul.bf16.gmra.mxu2 %v7724_v45  ;;  %v7740_v45 = vpack.c.bf16 %v1036_v17, %v1032_v28 }
 0x224   : > { %9387 = vst [vmem:[#allocation140_spill] sm:$0xff] %v7736_v9 }
 0x225   : > { %2608 = vmatmul.bf16.gmra.mxu3 %v7726_v62  ;;  %9389 = vst [vmem:[#allocation142_spill] sm:$0xff] %v7740_v45 }
 0x226   : > { %v2400_v29 = vpop.f32.mrf.mxu2  ;;  %v2064_v46 = vpop.f32.mrf.mxu0 }
 0x227   : > { %v2401_v33 = vadd.f32 %v2400_v29, %v2232_v27  ;;  %v2233_v24 = vpop.f32.mrf.mxu1  ;;  %v7738_v29 = vpack.c.bf16 %v1035_v60, %v1031_v30 }
 0x228   : > { %v2569_v40 = vpop.f32.mrf.mxu3  ;;  %v2234_v10 = vadd.f32 %v2233_v24, %v2064_v46 }
 0x229   : > { %v7734_v42 = vadd.f32 %v2569_v40, %v2401_v33  ;;  %9388 = vst [vmem:[#allocation141_spill] sm:$0xff] %v7738_v29  ;;  %v7742_v40 = vpack.c.bf16 %v1037_v31, %v1033_v8  ;;  %v1038_v8 = vld [vmem:[#allocation3 + $0x740] sm:$0xff]  ;;  %v1039_v31 = vld [vmem:[#allocation3 + $0x748] sm:$0xff] }
 0x22b   : > { %9386 = vst [vmem:[#allocation139_spill] sm:$0xff] %v7734_v42 }
 0x22c   : > { %9390 = vst [vmem:[#allocation143_spill] sm:$0xff] %v7742_v40 }
 0x22e   : > { %v2402_v43 = vpop.f32.mrf.mxu2  ;;  %v2067_v27 = vpop.f32.mrf.mxu0 }
 0x22f   : > { %v2403_v44 = vadd.f32 %v2402_v43, %v2234_v10  ;;  %v2236_v33 = vpop.f32.mrf.mxu1  ;;  %v1043_v43 = vld [vmem:[#allocation3 + $0x768] sm:$0xff] }
 0x230   : > { %v2571_v62 = vpop.f32.mrf.mxu3  ;;  %v2237_v24 = vadd.f32 %v2236_v33, %v2067_v27  ;;  %v1044_v27 = vld [vmem:[#allocation3 + $0x770] sm:$0xff]  ;;  %v1041_v33 = vld [vmem:[#allocation3 + $0x758] sm:$0xff] }
 0x231   : > { %v7744_v46 = vadd.f32 %v2571_v62, %v2403_v44  ;;  %2106 = vmatmul.bf16.gmra.mxu0 %v7736_v9  ;;  %v1042_v62 = vld [vmem:[#allocation3 + $0x760] sm:$0xff]  ;;  %v1040_v44 = vld [vmem:[#allocation3 + $0x750] sm:$0xff] }
 0x232   : > { %2275 = vmatmul.bf16.gmra.mxu1 %v7738_v29  ;;  %v1045_v29 = vld [vmem:[#allocation3 + $0x778] sm:$0xff]  ;;  %v7756_v42 = vpack.c.bf16 %v1044_v27, %v1040_v44  ;;  %v1046_v44 = vld [vmem:[#allocation3 + $0x780] sm:$0xff]  ;;  %v1051_v27 = vld [vmem:[#allocation3 + $0x7a8] sm:$0xff] }
 0x233   : > { %9391 = vst [vmem:[#allocation144_spill] sm:$0xff] %v7744_v46  ;;  %2444 = vmatmul.bf16.gmra.mxu2 %v7740_v45  ;;  %v7752_v45 = vpack.c.bf16 %v1042_v62, %v1038_v8 }
 0x234   : > { %9395 = vst [vmem:[#allocation148_spill] sm:$0xff] %v7756_v42 }
 0x235   : > { %2613 = vmatmul.bf16.gmra.mxu3 %v7742_v40  ;;  %9393 = vst [vmem:[#allocation146_spill] sm:$0xff] %v7752_v45 }
 0x236   : > { %v2405_v10 = vpop.f32.mrf.mxu2  ;;  %v2069_v30 = vpop.f32.mrf.mxu0 }
 0x237   : > { %v2406_v41 = vadd.f32 %v2405_v10, %v2237_v24  ;;  %v2238_v60 = vpop.f32.mrf.mxu1  ;;  %v7754_v10 = vpack.c.bf16 %v1043_v43, %v1039_v31 }
 0x238   : > { %v2574_v34 = vpop.f32.mrf.mxu3  ;;  %v2239_v17 = vadd.f32 %v2238_v60, %v2069_v30 }
 0x239   : > { %v7750_v28 = vadd.f32 %v2574_v34, %v2406_v41  ;;  %9394 = vst [vmem:[#allocation147_spill] sm:$0xff] %v7754_v10  ;;  %v7758_v34 = vpack.c.bf16 %v1045_v29, %v1041_v33  ;;  %v1048_v33 = vld [vmem:[#allocation3 + $0x790] sm:$0xff] }
 0x23b   : > { %9392 = vst [vmem:[#allocation145_spill] sm:$0xff] %v7750_v28  ;;  %v1060_v28 = vld [vmem:[#allocation3 + $0x7f0] sm:$0xff] }
 0x23c   : > { %9396 = vst [vmem:[#allocation149_spill] sm:$0xff] %v7758_v34 }
 0x23e   : > { %v2407_v46 = vpop.f32.mrf.mxu2  ;;  %v2072_v24 = vpop.f32.mrf.mxu0 }
 0x23f   : > { %v2408_v40 = vadd.f32 %v2407_v46, %v2239_v17  ;;  %v2241_v41 = vpop.f32.mrf.mxu1 }
 0x240   : > { %v2576_v9 = vpop.f32.mrf.mxu3  ;;  %v2242_v60 = vadd.f32 %v2241_v41, %v2072_v24  ;;  %v1052_v24 = vld [vmem:[#allocation3 + $0x7b0] sm:$0xff]  ;;  %v1049_v41 = vld [vmem:[#allocation3 + $0x798] sm:$0xff] }
 0x241   : > { %v7760_v30 = vadd.f32 %v2576_v9, %v2408_v40  ;;  %2111 = vmatmul.bf16.gmra.mxu0 %v7752_v45  ;;  %v1050_v9 = vld [vmem:[#allocation3 + $0x7a0] sm:$0xff]  ;;  %v1047_v40 = vld [vmem:[#allocation3 + $0x788] sm:$0xff] }
 0x242   : > { %2280 = vmatmul.bf16.gmra.mxu1 %v7754_v10  ;;  %v1053_v10 = vld [vmem:[#allocation3 + $0x7b8] sm:$0xff] }
 0x243   : > { %9397 = vst [vmem:[#allocation150_spill] sm:$0xff] %v7760_v30  ;;  %2449 = vmatmul.bf16.gmra.mxu2 %v7756_v42 }
 0x245   : > { %2618 = vmatmul.bf16.gmra.mxu3 %v7758_v34  ;;  %v7768_v34 = vpack.c.bf16 %v1050_v9, %v1046_v44  ;;  %v6729_v44 = vld [vmem:[%s7188_s1 + $0x2ec] sm:$0xf] }
 0x246   : > { %v2410_v46 = vpop.f32.mrf.mxu2  ;;  %v2074_v62 = vpop.f32.mrf.mxu0 }
 0x247   : > { %v2411_v17 = vadd.f32 %v2410_v46, %v2242_v60  ;;  %v2243_v31 = vpop.f32.mrf.mxu1  ;;  %9399 = vst [vmem:[#allocation152_spill] sm:$0xff] %v7768_v34 }
 0x248   : > { %v2579_v8 = vpop.f32.mrf.mxu3  ;;  %v2244_v29 = vadd.f32 %v2243_v31, %v2074_v62  ;;  %v7772_v62 = vpack.c.bf16 %v1052_v24, %v1048_v33 }
 0x249   : > { %v7766_v43 = vadd.f32 %v2579_v8, %v2411_v17  ;;  %v7770_v8 = vpack.c.bf16 %v1051_v27, %v1047_v40  ;;  %v6497_v40 = vld [vmem:[%s7188_s1 + $0x2f8] sm:$0xf0] }
 0x24a   : > { %9401 = vst [vmem:[#allocation154_spill] sm:$0xff] %v7772_v62  ;;  %v6500_v27 = vor.u32 %v6729_v44, %v6497_v40  ;;  %v1057_v40 = vld [vmem:[#allocation3 + $0x7d8] sm:$0xff] }
 0x24b   : > { %9398 = vst [vmem:[#allocation151_spill] sm:$0xff] %v7766_v43  ;;  %v7774_v43 = vpack.c.bf16 %v1053_v10, %v1049_v41 }
 0x24c   : > { %9400 = vst [vmem:[#allocation153_spill] sm:$0xff] %v7770_v8  ;;  %3817 = vmatpush.bf16.xpose.msra.mxu3 %v6500_v27 }
 0x24d   : > { %9402 = vst [vmem:[#allocation155_spill] sm:$0xff] %v7774_v43 }
 0x24e   : > { %v2412_v42 = vpop.f32.mrf.mxu2  ;;  %v2077_v17 = vpop.f32.mrf.mxu0 }
 0x24f   : > { %v2413_v60 = vadd.f32 %v2412_v42, %v2244_v29  ;;  %v2246_v31 = vpop.f32.mrf.mxu1  ;;  %v6495_v42 = vld [vmem:[%s7188_s1 + $0x2e8] sm:$0xf]  ;;  %v6731_v29 = vld [vmem:[%s7188_s1 + $0x2f4] sm:$0xf0] }
 0x250   : > { %v2581_v46 = vpop.f32.mrf.mxu3  ;;  %v2247_v45 = vadd.f32 %v2246_v31, %v2077_v17  ;;  %v6496_v9 = vor.u32 %v6731_v29, %v6495_v42  ;;  %v1054_v31 = vld [vmem:[#allocation3 + $0x7c0] sm:$0xff]  ;;  %v1059_v42 = vld [vmem:[#allocation3 + $0x7e8] sm:$0xff] }
 0x251   : > { %v7776_v30 = vadd.f32 %v2581_v46, %v2413_v60  ;;  %2116 = vmatmul.bf16.gmra.mxu0 %v7768_v34  ;;  %v6487_v29 = vld [vmem:[%s7188_s1 + $0x2e0] sm:$0xf]  ;;  %v1056_v34 = vld [vmem:[#allocation3 + $0x7d0] sm:$0xff] }
 0x252   : > { %2285 = vmatmul.bf16.gmra.mxu1 %v7770_v8  ;;  %3648 = vmatpush.bf16.xpose.msra.mxu2 %v6496_v9  ;;  %v6730_v8 = vld [vmem:[%s7188_s1 + $0x2ec] sm:$0xf0] }
 0x253   : > { %9403 = vst [vmem:[#allocation156_spill] sm:$0xff] %v7776_v30  ;;  %2454 = vmatmul.bf16.gmra.mxu2 %v7772_v62  ;;  %v1055_v62 = vld [vmem:[#allocation3 + $0x7c8] sm:$0xff]  ;;  %v6728_v30 = vld [vmem:[%s7188_s1 + $0x2e4] sm:$0xf]  ;;  %v6488_v44 = vor.u32 %v6730_v8, %v6487_v29 }
 0x255   : > { %2623 = vmatmul.bf16.gmra.mxu3 %v7774_v43  ;;  %v1058_v43 = vld [vmem:[#allocation3 + $0x7e0] sm:$0xff]  ;;  %3310 = vmatpush.bf16.xpose.msra.mxu0 %v6488_v44 }
 0x256   : > { %v2415_v10 = vpop.f32.mrf.mxu2  ;;  %v2079_v41 = vpop.f32.mrf.mxu0  ;;  %v7792_v61 = vpack.c.bf16 %v1058_v43, %v1054_v31 }
 0x257   : > { %v2416_v33 = vadd.f32 %v2415_v10, %v2247_v45  ;;  %v2248_v60 = vpop.f32.mrf.mxu1  ;;  %v6489_v45 = vld [vmem:[%s7188_s1 + $0x2f0] sm:$0xf0]  ;;  %v1061_v10 = vld [vmem:[#allocation3 + $0x7f8] sm:$0xff] }
 0x258   : > { %v2584_v24 = vpop.f32.mrf.mxu3  ;;  %v2249_v17 = vadd.f32 %v2248_v60, %v2079_v41  ;;  %v6492_v26 = vor.u32 %v6728_v30, %v6489_v45  ;;  %v7794_v41 = vpack.c.bf16 %v1059_v42, %v1055_v62  ;;  %v7796_v60 = vpack.c.bf16 %v1060_v28, %v1056_v34 }
 0x259   : > { %v7786_v46 = vadd.f32 %v2584_v24, %v2416_v33  ;;  %v7798_v35 = vpack.c.bf16 %v1061_v10, %v1057_v40 }
 0x25a   : > { %9405 = vst [vmem:[#allocation158_spill] sm:$0xff] %v7794_v41  ;;  %3479 = vmatpush.bf16.xpose.msra.mxu1 %v6492_v26 }
 0x25b   : > { %9404 = vst [vmem:[#allocation157_spill] sm:$0xff] %v7786_v46 }
 0x25e   : > { %v2417_v9 = vpop.f32.mrf.mxu2  ;;  %v2082_v24 = vpop.f32.mrf.mxu0 }
 0x25f   : > { %v2418_v27 = vadd.f32 %v2417_v9, %v2249_v17  ;;  %v2251_v46 = vpop.f32.mrf.mxu1 }
 0x260   : > { %v2586_v33 = vpop.f32.mrf.mxu3  ;;  %v2252_v29 = vadd.f32 %v2251_v46, %v2082_v24 }
 0x261   : > { %v7800_v8 = vadd.f32 %v2586_v33, %v2418_v27  ;;  %2121 = vmatmul.bf16.gmra.mxu0 %v7792_v61 }
 0x262   : > { %2290 = vmatmul.bf16.gmra.mxu1 %v7794_v41 }
 0x263   : > { %2459 = vmatmul.bf16.gmra.mxu2 %v7796_v60 }
 0x265   : > { %2628 = vmatmul.bf16.gmra.mxu3 %v7798_v35 }
 0x266   : > { %v2420_v30 = vpop.f32.mrf.mxu2  ;;  %v2084_v28 = vpop.f32.mrf.mxu0 }
 0x267   : > { %v2421_v43 = vadd.f32 %v2420_v30, %v2252_v29  ;;  %v2253_v34 = vpop.f32.mrf.mxu1 }
 0x268   : > { %v2589_v62 = vpop.f32.mrf.mxu3  ;;  %v2254_v17 = vadd.f32 %v2253_v34, %v2084_v28 }
 0x269   : > { %v7806_v26 = vadd.f32 %v2589_v62, %v2421_v43 }
 0x26e   : > { %v2422_v31 = vpop.f32.mrf.mxu2  ;;  %v2087_v46 = vpop.f32.mrf.mxu0 }
 0x26f   : > { %v2423_v42 = vadd.f32 %v2422_v31, %v2254_v17  ;;  %v2256_v45 = vpop.f32.mrf.mxu1 }
 0x270   : > { %v2591_v44 = vpop.f32.mrf.mxu3  ;;  %v2257_v10 = vadd.f32 %v2256_v45, %v2087_v46 }
 0x271   : > { %v7808_v40 = vadd.f32 %v2591_v44, %v2423_v42  ;;  %2642 = vmatmul.bf16.vlgmr.msrb.gmra.mxu0 %v7266_v52 }
 0x272   : > { %2811 = vmatmul.bf16.vlgmr.msrb.gmra.mxu1 %v7268_v53 }
 0x273   : > { %2980 = vmatmul.bf16.vlgmr.msrb.gmra.mxu2 %v7270_v54 }
 0x275   : > { %3149 = vmatmul.bf16.vlgmr.msrb.gmra.mxu3 %v7272_v55 }
 0x276   : > { %v2425_v9 = vpop.f32.mrf.mxu2  ;;  %v2089_v24 = vpop.f32.mrf.mxu0 }
 0x277   : > { %v2426_v27 = vadd.f32 %v2425_v9, %v2257_v10  ;;  %v2258_v29 = vpop.f32.mrf.mxu1 }
 0x278   : > { %v2594_v33 = vpop.f32.mrf.mxu3  ;;  %v2259_v43 = vadd.f32 %v2258_v29, %v2089_v24 }
 0x279   : > { %v7814_v30 = vadd.f32 %v2594_v33, %v2426_v27 }
 0x27e   : > { %v2427_v62 = vpop.f32.mrf.mxu2  ;;  %v2092_v17 = vpop.f32.mrf.mxu0 }
 0x27f   : > { %v2428_v28 = vadd.f32 %v2427_v62, %v2259_v43  ;;  %v2261_v31 = vpop.f32.mrf.mxu1 }
 0x280   : > { %v2596_v34 = vpop.f32.mrf.mxu3  ;;  %v2262_v44 = vadd.f32 %v2261_v31, %v2092_v17 }
 0x281   : > { %v7816_v42 = vadd.f32 %v2596_v34, %v2428_v28  ;;  %2647 = vmatmul.bf16.gmra.mxu0 %v7278_v0 }
 0x282   : > { %2816 = vmatmul.bf16.gmra.mxu1 %v7280_v1 }
 0x283   : > { %2985 = vmatmul.bf16.gmra.mxu2 %v7282_v2 }
 0x285   : > { %3154 = vmatmul.bf16.gmra.mxu3 %v7284_v3 }
 0x286   : > { %v2430_v46 = vpop.f32.mrf.mxu2  ;;  %v2094_v9 = vpop.f32.mrf.mxu0 }
 0x287   : > { %v2431_v45 = vadd.f32 %v2430_v46, %v2262_v44  ;;  %v2263_v27 = vpop.f32.mrf.mxu1  ;;  %v6479_v44 = vld [vmem:[%s7188_s1 + $0x2c8] sm:$0xf]  ;;  %v6727_v46 = vld [vmem:[%s7188_s1 + $0x2d4] sm:$0xf0] }
 0x288   : > { %v2599_v10 = vpop.f32.mrf.mxu3  ;;  %v2264_v24 = vadd.f32 %v2263_v27, %v2094_v9  ;;  %v6481_v9 = vld [vmem:[%s7188_s1 + $0x2d8] sm:$0xf0] }
 0x289   : > { %v7822_v33 = vadd.f32 %v2599_v10, %v2431_v45  ;;  %v6725_v45 = vld [vmem:[%s7188_s1 + $0x2cc] sm:$0xf]  ;;  %v6480_v10 = vor.u32 %v6727_v46, %v6479_v44 }
 0x28b   : > { %9406 = vst [vmem:[#allocation159_spill] sm:$0xff] %v7822_v33  ;;  %3649 = vmatpush.bf16.xpose.msra.mxu2 %v6480_v10  ;;  %v6473_v33 = vld [vmem:[%s7188_s1 + $0x2d0] sm:$0xf0] }
 0x28e   : > { %v2432_v29 = vpop.f32.mrf.mxu2  ;;  %v2097_v28 = vpop.f32.mrf.mxu0 }
 0x28f   : > { %v2433_v43 = vadd.f32 %v2432_v29, %v2264_v24  ;;  %v2266_v34 = vpop.f32.mrf.mxu1  ;;  %v6484_v24 = vor.u32 %v6725_v45, %v6481_v9 }
 0x290   : > { %v2601_v62 = vpop.f32.mrf.mxu3  ;;  %v2267_v31 = vadd.f32 %v2266_v34, %v2097_v28 }
 0x291   : > { %v7824_v17 = vadd.f32 %v2601_v62, %v2433_v43  ;;  %2652 = vmatmul.bf16.gmra.mxu0 %v7290_v12  ;;  %3818 = vmatpush.bf16.xpose.msra.mxu3 %v6484_v24 }
 0x292   : > { %2821 = vmatmul.bf16.gmra.mxu1 %v7292_v13  ;;  %v6726_v13 = vld [vmem:[%s7188_s1 + $0x2cc] sm:$0xf0] }
 0x293   : > { %9407 = vst [vmem:[#allocation160_spill] sm:$0xff] %v7824_v17  ;;  %2990 = vmatmul.bf16.gmra.mxu2 %v7294_v14  ;;  %v6471_v14 = vld [vmem:[%s7188_s1 + $0x2c0] sm:$0xf]  ;;  %v6724_v17 = vld [vmem:[%s7188_s1 + $0x2c4] sm:$0xf] }
 0x294   : > { %v6472_v12 = vor.u32 %v6726_v13, %v6471_v14  ;;  %v6476_v3 = vor.u32 %v6724_v17, %v6473_v33 }
 0x295   : > { %3159 = vmatmul.bf16.gmra.mxu3 %v7296_v15 }
 0x296   : > { %v2435_v27 = vpop.f32.mrf.mxu2  ;;  %v2099_v62 = vpop.f32.mrf.mxu0  ;;  %3311 = vmatpush.bf16.xpose.msra.mxu0 %v6472_v12  ;;  %3480 = vmatpush.bf16.xpose.msra.mxu1 %v6476_v3 }
 0x297   : > { %v2436_v29 = vadd.f32 %v2435_v27, %v2267_v31  ;;  %v2268_v28 = vpop.f32.mrf.mxu1 }
 0x298   : > { %v2604_v43 = vpop.f32.mrf.mxu3  ;;  %v2269_v15 = vadd.f32 %v2268_v28, %v2099_v62 }
 0x299   : > { %v7834_v34 = vadd.f32 %v2604_v43, %v2436_v29 }
 0x29e   : > { %v2437_v44 = vpop.f32.mrf.mxu2  ;;  %v2102_v45 = vpop.f32.mrf.mxu0 }
 0x29f   : > { %v2438_v46 = vadd.f32 %v2437_v44, %v2269_v15  ;;  %v2271_v31 = vpop.f32.mrf.mxu1 }
 0x2a0   : > { %v2606_v2 = vpop.f32.mrf.mxu3  ;;  %v2272_v10 = vadd.f32 %v2271_v31, %v2102_v45 }
 0x2a1   : > { %v7840_v9 = vadd.f32 %v2606_v2, %v2438_v46  ;;  %2657 = vmatmul.bf16.gmra.mxu0 %v7310_v36 }
 0x2a2   : > { %2826 = vmatmul.bf16.gmra.mxu1 %v7312_v37 }
 0x2a3   : > { %2995 = vmatmul.bf16.gmra.mxu2 %v7314_v38 }
 0x2a5   : > { %3164 = vmatmul.bf16.gmra.mxu3 %v7316_v39 }
 0x2a6   : > { %v2440_v13 = vpop.f32.mrf.mxu2  ;;  %v2104_v12 = vpop.f32.mrf.mxu0 }
 0x2a7   : > { %v2441_v14 = vadd.f32 %v2440_v13, %v2272_v10  ;;  %v2273_v15 = vpop.f32.mrf.mxu1 }
 0x2a8   : > { %v2609_v33 = vpop.f32.mrf.mxu3  ;;  %v2274_v3 = vadd.f32 %v2273_v15, %v2104_v12 }
 0x2a9   : > { %v7846_v17 = vadd.f32 %v2609_v33, %v2441_v14 }
 0x2ae   : > { %v2442_v27 = vpop.f32.mrf.mxu2  ;;  %v2107_v29 = vpop.f32.mrf.mxu0 }
 0x2af   : > { %v2443_v2 = vadd.f32 %v2442_v27, %v2274_v3  ;;  %v2276_v43 = vpop.f32.mrf.mxu1 }
 0x2b0   : > { %v2611_v24 = vpop.f32.mrf.mxu3  ;;  %v2277_v28 = vadd.f32 %v2276_v43, %v2107_v29 }
 0x2b1   : > { %v7848_v62 = vadd.f32 %v2611_v24, %v2443_v2  ;;  %2662 = vmatmul.bf16.gmra.mxu0 %v7322_v48 }
 0x2b2   : > { %2831 = vmatmul.bf16.gmra.mxu1 %v7324_v49 }
 0x2b3   : > { %3000 = vmatmul.bf16.gmra.mxu2 %v7326_v50 }
 0x2b5   : > { %3169 = vmatmul.bf16.gmra.mxu3 %v7328_v51 }
 0x2b6   : > { %v2445_v44 = vpop.f32.mrf.mxu2  ;;  %v2109_v31 = vpop.f32.mrf.mxu0 }
 0x2b7   : > { %v2446_v46 = vadd.f32 %v2445_v44, %v2277_v28  ;;  %v2278_v10 = vpop.f32.mrf.mxu1 }
 0x2b8   : > { %v2614_v45 = vpop.f32.mrf.mxu3  ;;  %v2279_v14 = vadd.f32 %v2278_v10, %v2109_v31 }
 0x2b9   : > { %v7854_v13 = vadd.f32 %v2614_v45, %v2446_v46 }
 0x2be   : > { %v2447_v33 = vpop.f32.mrf.mxu2  ;;  %v2112_v3 = vpop.f32.mrf.mxu0 }
 0x2bf   : > { %v2448_v12 = vadd.f32 %v2447_v33, %v2279_v14  ;;  %v2281_v27 = vpop.f32.mrf.mxu1 }
 0x2c0   : > { %v2616_v15 = vpop.f32.mrf.mxu3  ;;  %v2282_v24 = vadd.f32 %v2281_v27, %v2112_v3 }
 0x2c1   : > { %v7856_v2 = vadd.f32 %v2616_v15, %v2448_v12  ;;  %2667 = vmatmul.bf16.gmra.mxu0 %v7334_v4 }
 0x2c2   : > { %2836 = vmatmul.bf16.gmra.mxu1 %v7336_v5 }
 0x2c3   : > { %3005 = vmatmul.bf16.gmra.mxu2 %v7338_v6 }
 0x2c5   : > { %3174 = vmatmul.bf16.gmra.mxu3 %v7340_v7 }
 0x2c6   : > { %v2450_v29 = vpop.f32.mrf.mxu2  ;;  %v2114_v44 = vpop.f32.mrf.mxu0 }
 0x2c7   : > { %v2451_v43 = vadd.f32 %v2450_v29, %v2282_v24  ;;  %v2283_v46 = vpop.f32.mrf.mxu1  ;;  %v6463_v24 = vld [vmem:[%s7188_s1 + $0x2a8] sm:$0xf]  ;;  %v6723_v29 = vld [vmem:[%s7188_s1 + $0x2b4] sm:$0xf0] }
 0x2c8   : > { %v2619_v28 = vpop.f32.mrf.mxu3  ;;  %v2284_v31 = vadd.f32 %v2283_v46, %v2114_v44  ;;  %v6465_v44 = vld [vmem:[%s7188_s1 + $0x2b8] sm:$0xf0] }
 0x2c9   : > { %v7862_v45 = vadd.f32 %v2619_v28, %v2451_v43  ;;  %v6721_v43 = vld [vmem:[%s7188_s1 + $0x2ac] sm:$0xf]  ;;  %v6464_v28 = vor.u32 %v6723_v29, %v6463_v24  ;;  %v6455_v29 = vld [vmem:[%s7188_s1 + $0x2a0] sm:$0xf] }
 0x2cb   : > { %9408 = vst [vmem:[#allocation161_spill] sm:$0xff] %v7862_v45  ;;  %3650 = vmatpush.bf16.xpose.msra.mxu2 %v6464_v28  ;;  %v6720_v45 = vld [vmem:[%s7188_s1 + $0x2a4] sm:$0xf] }
 0x2ce   : > { %v2452_v10 = vpop.f32.mrf.mxu2  ;;  %v2117_v12 = vpop.f32.mrf.mxu0 }
 0x2cf   : > { %v2453_v14 = vadd.f32 %v2452_v10, %v2284_v31  ;;  %v2286_v15 = vpop.f32.mrf.mxu1  ;;  %v6468_v31 = vor.u32 %v6721_v43, %v6465_v44  ;;  %v6457_v43 = vld [vmem:[%s7188_s1 + $0x2b0] sm:$0xf0] }
 0x2d0   : > { %v2621_v33 = vpop.f32.mrf.mxu3  ;;  %v2287_v27 = vadd.f32 %v2286_v15, %v2117_v12  ;;  %v6460_v28 = vor.u32 %v6720_v45, %v6457_v43 }
 0x2d1   : > { %v7864_v3 = vadd.f32 %v2621_v33, %v2453_v14  ;;  %2672 = vmatmul.bf16.gmra.mxu0 %v7346_v20  ;;  %3819 = vmatpush.bf16.xpose.msra.mxu3 %v6468_v31  ;;  %v6722_v20 = vld [vmem:[%s7188_s1 + $0x2ac] sm:$0xf0] }
 0x2d2   : > { %2841 = vmatmul.bf16.gmra.mxu1 %v7348_v21  ;;  %v6456_v6 = vor.u32 %v6722_v20, %v6455_v29 }
 0x2d3   : > { %9409 = vst [vmem:[#allocation162_spill] sm:$0xff] %v7864_v3  ;;  %3010 = vmatmul.bf16.gmra.mxu2 %v7350_v22  ;;  %3481 = vmatpush.bf16.xpose.msra.mxu1 %v6460_v28 }
 0x2d4   : > { %3312 = vmatpush.bf16.xpose.msra.mxu0 %v6456_v6 }
 0x2d5   : > { %3179 = vmatmul.bf16.gmra.mxu3 %v7352_v23 }
 0x2d6   : > { %v2455_v46 = vpop.f32.mrf.mxu2  ;;  %v2119_v33 = vpop.f32.mrf.mxu0 }
 0x2d7   : > { %v2456_v10 = vadd.f32 %v2455_v46, %v2287_v27  ;;  %v2288_v12 = vpop.f32.mrf.mxu1 }
 0x2d8   : > { %v2624_v14 = vpop.f32.mrf.mxu3  ;;  %v2289_v23 = vadd.f32 %v2288_v12, %v2119_v33 }
 0x2d9   : > { %v7874_v15 = vadd.f32 %v2624_v14, %v2456_v10 }
 0x2de   : > { %v2457_v22 = vpop.f32.mrf.mxu2  ;;  %v2122_v24 = vpop.f32.mrf.mxu0 }
 0x2df   : > { %v2458_v21 = vadd.f32 %v2457_v22, %v2289_v23  ;;  %v2291_v7 = vpop.f32.mrf.mxu1 }
 0x2e0   : > { %v2626_v3 = vpop.f32.mrf.mxu3  ;;  %v2292_v44 = vadd.f32 %v2291_v7, %v2122_v24  ;;  %v5433_v24 = vld [vmem:[%s7894_s10] sm:$0xf] }
 0x2e1   : > { %v7880_v27 = vadd.f32 %v2626_v3, %v2458_v21  ;;  %2677 = vmatmul.bf16.gmra.mxu0 %v7366_v56  ;;  %v7898_v43 = vperm.slane %v5433_v24, 0 }
 0x2e2   : > { %2846 = vmatmul.bf16.gmra.mxu1 %v7368_v57 }
 0x2e3   : > { %3015 = vmatmul.bf16.gmra.mxu2 %v7370_v58 }
 0x2e5   : > { %3184 = vmatmul.bf16.gmra.mxu3 %v7372_v59 }
 0x2e6   : > { %v2460_v22 = vpop.f32.mrf.mxu2  ;;  %v2124_v20 = vpop.f32.mrf.mxu0 }
 0x2e7   : > { %v2461_v23 = vadd.f32 %v2460_v22, %v2292_v44  ;;  %v2293_v31 = vpop.f32.mrf.mxu1  ;;  %v7900_v22 = vperm.slane %v5433_v24, 1 }
 0x2e8   : > { %v2629_v46 = vpop.f32.mrf.mxu3  ;;  %v2294_v3 = vadd.f32 %v2293_v31, %v2124_v20  ;;  %v5443_v31 = vadd.f32 %v7898_v43, %v7390_v32  ;;  %v5447_v32 = vadd.f32 %v7898_v43, %v7400_v11 }
 0x2e9   : > { %v7886_v21 = vadd.f32 %v2629_v46, %v2461_v23 }
 0x2ee   : > { %v2462_v7 = vpop.f32.mrf.mxu2  ;;  %v2643_v14 = vpop.f32.mrf.mxu0 }
 0x2ef   : > { %v2463_v45 = vadd.f32 %v2462_v7, %v2294_v3  ;;  %v2812_v33 = vpop.f32.mrf.mxu1 }
 0x2f0   : > { %v2631_v10 = vpop.f32.mrf.mxu3  ;;  %v2813_v6 = vadd.f32 %v2812_v33, %v2643_v14 }
 0x2f1   : > { %v7889_v12 = vadd.f32 %v2631_v10, %v2463_v45  ;;  %2682 = vmatmul.bf16.gmra.mxu0 %v7378_v16 }
 0x2f2   : > { %2851 = vmatmul.bf16.gmra.mxu1 %v7380_v18 }
 0x2f3   : > { %3020 = vmatmul.bf16.gmra.mxu2 %v7382_v19 }
 0x2f5   : > { %3189 = vmatmul.bf16.gmra.mxu3 %v7384_v25  ;;  %v6718_v25 = vld [vmem:[%s7188_s1 + $0x28c] sm:$0xf0] }
 0x2f6   : > { %v2981_v29 = vpop.f32.mrf.mxu2  ;;  %v2645_v23 = vpop.f32.mrf.mxu0 }
 0x2f7   : > { %v2982_v44 = vadd.f32 %v2981_v29, %v2813_v6  ;;  %v2814_v46 = vpop.f32.mrf.mxu1 }
 0x2f8   : > { %v3150_v28 = vpop.f32.mrf.mxu3  ;;  %v2815_v45 = vadd.f32 %v2814_v46, %v2645_v23  ;;  %v9410_v23 = vld [vmem:[#allocation29_spill] sm:$0xff]  ;;  %v9411_v46 = vld [vmem:[#allocation30_spill] sm:$0xff] }
 0x2f9   : > { %v3151_v20 = vadd.f32 %v3150_v28, %v2982_v44 }
 0x2fb   : > { %v5444_v3 = vadd.f32 %v7900_v22, %v3151_v20 }
 0x2fd   : > { %v5699_v7 = vpack.c.bf16 %v5444_v3, %v5443_v31 }
 0x2fe   : > { %v2983_v10 = vpop.f32.mrf.mxu2  ;;  %v2648_v6 = vpop.f32.mrf.mxu0 }
 0x2ff   : > { %5827 = vst [vmem:[%s7907_s19] sm:$0xff] %v5699_v7  ;;  %v2984_v14 = vadd.f32 %v2983_v10, %v2815_v45  ;;  %v2817_v24 = vpop.f32.mrf.mxu1 }
 0x300   : > { %v3152_v33 = vpop.f32.mrf.mxu3  ;;  %v2818_v28 = vadd.f32 %v2817_v24, %v2648_v6 }
 0x301   : > { %v3153_v29 = vadd.f32 %v3152_v33, %v2984_v14  ;;  %2687 = vmatmul.bf16.gmra.mxu0 %v7392_v47  ;;  %v9412_v33 = vld [vmem:[#allocation31_spill] sm:$0xff]  ;;  %v6439_v47 = vld [vmem:[%s7188_s1 + $0x280] sm:$0xf] }
 0x302   : > { %2856 = vmatmul.bf16.gmra.mxu1 %v7394_v63  ;;  %v5451_v11 = vadd.f32 %v7898_v43, %v9412_v33 }
 0x303   : > { %v5448_v44 = vadd.f32 %v7900_v22, %v3153_v29  ;;  %3025 = vmatmul.bf16.gmra.mxu2 %v9410_v23 }
 0x305   : > { %3194 = vmatmul.bf16.gmra.mxu3 %v9411_v46  ;;  %v5701_v20 = vpack.c.bf16 %v5448_v44, %v5447_v32 }
 0x306   : > { %v2986_v31 = vpop.f32.mrf.mxu2  ;;  %v2650_v45 = vpop.f32.mrf.mxu0 }
 0x307   : > { %5829 = vst [vmem:[%s7907_s19 + $0x10] sm:$0xff] %v5701_v20  ;;  %v2987_v3 = vadd.f32 %v2986_v31, %v2818_v28  ;;  %v2819_v10 = vpop.f32.mrf.mxu1  ;;  %v9413_v20 = vld [vmem:[#allocation32_spill] sm:$0xff] }
 0x308   : > { %v3155_v7 = vpop.f32.mrf.mxu3  ;;  %v2820_v29 = vadd.f32 %v2819_v10, %v2650_v45  ;;  %v9414_v31 = vld [vmem:[#allocation36_spill] sm:$0xff]  ;;  %v9415_v10 = vld [vmem:[#allocation33_spill] sm:$0xff] }
 0x309   : > { %v3156_v14 = vadd.f32 %v3155_v7, %v2987_v3  ;;  %v5455_v3 = vadd.f32 %v7898_v43, %v9414_v31 }
 0x30b   : > { %v5452_v6 = vadd.f32 %v7900_v22, %v3156_v14  ;;  %v9416_v14 = vld [vmem:[#allocation34_spill] sm:$0xff] }
 0x30d   : > { %v5703_v24 = vpack.c.bf16 %v5452_v6, %v5451_v11 }
 0x30e   : > { %v2988_v63 = vpop.f32.mrf.mxu2  ;;  %v2653_v32 = vpop.f32.mrf.mxu0 }
 0x30f   : > { %5831 = vst [vmem:[%s7907_s19 + $0x20] sm:$0xff] %v5703_v24  ;;  %v2989_v23 = vadd.f32 %v2988_v63, %v2820_v29  ;;  %v2822_v44 = vpop.f32.mrf.mxu1  ;;  %v9417_v63 = vld [vmem:[#allocation35_spill] sm:$0xff]  ;;  %v6447_v24 = vld [vmem:[%s7188_s1 + $0x288] sm:$0xf] }
 0x310   : > { %v3157_v46 = vpop.f32.mrf.mxu3  ;;  %v2823_v45 = vadd.f32 %v2822_v44, %v2653_v32  ;;  %v6719_v29 = vld [vmem:[%s7188_s1 + $0x294] sm:$0xf0]  ;;  %v6449_v32 = vld [vmem:[%s7188_s1 + $0x298] sm:$0xf0] }
 0x311   : > { %v3158_v28 = vadd.f32 %v3157_v46, %v2989_v23  ;;  %2692 = vmatmul.bf16.gmra.mxu0 %v9413_v20  ;;  %v6448_v20 = vor.u32 %v6719_v29, %v6447_v24 }
 0x312   : > { %2861 = vmatmul.bf16.gmra.mxu1 %v9415_v10 }
 0x313   : > { %v5456_v7 = vadd.f32 %v7900_v22, %v3158_v28  ;;  %3030 = vmatmul.bf16.gmra.mxu2 %v9416_v14  ;;  %v6717_v28 = vld [vmem:[%s7188_s1 + $0x28c] sm:$0xf] }
 0x314   : > { %v6452_v10 = vor.u32 %v6717_v28, %v6449_v32  ;;  %3651 = vmatpush.bf16.xpose.msra.mxu2 %v6448_v20  ;;  %v6716_v20 = vld [vmem:[%s7188_s1 + $0x284] sm:$0xf]  ;;  %v6441_v28 = vld [vmem:[%s7188_s1 + $0x290] sm:$0xf0] }
 0x315   : > { %3199 = vmatmul.bf16.gmra.mxu3 %v9417_v63  ;;  %v5705_v33 = vpack.c.bf16 %v5456_v7, %v5455_v3  ;;  %v9418_v63 = vld [vmem:[#allocation37_spill] sm:$0xff]  ;;  %v6444_v19 = vor.u32 %v6716_v20, %v6441_v28  ;;  %v9424_v28 = vld [vmem:[#allocation43_spill] sm:$0xff] }
 0x316   : > { %v2991_v11 = vpop.f32.mrf.mxu2  ;;  %v2655_v6 = vpop.f32.mrf.mxu0  ;;  %v5459_v3 = vadd.f32 %v7898_v43, %v9418_v63  ;;  %3820 = vmatpush.bf16.xpose.msra.mxu3 %v6452_v10  ;;  %v9419_v63 = vld [vmem:[#allocation38_spill] sm:$0xff] }
 0x317   : > { %5833 = vst [vmem:[%s7907_s19 + $0x30] sm:$0xff] %v5705_v33  ;;  %v2992_v23 = vadd.f32 %v2991_v11, %v2823_v45  ;;  %v2824_v31 = vpop.f32.mrf.mxu1  ;;  %3482 = vmatpush.bf16.xpose.msra.mxu1 %v6444_v19 }
 0x318   : > { %v3160_v46 = vpop.f32.mrf.mxu3  ;;  %v2825_v33 = vadd.f32 %v2824_v31, %v2655_v6 }
 0x319   : > { %v3161_v44 = vadd.f32 %v3160_v46, %v2992_v23  ;;  %v6440_v46 = vor.u32 %v6718_v25, %v6439_v47 }
 0x31b   : > { %v5460_v7 = vadd.f32 %v7900_v22, %v3161_v44  ;;  %v9420_v44 = vld [vmem:[#allocation42_spill] sm:$0xff]  ;;  %3313 = vmatpush.bf16.xpose.msra.mxu0 %v6440_v46 }
 0x31c   : > { %v5463_v10 = vadd.f32 %v7898_v43, %v9420_v44 }
 0x31d   : > { %v5707_v45 = vpack.c.bf16 %v5460_v7, %v5459_v3  ;;  %v9421_v3 = vld [vmem:[#allocation39_spill] sm:$0xff]  ;;  %v9422_v7 = vld [vmem:[#allocation40_spill] sm:$0xff] }
 0x31e   : > { %v2993_v11 = vpop.f32.mrf.mxu2  ;;  %v2658_v14 = vpop.f32.mrf.mxu0 }
 0x31f   : > { %5835 = vst [vmem:[%s7907_s19 + $0x40] sm:$0xff] %v5707_v45  ;;  %v2994_v24 = vadd.f32 %v2993_v11, %v2825_v33  ;;  %v2827_v23 = vpop.f32.mrf.mxu1  ;;  %v9423_v45 = vld [vmem:[#allocation41_spill] sm:$0xff] }
 0x320   : > { %v3162_v29 = vpop.f32.mrf.mxu3  ;;  %v2828_v31 = vadd.f32 %v2827_v23, %v2658_v14  ;;  %v5467_v14 = vadd.f32 %v7898_v43, %v9424_v28 }
 0x321   : > { %v3163_v32 = vadd.f32 %v3162_v29, %v2994_v24  ;;  %2697 = vmatmul.bf16.gmra.mxu0 %v9419_v63 }
 0x322   : > { %2866 = vmatmul.bf16.gmra.mxu1 %v9421_v3  ;;  %v6714_v3 = vld [vmem:[%s7188_s1 + $0x26c] sm:$0xf0] }
 0x323   : > { %v5464_v6 = vadd.f32 %v7900_v22, %v3163_v32  ;;  %3035 = vmatmul.bf16.gmra.mxu2 %v9422_v7 }
 0x325   : > { %3204 = vmatmul.bf16.gmra.mxu3 %v9423_v45  ;;  %v5709_v25 = vpack.c.bf16 %v5464_v6, %v5463_v10  ;;  %v9427_v45 = vld [vmem:[#allocation45_spill] sm:$0xff] }
 0x326   : > { %v2996_v47 = vpop.f32.mrf.mxu2  ;;  %v2660_v24 = vpop.f32.mrf.mxu0 }
 0x327   : > { %5837 = vst [vmem:[%s7907_s19 + $0x50] sm:$0xff] %v5709_v25  ;;  %v2997_v33 = vadd.f32 %v2996_v47, %v2828_v31  ;;  %v2829_v29 = vpop.f32.mrf.mxu1  ;;  %v9425_v31 = vld [vmem:[#allocation44_spill] sm:$0xff] }
 0x328   : > { %v3165_v11 = vpop.f32.mrf.mxu3  ;;  %v2830_v44 = vadd.f32 %v2829_v29, %v2660_v24  ;;  %v9426_v47 = vld [vmem:[#allocation48_spill] sm:$0xff]  ;;  %v9429_v24 = vld [vmem:[#allocation47_spill] sm:$0xff] }
 0x329   : > { %v3166_v20 = vadd.f32 %v3165_v11, %v2997_v33  ;;  %v5471_v33 = vadd.f32 %v7898_v43, %v9426_v47 }
 0x32b   : > { %v5468_v23 = vadd.f32 %v7900_v22, %v3166_v20  ;;  %v9428_v20 = vld [vmem:[#allocation46_spill] sm:$0xff] }
 0x32d   : > { %v5711_v32 = vpack.c.bf16 %v5468_v23, %v5467_v14 }
 0x32e   : > { %v2998_v7 = vpop.f32.mrf.mxu2  ;;  %v2663_v19 = vpop.f32.mrf.mxu0 }
 0x32f   : > { %5839 = vst [vmem:[%s7907_s19 + $0x60] sm:$0xff] %v5711_v32  ;;  %v2999_v46 = vadd.f32 %v2998_v7, %v2830_v44  ;;  %v2832_v6 = vpop.f32.mrf.mxu1 }
 0x330   : > { %v3167_v10 = vpop.f32.mrf.mxu3  ;;  %v2833_v28 = vadd.f32 %v2832_v6, %v2663_v19 }
 0x331   : > { %v3168_v25 = vadd.f32 %v3167_v10, %v2999_v46  ;;  %2702 = vmatmul.bf16.gmra.mxu0 %v9425_v31  ;;  %v9430_v10 = vld [vmem:[#allocation49_spill] sm:$0xff]  ;;  %v9433_v31 = vld [vmem:[#allocation51_spill] sm:$0xff] }
 0x332   : > { %2871 = vmatmul.bf16.gmra.mxu1 %v9427_v45  ;;  %v5475_v47 = vadd.f32 %v7898_v43, %v9430_v10 }
 0x333   : > { %v5472_v11 = vadd.f32 %v7900_v22, %v3168_v25  ;;  %3040 = vmatmul.bf16.gmra.mxu2 %v9428_v20 }
 0x335   : > { %3209 = vmatmul.bf16.gmra.mxu3 %v9429_v24  ;;  %v5713_v7 = vpack.c.bf16 %v5472_v11, %v5471_v33 }
 0x336   : > { %v3001_v29 = vpop.f32.mrf.mxu2  ;;  %v2665_v32 = vpop.f32.mrf.mxu0 }
 0x337   : > { %5841 = vst [vmem:[%s7907_s19 + $0x70] sm:$0xff] %v5713_v7  ;;  %v3002_v14 = vadd.f32 %v3001_v29, %v2833_v28  ;;  %v2834_v44 = vpop.f32.mrf.mxu1  ;;  %v9431_v28 = vld [vmem:[#allocation50_spill] sm:$0xff] }
 0x338   : > { %v3170_v23 = vpop.f32.mrf.mxu3  ;;  %v2835_v25 = vadd.f32 %v2834_v44, %v2665_v32  ;;  %v9432_v29 = vld [vmem:[#allocation54_spill] sm:$0xff]  ;;  %v9435_v32 = vld [vmem:[#allocation53_spill] sm:$0xff] }
 0x339   : > { %v3171_v46 = vadd.f32 %v3170_v23, %v3002_v14  ;;  %v5479_v14 = vadd.f32 %v7898_v43, %v9432_v29 }
 0x33b   : > { %v5476_v19 = vadd.f32 %v7900_v22, %v3171_v46  ;;  %v9434_v46 = vld [vmem:[#allocation52_spill] sm:$0xff] }
 0x33d   : > { %v5715_v6 = vpack.c.bf16 %v5476_v19, %v5475_v47 }
 0x33e   : > { %v3003_v45 = vpop.f32.mrf.mxu2  ;;  %v2668_v33 = vpop.f32.mrf.mxu0 }
 0x33f   : > { %5843 = vst [vmem:[%s7907_s19 + $0x80] sm:$0xff] %v5715_v6  ;;  %v3004_v20 = vadd.f32 %v3003_v45, %v2835_v25  ;;  %v2837_v11 = vpop.f32.mrf.mxu1  ;;  %v9436_v25 = vld [vmem:[#allocation55_spill] sm:$0xff] }
 0x340   : > { %v3172_v24 = vpop.f32.mrf.mxu3  ;;  %v2838_v10 = vadd.f32 %v2837_v11, %v2668_v33  ;;  %v5483_v29 = vadd.f32 %v7898_v43, %v9436_v25 }
 0x341   : > { %v3173_v7 = vadd.f32 %v3172_v24, %v3004_v20  ;;  %2707 = vmatmul.bf16.gmra.mxu0 %v9431_v28  ;;  %v6423_v28 = vld [vmem:[%s7188_s1 + $0x260] sm:$0xf] }
 0x342   : > { %2876 = vmatmul.bf16.gmra.mxu1 %v9433_v31 }
 0x343   : > { %v5480_v23 = vadd.f32 %v7900_v22, %v3173_v7  ;;  %3045 = vmatmul.bf16.gmra.mxu2 %v9434_v46 }
 0x345   : > { %3214 = vmatmul.bf16.gmra.mxu3 %v9435_v32  ;;  %v5717_v45 = vpack.c.bf16 %v5480_v23, %v5479_v14 }
 0x346   : > { %v3006_v44 = vpop.f32.mrf.mxu2  ;;  %v2670_v24 = vpop.f32.mrf.mxu0 }
 0x347   : > { %5845 = vst [vmem:[%s7907_s19 + $0x90] sm:$0xff] %v5717_v45  ;;  %v3007_v47 = vadd.f32 %v3006_v44, %v2838_v10  ;;  %v2839_v19 = vpop.f32.mrf.mxu1  ;;  %v9437_v45 = vld [vmem:[#allocation56_spill] sm:$0xff] }
 0x348   : > { %v3175_v20 = vpop.f32.mrf.mxu3  ;;  %v2840_v7 = vadd.f32 %v2839_v19, %v2670_v24  ;;  %v9438_v44 = vld [vmem:[#allocation60_spill] sm:$0xff]  ;;  %v9439_v19 = vld [vmem:[#allocation57_spill] sm:$0xff] }
 0x349   : > { %v3176_v6 = vadd.f32 %v3175_v20, %v3007_v47  ;;  %v5487_v47 = vadd.f32 %v7898_v43, %v9438_v44 }
 0x34b   : > { %v5484_v33 = vadd.f32 %v7900_v22, %v3176_v6  ;;  %v9440_v6 = vld [vmem:[#allocation58_spill] sm:$0xff] }
 0x34d   : > { %v5719_v11 = vpack.c.bf16 %v5484_v33, %v5483_v29 }
 0x34e   : > { %v3008_v31 = vpop.f32.mrf.mxu2  ;;  %v2673_v14 = vpop.f32.mrf.mxu0 }
 0x34f   : > { %5847 = vst [vmem:[%s7907_s19 + $0xa0] sm:$0xff] %v5719_v11  ;;  %v3009_v46 = vadd.f32 %v3008_v31, %v2840_v7  ;;  %v2842_v23 = vpop.f32.mrf.mxu1  ;;  %v9441_v31 = vld [vmem:[#allocation59_spill] sm:$0xff]  ;;  %v6431_v11 = vld [vmem:[%s7188_s1 + $0x268] sm:$0xf] }
 0x350   : > { %v3177_v32 = vpop.f32.mrf.mxu3  ;;  %v2843_v24 = vadd.f32 %v2842_v23, %v2673_v14  ;;  %v6715_v7 = vld [vmem:[%s7188_s1 + $0x274] sm:$0xf0]  ;;  %v6433_v14 = vld [vmem:[%s7188_s1 + $0x278] sm:$0xf0] }
 0x351   : > { %v3178_v10 = vadd.f32 %v3177_v32, %v3009_v46  ;;  %2712 = vmatmul.bf16.gmra.mxu0 %v9437_v45  ;;  %v6432_v45 = vor.u32 %v6715_v7, %v6431_v11 }
 0x352   : > { %2881 = vmatmul.bf16.gmra.mxu1 %v9439_v19 }
 0x353   : > { %v5488_v20 = vadd.f32 %v7900_v22, %v3178_v10  ;;  %3050 = vmatmul.bf16.gmra.mxu2 %v9440_v6  ;;  %v6713_v10 = vld [vmem:[%s7188_s1 + $0x26c] sm:$0xf] }
 0x354   : > { %v6436_v19 = vor.u32 %v6713_v10, %v6433_v14  ;;  %3652 = vmatpush.bf16.xpose.msra.mxu2 %v6432_v45  ;;  %v6712_v45 = vld [vmem:[%s7188_s1 + $0x264] sm:$0xf]  ;;  %v6425_v10 = vld [vmem:[%s7188_s1 + $0x270] sm:$0xf0] }
 0x355   : > { %3219 = vmatmul.bf16.gmra.mxu3 %v9441_v31  ;;  %v5721_v25 = vpack.c.bf16 %v5488_v20, %v5487_v47  ;;  %v9442_v31 = vld [vmem:[#allocation61_spill] sm:$0xff]  ;;  %v6428_v63 = vor.u32 %v6712_v45, %v6425_v10  ;;  %v9448_v10 = vld [vmem:[#allocation67_spill] sm:$0xff] }
 0x356   : > { %v3011_v29 = vpop.f32.mrf.mxu2  ;;  %v2675_v33 = vpop.f32.mrf.mxu0  ;;  %v5491_v47 = vadd.f32 %v7898_v43, %v9442_v31  ;;  %3821 = vmatpush.bf16.xpose.msra.mxu3 %v6436_v19  ;;  %v9443_v31 = vld [vmem:[#allocation62_spill] sm:$0xff] }
 0x357   : > { %5849 = vst [vmem:[%s7907_s19 + $0xb0] sm:$0xff] %v5721_v25  ;;  %v3012_v46 = vadd.f32 %v3011_v29, %v2843_v24  ;;  %v2844_v44 = vpop.f32.mrf.mxu1  ;;  %3483 = vmatpush.bf16.xpose.msra.mxu1 %v6428_v63 }
 0x358   : > { %v3180_v32 = vpop.f32.mrf.mxu3  ;;  %v2845_v25 = vadd.f32 %v2844_v44, %v2675_v33 }
 0x359   : > { %v3181_v23 = vadd.f32 %v3180_v32, %v3012_v46  ;;  %v6424_v32 = vor.u32 %v6714_v3, %v6423_v28 }
 0x35b   : > { %v5492_v20 = vadd.f32 %v7900_v22, %v3181_v23  ;;  %v9444_v23 = vld [vmem:[#allocation66_spill] sm:$0xff]  ;;  %3314 = vmatpush.bf16.xpose.msra.mxu0 %v6424_v32 }
 0x35c   : > { %v5495_v19 = vadd.f32 %v7898_v43, %v9444_v23 }
 0x35d   : > { %v5723_v24 = vpack.c.bf16 %v5492_v20, %v5491_v47  ;;  %v9445_v47 = vld [vmem:[#allocation63_spill] sm:$0xff]  ;;  %v9446_v20 = vld [vmem:[#allocation64_spill] sm:$0xff] }
 0x35e   : > { %v3013_v29 = vpop.f32.mrf.mxu2  ;;  %v2678_v6 = vpop.f32.mrf.mxu0 }
 0x35f   : > { %5851 = vst [vmem:[%s7907_s19 + $0xc0] sm:$0xff] %v5723_v24  ;;  %v3014_v11 = vadd.f32 %v3013_v29, %v2845_v25  ;;  %v2847_v46 = vpop.f32.mrf.mxu1  ;;  %v9447_v24 = vld [vmem:[#allocation65_spill] sm:$0xff] }
 0x360   : > { %v3182_v7 = vpop.f32.mrf.mxu3  ;;  %v2848_v44 = vadd.f32 %v2847_v46, %v2678_v6  ;;  %v5499_v6 = vadd.f32 %v7898_v43, %v9448_v10 }
 0x361   : > { %v3183_v14 = vadd.f32 %v3182_v7, %v3014_v11  ;;  %2717 = vmatmul.bf16.gmra.mxu0 %v9443_v31 }
 0x362   : > { %2886 = vmatmul.bf16.gmra.mxu1 %v9445_v47  ;;  %v6710_v47 = vld [vmem:[%s7188_s1 + $0x24c] sm:$0xf0] }
 0x363   : > { %v5496_v33 = vadd.f32 %v7900_v22, %v3183_v14  ;;  %3055 = vmatmul.bf16.gmra.mxu2 %v9446_v20 }
 0x365   : > { %3224 = vmatmul.bf16.gmra.mxu3 %v9447_v24  ;;  %v5725_v3 = vpack.c.bf16 %v5496_v33, %v5495_v19  ;;  %v9451_v24 = vld [vmem:[#allocation69_spill] sm:$0xff] }
 0x366   : > { %v3016_v28 = vpop.f32.mrf.mxu2  ;;  %v2680_v11 = vpop.f32.mrf.mxu0 }
 0x367   : > { %5853 = vst [vmem:[%s7907_s19 + $0xd0] sm:$0xff] %v5725_v3  ;;  %v3017_v25 = vadd.f32 %v3016_v28, %v2848_v44  ;;  %v2849_v7 = vpop.f32.mrf.mxu1  ;;  %v9449_v44 = vld [vmem:[#allocation68_spill] sm:$0xff] }
 0x368   : > { %v3185_v29 = vpop.f32.mrf.mxu3  ;;  %v2850_v23 = vadd.f32 %v2849_v7, %v2680_v11  ;;  %v9450_v28 = vld [vmem:[#allocation72_spill] sm:$0xff]  ;;  %v9453_v11 = vld [vmem:[#allocation71_spill] sm:$0xff] }
 0x369   : > { %v3186_v45 = vadd.f32 %v3185_v29, %v3017_v25  ;;  %v5503_v25 = vadd.f32 %v7898_v43, %v9450_v28 }
 0x36b   : > { %v5500_v46 = vadd.f32 %v7900_v22, %v3186_v45  ;;  %v9452_v45 = vld [vmem:[#allocation70_spill] sm:$0xff] }
 0x36d   : > { %v5727_v14 = vpack.c.bf16 %v5500_v46, %v5499_v6 }
 0x36e   : > { %v3018_v20 = vpop.f32.mrf.mxu2  ;;  %v2683_v63 = vpop.f32.mrf.mxu0 }
 0x36f   : > { %5855 = vst [vmem:[%s7907_s19 + $0xe0] sm:$0xff] %v5727_v14  ;;  %v3019_v32 = vadd.f32 %v3018_v20, %v2850_v23  ;;  %v2852_v33 = vpop.f32.mrf.mxu1 }
 0x370   : > { %v3187_v19 = vpop.f32.mrf.mxu3  ;;  %v2853_v10 = vadd.f32 %v2852_v33, %v2683_v63 }
 0x371   : > { %v3188_v3 = vadd.f32 %v3187_v19, %v3019_v32  ;;  %2722 = vmatmul.bf16.gmra.mxu0 %v9449_v44  ;;  %v9454_v19 = vld [vmem:[#allocation73_spill] sm:$0xff]  ;;  %v9457_v44 = vld [vmem:[#allocation75_spill] sm:$0xff] }
 0x372   : > { %2891 = vmatmul.bf16.gmra.mxu1 %v9451_v24  ;;  %v5507_v28 = vadd.f32 %v7898_v43, %v9454_v19 }
 0x373   : > { %v5504_v29 = vadd.f32 %v7900_v22, %v3188_v3  ;;  %3060 = vmatmul.bf16.gmra.mxu2 %v9452_v45 }
 0x375   : > { %3229 = vmatmul.bf16.gmra.mxu3 %v9453_v11  ;;  %v5729_v20 = vpack.c.bf16 %v5504_v29, %v5503_v25 }
 0x376   : > { %v3021_v7 = vpop.f32.mrf.mxu2  ;;  %v2685_v14 = vpop.f32.mrf.mxu0 }
 0x377   : > { %5857 = vst [vmem:[%s7907_s19 + $0xf0] sm:$0xff] %v5729_v20  ;;  %v3022_v6 = vadd.f32 %v3021_v7, %v2853_v10  ;;  %v2854_v23 = vpop.f32.mrf.mxu1  ;;  %v9455_v10 = vld [vmem:[#allocation74_spill] sm:$0xff] }
 0x378   : > { %v3190_v46 = vpop.f32.mrf.mxu3  ;;  %v2855_v3 = vadd.f32 %v2854_v23, %v2685_v14  ;;  %v9456_v7 = vld [vmem:[#allocation78_spill] sm:$0xff]  ;;  %v9459_v14 = vld [vmem:[#allocation77_spill] sm:$0xff] }
 0x379   : > { %v3191_v32 = vadd.f32 %v3190_v46, %v3022_v6  ;;  %v5511_v6 = vadd.f32 %v7898_v43, %v9456_v7 }
 0x37b   : > { %v5508_v63 = vadd.f32 %v7900_v22, %v3191_v32  ;;  %v9458_v32 = vld [vmem:[#allocation76_spill] sm:$0xff] }
 0x37d   : > { %v5731_v33 = vpack.c.bf16 %v5508_v63, %v5507_v28 }
 0x37e   : > { %v3023_v24 = vpop.f32.mrf.mxu2  ;;  %v2688_v25 = vpop.f32.mrf.mxu0 }
 0x37f   : > { %5859 = vst [vmem:[%s7907_s19 + $0x100] sm:$0xff] %v5731_v33  ;;  %v3024_v45 = vadd.f32 %v3023_v24, %v2855_v3  ;;  %v2857_v29 = vpop.f32.mrf.mxu1  ;;  %v9460_v3 = vld [vmem:[#allocation79_spill] sm:$0xff] }
 0x380   : > { %v3192_v11 = vpop.f32.mrf.mxu3  ;;  %v2858_v19 = vadd.f32 %v2857_v29, %v2688_v25  ;;  %v5515_v7 = vadd.f32 %v7898_v43, %v9460_v3 }
 0x381   : > { %v3193_v20 = vadd.f32 %v3192_v11, %v3024_v45  ;;  %2727 = vmatmul.bf16.gmra.mxu0 %v9455_v10  ;;  %v6407_v10 = vld [vmem:[%s7188_s1 + $0x240] sm:$0xf] }
 0x382   : > { %2896 = vmatmul.bf16.gmra.mxu1 %v9457_v44 }
 0x383   : > { %v5512_v46 = vadd.f32 %v7900_v22, %v3193_v20  ;;  %3065 = vmatmul.bf16.gmra.mxu2 %v9458_v32 }
 0x385   : > { %3234 = vmatmul.bf16.gmra.mxu3 %v9459_v14  ;;  %v5733_v24 = vpack.c.bf16 %v5512_v46, %v5511_v6 }
 0x386   : > { %v3026_v23 = vpop.f32.mrf.mxu2  ;;  %v2690_v11 = vpop.f32.mrf.mxu0 }
 0x387   : > { %5861 = vst [vmem:[%s7907_s19 + $0x110] sm:$0xff] %v5733_v24  ;;  %v3027_v28 = vadd.f32 %v3026_v23, %v2858_v19  ;;  %v2859_v63 = vpop.f32.mrf.mxu1  ;;  %v9461_v24 = vld [vmem:[#allocation80_spill] sm:$0xff] }
 0x388   : > { %v3195_v45 = vpop.f32.mrf.mxu3  ;;  %v2860_v20 = vadd.f32 %v2859_v63, %v2690_v11  ;;  %v9462_v23 = vld [vmem:[#allocation84_spill] sm:$0xff]  ;;  %v9463_v63 = vld [vmem:[#allocation81_spill] sm:$0xff] }
 0x389   : > { %v3196_v33 = vadd.f32 %v3195_v45, %v3027_v28  ;;  %v5519_v28 = vadd.f32 %v7898_v43, %v9462_v23 }
 0x38b   : > { %v5516_v25 = vadd.f32 %v7900_v22, %v3196_v33  ;;  %v9464_v33 = vld [vmem:[#allocation82_spill] sm:$0xff] }
 0x38d   : > { %v5735_v29 = vpack.c.bf16 %v5516_v25, %v5515_v7 }
 0x38e   : > { %v3028_v44 = vpop.f32.mrf.mxu2  ;;  %v2693_v6 = vpop.f32.mrf.mxu0 }
 0x38f   : > { %5863 = vst [vmem:[%s7907_s19 + $0x120] sm:$0xff] %v5735_v29  ;;  %v3029_v32 = vadd.f32 %v3028_v44, %v2860_v20  ;;  %v2862_v46 = vpop.f32.mrf.mxu1  ;;  %v9465_v44 = vld [vmem:[#allocation83_spill] sm:$0xff]  ;;  %v6415_v29 = vld [vmem:[%s7188_s1 + $0x248] sm:$0xf] }
 0x390   : > { %v3197_v14 = vpop.f32.mrf.mxu3  ;;  %v2863_v11 = vadd.f32 %v2862_v46, %v2693_v6  ;;  %v6711_v20 = vld [vmem:[%s7188_s1 + $0x254] sm:$0xf0]  ;;  %v6417_v6 = vld [vmem:[%s7188_s1 + $0x258] sm:$0xf0] }
 0x391   : > { %v3198_v19 = vadd.f32 %v3197_v14, %v3029_v32  ;;  %2732 = vmatmul.bf16.gmra.mxu0 %v9461_v24  ;;  %v6416_v24 = vor.u32 %v6711_v20, %v6415_v29 }
 0x392   : > { %2901 = vmatmul.bf16.gmra.mxu1 %v9463_v63 }
 0x393   : > { %v5520_v45 = vadd.f32 %v7900_v22, %v3198_v19  ;;  %3070 = vmatmul.bf16.gmra.mxu2 %v9464_v33  ;;  %v6709_v19 = vld [vmem:[%s7188_s1 + $0x24c] sm:$0xf] }
 0x394   : > { %v6420_v63 = vor.u32 %v6709_v19, %v6417_v6  ;;  %3653 = vmatpush.bf16.xpose.msra.mxu2 %v6416_v24  ;;  %v6708_v24 = vld [vmem:[%s7188_s1 + $0x244] sm:$0xf]  ;;  %v6409_v19 = vld [vmem:[%s7188_s1 + $0x250] sm:$0xf0] }
 0x395   : > { %3239 = vmatmul.bf16.gmra.mxu3 %v9465_v44  ;;  %v5737_v3 = vpack.c.bf16 %v5520_v45, %v5519_v28  ;;  %v9466_v44 = vld [vmem:[#allocation85_spill] sm:$0xff]  ;;  %v6412_v31 = vor.u32 %v6708_v24, %v6409_v19  ;;  %v9472_v19 = vld [vmem:[#allocation91_spill] sm:$0xff] }
 0x396   : > { %v3031_v7 = vpop.f32.mrf.mxu2  ;;  %v2695_v25 = vpop.f32.mrf.mxu0  ;;  %v5523_v28 = vadd.f32 %v7898_v43, %v9466_v44  ;;  %3822 = vmatpush.bf16.xpose.msra.mxu3 %v6420_v63  ;;  %v9467_v44 = vld [vmem:[#allocation86_spill] sm:$0xff] }
 0x397   : > { %5865 = vst [vmem:[%s7907_s19 + $0x130] sm:$0xff] %v5737_v3  ;;  %v3032_v32 = vadd.f32 %v3031_v7, %v2863_v11  ;;  %v2864_v23 = vpop.f32.mrf.mxu1  ;;  %3484 = vmatpush.bf16.xpose.msra.mxu1 %v6412_v31 }
 0x398   : > { %v3200_v14 = vpop.f32.mrf.mxu3  ;;  %v2865_v3 = vadd.f32 %v2864_v23, %v2695_v25 }
 0x399   : > { %v3201_v46 = vadd.f32 %v3200_v14, %v3032_v32  ;;  %v6408_v14 = vor.u32 %v6710_v47, %v6407_v10 }
 0x39b   : > { %v5524_v45 = vadd.f32 %v7900_v22, %v3201_v46  ;;  %v9468_v46 = vld [vmem:[#allocation90_spill] sm:$0xff]  ;;  %3315 = vmatpush.bf16.xpose.msra.mxu0 %v6408_v14 }
 0x39c   : > { %v5527_v63 = vadd.f32 %v7898_v43, %v9468_v46 }
 0x39d   : > { %v5739_v11 = vpack.c.bf16 %v5524_v45, %v5523_v28  ;;  %v9469_v28 = vld [vmem:[#allocation87_spill] sm:$0xff]  ;;  %v9470_v45 = vld [vmem:[#allocation88_spill] sm:$0xff] }
 0x39e   : > { %v3033_v7 = vpop.f32.mrf.mxu2  ;;  %v2698_v33 = vpop.f32.mrf.mxu0 }
 0x39f   : > { %5867 = vst [vmem:[%s7907_s19 + $0x140] sm:$0xff] %v5739_v11  ;;  %v3034_v29 = vadd.f32 %v3033_v7, %v2865_v3  ;;  %v2867_v32 = vpop.f32.mrf.mxu1  ;;  %v9471_v11 = vld [vmem:[#allocation89_spill] sm:$0xff] }
 0x3a0   : > { %v3202_v20 = vpop.f32.mrf.mxu3  ;;  %v2868_v23 = vadd.f32 %v2867_v32, %v2698_v33  ;;  %v5531_v33 = vadd.f32 %v7898_v43, %v9472_v19 }
 0x3a1   : > { %v3203_v6 = vadd.f32 %v3202_v20, %v3034_v29  ;;  %2737 = vmatmul.bf16.gmra.mxu0 %v9467_v44 }
 0x3a2   : > { %2906 = vmatmul.bf16.gmra.mxu1 %v9469_v28  ;;  %v6706_v28 = vld [vmem:[%s7188_s1 + $0x22c] sm:$0xf0] }
 0x3a3   : > { %v5528_v25 = vadd.f32 %v7900_v22, %v3203_v6  ;;  %3075 = vmatmul.bf16.gmra.mxu2 %v9470_v45 }
 0x3a5   : > { %3244 = vmatmul.bf16.gmra.mxu3 %v9471_v11  ;;  %v5741_v47 = vpack.c.bf16 %v5528_v25, %v5527_v63  ;;  %v9475_v11 = vld [vmem:[#allocation93_spill] sm:$0xff] }
 0x3a6   : > { %v3036_v10 = vpop.f32.mrf.mxu2  ;;  %v2700_v29 = vpop.f32.mrf.mxu0 }
 0x3a7   : > { %5869 = vst [vmem:[%s7907_s19 + $0x150] sm:$0xff] %v5741_v47  ;;  %v3037_v3 = vadd.f32 %v3036_v10, %v2868_v23  ;;  %v2869_v20 = vpop.f32.mrf.mxu1  ;;  %v9473_v23 = vld [vmem:[#allocation92_spill] sm:$0xff] }
 0x3a8   : > { %v3205_v7 = vpop.f32.mrf.mxu3  ;;  %v2870_v46 = vadd.f32 %v2869_v20, %v2700_v29  ;;  %v9474_v10 = vld [vmem:[#allocation96_spill] sm:$0xff]  ;;  %v9477_v29 = vld [vmem:[#allocation95_spill] sm:$0xff] }
 0x3a9   : > { %v3206_v24 = vadd.f32 %v3205_v7, %v3037_v3  ;;  %v5535_v3 = vadd.f32 %v7898_v43, %v9474_v10 }
 0x3ab   : > { %v5532_v32 = vadd.f32 %v7900_v22, %v3206_v24  ;;  %v9476_v24 = vld [vmem:[#allocation94_spill] sm:$0xff] }
 0x3ad   : > { %v5743_v6 = vpack.c.bf16 %v5532_v32, %v5531_v33 }
 0x3ae   : > { %v3038_v45 = vpop.f32.mrf.mxu2  ;;  %v2703_v31 = vpop.f32.mrf.mxu0 }
 0x3af   : > { %5871 = vst [vmem:[%s7907_s19 + $0x160] sm:$0xff] %v5743_v6  ;;  %v3039_v14 = vadd.f32 %v3038_v45, %v2870_v46  ;;  %v2872_v25 = vpop.f32.mrf.mxu1 }
 0x3b0   : > { %v3207_v63 = vpop.f32.mrf.mxu3  ;;  %v2873_v19 = vadd.f32 %v2872_v25, %v2703_v31 }
 0x3b1   : > { %v3208_v47 = vadd.f32 %v3207_v63, %v3039_v14  ;;  %2742 = vmatmul.bf16.gmra.mxu0 %v9473_v23  ;;  %v9478_v63 = vld [vmem:[#allocation97_spill] sm:$0xff]  ;;  %v9481_v23 = vld [vmem:[#allocation99_spill] sm:$0xff] }
 0x3b2   : > { %2911 = vmatmul.bf16.gmra.mxu1 %v9475_v11  ;;  %v5539_v10 = vadd.f32 %v7898_v43, %v9478_v63 }
 0x3b3   : > { %v5536_v7 = vadd.f32 %v7900_v22, %v3208_v47  ;;  %3080 = vmatmul.bf16.gmra.mxu2 %v9476_v24 }
 0x3b5   : > { %3249 = vmatmul.bf16.gmra.mxu3 %v9477_v29  ;;  %v5745_v45 = vpack.c.bf16 %v5536_v7, %v5535_v3 }
 0x3b6   : > { %v3041_v20 = vpop.f32.mrf.mxu2  ;;  %v2705_v6 = vpop.f32.mrf.mxu0 }
 0x3b7   : > { %5873 = vst [vmem:[%s7907_s19 + $0x170] sm:$0xff] %v5745_v45  ;;  %v3042_v33 = vadd.f32 %v3041_v20, %v2873_v19  ;;  %v2874_v46 = vpop.f32.mrf.mxu1  ;;  %v9479_v19 = vld [vmem:[#allocation98_spill] sm:$0xff] }
 0x3b8   : > { %v3210_v32 = vpop.f32.mrf.mxu3  ;;  %v2875_v47 = vadd.f32 %v2874_v46, %v2705_v6  ;;  %v9480_v20 = vld [vmem:[#allocation102_spill] sm:$0xff]  ;;  %v9483_v6 = vld [vmem:[#allocation101_spill] sm:$0xff] }
 0x3b9   : > { %v3211_v14 = vadd.f32 %v3210_v32, %v3042_v33  ;;  %v5543_v33 = vadd.f32 %v7898_v43, %v9480_v20 }
 0x3bb   : > { %v5540_v31 = vadd.f32 %v7900_v22, %v3211_v14  ;;  %v9482_v14 = vld [vmem:[#allocation100_spill] sm:$0xff] }
 0x3bd   : > { %v5747_v25 = vpack.c.bf16 %v5540_v31, %v5539_v10 }
 0x3be   : > { %v3043_v11 = vpop.f32.mrf.mxu2  ;;  %v2708_v3 = vpop.f32.mrf.mxu0 }
 0x3bf   : > { %5875 = vst [vmem:[%s7907_s19 + $0x180] sm:$0xff] %v5747_v25  ;;  %v3044_v24 = vadd.f32 %v3043_v11, %v2875_v47  ;;  %v2877_v7 = vpop.f32.mrf.mxu1  ;;  %v9484_v47 = vld [vmem:[#allocation103_spill] sm:$0xff] }
 0x3c0   : > { %v3212_v29 = vpop.f32.mrf.mxu3  ;;  %v2878_v63 = vadd.f32 %v2877_v7, %v2708_v3  ;;  %v5547_v20 = vadd.f32 %v7898_v43, %v9484_v47 }
 0x3c1   : > { %v3213_v45 = vadd.f32 %v3212_v29, %v3044_v24  ;;  %2747 = vmatmul.bf16.gmra.mxu0 %v9479_v19  ;;  %v6391_v19 = vld [vmem:[%s7188_s1 + $0x220] sm:$0xf] }
 0x3c2   : > { %2916 = vmatmul.bf16.gmra.mxu1 %v9481_v23 }
 0x3c3   : > { %v5544_v32 = vadd.f32 %v7900_v22, %v3213_v45  ;;  %3085 = vmatmul.bf16.gmra.mxu2 %v9482_v14 }
 0x3c5   : > { %3254 = vmatmul.bf16.gmra.mxu3 %v9483_v6  ;;  %v5749_v11 = vpack.c.bf16 %v5544_v32, %v5543_v33 }
 0x3c6   : > { %v3046_v46 = vpop.f32.mrf.mxu2  ;;  %v2710_v29 = vpop.f32.mrf.mxu0 }
 0x3c7   : > { %5877 = vst [vmem:[%s7907_s19 + $0x190] sm:$0xff] %v5749_v11  ;;  %v3047_v10 = vadd.f32 %v3046_v46, %v2878_v63  ;;  %v2879_v31 = vpop.f32.mrf.mxu1  ;;  %v9485_v11 = vld [vmem:[#allocation104_spill] sm:$0xff] }
 0x3c8   : > { %v3215_v24 = vpop.f32.mrf.mxu3  ;;  %v2880_v45 = vadd.f32 %v2879_v31, %v2710_v29  ;;  %v9486_v46 = vld [vmem:[#allocation108_spill] sm:$0xff]  ;;  %v9487_v31 = vld [vmem:[#allocation105_spill] sm:$0xff] }
 0x3c9   : > { %v3216_v25 = vadd.f32 %v3215_v24, %v3047_v10  ;;  %v5551_v10 = vadd.f32 %v7898_v43, %v9486_v46 }
 0x3cb   : > { %v5548_v3 = vadd.f32 %v7900_v22, %v3216_v25  ;;  %v9488_v25 = vld [vmem:[#allocation106_spill] sm:$0xff] }
 0x3cd   : > { %v5751_v7 = vpack.c.bf16 %v5548_v3, %v5547_v20 }
 0x3ce   : > { %v3048_v23 = vpop.f32.mrf.mxu2  ;;  %v2713_v33 = vpop.f32.mrf.mxu0 }
 0x3cf   : > { %5879 = vst [vmem:[%s7907_s19 + $0x1a0] sm:$0xff] %v5751_v7  ;;  %v3049_v14 = vadd.f32 %v3048_v23, %v2880_v45  ;;  %v2882_v32 = vpop.f32.mrf.mxu1  ;;  %v9489_v23 = vld [vmem:[#allocation107_spill] sm:$0xff]  ;;  %v6399_v7 = vld [vmem:[%s7188_s1 + $0x228] sm:$0xf] }
 0x3d0   : > { %v3217_v6 = vpop.f32.mrf.mxu3  ;;  %v2883_v29 = vadd.f32 %v2882_v32, %v2713_v33  ;;  %v6707_v45 = vld [vmem:[%s7188_s1 + $0x234] sm:$0xf0]  ;;  %v6401_v33 = vld [vmem:[%s7188_s1 + $0x238] sm:$0xf0] }
 0x3d1   : > { %v3218_v63 = vadd.f32 %v3217_v6, %v3049_v14  ;;  %2752 = vmatmul.bf16.gmra.mxu0 %v9485_v11  ;;  %v6400_v11 = vor.u32 %v6707_v45, %v6399_v7 }
 0x3d2   : > { %2921 = vmatmul.bf16.gmra.mxu1 %v9487_v31 }
 0x3d3   : > { %v5552_v24 = vadd.f32 %v7900_v22, %v3218_v63  ;;  %3090 = vmatmul.bf16.gmra.mxu2 %v9488_v25  ;;  %v6705_v63 = vld [vmem:[%s7188_s1 + $0x22c] sm:$0xf] }
 0x3d4   : > { %v6404_v31 = vor.u32 %v6705_v63, %v6401_v33  ;;  %3654 = vmatpush.bf16.xpose.msra.mxu2 %v6400_v11  ;;  %v6704_v11 = vld [vmem:[%s7188_s1 + $0x224] sm:$0xf]  ;;  %v6393_v63 = vld [vmem:[%s7188_s1 + $0x230] sm:$0xf0] }
 0x3d5   : > { %3259 = vmatmul.bf16.gmra.mxu3 %v9489_v23  ;;  %v5753_v47 = vpack.c.bf16 %v5552_v24, %v5551_v10  ;;  %v9490_v23 = vld [vmem:[#allocation109_spill] sm:$0xff]  ;;  %v6396_v44 = vor.u32 %v6704_v11, %v6393_v63  ;;  %v9496_v63 = vld [vmem:[#allocation115_spill] sm:$0xff] }
 0x3d6   : > { %v3051_v20 = vpop.f32.mrf.mxu2  ;;  %v2715_v3 = vpop.f32.mrf.mxu0  ;;  %v5555_v10 = vadd.f32 %v7898_v43, %v9490_v23  ;;  %3823 = vmatpush.bf16.xpose.msra.mxu3 %v6404_v31  ;;  %v9491_v23 = vld [vmem:[#allocation110_spill] sm:$0xff] }
 0x3d7   : > { %5881 = vst [vmem:[%s7907_s19 + $0x1b0] sm:$0xff] %v5753_v47  ;;  %v3052_v14 = vadd.f32 %v3051_v20, %v2883_v29  ;;  %v2884_v46 = vpop.f32.mrf.mxu1  ;;  %3485 = vmatpush.bf16.xpose.msra.mxu1 %v6396_v44 }
 0x3d8   : > { %v3220_v6 = vpop.f32.mrf.mxu3  ;;  %v2885_v47 = vadd.f32 %v2884_v46, %v2715_v3 }
 0x3d9   : > { %v3221_v32 = vadd.f32 %v3220_v6, %v3052_v14  ;;  %v6392_v6 = vor.u32 %v6706_v28, %v6391_v19 }
 0x3db   : > { %v5556_v24 = vadd.f32 %v7900_v22, %v3221_v32  ;;  %v9492_v32 = vld [vmem:[#allocation114_spill] sm:$0xff]  ;;  %3316 = vmatpush.bf16.xpose.msra.mxu0 %v6392_v6 }
 0x3dc   : > { %v5559_v31 = vadd.f32 %v7898_v43, %v9492_v32 }
 0x3dd   : > { %v5755_v29 = vpack.c.bf16 %v5556_v24, %v5555_v10  ;;  %v9493_v10 = vld [vmem:[#allocation111_spill] sm:$0xff]  ;;  %v9494_v24 = vld [vmem:[#allocation112_spill] sm:$0xff] }
 0x3de   : > { %v3053_v20 = vpop.f32.mrf.mxu2  ;;  %v2718_v25 = vpop.f32.mrf.mxu0 }
 0x3df   : > { %5883 = vst [vmem:[%s7907_s19 + $0x1c0] sm:$0xff] %v5755_v29  ;;  %v3054_v7 = vadd.f32 %v3053_v20, %v2885_v47  ;;  %v2887_v14 = vpop.f32.mrf.mxu1  ;;  %v9495_v29 = vld [vmem:[#allocation113_spill] sm:$0xff] }
 0x3e0   : > { %v3222_v45 = vpop.f32.mrf.mxu3  ;;  %v2888_v46 = vadd.f32 %v2887_v14, %v2718_v25  ;;  %v5563_v25 = vadd.f32 %v7898_v43, %v9496_v63 }
 0x3e1   : > { %v3223_v33 = vadd.f32 %v3222_v45, %v3054_v7  ;;  %2757 = vmatmul.bf16.gmra.mxu0 %v9491_v23 }
 0x3e2   : > { %2926 = vmatmul.bf16.gmra.mxu1 %v9493_v10  ;;  %v6702_v10 = vld [vmem:[%s7188_s1 + $0x20c] sm:$0xf0] }
 0x3e3   : > { %v5560_v3 = vadd.f32 %v7900_v22, %v3223_v33  ;;  %3095 = vmatmul.bf16.gmra.mxu2 %v9494_v24 }
 0x3e5   : > { %3264 = vmatmul.bf16.gmra.mxu3 %v9495_v29  ;;  %v5757_v28 = vpack.c.bf16 %v5560_v3, %v5559_v31  ;;  %v9499_v29 = vld [vmem:[#allocation117_spill] sm:$0xff] }
 0x3e6   : > { %v3056_v19 = vpop.f32.mrf.mxu2  ;;  %v2720_v7 = vpop.f32.mrf.mxu0 }
 0x3e7   : > { %5885 = vst [vmem:[%s7907_s19 + $0x1d0] sm:$0xff] %v5757_v28  ;;  %v3057_v47 = vadd.f32 %v3056_v19, %v2888_v46  ;;  %v2889_v45 = vpop.f32.mrf.mxu1  ;;  %v9497_v46 = vld [vmem:[#allocation116_spill] sm:$0xff] }
 0x3e8   : > { %v3225_v20 = vpop.f32.mrf.mxu3  ;;  %v2890_v32 = vadd.f32 %v2889_v45, %v2720_v7  ;;  %v9498_v19 = vld [vmem:[#allocation120_spill] sm:$0xff]  ;;  %v9501_v7 = vld [vmem:[#allocation119_spill] sm:$0xff] }
 0x3e9   : > { %v3226_v11 = vadd.f32 %v3225_v20, %v3057_v47  ;;  %v5567_v47 = vadd.f32 %v7898_v43, %v9498_v19 }
 0x3eb   : > { %v5564_v14 = vadd.f32 %v7900_v22, %v3226_v11  ;;  %v9500_v11 = vld [vmem:[#allocation118_spill] sm:$0xff] }
 0x3ed   : > { %v5759_v33 = vpack.c.bf16 %v5564_v14, %v5563_v25 }
 0x3ee   : > { %v3058_v24 = vpop.f32.mrf.mxu2  ;;  %v2723_v44 = vpop.f32.mrf.mxu0 }
 0x3ef   : > { %5887 = vst [vmem:[%s7907_s19 + $0x1e0] sm:$0xff] %v5759_v33  ;;  %v3059_v6 = vadd.f32 %v3058_v24, %v2890_v32  ;;  %v2892_v3 = vpop.f32.mrf.mxu1 }
 0x3f0   : > { %v3227_v31 = vpop.f32.mrf.mxu3  ;;  %v2893_v63 = vadd.f32 %v2892_v3, %v2723_v44 }
 0x3f1   : > { %v3228_v28 = vadd.f32 %v3227_v31, %v3059_v6  ;;  %2762 = vmatmul.bf16.gmra.mxu0 %v9497_v46  ;;  %v9502_v31 = vld [vmem:[#allocation121_spill] sm:$0xff]  ;;  %v9505_v46 = vld [vmem:[#allocation123_spill] sm:$0xff] }
 0x3f2   : > { %2931 = vmatmul.bf16.gmra.mxu1 %v9499_v29  ;;  %v5571_v19 = vadd.f32 %v7898_v43, %v9502_v31 }
 0x3f3   : > { %v5568_v20 = vadd.f32 %v7900_v22, %v3228_v28  ;;  %3100 = vmatmul.bf16.gmra.mxu2 %v9500_v11 }
 0x3f5   : > { %3269 = vmatmul.bf16.gmra.mxu3 %v9501_v7  ;;  %v5761_v24 = vpack.c.bf16 %v5568_v20, %v5567_v47 }
 0x3f6   : > { %v3061_v45 = vpop.f32.mrf.mxu2  ;;  %v2725_v33 = vpop.f32.mrf.mxu0 }
 0x3f7   : > { %5889 = vst [vmem:[%s7907_s19 + $0x1f0] sm:$0xff] %v5761_v24  ;;  %v3062_v25 = vadd.f32 %v3061_v45, %v2893_v63  ;;  %v2894_v32 = vpop.f32.mrf.mxu1  ;;  %v9503_v63 = vld [vmem:[#allocation122_spill] sm:$0xff] }
 0x3f8   : > { %v3230_v14 = vpop.f32.mrf.mxu3  ;;  %v2895_v28 = vadd.f32 %v2894_v32, %v2725_v33  ;;  %v9504_v45 = vld [vmem:[#allocation126_spill] sm:$0xff]  ;;  %v9507_v33 = vld [vmem:[#allocation125_spill] sm:$0xff] }
 0x3f9   : > { %v3231_v6 = vadd.f32 %v3230_v14, %v3062_v25  ;;  %v5575_v25 = vadd.f32 %v7898_v43, %v9504_v45 }
 0x3fb   : > { %v5572_v44 = vadd.f32 %v7900_v22, %v3231_v6  ;;  %v9506_v6 = vld [vmem:[#allocation124_spill] sm:$0xff] }
 0x3fd   : > { %v5763_v3 = vpack.c.bf16 %v5572_v44, %v5571_v19 }
 0x3fe   : > { %v3063_v29 = vpop.f32.mrf.mxu2  ;;  %v2728_v47 = vpop.f32.mrf.mxu0 }
 0x3ff   : > { %5891 = vst [vmem:[%s7907_s19 + $0x200] sm:$0xff] %v5763_v3  ;;  %v3064_v11 = vadd.f32 %v3063_v29, %v2895_v28  ;;  %v2897_v20 = vpop.f32.mrf.mxu1  ;;  %v9508_v28 = vld [vmem:[#allocation127_spill] sm:$0xff] }
 0x400   : > { %v3232_v7 = vpop.f32.mrf.mxu3  ;;  %v2898_v31 = vadd.f32 %v2897_v20, %v2728_v47  ;;  %v5579_v45 = vadd.f32 %v7898_v43, %v9508_v28 }
 0x401   : > { %v3233_v24 = vadd.f32 %v3232_v7, %v3064_v11  ;;  %2767 = vmatmul.bf16.gmra.mxu0 %v9503_v63  ;;  %v6375_v63 = vld [vmem:[%s7188_s1 + $0x200] sm:$0xf] }
 0x402   : > { %2936 = vmatmul.bf16.gmra.mxu1 %v9505_v46 }
 0x403   : > { %v5576_v14 = vadd.f32 %v7900_v22, %v3233_v24  ;;  %3105 = vmatmul.bf16.gmra.mxu2 %v9506_v6 }
 0x405   : > { %3274 = vmatmul.bf16.gmra.mxu3 %v9507_v33  ;;  %v5765_v29 = vpack.c.bf16 %v5576_v14, %v5575_v25 }
 0x406   : > { %v3066_v32 = vpop.f32.mrf.mxu2  ;;  %v2730_v7 = vpop.f32.mrf.mxu0 }
 0x407   : > { %5893 = vst [vmem:[%s7907_s19 + $0x210] sm:$0xff] %v5765_v29  ;;  %v3067_v19 = vadd.f32 %v3066_v32, %v2898_v31  ;;  %v2899_v44 = vpop.f32.mrf.mxu1  ;;  %v9509_v29 = vld [vmem:[#allocation128_spill] sm:$0xff] }
 0x408   : > { %v3235_v11 = vpop.f32.mrf.mxu3  ;;  %v2900_v24 = vadd.f32 %v2899_v44, %v2730_v7  ;;  %v9510_v32 = vld [vmem:[#allocation132_spill] sm:$0xff]  ;;  %v9511_v44 = vld [vmem:[#allocation129_spill] sm:$0xff] }
 0x409   : > { %v3236_v3 = vadd.f32 %v3235_v11, %v3067_v19  ;;  %v5583_v19 = vadd.f32 %v7898_v43, %v9510_v32 }
 0x40b   : > { %v5580_v47 = vadd.f32 %v7900_v22, %v3236_v3  ;;  %v9512_v3 = vld [vmem:[#allocation130_spill] sm:$0xff] }
 0x40d   : > { %v5767_v20 = vpack.c.bf16 %v5580_v47, %v5579_v45 }
 0x40e   : > { %v3068_v46 = vpop.f32.mrf.mxu2  ;;  %v2733_v25 = vpop.f32.mrf.mxu0 }
 0x40f   : > { %5895 = vst [vmem:[%s7907_s19 + $0x220] sm:$0xff] %v5767_v20  ;;  %v3069_v6 = vadd.f32 %v3068_v46, %v2900_v24  ;;  %v2902_v14 = vpop.f32.mrf.mxu1  ;;  %v9513_v46 = vld [vmem:[#allocation131_spill] sm:$0xff]  ;;  %v6383_v20 = vld [vmem:[%s7188_s1 + $0x208] sm:$0xf] }
 0x410   : > { %v3237_v33 = vpop.f32.mrf.mxu3  ;;  %v2903_v7 = vadd.f32 %v2902_v14, %v2733_v25  ;;  %v6703_v24 = vld [vmem:[%s7188_s1 + $0x214] sm:$0xf0]  ;;  %v6385_v25 = vld [vmem:[%s7188_s1 + $0x218] sm:$0xf0] }
 0x411   : > { %v3238_v31 = vadd.f32 %v3237_v33, %v3069_v6  ;;  %2772 = vmatmul.bf16.gmra.mxu0 %v9509_v29  ;;  %v6384_v29 = vor.u32 %v6703_v24, %v6383_v20 }
 0x412   : > { %2941 = vmatmul.bf16.gmra.mxu1 %v9511_v44 }
 0x413   : > { %v5584_v11 = vadd.f32 %v7900_v22, %v3238_v31  ;;  %3110 = vmatmul.bf16.gmra.mxu2 %v9512_v3  ;;  %v6701_v31 = vld [vmem:[%s7188_s1 + $0x20c] sm:$0xf] }
 0x414   : > { %v6388_v44 = vor.u32 %v6701_v31, %v6385_v25  ;;  %3655 = vmatpush.bf16.xpose.msra.mxu2 %v6384_v29  ;;  %v6700_v29 = vld [vmem:[%s7188_s1 + $0x204] sm:$0xf]  ;;  %v6377_v31 = vld [vmem:[%s7188_s1 + $0x210] sm:$0xf0] }
 0x415   : > { %3279 = vmatmul.bf16.gmra.mxu3 %v9513_v46  ;;  %v5769_v28 = vpack.c.bf16 %v5584_v11, %v5583_v19  ;;  %v9514_v46 = vld [vmem:[#allocation133_spill] sm:$0xff]  ;;  %v6380_v23 = vor.u32 %v6700_v29, %v6377_v31  ;;  %v9520_v31 = vld [vmem:[#allocation139_spill] sm:$0xff] }
 0x416   : > { %v3071_v45 = vpop.f32.mrf.mxu2  ;;  %v2735_v47 = vpop.f32.mrf.mxu0  ;;  %v5587_v19 = vadd.f32 %v7898_v43, %v9514_v46  ;;  %3824 = vmatpush.bf16.xpose.msra.mxu3 %v6388_v44  ;;  %v9515_v46 = vld [vmem:[#allocation134_spill] sm:$0xff] }
 0x417   : > { %5897 = vst [vmem:[%s7907_s19 + $0x230] sm:$0xff] %v5769_v28  ;;  %v3072_v6 = vadd.f32 %v3071_v45, %v2903_v7  ;;  %v2904_v32 = vpop.f32.mrf.mxu1  ;;  %3486 = vmatpush.bf16.xpose.msra.mxu1 %v6380_v23 }
 0x418   : > { %v3240_v33 = vpop.f32.mrf.mxu3  ;;  %v2905_v28 = vadd.f32 %v2904_v32, %v2735_v47 }
 0x419   : > { %v3241_v14 = vadd.f32 %v3240_v33, %v3072_v6  ;;  %v6376_v33 = vor.u32 %v6702_v10, %v6375_v63 }
 0x41b   : > { %v5588_v11 = vadd.f32 %v7900_v22, %v3241_v14  ;;  %v9516_v14 = vld [vmem:[#allocation138_spill] sm:$0xff]  ;;  %3317 = vmatpush.bf16.xpose.msra.mxu0 %v6376_v33 }
 0x41c   : > { %v5591_v44 = vadd.f32 %v7898_v43, %v9516_v14 }
 0x41d   : > { %v5771_v7 = vpack.c.bf16 %v5588_v11, %v5587_v19  ;;  %v9517_v19 = vld [vmem:[#allocation135_spill] sm:$0xff]  ;;  %v9518_v11 = vld [vmem:[#allocation136_spill] sm:$0xff] }
 0x41e   : > { %v3073_v45 = vpop.f32.mrf.mxu2  ;;  %v2738_v3 = vpop.f32.mrf.mxu0 }
 0x41f   : > { %5899 = vst [vmem:[%s7907_s19 + $0x240] sm:$0xff] %v5771_v7  ;;  %v3074_v20 = vadd.f32 %v3073_v45, %v2905_v28  ;;  %v2907_v6 = vpop.f32.mrf.mxu1  ;;  %v9519_v7 = vld [vmem:[#allocation137_spill] sm:$0xff] }
 0x420   : > { %v3242_v24 = vpop.f32.mrf.mxu3  ;;  %v2908_v32 = vadd.f32 %v2907_v6, %v2738_v3  ;;  %v5595_v3 = vadd.f32 %v7898_v43, %v9520_v31 }
 0x421   : > { %v3243_v25 = vadd.f32 %v3242_v24, %v3074_v20  ;;  %2777 = vmatmul.bf16.gmra.mxu0 %v9515_v46 }
 0x422   : > { %2946 = vmatmul.bf16.gmra.mxu1 %v9517_v19  ;;  %v6762_v19 = vld [vmem:[%s7188_s1 + $0x3ec] sm:$0xf0] }
 0x423   : > { %v5592_v47 = vadd.f32 %v7900_v22, %v3243_v25  ;;  %3115 = vmatmul.bf16.gmra.mxu2 %v9518_v11 }
 0x425   : > { %3284 = vmatmul.bf16.gmra.mxu3 %v9519_v7  ;;  %v5773_v10 = vpack.c.bf16 %v5592_v47, %v5591_v44  ;;  %v9523_v7 = vld [vmem:[#allocation141_spill] sm:$0xff] }
 0x426   : > { %v3076_v63 = vpop.f32.mrf.mxu2  ;;  %v2740_v20 = vpop.f32.mrf.mxu0 }
 0x427   : > { %5901 = vst [vmem:[%s7907_s19 + $0x250] sm:$0xff] %v5773_v10  ;;  %v3077_v28 = vadd.f32 %v3076_v63, %v2908_v32  ;;  %v2909_v24 = vpop.f32.mrf.mxu1  ;;  %v9521_v32 = vld [vmem:[#allocation140_spill] sm:$0xff] }
 0x428   : > { %v3245_v45 = vpop.f32.mrf.mxu3  ;;  %v2910_v14 = vadd.f32 %v2909_v24, %v2740_v20  ;;  %v9522_v63 = vld [vmem:[#allocation144_spill] sm:$0xff]  ;;  %v9525_v20 = vld [vmem:[#allocation143_spill] sm:$0xff] }
 0x429   : > { %v3246_v29 = vadd.f32 %v3245_v45, %v3077_v28  ;;  %v5599_v28 = vadd.f32 %v7898_v43, %v9522_v63 }
 0x42b   : > { %v5596_v6 = vadd.f32 %v7900_v22, %v3246_v29  ;;  %v9524_v29 = vld [vmem:[#allocation142_spill] sm:$0xff] }
 0x42d   : > { %v5775_v25 = vpack.c.bf16 %v5596_v6, %v5595_v3 }
 0x42e   : > { %v3078_v11 = vpop.f32.mrf.mxu2  ;;  %v2743_v23 = vpop.f32.mrf.mxu0 }
 0x42f   : > { %5903 = vst [vmem:[%s7907_s19 + $0x260] sm:$0xff] %v5775_v25  ;;  %v3079_v33 = vadd.f32 %v3078_v11, %v2910_v14  ;;  %v2912_v47 = vpop.f32.mrf.mxu1 }
 0x430   : > { %v3247_v44 = vpop.f32.mrf.mxu3  ;;  %v2913_v31 = vadd.f32 %v2912_v47, %v2743_v23 }
 0x431   : > { %v3248_v10 = vadd.f32 %v3247_v44, %v3079_v33  ;;  %2782 = vmatmul.bf16.gmra.mxu0 %v9521_v32  ;;  %v9526_v44 = vld [vmem:[#allocation145_spill] sm:$0xff]  ;;  %v9529_v32 = vld [vmem:[#allocation147_spill] sm:$0xff] }
 0x432   : > { %2951 = vmatmul.bf16.gmra.mxu1 %v9523_v7  ;;  %v5603_v63 = vadd.f32 %v7898_v43, %v9526_v44 }
 0x433   : > { %v5600_v45 = vadd.f32 %v7900_v22, %v3248_v10  ;;  %3120 = vmatmul.bf16.gmra.mxu2 %v9524_v29 }
 0x435   : > { %3289 = vmatmul.bf16.gmra.mxu3 %v9525_v20  ;;  %v5777_v11 = vpack.c.bf16 %v5600_v45, %v5599_v28 }
 0x436   : > { %v3081_v24 = vpop.f32.mrf.mxu2  ;;  %v2745_v25 = vpop.f32.mrf.mxu0 }
 0x437   : > { %5905 = vst [vmem:[%s7907_s19 + $0x270] sm:$0xff] %v5777_v11  ;;  %v3082_v3 = vadd.f32 %v3081_v24, %v2913_v31  ;;  %v2914_v14 = vpop.f32.mrf.mxu1  ;;  %v9527_v31 = vld [vmem:[#allocation146_spill] sm:$0xff] }
 0x438   : > { %v3250_v6 = vpop.f32.mrf.mxu3  ;;  %v2915_v10 = vadd.f32 %v2914_v14, %v2745_v25  ;;  %v9528_v24 = vld [vmem:[#allocation150_spill] sm:$0xff]  ;;  %v9531_v25 = vld [vmem:[#allocation149_spill] sm:$0xff] }
 0x439   : > { %v3251_v33 = vadd.f32 %v3250_v6, %v3082_v3  ;;  %v5607_v3 = vadd.f32 %v7898_v43, %v9528_v24 }
 0x43b   : > { %v5604_v23 = vadd.f32 %v7900_v22, %v3251_v33  ;;  %v9530_v33 = vld [vmem:[#allocation148_spill] sm:$0xff] }
 0x43d   : > { %v5779_v47 = vpack.c.bf16 %v5604_v23, %v5603_v63 }
 0x43e   : > { %v3083_v7 = vpop.f32.mrf.mxu2  ;;  %v2748_v28 = vpop.f32.mrf.mxu0 }
 0x43f   : > { %5907 = vst [vmem:[%s7907_s19 + $0x280] sm:$0xff] %v5779_v47  ;;  %v3084_v29 = vadd.f32 %v3083_v7, %v2915_v10  ;;  %v2917_v45 = vpop.f32.mrf.mxu1  ;;  %v9532_v10 = vld [vmem:[#allocation151_spill] sm:$0xff] }
 0x440   : > { %v3252_v20 = vpop.f32.mrf.mxu3  ;;  %v2918_v44 = vadd.f32 %v2917_v45, %v2748_v28  ;;  %v5611_v24 = vadd.f32 %v7898_v43, %v9532_v10 }
 0x441   : > { %v3253_v11 = vadd.f32 %v3252_v20, %v3084_v29  ;;  %2787 = vmatmul.bf16.gmra.mxu0 %v9527_v31  ;;  %v6615_v31 = vld [vmem:[%s7188_s1 + $0x3e0] sm:$0xf] }
 0x442   : > { %2956 = vmatmul.bf16.gmra.mxu1 %v9529_v32 }
 0x443   : > { %v5608_v6 = vadd.f32 %v7900_v22, %v3253_v11  ;;  %3125 = vmatmul.bf16.gmra.mxu2 %v9530_v33 }
 0x445   : > { %3294 = vmatmul.bf16.gmra.mxu3 %v9531_v25  ;;  %v5781_v7 = vpack.c.bf16 %v5608_v6, %v5607_v3 }
 0x446   : > { %v3086_v14 = vpop.f32.mrf.mxu2  ;;  %v2750_v20 = vpop.f32.mrf.mxu0 }
 0x447   : > { %5909 = vst [vmem:[%s7907_s19 + $0x290] sm:$0xff] %v5781_v7  ;;  %v3087_v63 = vadd.f32 %v3086_v14, %v2918_v44  ;;  %v2919_v23 = vpop.f32.mrf.mxu1  ;;  %v9533_v7 = vld [vmem:[#allocation152_spill] sm:$0xff] }
 0x448   : > { %v3255_v29 = vpop.f32.mrf.mxu3  ;;  %v2920_v11 = vadd.f32 %v2919_v23, %v2750_v20  ;;  %v9534_v14 = vld [vmem:[#allocation156_spill] sm:$0xff]  ;;  %v9535_v23 = vld [vmem:[#allocation153_spill] sm:$0xff] }
 0x449   : > { %v3256_v47 = vadd.f32 %v3255_v29, %v3087_v63  ;;  %v5615_v63 = vadd.f32 %v7898_v43, %v9534_v14 }
 0x44b   : > { %v5612_v28 = vadd.f32 %v7900_v22, %v3256_v47  ;;  %v9536_v47 = vld [vmem:[#allocation154_spill] sm:$0xff] }
 0x44d   : > { %v5783_v45 = vpack.c.bf16 %v5612_v28, %v5611_v24 }
 0x44e   : > { %v3088_v32 = vpop.f32.mrf.mxu2  ;;  %v2753_v3 = vpop.f32.mrf.mxu0 }
 0x44f   : > { %5911 = vst [vmem:[%s7907_s19 + $0x2a0] sm:$0xff] %v5783_v45  ;;  %v3089_v33 = vadd.f32 %v3088_v32, %v2920_v11  ;;  %v2922_v6 = vpop.f32.mrf.mxu1  ;;  %v9537_v32 = vld [vmem:[#allocation155_spill] sm:$0xff]  ;;  %v6623_v45 = vld [vmem:[%s7188_s1 + $0x3e8] sm:$0xf] }
 0x450   : > { %v3257_v25 = vpop.f32.mrf.mxu3  ;;  %v2923_v20 = vadd.f32 %v2922_v6, %v2753_v3  ;;  %v6763_v11 = vld [vmem:[%s7188_s1 + $0x3f4] sm:$0xf0]  ;;  %v6625_v3 = vld [vmem:[%s7188_s1 + $0x3f8] sm:$0xf0] }
 0x451   : > { %v3258_v44 = vadd.f32 %v3257_v25, %v3089_v33  ;;  %2792 = vmatmul.bf16.gmra.mxu0 %v9533_v7  ;;  %v6624_v7 = vor.u32 %v6763_v11, %v6623_v45 }
 0x452   : > { %2961 = vmatmul.bf16.gmra.mxu1 %v9535_v23 }
 0x453   : > { %v5616_v29 = vadd.f32 %v7900_v22, %v3258_v44  ;;  %3130 = vmatmul.bf16.gmra.mxu2 %v9536_v47  ;;  %v6761_v44 = vld [vmem:[%s7188_s1 + $0x3ec] sm:$0xf] }
 0x454   : > { %v6628_v23 = vor.u32 %v6761_v44, %v6625_v3  ;;  %4324 = vmatpush.bf16.xpose.msrb.mxu2 %v6624_v7  ;;  %v6760_v7 = vld [vmem:[%s7188_s1 + $0x3e4] sm:$0xf]  ;;  %v6617_v44 = vld [vmem:[%s7188_s1 + $0x3f0] sm:$0xf0] }
 0x455   : > { %3299 = vmatmul.bf16.gmra.mxu3 %v9537_v32  ;;  %v5785_v10 = vpack.c.bf16 %v5616_v29, %v5615_v63  ;;  %v9538_v32 = vld [vmem:[#allocation157_spill] sm:$0xff]  ;;  %v6620_v46 = vor.u32 %v6760_v7, %v6617_v44  ;;  %v5631_v44 = vadd.f32 %v7898_v43, %v7808_v40  ;;  %v5635_v40 = vadd.f32 %v7898_v43, %v7814_v30 }
 0x456   : > { %v3091_v24 = vpop.f32.mrf.mxu2  ;;  %v2755_v28 = vpop.f32.mrf.mxu0  ;;  %v5619_v63 = vadd.f32 %v7898_v43, %v9538_v32  ;;  %4493 = vmatpush.bf16.xpose.msrb.mxu3 %v6628_v23  ;;  %v5623_v23 = vadd.f32 %v7898_v43, %v7800_v8 }
 0x457   : > { %5913 = vst [vmem:[%s7907_s19 + $0x2b0] sm:$0xff] %v5785_v10  ;;  %v3092_v33 = vadd.f32 %v3091_v24, %v2923_v20  ;;  %v2924_v14 = vpop.f32.mrf.mxu1  ;;  %4155 = vmatpush.bf16.xpose.msrb.mxu1 %v6620_v46 }
 0x458   : > { %v3260_v25 = vpop.f32.mrf.mxu3  ;;  %v2925_v10 = vadd.f32 %v2924_v14, %v2755_v28 }
 0x459   : > { %v3261_v6 = vadd.f32 %v3260_v25, %v3092_v33  ;;  %v6616_v25 = vor.u32 %v6762_v19, %v6615_v31 }
 0x45b   : > { %v5620_v29 = vadd.f32 %v7900_v22, %v3261_v6  ;;  %3986 = vmatpush.bf16.xpose.msrb.mxu0 %v6616_v25 }
 0x45d   : > { %v5787_v20 = vpack.c.bf16 %v5620_v29, %v5619_v63 }
 0x45e   : > { %v3093_v24 = vpop.f32.mrf.mxu2  ;;  %v2758_v47 = vpop.f32.mrf.mxu0 }
 0x45f   : > { %5915 = vst [vmem:[%s7907_s19 + $0x2c0] sm:$0xff] %v5787_v20  ;;  %v3094_v45 = vadd.f32 %v3093_v24, %v2925_v10  ;;  %v2927_v33 = vpop.f32.mrf.mxu1 }
 0x460   : > { %v3262_v11 = vpop.f32.mrf.mxu3  ;;  %v2928_v28 = vadd.f32 %v2927_v33, %v2758_v47  ;;  %v5627_v47 = vadd.f32 %v7898_v43, %v7806_v26 }
 0x461   : > { %v3263_v3 = vadd.f32 %v3262_v11, %v3094_v45  ;;  %2797 = vmatmul.bf16.gmra.mxu0 %v7792_v61 }
 0x462   : > { %2966 = vmatmul.bf16.gmra.mxu1 %v7794_v41 }
 0x463   : > { %v5624_v32 = vadd.f32 %v7900_v22, %v3263_v3  ;;  %3135 = vmatmul.bf16.gmra.mxu2 %v7796_v60 }
 0x465   : > { %3304 = vmatmul.bf16.gmra.mxu3 %v7798_v35  ;;  %v5789_v19 = vpack.c.bf16 %v5624_v32, %v5623_v23 }
 0x466   : > { %v3096_v31 = vpop.f32.mrf.mxu2  ;;  %v2760_v63 = vpop.f32.mrf.mxu0 }
 0x467   : > { %5917 = vst [vmem:[%s7907_s19 + $0x2d0] sm:$0xff] %v5789_v19  ;;  %v3097_v14 = vadd.f32 %v3096_v31, %v2928_v28  ;;  %v2929_v29 = vpop.f32.mrf.mxu1 }
 0x468   : > { %v3265_v6 = vpop.f32.mrf.mxu3  ;;  %v2930_v24 = vadd.f32 %v2929_v29, %v2760_v63 }
 0x469   : > { %v3266_v8 = vadd.f32 %v3265_v6, %v3097_v14 }
 0x46b   : > { %v5628_v20 = vadd.f32 %v7900_v22, %v3266_v8 }
 0x46d   : > { %v5791_v10 = vpack.c.bf16 %v5628_v20, %v5627_v47 }
 0x46e   : > { %v3098_v45 = vpop.f32.mrf.mxu2  ;;  %v2763_v46 = vpop.f32.mrf.mxu0 }
 0x46f   : > { %5919 = vst [vmem:[%s7907_s19 + $0x2e0] sm:$0xff] %v5791_v10  ;;  %v3099_v11 = vadd.f32 %v3098_v45, %v2930_v24  ;;  %v2932_v25 = vpop.f32.mrf.mxu1 }
 0x470   : > { %v3267_v33 = vpop.f32.mrf.mxu3  ;;  %v2933_v26 = vadd.f32 %v2932_v25, %v2763_v46  ;;  %v9539_v25 = vld [vmem:[#allocation13_spill] sm:$0xff] }
 0x471   : > { %v3268_v7 = vadd.f32 %v3267_v33, %v3099_v11  ;;  %3318 = vmatmul.bf16.vlgmr.msra.gmra.mxu0 %v7266_v52  ;;  %v5639_v33 = vadd.f32 %v7898_v43, %v7816_v42 }
 0x472   : > { %3487 = vmatmul.bf16.vlgmr.msra.gmra.mxu1 %v7268_v53 }
 0x473   : > { %v5632_v3 = vadd.f32 %v7900_v22, %v3268_v7  ;;  %3656 = vmatmul.bf16.vlgmr.msra.gmra.mxu2 %v7270_v54  ;;  %v9540_v7 = vld [vmem:[#allocation14_spill] sm:$0xff] }
 0x475   : > { %3825 = vmatmul.bf16.vlgmr.msra.gmra.mxu3 %v7272_v55  ;;  %v5793_v23 = vpack.c.bf16 %v5632_v3, %v5631_v44 }
 0x476   : > { %v3101_v32 = vpop.f32.mrf.mxu2  ;;  %v2765_v31 = vpop.f32.mrf.mxu0 }
 0x477   : > { %5921 = vst [vmem:[%s7907_s19 + $0x2f0] sm:$0xff] %v5793_v23  ;;  %v3102_v28 = vadd.f32 %v3101_v32, %v2933_v26  ;;  %v2934_v14 = vpop.f32.mrf.mxu1 }
 0x478   : > { %v3270_v19 = vpop.f32.mrf.mxu3  ;;  %v2935_v8 = vadd.f32 %v2934_v14, %v2765_v31  ;;  %v9541_v31 = vld [vmem:[#allocation159_spill] sm:$0xff] }
 0x479   : > { %v3271_v6 = vadd.f32 %v3270_v19, %v3102_v28  ;;  %v5643_v42 = vadd.f32 %v7898_v43, %v9541_v31  ;;  %v6607_v31 = vld [vmem:[%s7188_s1 + $0x3c8] sm:$0xf] }
 0x47b   : > { %v5636_v63 = vadd.f32 %v7900_v22, %v3271_v6 }
 0x47d   : > { %v5795_v29 = vpack.c.bf16 %v5636_v63, %v5635_v40 }
 0x47e   : > { %v3103_v47 = vpop.f32.mrf.mxu2  ;;  %v2768_v24 = vpop.f32.mrf.mxu0 }
 0x47f   : > { %5923 = vst [vmem:[%s7907_s19 + $0x300] sm:$0xff] %v5795_v29  ;;  %v3104_v20 = vadd.f32 %v3103_v47, %v2935_v8  ;;  %v2937_v45 = vpop.f32.mrf.mxu1 }
 0x480   : > { %v3272_v10 = vpop.f32.mrf.mxu3  ;;  %v2938_v30 = vadd.f32 %v2937_v45, %v2768_v24  ;;  %v9542_v24 = vld [vmem:[#allocation15_spill] sm:$0xff]  ;;  %v9543_v45 = vld [vmem:[#allocation160_spill] sm:$0xff] }
 0x481   : > { %v3273_v11 = vadd.f32 %v3272_v10, %v3104_v20  ;;  %3323 = vmatmul.bf16.gmra.mxu0 %v7278_v0 }
 0x482   : > { %3492 = vmatmul.bf16.gmra.mxu1 %v7280_v1 }
 0x483   : > { %v5640_v46 = vadd.f32 %v7900_v22, %v3273_v11  ;;  %3661 = vmatmul.bf16.gmra.mxu2 %v9539_v25  ;;  %v5647_v11 = vadd.f32 %v7898_v43, %v9543_v45 }
 0x485   : > { %3830 = vmatmul.bf16.gmra.mxu3 %v9540_v7  ;;  %v5797_v44 = vpack.c.bf16 %v5640_v46, %v5639_v33 }
 0x486   : > { %v3106_v3 = vpop.f32.mrf.mxu2  ;;  %v2770_v32 = vpop.f32.mrf.mxu0 }
 0x487   : > { %5925 = vst [vmem:[%s7907_s19 + $0x310] sm:$0xff] %v5797_v44  ;;  %v3107_v26 = vadd.f32 %v3106_v3, %v2938_v30  ;;  %v2939_v28 = vpop.f32.mrf.mxu1  ;;  %v9544_v30 = vld [vmem:[#allocation16_spill] sm:$0xff]  ;;  %v9545_v44 = vld [vmem:[#allocation17_spill] sm:$0xff]  ;;  %v9546_v3 = vld [vmem:[#allocation18_spill] sm:$0xff] }
 0x488   : > { %v3275_v23 = vpop.f32.mrf.mxu3  ;;  %v2940_v40 = vadd.f32 %v2939_v28, %v2770_v32 }
 0x489   : > { %v3276_v19 = vadd.f32 %v3275_v23, %v3107_v26 }
 0x48b   : > { %v5644_v14 = vadd.f32 %v7900_v22, %v3276_v19 }
 0x48d   : > { %v5799_v6 = vpack.c.bf16 %v5644_v14, %v5643_v42  ;;  %v6759_v42 = vld [vmem:[%s7188_s1 + $0x3d4] sm:$0xf0] }
 0x48e   : > { %v3108_v63 = vpop.f32.mrf.mxu2  ;;  %v2773_v47 = vpop.f32.mrf.mxu0 }
 0x48f   : > { %5927 = vst [vmem:[%s7907_s19 + $0x320] sm:$0xff] %v5799_v6  ;;  %v3109_v29 = vadd.f32 %v3108_v63, %v2940_v40  ;;  %v2942_v20 = vpop.f32.mrf.mxu1  ;;  %v6608_v6 = vor.u32 %v6759_v42, %v6607_v31  ;;  %v6757_v40 = vld [vmem:[%s7188_s1 + $0x3cc] sm:$0xf]  ;;  %v6609_v63 = vld [vmem:[%s7188_s1 + $0x3d8] sm:$0xf0] }
 0x490   : > { %v3277_v8 = vpop.f32.mrf.mxu3  ;;  %v2943_v46 = vadd.f32 %v2942_v20, %v2773_v47  ;;  %v5651_v47 = vadd.f32 %v7898_v43, %v7834_v34  ;;  %v6758_v31 = vld [vmem:[%s7188_s1 + $0x3cc] sm:$0xf0]  ;;  %v6756_v42 = vld [vmem:[%s7188_s1 + $0x3c4] sm:$0xf]  ;;  %v5655_v34 = vadd.f32 %v7898_v43, %v7840_v9 }
 0x491   : > { %v3278_v10 = vadd.f32 %v3277_v8, %v3109_v29  ;;  %3328 = vmatmul.bf16.gmra.mxu0 %v9542_v24  ;;  %v6612_v8 = vor.u32 %v6757_v40, %v6609_v63  ;;  %4325 = vmatpush.bf16.xpose.msrb.mxu2 %v6608_v6  ;;  %v6601_v6 = vld [vmem:[%s7188_s1 + $0x3d0] sm:$0xf0] }
 0x492   : > { %3497 = vmatmul.bf16.gmra.mxu1 %v9544_v30  ;;  %v6604_v63 = vor.u32 %v6756_v42, %v6601_v6 }
 0x493   : > { %v5648_v33 = vadd.f32 %v7900_v22, %v3278_v10  ;;  %3666 = vmatmul.bf16.gmra.mxu2 %v9545_v44  ;;  %4494 = vmatpush.bf16.xpose.msrb.mxu3 %v6612_v8 }
 0x494   : > { %4156 = vmatpush.bf16.xpose.msrb.mxu1 %v6604_v63 }
 0x495   : > { %3835 = vmatmul.bf16.gmra.mxu3 %v9546_v3  ;;  %v5801_v26 = vpack.c.bf16 %v5648_v33, %v5647_v11 }
 0x496   : > { %v3111_v23 = vpop.f32.mrf.mxu2  ;;  %v2775_v19 = vpop.f32.mrf.mxu0 }
 0x497   : > { %5929 = vst [vmem:[%s7907_s19 + $0x330] sm:$0xff] %v5801_v26  ;;  %v3112_v32 = vadd.f32 %v3111_v23, %v2943_v46  ;;  %v2944_v14 = vpop.f32.mrf.mxu1  ;;  %v6599_v23 = vld [vmem:[%s7188_s1 + $0x3c0] sm:$0xf] }
 0x498   : > { %v3280_v28 = vpop.f32.mrf.mxu3  ;;  %v2945_v45 = vadd.f32 %v2944_v14, %v2775_v19 }
 0x499   : > { %v3281_v29 = vadd.f32 %v3280_v28, %v3112_v32  ;;  %v6600_v28 = vor.u32 %v6758_v31, %v6599_v23 }
 0x49b   : > { %v5652_v20 = vadd.f32 %v7900_v22, %v3281_v29  ;;  %3987 = vmatpush.bf16.xpose.msrb.mxu0 %v6600_v28 }
 0x49d   : > { %v5803_v10 = vpack.c.bf16 %v5652_v20, %v5651_v47 }
 0x49e   : > { %v3113_v11 = vpop.f32.mrf.mxu2  ;;  %v2778_v26 = vpop.f32.mrf.mxu0 }
 0x49f   : > { %5931 = vst [vmem:[%s7907_s19 + $0x340] sm:$0xff] %v5803_v10  ;;  %v3114_v33 = vadd.f32 %v3113_v11, %v2945_v45  ;;  %v2947_v32 = vpop.f32.mrf.mxu1  ;;  %v5659_v11 = vadd.f32 %v7898_v43, %v7846_v17 }
 0x4a0   : > { %v3282_v46 = vpop.f32.mrf.mxu3  ;;  %v2948_v14 = vadd.f32 %v2947_v32, %v2778_v26 }
 0x4a1   : > { %v3283_v40 = vadd.f32 %v3282_v46, %v3114_v33  ;;  %3333 = vmatmul.bf16.gmra.mxu0 %v7310_v36 }
 0x4a2   : > { %3502 = vmatmul.bf16.gmra.mxu1 %v7312_v37 }
 0x4a3   : > { %v5656_v19 = vadd.f32 %v7900_v22, %v3283_v40  ;;  %3671 = vmatmul.bf16.gmra.mxu2 %v7314_v38  ;;  %v5663_v40 = vadd.f32 %v7898_v43, %v7848_v62  ;;  %v5667_v62 = vadd.f32 %v7898_v43, %v7854_v13 }
 0x4a5   : > { %3840 = vmatmul.bf16.gmra.mxu3 %v7316_v39  ;;  %v5805_v29 = vpack.c.bf16 %v5656_v19, %v5655_v34 }
 0x4a6   : > { %v3116_v8 = vpop.f32.mrf.mxu2  ;;  %v2780_v10 = vpop.f32.mrf.mxu0 }
 0x4a7   : > { %5933 = vst [vmem:[%s7907_s19 + $0x350] sm:$0xff] %v5805_v29  ;;  %v3117_v47 = vadd.f32 %v3116_v8, %v2948_v14  ;;  %v2949_v45 = vpop.f32.mrf.mxu1 }
 0x4a8   : > { %v3285_v20 = vpop.f32.mrf.mxu3  ;;  %v2950_v26 = vadd.f32 %v2949_v45, %v2780_v10 }
 0x4a9   : > { %v3286_v9 = vadd.f32 %v3285_v20, %v3117_v47 }
 0x4ab   : > { %v5660_v33 = vadd.f32 %v7900_v22, %v3286_v9 }
 0x4ad   : > { %v5807_v46 = vpack.c.bf16 %v5660_v33, %v5659_v11 }
 0x4ae   : > { %v3118_v23 = vpop.f32.mrf.mxu2  ;;  %v2783_v28 = vpop.f32.mrf.mxu0 }
 0x4af   : > { %5935 = vst [vmem:[%s7907_s19 + $0x360] sm:$0xff] %v5807_v46  ;;  %v3119_v31 = vadd.f32 %v3118_v23, %v2950_v26  ;;  %v2952_v42 = vpop.f32.mrf.mxu1 }
 0x4b0   : > { %v3287_v32 = vpop.f32.mrf.mxu3  ;;  %v2953_v17 = vadd.f32 %v2952_v42, %v2783_v28  ;;  %v9547_v42 = vld [vmem:[#allocation19_spill] sm:$0xff] }
 0x4b1   : > { %v3288_v6 = vadd.f32 %v3287_v32, %v3119_v31  ;;  %3338 = vmatmul.bf16.gmra.mxu0 %v7322_v48  ;;  %v5671_v32 = vadd.f32 %v7898_v43, %v7856_v2 }
 0x4b2   : > { %3507 = vmatmul.bf16.gmra.mxu1 %v7324_v49 }
 0x4b3   : > { %v5664_v63 = vadd.f32 %v7900_v22, %v3288_v6  ;;  %3676 = vmatmul.bf16.gmra.mxu2 %v7326_v50  ;;  %v9548_v6 = vld [vmem:[#allocation20_spill] sm:$0xff] }
 0x4b5   : > { %3845 = vmatmul.bf16.gmra.mxu3 %v7328_v51  ;;  %v5809_v34 = vpack.c.bf16 %v5664_v63, %v5663_v40 }
 0x4b6   : > { %v3121_v19 = vpop.f32.mrf.mxu2  ;;  %v2785_v8 = vpop.f32.mrf.mxu0 }
 0x4b7   : > { %5937 = vst [vmem:[%s7907_s19 + $0x370] sm:$0xff] %v5809_v34  ;;  %v3122_v14 = vadd.f32 %v3121_v19, %v2953_v17  ;;  %v2954_v47 = vpop.f32.mrf.mxu1 }
 0x4b8   : > { %v3290_v29 = vpop.f32.mrf.mxu3  ;;  %v2955_v9 = vadd.f32 %v2954_v47, %v2785_v8  ;;  %v9549_v8 = vld [vmem:[#allocation161_spill] sm:$0xff] }
 0x4b9   : > { %v3291_v20 = vadd.f32 %v3290_v29, %v3122_v14  ;;  %v5675_v2 = vadd.f32 %v7898_v43, %v9549_v8  ;;  %v6591_v8 = vld [vmem:[%s7188_s1 + $0x3a8] sm:$0xf] }
 0x4bb   : > { %v5668_v10 = vadd.f32 %v7900_v22, %v3291_v20 }
 0x4bd   : > { %v5811_v45 = vpack.c.bf16 %v5668_v10, %v5667_v62 }
 0x4be   : > { %v3123_v11 = vpop.f32.mrf.mxu2  ;;  %v2788_v26 = vpop.f32.mrf.mxu0 }
 0x4bf   : > { %5939 = vst [vmem:[%s7907_s19 + $0x380] sm:$0xff] %v5811_v45  ;;  %v3124_v33 = vadd.f32 %v3123_v11, %v2955_v9  ;;  %v2957_v23 = vpop.f32.mrf.mxu1 }
 0x4c0   : > { %v3292_v46 = vpop.f32.mrf.mxu3  ;;  %v2958_v13 = vadd.f32 %v2957_v23, %v2788_v26  ;;  %v9550_v26 = vld [vmem:[#allocation21_spill] sm:$0xff]  ;;  %v9551_v23 = vld [vmem:[#allocation162_spill] sm:$0xff] }
 0x4c1   : > { %v3293_v31 = vadd.f32 %v3292_v46, %v3124_v33  ;;  %3343 = vmatmul.bf16.gmra.mxu0 %v7334_v4 }
 0x4c2   : > { %3512 = vmatmul.bf16.gmra.mxu1 %v7336_v5 }
 0x4c3   : > { %v5672_v28 = vadd.f32 %v7900_v22, %v3293_v31  ;;  %3681 = vmatmul.bf16.gmra.mxu2 %v9547_v42  ;;  %v5679_v31 = vadd.f32 %v7898_v43, %v9551_v23  ;;  %v6754_v23 = vld [vmem:[%s7188_s1 + $0x3ac] sm:$0xf0] }
 0x4c5   : > { %3850 = vmatmul.bf16.gmra.mxu3 %v9548_v6  ;;  %v5813_v40 = vpack.c.bf16 %v5672_v28, %v5671_v32 }
 0x4c6   : > { %v3126_v63 = vpop.f32.mrf.mxu2  ;;  %v2790_v19 = vpop.f32.mrf.mxu0 }
 0x4c7   : > { %5941 = vst [vmem:[%s7907_s19 + $0x390] sm:$0xff] %v5813_v40  ;;  %v3127_v17 = vadd.f32 %v3126_v63, %v2958_v13  ;;  %v2959_v14 = vpop.f32.mrf.mxu1  ;;  %v9552_v13 = vld [vmem:[#allocation22_spill] sm:$0xff]  ;;  %v9553_v40 = vld [vmem:[#allocation23_spill] sm:$0xff]  ;;  %v9554_v63 = vld [vmem:[#allocation24_spill] sm:$0xff] }
 0x4c8   : > { %v3295_v34 = vpop.f32.mrf.mxu3  ;;  %v2960_v62 = vadd.f32 %v2959_v14, %v2790_v19 }
 0x4c9   : > { %v3296_v29 = vadd.f32 %v3295_v34, %v3127_v17 }
 0x4cb   : > { %v5676_v47 = vadd.f32 %v7900_v22, %v3296_v29 }
 0x4cd   : > { %v5815_v20 = vpack.c.bf16 %v5676_v47, %v5675_v2  ;;  %v6755_v2 = vld [vmem:[%s7188_s1 + $0x3b4] sm:$0xf0] }
 0x4ce   : > { %v3128_v10 = vpop.f32.mrf.mxu2  ;;  %v2793_v11 = vpop.f32.mrf.mxu0 }
 0x4cf   : > { %5943 = vst [vmem:[%s7907_s19 + $0x3a0] sm:$0xff] %v5815_v20  ;;  %v3129_v45 = vadd.f32 %v3128_v10, %v2960_v62  ;;  %v2962_v33 = vpop.f32.mrf.mxu1  ;;  %v6592_v20 = vor.u32 %v6755_v2, %v6591_v8  ;;  %v6753_v62 = vld [vmem:[%s7188_s1 + $0x3ac] sm:$0xf]  ;;  %v6593_v10 = vld [vmem:[%s7188_s1 + $0x3b8] sm:$0xf0] }
 0x4d0   : > { %v3297_v9 = vpop.f32.mrf.mxu3  ;;  %v2963_v28 = vadd.f32 %v2962_v33, %v2793_v11  ;;  %v5683_v11 = vadd.f32 %v7898_v43, %v7874_v15 }
 0x4d1   : > { %v3298_v46 = vadd.f32 %v3297_v9, %v3129_v45  ;;  %3348 = vmatmul.bf16.gmra.mxu0 %v9550_v26  ;;  %v6596_v9 = vor.u32 %v6753_v62, %v6593_v10  ;;  %4326 = vmatpush.bf16.xpose.msrb.mxu2 %v6592_v20  ;;  %v5687_v10 = vadd.f32 %v7898_v43, %v7880_v27 }
 0x4d2   : > { %3517 = vmatmul.bf16.gmra.mxu1 %v9552_v13  ;;  %v5691_v27 = vadd.f32 %v7898_v43, %v7886_v21 }
 0x4d3   : > { %v5680_v32 = vadd.f32 %v7900_v22, %v3298_v46  ;;  %3686 = vmatmul.bf16.gmra.mxu2 %v9553_v40  ;;  %4495 = vmatpush.bf16.xpose.msrb.mxu3 %v6596_v9  ;;  %v6583_v46 = vld [vmem:[%s7188_s1 + $0x3a0] sm:$0xf] }
 0x4d5   : > { %3855 = vmatmul.bf16.gmra.mxu3 %v9554_v63  ;;  %v5817_v17 = vpack.c.bf16 %v5680_v32, %v5679_v31  ;;  %v6752_v31 = vld [vmem:[%s7188_s1 + $0x3a4] sm:$0xf]  ;;  %v6584_v32 = vor.u32 %v6754_v23, %v6583_v46 }
 0x4d6   : > { %v3131_v34 = vpop.f32.mrf.mxu2  ;;  %v2795_v29 = vpop.f32.mrf.mxu0 }
 0x4d7   : > { %5945 = vst [vmem:[%s7907_s19 + $0x3b0] sm:$0xff] %v5817_v17  ;;  %v3132_v19 = vadd.f32 %v3131_v34, %v2963_v28  ;;  %v2964_v47 = vpop.f32.mrf.mxu1  ;;  %v6585_v28 = vld [vmem:[%s7188_s1 + $0x3b0] sm:$0xf0]  ;;  %3988 = vmatpush.bf16.xpose.msrb.mxu0 %v6584_v32 }
 0x4d8   : > { %v3300_v14 = vpop.f32.mrf.mxu3  ;;  %v2965_v34 = vadd.f32 %v2964_v47, %v2795_v29  ;;  %v6588_v8 = vor.u32 %v6752_v31, %v6585_v28 }
 0x4d9   : > { %v3301_v45 = vadd.f32 %v3300_v14, %v3132_v19 }
 0x4da   : > { %4157 = vmatpush.bf16.xpose.msrb.mxu1 %v6588_v8 }
 0x4db   : > { %v5684_v33 = vadd.f32 %v7900_v22, %v3301_v45 }
 0x4dd   : > { %v5819_v17 = vpack.c.bf16 %v5684_v33, %v5683_v11 }
 0x4de   : > { %v3133_v2 = vpop.f32.mrf.mxu2  ;;  %v2798_v20 = vpop.f32.mrf.mxu0 }
 0x4df   : > { %5947 = vst [vmem:[%s7907_s19 + $0x3c0] sm:$0xff] %v5819_v17  ;;  %v3134_v19 = vadd.f32 %v3133_v2, %v2965_v34  ;;  %v2967_v15 = vpop.f32.mrf.mxu1 }
 0x4e0   : > { %v3302_v14 = vpop.f32.mrf.mxu3  ;;  %v2968_v9 = vadd.f32 %v2967_v15, %v2798_v20 }
 0x4e1   : > { %v3303_v62 = vadd.f32 %v3302_v14, %v3134_v19  ;;  %3353 = vmatmul.bf16.gmra.mxu0 %v7366_v56 }
 0x4e2   : > { %3522 = vmatmul.bf16.gmra.mxu1 %v7368_v57 }
 0x4e3   : > { %v5688_v45 = vadd.f32 %v7900_v22, %v3303_v62  ;;  %3691 = vmatmul.bf16.gmra.mxu2 %v7370_v58  ;;  %v5695_v62 = vadd.f32 %v7898_v43, %v7889_v12 }
 0x4e5   : > { %3860 = vmatmul.bf16.gmra.mxu3 %v7372_v59  ;;  %v5821_v29 = vpack.c.bf16 %v5688_v45, %v5687_v10  ;;  %v9555_v10 = vld [vmem:[#allocation25_spill] sm:$0xff]  ;;  %v9556_v45 = vld [vmem:[#allocation26_spill] sm:$0xff] }
 0x4e6   : > { %v3136_v47 = vpop.f32.mrf.mxu2  ;;  %v2800_v46 = vpop.f32.mrf.mxu0 }
 0x4e7   : > { %5949 = vst [vmem:[%s7907_s19 + $0x3d0] sm:$0xff] %v5821_v29  ;;  %v3137_v11 = vadd.f32 %v3136_v47, %v2968_v9  ;;  %v2969_v23 = vpop.f32.mrf.mxu1 }
 0x4e8   : > { %v3305_v33 = vpop.f32.mrf.mxu3  ;;  %v2970_v17 = vadd.f32 %v2969_v23, %v2800_v46 }
 0x4e9   : > { %v3306_v31 = vadd.f32 %v3305_v33, %v3137_v11 }
 0x4eb   : > { %v5692_v32 = vadd.f32 %v7900_v22, %v3306_v31 }
 0x4ed   : > { %v5823_v28 = vpack.c.bf16 %v5692_v32, %v5691_v27 }
 0x4ee   : > { %v3138_v34 = vpop.f32.mrf.mxu2  ;;  %v3319_v19 = vpop.f32.mrf.mxu0 }
 0x4ef   : > { %5951 = vst [vmem:[%s7907_s19 + $0x3e0] sm:$0xff] %v5823_v28  ;;  %v3139_v8 = vadd.f32 %v3138_v34, %v2970_v17  ;;  %v3488_v14 = vpop.f32.mrf.mxu1  ;;  %v9557_v34 = vld [vmem:[#allocation27_spill] sm:$0xff] }
 0x4f0   : > { %v3307_v2 = vpop.f32.mrf.mxu3  ;;  %v3489_v15 = vadd.f32 %v3488_v14, %v3319_v19  ;;  %v9560_v19 = vld [vmem:[#allocation30_spill] sm:$0xff] }
 0x4f1   : > { %v3308_v20 = vadd.f32 %v3307_v2, %v3139_v8  ;;  %3358 = vmatmul.bf16.gmra.mxu0 %v7378_v16  ;;  %v9558_v8 = vld [vmem:[#allocation28_spill] sm:$0xff]  ;;  %v9559_v2 = vld [vmem:[#allocation29_spill] sm:$0xff] }
 0x4f2   : > { %3527 = vmatmul.bf16.gmra.mxu1 %v7380_v18 }
 0x4f3   : > { %v5696_v21 = vadd.f32 %v7900_v22, %v3308_v20  ;;  %3696 = vmatmul.bf16.gmra.mxu2 %v9555_v10 }
 0x4f5   : > { %3865 = vmatmul.bf16.gmra.mxu3 %v9556_v45  ;;  %v5825_v9 = vpack.c.bf16 %v5696_v21, %v5695_v62 }
 0x4f6   : > { %v3657_v29 = vpop.f32.mrf.mxu2  ;;  %v3321_v33 = vpop.f32.mrf.mxu0 }
 0x4f7   : > { %5953 = vst [vmem:[%s7907_s19 + $0x3f0] sm:$0xff] %v5825_v9  ;;  %v3658_v47 = vadd.f32 %v3657_v29, %v3489_v15  ;;  %v3490_v46 = vpop.f32.mrf.mxu1 }
 0x4f8   : > { %v3826_v11 = vpop.f32.mrf.mxu3  ;;  %v3491_v31 = vadd.f32 %v3490_v46, %v3321_v33 }
 0x4f9   : > { %v8354_v23 = vadd.f32 %v3826_v11, %v3658_v47 }
 0x4fe   : > { %v3659_v27 = vpop.f32.mrf.mxu2  ;;  %v3324_v22 = vpop.f32.mrf.mxu0 }
 0x4ff   : > { %v3660_v12 = vadd.f32 %v3659_v27, %v3491_v31  ;;  %v3493_v32 = vpop.f32.mrf.mxu1 }
 0x500   : > { %v3828_v43 = vpop.f32.mrf.mxu3  ;;  %v3494_v17 = vadd.f32 %v3493_v32, %v3324_v22  ;;  %v9564_v22 = vld [vmem:[#allocation33_spill] sm:$0xff]  ;;  %v9565_v32 = vld [vmem:[#allocation34_spill] sm:$0xff] }
 0x501   : > { %v8356_v28 = vadd.f32 %v3828_v43, %v3660_v12  ;;  %3363 = vmatmul.bf16.gmra.mxu0 %v9557_v34  ;;  %v9563_v43 = vld [vmem:[#allocation32_spill] sm:$0xff] }
 0x502   : > { %3532 = vmatmul.bf16.gmra.mxu1 %v9558_v8 }
 0x503   : > { %3701 = vmatmul.bf16.gmra.mxu2 %v9559_v2 }
 0x505   : > { %3870 = vmatmul.bf16.gmra.mxu3 %v9560_v19  ;;  %v6569_v19 = vld [vmem:[%s7188_s1 + $0x390] sm:$0xf0] }
 0x506   : > { %v3662_v14 = vpop.f32.mrf.mxu2  ;;  %v3326_v62 = vpop.f32.mrf.mxu0 }
 0x507   : > { %v3663_v20 = vadd.f32 %v3662_v14, %v3494_v17  ;;  %v3495_v21 = vpop.f32.mrf.mxu1  ;;  %v9566_v17 = vld [vmem:[#allocation35_spill] sm:$0xff]  ;;  %v6575_v14 = vld [vmem:[%s7188_s1 + $0x388] sm:$0xf] }
 0x508   : > { %v3831_v15 = vpop.f32.mrf.mxu3  ;;  %v3496_v29 = vadd.f32 %v3495_v21, %v3326_v62  ;;  %v6577_v21 = vld [vmem:[%s7188_s1 + $0x398] sm:$0xf0] }
 0x509   : > { %v8362_v9 = vadd.f32 %v3831_v15, %v3663_v20  ;;  %v6751_v20 = vld [vmem:[%s7188_s1 + $0x394] sm:$0xf0]  ;;  %v6749_v15 = vld [vmem:[%s7188_s1 + $0x38c] sm:$0xf] }
 0x50a   : > { %v6576_v62 = vor.u32 %v6751_v20, %v6575_v14 }
 0x50b   : > { %9561 = vst [vmem:[#allocation31_spill] sm:$0xff] %v8362_v9 }
 0x50c   : > { %4327 = vmatpush.bf16.xpose.msrb.mxu2 %v6576_v62 }
 0x50e   : > { %v3664_v47 = vpop.f32.mrf.mxu2  ;;  %v3329_v46 = vpop.f32.mrf.mxu0 }
 0x50f   : > { %v3665_v11 = vadd.f32 %v3664_v47, %v3496_v29  ;;  %v3498_v31 = vpop.f32.mrf.mxu1  ;;  %v6580_v47 = vor.u32 %v6749_v15, %v6577_v21 }
 0x510   : > { %v3833_v33 = vpop.f32.mrf.mxu3  ;;  %v3499_v12 = vadd.f32 %v3498_v31, %v3329_v46 }
 0x511   : > { %v8364_v27 = vadd.f32 %v3833_v33, %v3665_v11  ;;  %3368 = vmatmul.bf16.gmra.mxu0 %v9563_v43  ;;  %4496 = vmatpush.bf16.xpose.msrb.mxu3 %v6580_v47  ;;  %v6748_v43 = vld [vmem:[%s7188_s1 + $0x384] sm:$0xf]  ;;  %v9570_v47 = vld [vmem:[#allocation39_spill] sm:$0xff] }
 0x512   : > { %3537 = vmatmul.bf16.gmra.mxu1 %v9564_v22  ;;  %v6567_v22 = vld [vmem:[%s7188_s1 + $0x380] sm:$0xf]  ;;  %v6572_v2 = vor.u32 %v6748_v43, %v6569_v19 }
 0x513   : > { %9562 = vst [vmem:[#allocation36_spill] sm:$0xff] %v8364_v27  ;;  %3706 = vmatmul.bf16.gmra.mxu2 %v9565_v32  ;;  %v6750_v27 = vld [vmem:[%s7188_s1 + $0x38c] sm:$0xf0] }
 0x514   : > { %v6568_v9 = vor.u32 %v6750_v27, %v6567_v22  ;;  %4158 = vmatpush.bf16.xpose.msrb.mxu1 %v6572_v2 }
 0x515   : > { %3875 = vmatmul.bf16.gmra.mxu3 %v9566_v17 }
 0x516   : > { %v3667_v29 = vpop.f32.mrf.mxu2  ;;  %v3331_v46 = vpop.f32.mrf.mxu0  ;;  %3989 = vmatpush.bf16.xpose.msrb.mxu0 %v6568_v9 }
 0x517   : > { %v3668_v11 = vadd.f32 %v3667_v29, %v3499_v12  ;;  %v3500_v31 = vpop.f32.mrf.mxu1  ;;  %v9569_v29 = vld [vmem:[#allocation38_spill] sm:$0xff] }
 0x518   : > { %v3836_v33 = vpop.f32.mrf.mxu3  ;;  %v3501_v17 = vadd.f32 %v3500_v31, %v3331_v46 }
 0x519   : > { %v8374_v32 = vadd.f32 %v3836_v33, %v3668_v11  ;;  %v9571_v11 = vld [vmem:[#allocation40_spill] sm:$0xff]  ;;  %v9572_v33 = vld [vmem:[#allocation41_spill] sm:$0xff] }
 0x51b   : > { %9567 = vst [vmem:[#allocation37_spill] sm:$0xff] %v8374_v32 }
 0x51e   : > { %v3669_v14 = vpop.f32.mrf.mxu2  ;;  %v3334_v15 = vpop.f32.mrf.mxu0 }
 0x51f   : > { %v3670_v20 = vadd.f32 %v3669_v14, %v3501_v17  ;;  %v3503_v12 = vpop.f32.mrf.mxu1 }
 0x520   : > { %v3838_v8 = vpop.f32.mrf.mxu3  ;;  %v3504_v62 = vadd.f32 %v3503_v12, %v3334_v15 }
 0x521   : > { %v8380_v21 = vadd.f32 %v3838_v8, %v3670_v20  ;;  %3373 = vmatmul.bf16.gmra.mxu0 %v9569_v29 }
 0x522   : > { %3542 = vmatmul.bf16.gmra.mxu1 %v9570_v47  ;;  %v9575_v47 = vld [vmem:[#allocation44_spill] sm:$0xff] }
 0x523   : > { %9568 = vst [vmem:[#allocation42_spill] sm:$0xff] %v8380_v21  ;;  %3711 = vmatmul.bf16.gmra.mxu2 %v9571_v11  ;;  %v9576_v11 = vld [vmem:[#allocation45_spill] sm:$0xff]  ;;  %v6553_v21 = vld [vmem:[%s7188_s1 + $0x370] sm:$0xf0] }
 0x525   : > { %3880 = vmatmul.bf16.gmra.mxu3 %v9572_v33  ;;  %v9577_v33 = vld [vmem:[#allocation46_spill] sm:$0xff] }
 0x526   : > { %v3672_v27 = vpop.f32.mrf.mxu2  ;;  %v3336_v9 = vpop.f32.mrf.mxu0 }
 0x527   : > { %v3673_v19 = vadd.f32 %v3672_v27, %v3504_v62  ;;  %v3505_v22 = vpop.f32.mrf.mxu1  ;;  %v9578_v62 = vld [vmem:[#allocation47_spill] sm:$0xff] }
 0x528   : > { %v3841_v43 = vpop.f32.mrf.mxu3  ;;  %v3506_v2 = vadd.f32 %v3505_v22, %v3336_v9 }
 0x529   : > { %v8386_v17 = vadd.f32 %v3841_v43, %v3673_v19 }
 0x52b   : > { %9573 = vst [vmem:[#allocation43_spill] sm:$0xff] %v8386_v17 }
 0x52e   : > { %v3674_v46 = vpop.f32.mrf.mxu2  ;;  %v3339_v14 = vpop.f32.mrf.mxu0 }
 0x52f   : > { %v3675_v8 = vadd.f32 %v3674_v46, %v3506_v2  ;;  %v3508_v20 = vpop.f32.mrf.mxu1 }
 0x530   : > { %v3843_v31 = vpop.f32.mrf.mxu3  ;;  %v3509_v12 = vadd.f32 %v3508_v20, %v3339_v14 }
 0x531   : > { %v8388_v15 = vadd.f32 %v3843_v31, %v3675_v8  ;;  %3378 = vmatmul.bf16.gmra.mxu0 %v9575_v47  ;;  %v9581_v47 = vld [vmem:[#allocation50_spill] sm:$0xff] }
 0x532   : > { %3547 = vmatmul.bf16.gmra.mxu1 %v9576_v11 }
 0x533   : > { %9574 = vst [vmem:[#allocation48_spill] sm:$0xff] %v8388_v15  ;;  %3716 = vmatmul.bf16.gmra.mxu2 %v9577_v33  ;;  %v9582_v33 = vld [vmem:[#allocation51_spill] sm:$0xff] }
 0x535   : > { %3885 = vmatmul.bf16.gmra.mxu3 %v9578_v62  ;;  %v9583_v62 = vld [vmem:[#allocation52_spill] sm:$0xff] }
 0x536   : > { %v3677_v27 = vpop.f32.mrf.mxu2  ;;  %v3341_v9 = vpop.f32.mrf.mxu0 }
 0x537   : > { %v3678_v19 = vadd.f32 %v3677_v27, %v3509_v12  ;;  %v3510_v22 = vpop.f32.mrf.mxu1  ;;  %v9584_v12 = vld [vmem:[#allocation53_spill] sm:$0xff] }
 0x538   : > { %v3846_v43 = vpop.f32.mrf.mxu3  ;;  %v3511_v46 = vadd.f32 %v3510_v22, %v3341_v9 }
 0x539   : > { %v8394_v2 = vadd.f32 %v3846_v43, %v3678_v19 }
 0x53b   : > { %9579 = vst [vmem:[#allocation49_spill] sm:$0xff] %v8394_v2 }
 0x53e   : > { %v3679_v17 = vpop.f32.mrf.mxu2  ;;  %v3344_v14 = vpop.f32.mrf.mxu0 }
 0x53f   : > { %v3680_v8 = vadd.f32 %v3679_v17, %v3511_v46  ;;  %v3513_v20 = vpop.f32.mrf.mxu1 }
 0x540   : > { %v3848_v31 = vpop.f32.mrf.mxu3  ;;  %v3514_v11 = vadd.f32 %v3513_v20, %v3344_v14 }
 0x541   : > { %v8396_v15 = vadd.f32 %v3848_v31, %v3680_v8  ;;  %3383 = vmatmul.bf16.gmra.mxu0 %v9581_v47  ;;  %v9590_v47 = vld [vmem:[#allocation59_spill] sm:$0xff] }
 0x542   : > { %3552 = vmatmul.bf16.gmra.mxu1 %v9582_v33 }
 0x543   : > { %9580 = vst [vmem:[#allocation54_spill] sm:$0xff] %v8396_v15  ;;  %3721 = vmatmul.bf16.gmra.mxu2 %v9583_v62  ;;  %v9587_v15 = vld [vmem:[#allocation56_spill] sm:$0xff] }
 0x545   : > { %3890 = vmatmul.bf16.gmra.mxu3 %v9584_v12 }
 0x546   : > { %v3682_v27 = vpop.f32.mrf.mxu2  ;;  %v3346_v9 = vpop.f32.mrf.mxu0 }
 0x547   : > { %v3683_v19 = vadd.f32 %v3682_v27, %v3514_v11  ;;  %v3515_v17 = vpop.f32.mrf.mxu1  ;;  %v9588_v11 = vld [vmem:[#allocation57_spill] sm:$0xff]  ;;  %v9589_v27 = vld [vmem:[#allocation58_spill] sm:$0xff] }
 0x548   : > { %v3851_v43 = vpop.f32.mrf.mxu3  ;;  %v3516_v46 = vadd.f32 %v3515_v17, %v3346_v9  ;;  %v6745_v9 = vld [vmem:[%s7188_s1 + $0x36c] sm:$0xf] }
 0x549   : > { %v8402_v22 = vadd.f32 %v3851_v43, %v3683_v19  ;;  %v6559_v19 = vld [vmem:[%s7188_s1 + $0x368] sm:$0xf]  ;;  %v6747_v43 = vld [vmem:[%s7188_s1 + $0x374] sm:$0xf0] }
 0x54a   : > { %v6560_v17 = vor.u32 %v6747_v43, %v6559_v19 }
 0x54b   : > { %9585 = vst [vmem:[#allocation55_spill] sm:$0xff] %v8402_v22  ;;  %v6744_v22 = vld [vmem:[%s7188_s1 + $0x364] sm:$0xf] }
 0x54c   : > { %4328 = vmatpush.bf16.xpose.msrb.mxu2 %v6560_v17  ;;  %v6556_v29 = vor.u32 %v6744_v22, %v6553_v21 }
 0x54e   : > { %v3684_v8 = vpop.f32.mrf.mxu2  ;;  %v3349_v20 = vpop.f32.mrf.mxu0  ;;  %4159 = vmatpush.bf16.xpose.msrb.mxu1 %v6556_v29 }
 0x54f   : > { %v3685_v31 = vadd.f32 %v3684_v8, %v3516_v46  ;;  %v3518_v33 = vpop.f32.mrf.mxu1  ;;  %v6561_v46 = vld [vmem:[%s7188_s1 + $0x378] sm:$0xf0] }
 0x550   : > { %v3853_v14 = vpop.f32.mrf.mxu3  ;;  %v3519_v12 = vadd.f32 %v3518_v33, %v3349_v20 }
 0x551   : > { %v8404_v62 = vadd.f32 %v3853_v14, %v3685_v31  ;;  %3388 = vmatmul.bf16.gmra.mxu0 %v9587_v15  ;;  %v6564_v31 = vor.u32 %v6745_v9, %v6561_v46  ;;  %v6746_v15 = vld [vmem:[%s7188_s1 + $0x36c] sm:$0xf0] }
 0x552   : > { %3557 = vmatmul.bf16.gmra.mxu1 %v9588_v11 }
 0x553   : > { %9586 = vst [vmem:[#allocation60_spill] sm:$0xff] %v8404_v62  ;;  %3726 = vmatmul.bf16.gmra.mxu2 %v9589_v27  ;;  %4497 = vmatpush.bf16.xpose.msrb.mxu3 %v6564_v31  ;;  %v6551_v62 = vld [vmem:[%s7188_s1 + $0x360] sm:$0xf]  ;;  %v9594_v31 = vld [vmem:[#allocation63_spill] sm:$0xff] }
 0x554   : > { %v6552_v2 = vor.u32 %v6746_v15, %v6551_v62 }
 0x555   : > { %3895 = vmatmul.bf16.gmra.mxu3 %v9590_v47 }
 0x556   : > { %v3687_v8 = vpop.f32.mrf.mxu2  ;;  %v3351_v20 = vpop.f32.mrf.mxu0  ;;  %3990 = vmatpush.bf16.xpose.msrb.mxu0 %v6552_v2 }
 0x557   : > { %v3688_v33 = vadd.f32 %v3687_v8, %v3519_v12  ;;  %v3520_v11 = vpop.f32.mrf.mxu1  ;;  %v9593_v8 = vld [vmem:[#allocation62_spill] sm:$0xff] }
 0x558   : > { %v3856_v14 = vpop.f32.mrf.mxu3  ;;  %v3521_v47 = vadd.f32 %v3520_v11, %v3351_v20  ;;  %v9595_v11 = vld [vmem:[#allocation64_spill] sm:$0xff] }
 0x559   : > { %v8414_v27 = vadd.f32 %v3856_v14, %v3688_v33  ;;  %v9596_v33 = vld [vmem:[#allocation65_spill] sm:$0xff] }
 0x55b   : > { %9591 = vst [vmem:[#allocation61_spill] sm:$0xff] %v8414_v27 }
 0x55e   : > { %v3689_v19 = vpop.f32.mrf.mxu2  ;;  %v3354_v9 = vpop.f32.mrf.mxu0 }
 0x55f   : > { %v3690_v43 = vadd.f32 %v3689_v19, %v3521_v47  ;;  %v3523_v12 = vpop.f32.mrf.mxu1 }
 0x560   : > { %v3858_v32 = vpop.f32.mrf.mxu3  ;;  %v3524_v17 = vadd.f32 %v3523_v12, %v3354_v9 }
 0x561   : > { %v8420_v46 = vadd.f32 %v3858_v32, %v3690_v43  ;;  %3393 = vmatmul.bf16.gmra.mxu0 %v9593_v8 }
 0x562   : > { %3562 = vmatmul.bf16.gmra.mxu1 %v9594_v31  ;;  %v9599_v31 = vld [vmem:[#allocation68_spill] sm:$0xff] }
 0x563   : > { %9592 = vst [vmem:[#allocation66_spill] sm:$0xff] %v8420_v46  ;;  %3731 = vmatmul.bf16.gmra.mxu2 %v9595_v11  ;;  %v9600_v11 = vld [vmem:[#allocation69_spill] sm:$0xff]  ;;  %v6537_v46 = vld [vmem:[%s7188_s1 + $0x350] sm:$0xf0] }
 0x565   : > { %3900 = vmatmul.bf16.gmra.mxu3 %v9596_v33  ;;  %v9601_v33 = vld [vmem:[#allocation70_spill] sm:$0xff] }
 0x566   : > { %v3692_v15 = vpop.f32.mrf.mxu2  ;;  %v3356_v2 = vpop.f32.mrf.mxu0 }
 0x567   : > { %v3693_v21 = vadd.f32 %v3692_v15, %v3524_v17  ;;  %v3525_v47 = vpop.f32.mrf.mxu1  ;;  %v9602_v17 = vld [vmem:[#allocation71_spill] sm:$0xff] }
 0x568   : > { %v3861_v62 = vpop.f32.mrf.mxu3  ;;  %v3526_v29 = vadd.f32 %v3525_v47, %v3356_v2 }
 0x569   : > { %v8426_v22 = vadd.f32 %v3861_v62, %v3693_v21 }
 0x56b   : > { %9597 = vst [vmem:[#allocation67_spill] sm:$0xff] %v8426_v22 }
 0x56e   : > { %v3694_v14 = vpop.f32.mrf.mxu2  ;;  %v3359_v19 = vpop.f32.mrf.mxu0 }
 0x56f   : > { %v3695_v32 = vadd.f32 %v3694_v14, %v3526_v29  ;;  %v3528_v43 = vpop.f32.mrf.mxu1 }
 0x570   : > { %v3863_v20 = vpop.f32.mrf.mxu3  ;;  %v3529_v12 = vadd.f32 %v3528_v43, %v3359_v19 }
 0x571   : > { %v8428_v9 = vadd.f32 %v3863_v20, %v3695_v32  ;;  %3398 = vmatmul.bf16.gmra.mxu0 %v9599_v31  ;;  %v9605_v31 = vld [vmem:[#allocation74_spill] sm:$0xff] }
 0x572   : > { %3567 = vmatmul.bf16.gmra.mxu1 %v9600_v11 }
 0x573   : > { %9598 = vst [vmem:[#allocation72_spill] sm:$0xff] %v8428_v9  ;;  %3736 = vmatmul.bf16.gmra.mxu2 %v9601_v33  ;;  %v9606_v33 = vld [vmem:[#allocation75_spill] sm:$0xff] }
 0x575   : > { %3905 = vmatmul.bf16.gmra.mxu3 %v9602_v17  ;;  %v9607_v17 = vld [vmem:[#allocation76_spill] sm:$0xff] }
 0x576   : > { %v3697_v15 = vpop.f32.mrf.mxu2  ;;  %v3361_v2 = vpop.f32.mrf.mxu0 }
 0x577   : > { %v3698_v21 = vadd.f32 %v3697_v15, %v3529_v12  ;;  %v3530_v47 = vpop.f32.mrf.mxu1  ;;  %v9608_v12 = vld [vmem:[#allocation77_spill] sm:$0xff] }
 0x578   : > { %v3866_v62 = vpop.f32.mrf.mxu3  ;;  %v3531_v14 = vadd.f32 %v3530_v47, %v3361_v2 }
 0x579   : > { %v8434_v29 = vadd.f32 %v3866_v62, %v3698_v21 }
 0x57b   : > { %9603 = vst [vmem:[#allocation73_spill] sm:$0xff] %v8434_v29 }
 0x57e   : > { %v3699_v22 = vpop.f32.mrf.mxu2  ;;  %v3364_v19 = vpop.f32.mrf.mxu0 }
 0x57f   : > { %v3700_v32 = vadd.f32 %v3699_v22, %v3531_v14  ;;  %v3533_v43 = vpop.f32.mrf.mxu1 }
 0x580   : > { %v3868_v20 = vpop.f32.mrf.mxu3  ;;  %v3534_v11 = vadd.f32 %v3533_v43, %v3364_v19 }
 0x581   : > { %v8436_v9 = vadd.f32 %v3868_v20, %v3700_v32  ;;  %3403 = vmatmul.bf16.gmra.mxu0 %v9605_v31  ;;  %v9614_v31 = vld [vmem:[#allocation83_spill] sm:$0xff] }
 0x582   : > { %3572 = vmatmul.bf16.gmra.mxu1 %v9606_v33 }
 0x583   : > { %9604 = vst [vmem:[#allocation78_spill] sm:$0xff] %v8436_v9  ;;  %3741 = vmatmul.bf16.gmra.mxu2 %v9607_v17  ;;  %v9611_v9 = vld [vmem:[#allocation80_spill] sm:$0xff] }
 0x585   : > { %3910 = vmatmul.bf16.gmra.mxu3 %v9608_v12 }
 0x586   : > { %v3702_v15 = vpop.f32.mrf.mxu2  ;;  %v3366_v2 = vpop.f32.mrf.mxu0 }
 0x587   : > { %v3703_v21 = vadd.f32 %v3702_v15, %v3534_v11  ;;  %v3535_v22 = vpop.f32.mrf.mxu1  ;;  %v9612_v11 = vld [vmem:[#allocation81_spill] sm:$0xff]  ;;  %v9613_v15 = vld [vmem:[#allocation82_spill] sm:$0xff] }
 0x588   : > { %v3871_v62 = vpop.f32.mrf.mxu3  ;;  %v3536_v14 = vadd.f32 %v3535_v22, %v3366_v2  ;;  %v6741_v2 = vld [vmem:[%s7188_s1 + $0x34c] sm:$0xf] }
 0x589   : > { %v8442_v47 = vadd.f32 %v3871_v62, %v3703_v21  ;;  %v6543_v21 = vld [vmem:[%s7188_s1 + $0x348] sm:$0xf]  ;;  %v6743_v62 = vld [vmem:[%s7188_s1 + $0x354] sm:$0xf0] }
 0x58a   : > { %v6544_v22 = vor.u32 %v6743_v62, %v6543_v21 }
 0x58b   : > { %9609 = vst [vmem:[#allocation79_spill] sm:$0xff] %v8442_v47  ;;  %v6740_v47 = vld [vmem:[%s7188_s1 + $0x344] sm:$0xf] }
 0x58c   : > { %4329 = vmatpush.bf16.xpose.msrb.mxu2 %v6544_v22  ;;  %v6540_v8 = vor.u32 %v6740_v47, %v6537_v46 }
 0x58e   : > { %v3704_v32 = vpop.f32.mrf.mxu2  ;;  %v3369_v43 = vpop.f32.mrf.mxu0  ;;  %4160 = vmatpush.bf16.xpose.msrb.mxu1 %v6540_v8 }
 0x58f   : > { %v3705_v20 = vadd.f32 %v3704_v32, %v3536_v14  ;;  %v3538_v33 = vpop.f32.mrf.mxu1  ;;  %v6545_v14 = vld [vmem:[%s7188_s1 + $0x358] sm:$0xf0] }
 0x590   : > { %v3873_v19 = vpop.f32.mrf.mxu3  ;;  %v3539_v12 = vadd.f32 %v3538_v33, %v3369_v43 }
 0x591   : > { %v8444_v17 = vadd.f32 %v3873_v19, %v3705_v20  ;;  %3408 = vmatmul.bf16.gmra.mxu0 %v9611_v9  ;;  %v6548_v20 = vor.u32 %v6741_v2, %v6545_v14  ;;  %v6742_v9 = vld [vmem:[%s7188_s1 + $0x34c] sm:$0xf0] }
 0x592   : > { %3577 = vmatmul.bf16.gmra.mxu1 %v9612_v11 }
 0x593   : > { %9610 = vst [vmem:[#allocation84_spill] sm:$0xff] %v8444_v17  ;;  %3746 = vmatmul.bf16.gmra.mxu2 %v9613_v15  ;;  %4498 = vmatpush.bf16.xpose.msrb.mxu3 %v6548_v20  ;;  %v6535_v17 = vld [vmem:[%s7188_s1 + $0x340] sm:$0xf]  ;;  %v9618_v20 = vld [vmem:[#allocation87_spill] sm:$0xff] }
 0x594   : > { %v6536_v29 = vor.u32 %v6742_v9, %v6535_v17 }
 0x595   : > { %3915 = vmatmul.bf16.gmra.mxu3 %v9614_v31 }
 0x596   : > { %v3707_v32 = vpop.f32.mrf.mxu2  ;;  %v3371_v43 = vpop.f32.mrf.mxu0  ;;  %3991 = vmatpush.bf16.xpose.msrb.mxu0 %v6536_v29 }
 0x597   : > { %v3708_v33 = vadd.f32 %v3707_v32, %v3539_v12  ;;  %v3540_v11 = vpop.f32.mrf.mxu1  ;;  %v9617_v32 = vld [vmem:[#allocation86_spill] sm:$0xff] }
 0x598   : > { %v3876_v19 = vpop.f32.mrf.mxu3  ;;  %v3541_v31 = vadd.f32 %v3540_v11, %v3371_v43  ;;  %v9619_v11 = vld [vmem:[#allocation88_spill] sm:$0xff] }
 0x599   : > { %v8454_v15 = vadd.f32 %v3876_v19, %v3708_v33  ;;  %v9620_v33 = vld [vmem:[#allocation89_spill] sm:$0xff] }
 0x59b   : > { %9615 = vst [vmem:[#allocation85_spill] sm:$0xff] %v8454_v15 }
 0x59e   : > { %v3709_v21 = vpop.f32.mrf.mxu2  ;;  %v3374_v2 = vpop.f32.mrf.mxu0 }
 0x59f   : > { %v3710_v62 = vadd.f32 %v3709_v21, %v3541_v31  ;;  %v3543_v12 = vpop.f32.mrf.mxu1 }
 0x5a0   : > { %v3878_v27 = vpop.f32.mrf.mxu3  ;;  %v3544_v22 = vadd.f32 %v3543_v12, %v3374_v2 }
 0x5a1   : > { %v8460_v14 = vadd.f32 %v3878_v27, %v3710_v62  ;;  %3413 = vmatmul.bf16.gmra.mxu0 %v9617_v32 }
 0x5a2   : > { %3582 = vmatmul.bf16.gmra.mxu1 %v9618_v20  ;;  %v9623_v20 = vld [vmem:[#allocation92_spill] sm:$0xff] }
 0x5a3   : > { %9616 = vst [vmem:[#allocation90_spill] sm:$0xff] %v8460_v14  ;;  %3751 = vmatmul.bf16.gmra.mxu2 %v9619_v11  ;;  %v9624_v11 = vld [vmem:[#allocation93_spill] sm:$0xff]  ;;  %v6521_v14 = vld [vmem:[%s7188_s1 + $0x330] sm:$0xf0] }
 0x5a5   : > { %3920 = vmatmul.bf16.gmra.mxu3 %v9620_v33  ;;  %v9625_v33 = vld [vmem:[#allocation94_spill] sm:$0xff] }
 0x5a6   : > { %v3712_v9 = vpop.f32.mrf.mxu2  ;;  %v3376_v29 = vpop.f32.mrf.mxu0 }
 0x5a7   : > { %v3713_v46 = vadd.f32 %v3712_v9, %v3544_v22  ;;  %v3545_v31 = vpop.f32.mrf.mxu1  ;;  %v9626_v22 = vld [vmem:[#allocation95_spill] sm:$0xff] }
 0x5a8   : > { %v3881_v17 = vpop.f32.mrf.mxu3  ;;  %v3546_v8 = vadd.f32 %v3545_v31, %v3376_v29 }
 0x5a9   : > { %v8466_v47 = vadd.f32 %v3881_v17, %v3713_v46 }
 0x5ab   : > { %9621 = vst [vmem:[#allocation91_spill] sm:$0xff] %v8466_v47 }
 0x5ae   : > { %v3714_v19 = vpop.f32.mrf.mxu2  ;;  %v3379_v21 = vpop.f32.mrf.mxu0 }
 0x5af   : > { %v3715_v27 = vadd.f32 %v3714_v19, %v3546_v8  ;;  %v3548_v62 = vpop.f32.mrf.mxu1 }
 0x5b0   : > { %v3883_v43 = vpop.f32.mrf.mxu3  ;;  %v3549_v12 = vadd.f32 %v3548_v62, %v3379_v21 }
 0x5b1   : > { %v8468_v2 = vadd.f32 %v3883_v43, %v3715_v27  ;;  %3418 = vmatmul.bf16.gmra.mxu0 %v9623_v20  ;;  %v9629_v20 = vld [vmem:[#allocation98_spill] sm:$0xff] }
 0x5b2   : > { %3587 = vmatmul.bf16.gmra.mxu1 %v9624_v11 }
 0x5b3   : > { %9622 = vst [vmem:[#allocation96_spill] sm:$0xff] %v8468_v2  ;;  %3756 = vmatmul.bf16.gmra.mxu2 %v9625_v33  ;;  %v9630_v33 = vld [vmem:[#allocation99_spill] sm:$0xff] }
 0x5b5   : > { %3925 = vmatmul.bf16.gmra.mxu3 %v9626_v22  ;;  %v9631_v22 = vld [vmem:[#allocation100_spill] sm:$0xff] }
 0x5b6   : > { %v3717_v9 = vpop.f32.mrf.mxu2  ;;  %v3381_v29 = vpop.f32.mrf.mxu0 }
 0x5b7   : > { %v3718_v46 = vadd.f32 %v3717_v9, %v3549_v12  ;;  %v3550_v31 = vpop.f32.mrf.mxu1  ;;  %v9632_v12 = vld [vmem:[#allocation101_spill] sm:$0xff] }
 0x5b8   : > { %v3886_v17 = vpop.f32.mrf.mxu3  ;;  %v3551_v19 = vadd.f32 %v3550_v31, %v3381_v29 }
 0x5b9   : > { %v8474_v8 = vadd.f32 %v3886_v17, %v3718_v46 }
 0x5bb   : > { %9627 = vst [vmem:[#allocation97_spill] sm:$0xff] %v8474_v8 }
 0x5be   : > { %v3719_v47 = vpop.f32.mrf.mxu2  ;;  %v3384_v21 = vpop.f32.mrf.mxu0 }
 0x5bf   : > { %v3720_v27 = vadd.f32 %v3719_v47, %v3551_v19  ;;  %v3553_v62 = vpop.f32.mrf.mxu1 }
 0x5c0   : > { %v3888_v43 = vpop.f32.mrf.mxu3  ;;  %v3554_v11 = vadd.f32 %v3553_v62, %v3384_v21 }
 0x5c1   : > { %v8476_v2 = vadd.f32 %v3888_v43, %v3720_v27  ;;  %3423 = vmatmul.bf16.gmra.mxu0 %v9629_v20  ;;  %v9638_v20 = vld [vmem:[#allocation107_spill] sm:$0xff] }
 0x5c2   : > { %3592 = vmatmul.bf16.gmra.mxu1 %v9630_v33 }
 0x5c3   : > { %9628 = vst [vmem:[#allocation102_spill] sm:$0xff] %v8476_v2  ;;  %3761 = vmatmul.bf16.gmra.mxu2 %v9631_v22  ;;  %v9635_v2 = vld [vmem:[#allocation104_spill] sm:$0xff] }
 0x5c5   : > { %3930 = vmatmul.bf16.gmra.mxu3 %v9632_v12 }
 0x5c6   : > { %v3722_v9 = vpop.f32.mrf.mxu2  ;;  %v3386_v29 = vpop.f32.mrf.mxu0 }
 0x5c7   : > { %v3723_v46 = vadd.f32 %v3722_v9, %v3554_v11  ;;  %v3555_v47 = vpop.f32.mrf.mxu1  ;;  %v9636_v11 = vld [vmem:[#allocation105_spill] sm:$0xff]  ;;  %v9637_v9 = vld [vmem:[#allocation106_spill] sm:$0xff] }
 0x5c8   : > { %v3891_v17 = vpop.f32.mrf.mxu3  ;;  %v3556_v19 = vadd.f32 %v3555_v47, %v3386_v29  ;;  %v6737_v29 = vld [vmem:[%s7188_s1 + $0x32c] sm:$0xf] }
 0x5c9   : > { %v8482_v31 = vadd.f32 %v3891_v17, %v3723_v46  ;;  %v6527_v46 = vld [vmem:[%s7188_s1 + $0x328] sm:$0xf]  ;;  %v6739_v17 = vld [vmem:[%s7188_s1 + $0x334] sm:$0xf0] }
 0x5ca   : > { %v6528_v47 = vor.u32 %v6739_v17, %v6527_v46 }
 0x5cb   : > { %9633 = vst [vmem:[#allocation103_spill] sm:$0xff] %v8482_v31  ;;  %v6736_v31 = vld [vmem:[%s7188_s1 + $0x324] sm:$0xf] }
 0x5cc   : > { %4330 = vmatpush.bf16.xpose.msrb.mxu2 %v6528_v47  ;;  %v6524_v32 = vor.u32 %v6736_v31, %v6521_v14 }
 0x5ce   : > { %v3724_v27 = vpop.f32.mrf.mxu2  ;;  %v3389_v62 = vpop.f32.mrf.mxu0  ;;  %4161 = vmatpush.bf16.xpose.msrb.mxu1 %v6524_v32 }
 0x5cf   : > { %v3725_v43 = vadd.f32 %v3724_v27, %v3556_v19  ;;  %v3558_v33 = vpop.f32.mrf.mxu1  ;;  %v6529_v19 = vld [vmem:[%s7188_s1 + $0x338] sm:$0xf0] }
 0x5d0   : > { %v3893_v21 = vpop.f32.mrf.mxu3  ;;  %v3559_v12 = vadd.f32 %v3558_v33, %v3389_v62 }
 0x5d1   : > { %v8484_v22 = vadd.f32 %v3893_v21, %v3725_v43  ;;  %3428 = vmatmul.bf16.gmra.mxu0 %v9635_v2  ;;  %v6532_v43 = vor.u32 %v6737_v29, %v6529_v19  ;;  %v6738_v2 = vld [vmem:[%s7188_s1 + $0x32c] sm:$0xf0] }
 0x5d2   : > { %3597 = vmatmul.bf16.gmra.mxu1 %v9636_v11 }
 0x5d3   : > { %9634 = vst [vmem:[#allocation108_spill] sm:$0xff] %v8484_v22  ;;  %3766 = vmatmul.bf16.gmra.mxu2 %v9637_v9  ;;  %4499 = vmatpush.bf16.xpose.msrb.mxu3 %v6532_v43  ;;  %v6519_v22 = vld [vmem:[%s7188_s1 + $0x320] sm:$0xf]  ;;  %v9642_v43 = vld [vmem:[#allocation111_spill] sm:$0xff] }
 0x5d4   : > { %v6520_v8 = vor.u32 %v6738_v2, %v6519_v22 }
 0x5d5   : > { %3935 = vmatmul.bf16.gmra.mxu3 %v9638_v20 }
 0x5d6   : > { %v3727_v27 = vpop.f32.mrf.mxu2  ;;  %v3391_v62 = vpop.f32.mrf.mxu0  ;;  %3992 = vmatpush.bf16.xpose.msrb.mxu0 %v6520_v8 }
 0x5d7   : > { %v3728_v33 = vadd.f32 %v3727_v27, %v3559_v12  ;;  %v3560_v11 = vpop.f32.mrf.mxu1  ;;  %v9641_v27 = vld [vmem:[#allocation110_spill] sm:$0xff] }
 0x5d8   : > { %v3896_v21 = vpop.f32.mrf.mxu3  ;;  %v3561_v20 = vadd.f32 %v3560_v11, %v3391_v62  ;;  %v9643_v11 = vld [vmem:[#allocation112_spill] sm:$0xff] }
 0x5d9   : > { %v8494_v9 = vadd.f32 %v3896_v21, %v3728_v33  ;;  %v9644_v33 = vld [vmem:[#allocation113_spill] sm:$0xff] }
 0x5db   : > { %9639 = vst [vmem:[#allocation109_spill] sm:$0xff] %v8494_v9 }
 0x5de   : > { %v3729_v46 = vpop.f32.mrf.mxu2  ;;  %v3394_v29 = vpop.f32.mrf.mxu0 }
 0x5df   : > { %v3730_v17 = vadd.f32 %v3729_v46, %v3561_v20  ;;  %v3563_v12 = vpop.f32.mrf.mxu1 }
 0x5e0   : > { %v3898_v15 = vpop.f32.mrf.mxu3  ;;  %v3564_v47 = vadd.f32 %v3563_v12, %v3394_v29 }
 0x5e1   : > { %v8500_v19 = vadd.f32 %v3898_v15, %v3730_v17  ;;  %3433 = vmatmul.bf16.gmra.mxu0 %v9641_v27 }
 0x5e2   : > { %3602 = vmatmul.bf16.gmra.mxu1 %v9642_v43  ;;  %v9647_v43 = vld [vmem:[#allocation116_spill] sm:$0xff] }
 0x5e3   : > { %9640 = vst [vmem:[#allocation114_spill] sm:$0xff] %v8500_v19  ;;  %3771 = vmatmul.bf16.gmra.mxu2 %v9643_v11  ;;  %v9648_v11 = vld [vmem:[#allocation117_spill] sm:$0xff]  ;;  %v6505_v19 = vld [vmem:[%s7188_s1 + $0x310] sm:$0xf0] }
 0x5e5   : > { %3940 = vmatmul.bf16.gmra.mxu3 %v9644_v33  ;;  %v9649_v33 = vld [vmem:[#allocation118_spill] sm:$0xff] }
 0x5e6   : > { %v3732_v2 = vpop.f32.mrf.mxu2  ;;  %v3396_v8 = vpop.f32.mrf.mxu0 }
 0x5e7   : > { %v3733_v14 = vadd.f32 %v3732_v2, %v3564_v47  ;;  %v3565_v20 = vpop.f32.mrf.mxu1  ;;  %v9650_v47 = vld [vmem:[#allocation119_spill] sm:$0xff] }
 0x5e8   : > { %v3901_v22 = vpop.f32.mrf.mxu3  ;;  %v3566_v32 = vadd.f32 %v3565_v20, %v3396_v8 }
 0x5e9   : > { %v8506_v31 = vadd.f32 %v3901_v22, %v3733_v14 }
 0x5eb   : > { %9645 = vst [vmem:[#allocation115_spill] sm:$0xff] %v8506_v31 }
 0x5ee   : > { %v3734_v21 = vpop.f32.mrf.mxu2  ;;  %v3399_v46 = vpop.f32.mrf.mxu0 }
 0x5ef   : > { %v3735_v15 = vadd.f32 %v3734_v21, %v3566_v32  ;;  %v3568_v17 = vpop.f32.mrf.mxu1 }
 0x5f0   : > { %v3903_v62 = vpop.f32.mrf.mxu3  ;;  %v3569_v12 = vadd.f32 %v3568_v17, %v3399_v46 }
 0x5f1   : > { %v8508_v29 = vadd.f32 %v3903_v62, %v3735_v15  ;;  %3438 = vmatmul.bf16.gmra.mxu0 %v9647_v43  ;;  %v9653_v43 = vld [vmem:[#allocation122_spill] sm:$0xff] }
 0x5f2   : > { %3607 = vmatmul.bf16.gmra.mxu1 %v9648_v11 }
 0x5f3   : > { %9646 = vst [vmem:[#allocation120_spill] sm:$0xff] %v8508_v29  ;;  %3776 = vmatmul.bf16.gmra.mxu2 %v9649_v33  ;;  %v9654_v33 = vld [vmem:[#allocation123_spill] sm:$0xff] }
 0x5f5   : > { %3945 = vmatmul.bf16.gmra.mxu3 %v9650_v47  ;;  %v9655_v47 = vld [vmem:[#allocation124_spill] sm:$0xff] }
 0x5f6   : > { %v3737_v2 = vpop.f32.mrf.mxu2  ;;  %v3401_v8 = vpop.f32.mrf.mxu0 }
 0x5f7   : > { %v3738_v14 = vadd.f32 %v3737_v2, %v3569_v12  ;;  %v3570_v20 = vpop.f32.mrf.mxu1  ;;  %v9656_v12 = vld [vmem:[#allocation125_spill] sm:$0xff] }
 0x5f8   : > { %v3906_v22 = vpop.f32.mrf.mxu3  ;;  %v3571_v21 = vadd.f32 %v3570_v20, %v3401_v8 }
 0x5f9   : > { %v8514_v32 = vadd.f32 %v3906_v22, %v3738_v14 }
 0x5fb   : > { %9651 = vst [vmem:[#allocation121_spill] sm:$0xff] %v8514_v32 }
 0x5fe   : > { %v3739_v31 = vpop.f32.mrf.mxu2  ;;  %v3404_v46 = vpop.f32.mrf.mxu0 }
 0x5ff   : > { %v3740_v15 = vadd.f32 %v3739_v31, %v3571_v21  ;;  %v3573_v17 = vpop.f32.mrf.mxu1 }
 0x600   : > { %v3908_v62 = vpop.f32.mrf.mxu3  ;;  %v3574_v11 = vadd.f32 %v3573_v17, %v3404_v46 }
 0x601   : > { %v8516_v29 = vadd.f32 %v3908_v62, %v3740_v15  ;;  %3443 = vmatmul.bf16.gmra.mxu0 %v9653_v43  ;;  %v9662_v43 = vld [vmem:[#allocation131_spill] sm:$0xff] }
 0x602   : > { %3612 = vmatmul.bf16.gmra.mxu1 %v9654_v33 }
 0x603   : > { %9652 = vst [vmem:[#allocation126_spill] sm:$0xff] %v8516_v29  ;;  %3781 = vmatmul.bf16.gmra.mxu2 %v9655_v47  ;;  %v9659_v29 = vld [vmem:[#allocation128_spill] sm:$0xff] }
 0x605   : > { %3950 = vmatmul.bf16.gmra.mxu3 %v9656_v12 }
 0x606   : > { %v3742_v2 = vpop.f32.mrf.mxu2  ;;  %v3406_v8 = vpop.f32.mrf.mxu0 }
 0x607   : > { %v3743_v14 = vadd.f32 %v3742_v2, %v3574_v11  ;;  %v3575_v31 = vpop.f32.mrf.mxu1  ;;  %v9660_v11 = vld [vmem:[#allocation129_spill] sm:$0xff]  ;;  %v9661_v2 = vld [vmem:[#allocation130_spill] sm:$0xff] }
 0x608   : > { %v3911_v22 = vpop.f32.mrf.mxu3  ;;  %v3576_v21 = vadd.f32 %v3575_v31, %v3406_v8  ;;  %v6733_v8 = vld [vmem:[%s7188_s1 + $0x30c] sm:$0xf] }
 0x609   : > { %v8522_v20 = vadd.f32 %v3911_v22, %v3743_v14  ;;  %v6511_v14 = vld [vmem:[%s7188_s1 + $0x308] sm:$0xf]  ;;  %v6735_v22 = vld [vmem:[%s7188_s1 + $0x314] sm:$0xf0] }
 0x60a   : > { %v6512_v31 = vor.u32 %v6735_v22, %v6511_v14 }
 0x60b   : > { %9657 = vst [vmem:[#allocation127_spill] sm:$0xff] %v8522_v20  ;;  %v6732_v20 = vld [vmem:[%s7188_s1 + $0x304] sm:$0xf] }
 0x60c   : > { %4331 = vmatpush.bf16.xpose.msrb.mxu2 %v6512_v31  ;;  %v6508_v27 = vor.u32 %v6732_v20, %v6505_v19 }
 0x60e   : > { %v3744_v15 = vpop.f32.mrf.mxu2  ;;  %v3409_v17 = vpop.f32.mrf.mxu0  ;;  %4162 = vmatpush.bf16.xpose.msrb.mxu1 %v6508_v27 }
 0x60f   : > { %v3745_v62 = vadd.f32 %v3744_v15, %v3576_v21  ;;  %v3578_v33 = vpop.f32.mrf.mxu1  ;;  %v6513_v21 = vld [vmem:[%s7188_s1 + $0x318] sm:$0xf0] }
 0x610   : > { %v3913_v46 = vpop.f32.mrf.mxu3  ;;  %v3579_v12 = vadd.f32 %v3578_v33, %v3409_v17 }
 0x611   : > { %v8524_v47 = vadd.f32 %v3913_v46, %v3745_v62  ;;  %3448 = vmatmul.bf16.gmra.mxu0 %v9659_v29  ;;  %v6516_v62 = vor.u32 %v6733_v8, %v6513_v21  ;;  %v6734_v29 = vld [vmem:[%s7188_s1 + $0x30c] sm:$0xf0] }
 0x612   : > { %3617 = vmatmul.bf16.gmra.mxu1 %v9660_v11 }
 0x613   : > { %9658 = vst [vmem:[#allocation132_spill] sm:$0xff] %v8524_v47  ;;  %3786 = vmatmul.bf16.gmra.mxu2 %v9661_v2  ;;  %4500 = vmatpush.bf16.xpose.msrb.mxu3 %v6516_v62  ;;  %v6503_v47 = vld [vmem:[%s7188_s1 + $0x300] sm:$0xf]  ;;  %v9664_v62 = vld [vmem:[#allocation135_spill] sm:$0xff] }
 0x614   : > { %v6504_v32 = vor.u32 %v6734_v29, %v6503_v47 }
 0x615   : > { %3955 = vmatmul.bf16.gmra.mxu3 %v9662_v43 }
 0x616   : > { %v3747_v15 = vpop.f32.mrf.mxu2  ;;  %v3411_v17 = vpop.f32.mrf.mxu0  ;;  %3993 = vmatpush.bf16.xpose.msrb.mxu0 %v6504_v32 }
 0x617   : > { %v3748_v33 = vadd.f32 %v3747_v15, %v3579_v12  ;;  %v3580_v11 = vpop.f32.mrf.mxu1  ;;  %v9663_v15 = vld [vmem:[#allocation134_spill] sm:$0xff] }
 0x618   : > { %v3916_v46 = vpop.f32.mrf.mxu3  ;;  %v3581_v43 = vadd.f32 %v3580_v11, %v3411_v17  ;;  %v9665_v11 = vld [vmem:[#allocation136_spill] sm:$0xff] }
 0x619   : > { %v8534_v2 = vadd.f32 %v3916_v46, %v3748_v33  ;;  %v9666_v33 = vld [vmem:[#allocation137_spill] sm:$0xff] }
 0x61e   : > { %v3749_v14 = vpop.f32.mrf.mxu2  ;;  %v3414_v8 = vpop.f32.mrf.mxu0 }
 0x61f   : > { %v3750_v22 = vadd.f32 %v3749_v14, %v3581_v43  ;;  %v3583_v12 = vpop.f32.mrf.mxu1 }
 0x620   : > { %v3918_v9 = vpop.f32.mrf.mxu3  ;;  %v3584_v31 = vadd.f32 %v3583_v12, %v3414_v8 }
 0x621   : > { %v8540_v21 = vadd.f32 %v3918_v9, %v3750_v22  ;;  %3453 = vmatmul.bf16.gmra.mxu0 %v9663_v15 }
 0x622   : > { %3622 = vmatmul.bf16.gmra.mxu1 %v9664_v62  ;;  %v9669_v62 = vld [vmem:[#allocation140_spill] sm:$0xff] }
 0x623   : > { %3791 = vmatmul.bf16.gmra.mxu2 %v9665_v11  ;;  %v9670_v11 = vld [vmem:[#allocation141_spill] sm:$0xff] }
 0x625   : > { %3960 = vmatmul.bf16.gmra.mxu3 %v9666_v33  ;;  %v9671_v33 = vld [vmem:[#allocation142_spill] sm:$0xff] }
 0x626   : > { %v3752_v29 = vpop.f32.mrf.mxu2  ;;  %v3416_v32 = vpop.f32.mrf.mxu0 }
 0x627   : > { %v3753_v19 = vadd.f32 %v3752_v29, %v3584_v31  ;;  %v3585_v43 = vpop.f32.mrf.mxu1  ;;  %v9672_v31 = vld [vmem:[#allocation143_spill] sm:$0xff] }
 0x628   : > { %v3921_v47 = vpop.f32.mrf.mxu3  ;;  %v3586_v27 = vadd.f32 %v3585_v43, %v3416_v32 }
 0x629   : > { %v8546_v20 = vadd.f32 %v3921_v47, %v3753_v19 }
 0x62b   : > { %9667 = vst [vmem:[#allocation133_spill] sm:$0xff] %v8546_v20 }
 0x62e   : > { %v3754_v46 = vpop.f32.mrf.mxu2  ;;  %v3419_v14 = vpop.f32.mrf.mxu0 }
 0x62f   : > { %v3755_v9 = vadd.f32 %v3754_v46, %v3586_v27  ;;  %v3588_v22 = vpop.f32.mrf.mxu1 }
 0x630   : > { %v3923_v17 = vpop.f32.mrf.mxu3  ;;  %v3589_v12 = vadd.f32 %v3588_v22, %v3419_v14 }
 0x631   : > { %v8548_v8 = vadd.f32 %v3923_v17, %v3755_v9  ;;  %3458 = vmatmul.bf16.gmra.mxu0 %v9669_v62  ;;  %v9675_v62 = vld [vmem:[#allocation146_spill] sm:$0xff] }
 0x632   : > { %3627 = vmatmul.bf16.gmra.mxu1 %v9670_v11 }
 0x633   : > { %9668 = vst [vmem:[#allocation138_spill] sm:$0xff] %v8548_v8  ;;  %3796 = vmatmul.bf16.gmra.mxu2 %v9671_v33  ;;  %v9676_v33 = vld [vmem:[#allocation147_spill] sm:$0xff] }
 0x635   : > { %3965 = vmatmul.bf16.gmra.mxu3 %v9672_v31  ;;  %v9677_v31 = vld [vmem:[#allocation148_spill] sm:$0xff] }
 0x636   : > { %v3757_v29 = vpop.f32.mrf.mxu2  ;;  %v3421_v32 = vpop.f32.mrf.mxu0 }
 0x637   : > { %v3758_v19 = vadd.f32 %v3757_v29, %v3589_v12  ;;  %v3590_v43 = vpop.f32.mrf.mxu1  ;;  %v9678_v12 = vld [vmem:[#allocation149_spill] sm:$0xff] }
 0x638   : > { %v3926_v47 = vpop.f32.mrf.mxu3  ;;  %v3591_v46 = vadd.f32 %v3590_v43, %v3421_v32 }
 0x639   : > { %v8554_v27 = vadd.f32 %v3926_v47, %v3758_v19 }
 0x63b   : > { %9673 = vst [vmem:[#allocation139_spill] sm:$0xff] %v8554_v27 }
 0x63e   : > { %v3759_v20 = vpop.f32.mrf.mxu2  ;;  %v3424_v14 = vpop.f32.mrf.mxu0 }
 0x63f   : > { %v3760_v9 = vadd.f32 %v3759_v20, %v3591_v46  ;;  %v3593_v22 = vpop.f32.mrf.mxu1 }
 0x640   : > { %v3928_v17 = vpop.f32.mrf.mxu3  ;;  %v3594_v11 = vadd.f32 %v3593_v22, %v3424_v14 }
 0x641   : > { %v8556_v8 = vadd.f32 %v3928_v17, %v3760_v9  ;;  %3463 = vmatmul.bf16.gmra.mxu0 %v9675_v62  ;;  %v9681_v62 = vld [vmem:[#allocation152_spill] sm:$0xff] }
 0x642   : > { %3632 = vmatmul.bf16.gmra.mxu1 %v9676_v33 }
 0x643   : > { %9674 = vst [vmem:[#allocation144_spill] sm:$0xff] %v8556_v8  ;;  %3801 = vmatmul.bf16.gmra.mxu2 %v9677_v31  ;;  %v9682_v31 = vld [vmem:[#allocation153_spill] sm:$0xff] }
 0x645   : > { %3970 = vmatmul.bf16.gmra.mxu3 %v9678_v12  ;;  %v9683_v12 = vld [vmem:[#allocation154_spill] sm:$0xff] }
 0x646   : > { %v3762_v29 = vpop.f32.mrf.mxu2  ;;  %v3426_v32 = vpop.f32.mrf.mxu0 }
 0x647   : > { %v3763_v19 = vadd.f32 %v3762_v29, %v3594_v11  ;;  %v3595_v43 = vpop.f32.mrf.mxu1  ;;  %v9684_v11 = vld [vmem:[#allocation155_spill] sm:$0xff] }
 0x648   : > { %v3931_v47 = vpop.f32.mrf.mxu3  ;;  %v3596_v46 = vadd.f32 %v3595_v43, %v3426_v32 }
 0x649   : > { %v8562_v20 = vadd.f32 %v3931_v47, %v3763_v19 }
 0x64b   : > { %9679 = vst [vmem:[#allocation145_spill] sm:$0xff] %v8562_v20 }
 0x64e   : > { %v3764_v27 = vpop.f32.mrf.mxu2  ;;  %v3429_v14 = vpop.f32.mrf.mxu0 }
 0x64f   : > { %v3765_v9 = vadd.f32 %v3764_v27, %v3596_v46  ;;  %v3598_v22 = vpop.f32.mrf.mxu1 }
 0x650   : > { %v3933_v17 = vpop.f32.mrf.mxu3  ;;  %v3599_v33 = vadd.f32 %v3598_v22, %v3429_v14 }
 0x651   : > { %v8564_v8 = vadd.f32 %v3933_v17, %v3765_v9  ;;  %3468 = vmatmul.bf16.gmra.mxu0 %v9681_v62 }
 0x652   : > { %3637 = vmatmul.bf16.gmra.mxu1 %v9682_v31 }
 0x653   : > { %9680 = vst [vmem:[#allocation150_spill] sm:$0xff] %v8564_v8  ;;  %3806 = vmatmul.bf16.gmra.mxu2 %v9683_v12 }
 0x655   : > { %3975 = vmatmul.bf16.gmra.mxu3 %v9684_v11 }
 0x656   : > { %v3767_v29 = vpop.f32.mrf.mxu2  ;;  %v3431_v32 = vpop.f32.mrf.mxu0 }
 0x657   : > { %v3768_v19 = vadd.f32 %v3767_v29, %v3599_v33  ;;  %v3600_v43 = vpop.f32.mrf.mxu1 }
 0x658   : > { %v3936_v47 = vpop.f32.mrf.mxu3  ;;  %v3601_v46 = vadd.f32 %v3600_v43, %v3431_v32 }
 0x659   : > { %v8570_v27 = vadd.f32 %v3936_v47, %v3768_v19 }
 0x65e   : > { %v3769_v20 = vpop.f32.mrf.mxu2  ;;  %v3434_v14 = vpop.f32.mrf.mxu0 }
 0x65f   : > { %v3770_v9 = vadd.f32 %v3769_v20, %v3601_v46  ;;  %v3603_v22 = vpop.f32.mrf.mxu1 }
 0x660   : > { %v3938_v17 = vpop.f32.mrf.mxu3  ;;  %v3604_v31 = vadd.f32 %v3603_v22, %v3434_v14 }
 0x661   : > { %v8572_v8 = vadd.f32 %v3938_v17, %v3770_v9  ;;  %3473 = vmatmul.bf16.gmra.mxu0 %v7792_v61 }
 0x662   : > { %3642 = vmatmul.bf16.gmra.mxu1 %v7794_v41 }
 0x663   : > { %9685 = vst [vmem:[#allocation151_spill] sm:$0xff] %v8572_v8  ;;  %3811 = vmatmul.bf16.gmra.mxu2 %v7796_v60 }
 0x665   : > { %3980 = vmatmul.bf16.gmra.mxu3 %v7798_v35 }
 0x666   : > { %v3772_v33 = vpop.f32.mrf.mxu2  ;;  %v3436_v47 = vpop.f32.mrf.mxu0 }
 0x667   : > { %v3773_v29 = vadd.f32 %v3772_v33, %v3604_v31  ;;  %v3605_v32 = vpop.f32.mrf.mxu1 }
 0x668   : > { %v3941_v19 = vpop.f32.mrf.mxu3  ;;  %v3606_v43 = vadd.f32 %v3605_v32, %v3436_v47 }
 0x669   : > { %v8578_v20 = vadd.f32 %v3941_v19, %v3773_v29 }
 0x66e   : > { %v3774_v46 = vpop.f32.mrf.mxu2  ;;  %v3439_v14 = vpop.f32.mrf.mxu0 }
 0x66f   : > { %v3775_v9 = vadd.f32 %v3774_v46, %v3606_v43  ;;  %v3608_v22 = vpop.f32.mrf.mxu1 }
 0x670   : > { %v3943_v17 = vpop.f32.mrf.mxu3  ;;  %v3609_v41 = vadd.f32 %v3608_v22, %v3439_v14 }
 0x671   : > { %v8580_v8 = vadd.f32 %v3943_v17, %v3775_v9  ;;  %3994 = vmatmul.bf16.vlgmr.msrb.gmra.mxu0 %v7266_v52 }
 0x672   : > { %4163 = vmatmul.bf16.vlgmr.msrb.gmra.mxu1 %v7268_v53 }
 0x673   : > { %4332 = vmatmul.bf16.vlgmr.msrb.gmra.mxu2 %v7270_v54 }
 0x675   : > { %4501 = vmatmul.bf16.vlgmr.msrb.gmra.mxu3 %v7272_v55 }
 0x676   : > { %v3777_v31 = vpop.f32.mrf.mxu2  ;;  %v3441_v19 = vpop.f32.mrf.mxu0 }
 0x677   : > { %v3778_v33 = vadd.f32 %v3777_v31, %v3609_v41  ;;  %v3610_v47 = vpop.f32.mrf.mxu1 }
 0x678   : > { %v3946_v29 = vpop.f32.mrf.mxu3  ;;  %v3611_v43 = vadd.f32 %v3610_v47, %v3441_v19 }
 0x679   : > { %v8586_v32 = vadd.f32 %v3946_v29, %v3778_v33 }
 0x67e   : > { %v3779_v46 = vpop.f32.mrf.mxu2  ;;  %v3444_v14 = vpop.f32.mrf.mxu0 }
 0x67f   : > { %v3780_v9 = vadd.f32 %v3779_v46, %v3611_v43  ;;  %v3613_v22 = vpop.f32.mrf.mxu1 }
 0x680   : > { %v3948_v17 = vpop.f32.mrf.mxu3  ;;  %v3614_v53 = vadd.f32 %v3613_v22, %v3444_v14 }
 0x681   : > { %v8588_v52 = vadd.f32 %v3948_v17, %v3780_v9  ;;  %3999 = vmatmul.bf16.gmra.mxu0 %v7278_v0 }
 0x682   : > { %4168 = vmatmul.bf16.gmra.mxu1 %v7280_v1 }
 0x683   : > { %4337 = vmatmul.bf16.gmra.mxu2 %v9539_v25 }
 0x685   : > { %4506 = vmatmul.bf16.gmra.mxu3 %v9540_v7 }
 0x686   : > { %v3782_v54 = vpop.f32.mrf.mxu2  ;;  %v3446_v31 = vpop.f32.mrf.mxu0 }
 0x687   : > { %v3783_v55 = vadd.f32 %v3782_v54, %v3614_v53  ;;  %v3615_v33 = vpop.f32.mrf.mxu1 }
 0x688   : > { %v3951_v41 = vpop.f32.mrf.mxu3  ;;  %v3616_v19 = vadd.f32 %v3615_v33, %v3446_v31 }
 0x689   : > { %v8594_v29 = vadd.f32 %v3951_v41, %v3783_v55 }
 0x68e   : > { %v3784_v47 = vpop.f32.mrf.mxu2  ;;  %v3449_v9 = vpop.f32.mrf.mxu0 }
 0x68f   : > { %v3785_v43 = vadd.f32 %v3784_v47, %v3616_v19  ;;  %v3618_v17 = vpop.f32.mrf.mxu1 }
 0x690   : > { %v3953_v46 = vpop.f32.mrf.mxu3  ;;  %v3619_v1 = vadd.f32 %v3618_v17, %v3449_v9 }
 0x691   : > { %v8596_v0 = vadd.f32 %v3953_v46, %v3785_v43  ;;  %4004 = vmatmul.bf16.gmra.mxu0 %v9542_v24 }
 0x692   : > { %4173 = vmatmul.bf16.gmra.mxu1 %v9544_v30 }
 0x693   : > { %4342 = vmatmul.bf16.gmra.mxu2 %v9545_v44 }
 0x695   : > { %4511 = vmatmul.bf16.gmra.mxu3 %v9546_v3 }
 0x696   : > { %v3787_v25 = vpop.f32.mrf.mxu2  ;;  %v3451_v22 = vpop.f32.mrf.mxu0 }
 0x697   : > { %v3788_v7 = vadd.f32 %v3787_v25, %v3619_v1  ;;  %v3620_v53 = vpop.f32.mrf.mxu1 }
 0x698   : > { %v3956_v14 = vpop.f32.mrf.mxu3  ;;  %v3621_v55 = vadd.f32 %v3620_v53, %v3451_v22 }
 0x699   : > { %v8602_v54 = vadd.f32 %v3956_v14, %v3788_v7 }
 0x69e   : > { %v3789_v41 = vpop.f32.mrf.mxu2  ;;  %v3454_v19 = vpop.f32.mrf.mxu0 }
 0x69f   : > { %v3790_v31 = vadd.f32 %v3789_v41, %v3621_v55  ;;  %v3623_v47 = vpop.f32.mrf.mxu1 }
 0x6a0   : > { %v3958_v33 = vpop.f32.mrf.mxu3  ;;  %v3624_v30 = vadd.f32 %v3623_v47, %v3454_v19 }
 0x6a1   : > { %v8604_v24 = vadd.f32 %v3958_v33, %v3790_v31  ;;  %4009 = vmatmul.bf16.gmra.mxu0 %v7310_v36 }
 0x6a2   : > { %4178 = vmatmul.bf16.gmra.mxu1 %v7312_v37 }
 0x6a3   : > { %4347 = vmatmul.bf16.gmra.mxu2 %v7314_v38 }
 0x6a5   : > { %4516 = vmatmul.bf16.gmra.mxu3 %v7316_v39 }
 0x6a6   : > { %v3792_v44 = vpop.f32.mrf.mxu2  ;;  %v3456_v46 = vpop.f32.mrf.mxu0 }
 0x6a7   : > { %v3793_v3 = vadd.f32 %v3792_v44, %v3624_v30  ;;  %v3625_v9 = vpop.f32.mrf.mxu1 }
 0x6a8   : > { %v3961_v43 = vpop.f32.mrf.mxu3  ;;  %v3626_v1 = vadd.f32 %v3625_v9, %v3456_v46 }
 0x6a9   : > { %v8610_v17 = vadd.f32 %v3961_v43, %v3793_v3 }
 0x6ae   : > { %v3794_v25 = vpop.f32.mrf.mxu2  ;;  %v3459_v22 = vpop.f32.mrf.mxu0 }
 0x6af   : > { %v3795_v7 = vadd.f32 %v3794_v25, %v3626_v1  ;;  %v3628_v53 = vpop.f32.mrf.mxu1 }
 0x6b0   : > { %v3963_v14 = vpop.f32.mrf.mxu3  ;;  %v3629_v37 = vadd.f32 %v3628_v53, %v3459_v22 }
 0x6b1   : > { %v8612_v36 = vadd.f32 %v3963_v14, %v3795_v7  ;;  %4014 = vmatmul.bf16.gmra.mxu0 %v7322_v48 }
 0x6b2   : > { %4183 = vmatmul.bf16.gmra.mxu1 %v7324_v49 }
 0x6b3   : > { %4352 = vmatmul.bf16.gmra.mxu2 %v7326_v50 }
 0x6b5   : > { %4521 = vmatmul.bf16.gmra.mxu3 %v7328_v51 }
 0x6b6   : > { %v3797_v38 = vpop.f32.mrf.mxu2  ;;  %v3461_v41 = vpop.f32.mrf.mxu0 }
 0x6b7   : > { %v3798_v39 = vadd.f32 %v3797_v38, %v3629_v37  ;;  %v3630_v31 = vpop.f32.mrf.mxu1 }
 0x6b8   : > { %v3966_v55 = vpop.f32.mrf.mxu3  ;;  %v3631_v19 = vadd.f32 %v3630_v31, %v3461_v41 }
 0x6b9   : > { %v8618_v33 = vadd.f32 %v3966_v55, %v3798_v39 }
 0x6be   : > { %v3799_v47 = vpop.f32.mrf.mxu2  ;;  %v3464_v3 = vpop.f32.mrf.mxu0 }
 0x6bf   : > { %v3800_v30 = vadd.f32 %v3799_v47, %v3631_v19  ;;  %v3633_v43 = vpop.f32.mrf.mxu1 }
 0x6c0   : > { %v3968_v44 = vpop.f32.mrf.mxu3  ;;  %v3634_v49 = vadd.f32 %v3633_v43, %v3464_v3 }
 0x6c1   : > { %v8620_v48 = vadd.f32 %v3968_v44, %v3800_v30  ;;  %4019 = vmatmul.bf16.gmra.mxu0 %v7334_v4 }
 0x6c2   : > { %4188 = vmatmul.bf16.gmra.mxu1 %v7336_v5 }
 0x6c3   : > { %4357 = vmatmul.bf16.gmra.mxu2 %v9547_v42 }
 0x6c5   : > { %4526 = vmatmul.bf16.gmra.mxu3 %v9548_v6 }
 0x6c6   : > { %v3802_v50 = vpop.f32.mrf.mxu2  ;;  %v3466_v9 = vpop.f32.mrf.mxu0 }
 0x6c7   : > { %v3803_v51 = vadd.f32 %v3802_v50, %v3634_v49  ;;  %v3635_v1 = vpop.f32.mrf.mxu1 }
 0x6c8   : > { %v3971_v46 = vpop.f32.mrf.mxu3  ;;  %v3636_v7 = vadd.f32 %v3635_v1, %v3466_v9 }
 0x6c9   : > { %v8626_v25 = vadd.f32 %v3971_v46, %v3803_v51 }
 0x6ce   : > { %v3804_v14 = vpop.f32.mrf.mxu2  ;;  %v3469_v37 = vpop.f32.mrf.mxu0 }
 0x6cf   : > { %v3805_v22 = vadd.f32 %v3804_v14, %v3636_v7  ;;  %v3638_v38 = vpop.f32.mrf.mxu1 }
 0x6d0   : > { %v3973_v53 = vpop.f32.mrf.mxu3  ;;  %v3639_v5 = vadd.f32 %v3638_v38, %v3469_v37 }
 0x6d1   : > { %v8628_v4 = vadd.f32 %v3973_v53, %v3805_v22  ;;  %4024 = vmatmul.bf16.gmra.mxu0 %v9550_v26 }
 0x6d2   : > { %4193 = vmatmul.bf16.gmra.mxu1 %v9552_v13 }
 0x6d3   : > { %4362 = vmatmul.bf16.gmra.mxu2 %v9553_v40 }
 0x6d5   : > { %4531 = vmatmul.bf16.gmra.mxu3 %v9554_v63 }
 0x6d6   : > { %v3807_v42 = vpop.f32.mrf.mxu2  ;;  %v3471_v55 = vpop.f32.mrf.mxu0 }
 0x6d7   : > { %v3808_v6 = vadd.f32 %v3807_v42, %v3639_v5  ;;  %v3640_v41 = vpop.f32.mrf.mxu1 }
 0x6d8   : > { %v3976_v39 = vpop.f32.mrf.mxu3  ;;  %v3641_v19 = vadd.f32 %v3640_v41, %v3471_v55 }
 0x6d9   : > { %v8634_v31 = vadd.f32 %v3976_v39, %v3808_v6 }
 0x6de   : > { %v3809_v47 = vpop.f32.mrf.mxu2  ;;  %v3474_v3 = vpop.f32.mrf.mxu0 }
 0x6df   : > { %v3810_v30 = vadd.f32 %v3809_v47, %v3641_v19  ;;  %v3643_v43 = vpop.f32.mrf.mxu1 }
 0x6e0   : > { %v3978_v44 = vpop.f32.mrf.mxu3  ;;  %v3644_v13 = vadd.f32 %v3643_v43, %v3474_v3 }
 0x6e1   : > { %v8636_v26 = vadd.f32 %v3978_v44, %v3810_v30  ;;  %4029 = vmatmul.bf16.gmra.mxu0 %v7366_v56 }
 0x6e2   : > { %4198 = vmatmul.bf16.gmra.mxu1 %v7368_v57 }
 0x6e3   : > { %4367 = vmatmul.bf16.gmra.mxu2 %v7370_v58 }
 0x6e5   : > { %4536 = vmatmul.bf16.gmra.mxu3 %v7372_v59  ;;  %v6850_v59 = vld [vmem:[%s7894_s10] sm:$0xf] }
 0x6e6   : > { %v3812_v40 = vpop.f32.mrf.mxu2  ;;  %v3476_v50 = vpop.f32.mrf.mxu0  ;;  %v8651_v37 = vperm.slane %v6850_v59, 2  ;;  %v8653_v42 = vperm.slane %v6850_v59, 3 }
 0x6e7   : > { %v3813_v63 = vadd.f32 %v3812_v40, %v3644_v13  ;;  %v3645_v51 = vpop.f32.mrf.mxu1  ;;  %v9686_v40 = vld [vmem:[#allocation28_spill] sm:$0xff] }
 0x6e8   : > { %v3981_v49 = vpop.f32.mrf.mxu3  ;;  %v3646_v9 = vadd.f32 %v3645_v51, %v3476_v50  ;;  %v5449_v43 = vadd.f32 %v8651_v37, %v8356_v28 }
 0x6e9   : > { %v8642_v46 = vadd.f32 %v3981_v49, %v3813_v63  ;;  %v9687_v63 = vld [vmem:[#allocation29_spill] sm:$0xff]  ;;  %v9688_v49 = vld [vmem:[#allocation30_spill] sm:$0xff] }
 0x6ee   : > { %v3814_v1 = vpop.f32.mrf.mxu2  ;;  %v3995_v22 = vpop.f32.mrf.mxu0 }
 0x6ef   : > { %v3815_v7 = vadd.f32 %v3814_v1, %v3646_v9  ;;  %v4164_v56 = vpop.f32.mrf.mxu1 }
 0x6f0   : > { %v3983_v14 = vpop.f32.mrf.mxu3  ;;  %v4165_v57 = vadd.f32 %v4164_v56, %v3995_v22  ;;  %v9689_v22 = vld [vmem:[#allocation31_spill] sm:$0xff] }
 0x6f1   : > { %v8644_v53 = vadd.f32 %v3983_v14, %v3815_v7  ;;  %4034 = vmatmul.bf16.gmra.mxu0 %v7378_v16  ;;  %v5445_v16 = vadd.f32 %v8651_v37, %v8354_v23  ;;  %v5453_v28 = vadd.f32 %v8651_v37, %v9689_v22 }
 0x6f2   : > { %4203 = vmatmul.bf16.gmra.mxu1 %v7380_v18 }
 0x6f3   : > { %4372 = vmatmul.bf16.gmra.mxu2 %v9555_v10 }
 0x6f5   : > { %4541 = vmatmul.bf16.gmra.mxu3 %v9556_v45 }
 0x6f6   : > { %v4333_v58 = vpop.f32.mrf.mxu2  ;;  %v3997_v6 = vpop.f32.mrf.mxu0 }
 0x6f7   : > { %v4334_v38 = vadd.f32 %v4333_v58, %v4165_v57  ;;  %v4166_v39 = vpop.f32.mrf.mxu1 }
 0x6f8   : > { %v4502_v5 = vpop.f32.mrf.mxu3  ;;  %v4167_v41 = vadd.f32 %v4166_v39, %v3997_v6 }
 0x6f9   : > { %v4503_v55 = vadd.f32 %v4502_v5, %v4334_v38 }
 0x6fb   : > { %v5446_v18 = vadd.f32 %v8653_v42, %v4503_v55 }
 0x6fd   : > { %v5700_v10 = vpack.c.bf16 %v5446_v18, %v5445_v16  ;;  %v9690_v16 = vld [vmem:[#allocation32_spill] sm:$0xff] }
 0x6fe   : > { %v4335_v19 = vpop.f32.mrf.mxu2  ;;  %v4000_v30 = vpop.f32.mrf.mxu0  ;;  %v9691_v18 = vld [vmem:[#allocation36_spill] sm:$0xff] }
 0x6ff   : > { %5828 = vst [vmem:[%s7907_s19 + $0x8] sm:$0xff] %v5700_v10  ;;  %v4336_v45 = vadd.f32 %v4335_v19, %v4167_v41  ;;  %v4169_v44 = vpop.f32.mrf.mxu1  ;;  %v5457_v10 = vadd.f32 %v8651_v37, %v9691_v18 }
 0x700   : > { %v4504_v47 = vpop.f32.mrf.mxu3  ;;  %v4170_v23 = vadd.f32 %v4169_v44, %v4000_v30  ;;  %v9694_v30 = vld [vmem:[#allocation35_spill] sm:$0xff] }
 0x701   : > { %v4505_v3 = vadd.f32 %v4504_v47, %v4336_v45  ;;  %4039 = vmatmul.bf16.gmra.mxu0 %v9557_v34  ;;  %v9692_v45 = vld [vmem:[#allocation33_spill] sm:$0xff]  ;;  %v9693_v47 = vld [vmem:[#allocation34_spill] sm:$0xff] }
 0x702   : > { %4208 = vmatmul.bf16.gmra.mxu1 %v9686_v40 }
 0x703   : > { %v5450_v13 = vadd.f32 %v8653_v42, %v4505_v3  ;;  %4377 = vmatmul.bf16.gmra.mxu2 %v9687_v63 }
 0x705   : > { %4546 = vmatmul.bf16.gmra.mxu3 %v9688_v49  ;;  %v5702_v50 = vpack.c.bf16 %v5450_v13, %v5449_v43  ;;  %v9695_v49 = vld [vmem:[#allocation37_spill] sm:$0xff] }
 0x706   : > { %v4338_v51 = vpop.f32.mrf.mxu2  ;;  %v4002_v7 = vpop.f32.mrf.mxu0 }
 0x707   : > { %5830 = vst [vmem:[%s7907_s19 + $0x18] sm:$0xff] %v5702_v50  ;;  %v4339_v9 = vadd.f32 %v4338_v51, %v4170_v23  ;;  %v4171_v34 = vpop.f32.mrf.mxu1  ;;  %v5461_v50 = vadd.f32 %v8651_v37, %v9695_v49 }
 0x708   : > { %v4507_v1 = vpop.f32.mrf.mxu3  ;;  %v4172_v58 = vadd.f32 %v4171_v34, %v4002_v7 }
 0x709   : > { %v4508_v14 = vadd.f32 %v4507_v1, %v4339_v9 }
 0x70b   : > { %v5454_v56 = vadd.f32 %v8653_v42, %v4508_v14 }
 0x70d   : > { %v5704_v57 = vpack.c.bf16 %v5454_v56, %v5453_v28 }
 0x70e   : > { %v4340_v59 = vpop.f32.mrf.mxu2  ;;  %v4005_v6 = vpop.f32.mrf.mxu0 }
 0x70f   : > { %5832 = vst [vmem:[%s7907_s19 + $0x28] sm:$0xff] %v5704_v57  ;;  %v4341_v38 = vadd.f32 %v4340_v59, %v4172_v58  ;;  %v4174_v39 = vpop.f32.mrf.mxu1  ;;  %v9696_v57 = vld [vmem:[#allocation38_spill] sm:$0xff] }
 0x710   : > { %v4509_v5 = vpop.f32.mrf.mxu3  ;;  %v4175_v19 = vadd.f32 %v4174_v39, %v4005_v6  ;;  %v9697_v58 = vld [vmem:[#allocation42_spill] sm:$0xff]  ;;  %v9698_v6 = vld [vmem:[#allocation39_spill] sm:$0xff]  ;;  %v9699_v39 = vld [vmem:[#allocation40_spill] sm:$0xff] }
 0x711   : > { %v4510_v55 = vadd.f32 %v4509_v5, %v4341_v38  ;;  %4044 = vmatmul.bf16.gmra.mxu0 %v9690_v16  ;;  %v5465_v59 = vadd.f32 %v8651_v37, %v9697_v58 }
 0x712   : > { %4213 = vmatmul.bf16.gmra.mxu1 %v9692_v45 }
 0x713   : > { %v5458_v41 = vadd.f32 %v8653_v42, %v4510_v55  ;;  %4382 = vmatmul.bf16.gmra.mxu2 %v9693_v47  ;;  %v9700_v55 = vld [vmem:[#allocation41_spill] sm:$0xff] }
 0x715   : > { %4551 = vmatmul.bf16.gmra.mxu3 %v9694_v30  ;;  %v5706_v44 = vpack.c.bf16 %v5458_v41, %v5457_v10  ;;  %v9701_v30 = vld [vmem:[#allocation43_spill] sm:$0xff] }
 0x716   : > { %v4343_v3 = vpop.f32.mrf.mxu2  ;;  %v4007_v23 = vpop.f32.mrf.mxu0 }
 0x717   : > { %5834 = vst [vmem:[%s7907_s19 + $0x38] sm:$0xff] %v5706_v44  ;;  %v4344_v43 = vadd.f32 %v4343_v3, %v4175_v19  ;;  %v4176_v40 = vpop.f32.mrf.mxu1  ;;  %v5469_v44 = vadd.f32 %v8651_v37, %v9701_v30 }
 0x718   : > { %v4512_v13 = vpop.f32.mrf.mxu3  ;;  %v4177_v1 = vadd.f32 %v4176_v40, %v4007_v23 }
 0x719   : > { %v4513_v63 = vadd.f32 %v4512_v13, %v4344_v43 }
 0x71b   : > { %v5462_v51 = vadd.f32 %v8653_v42, %v4513_v63 }
 0x71d   : > { %v5708_v9 = vpack.c.bf16 %v5462_v51, %v5461_v50 }
 0x71e   : > { %v4345_v7 = vpop.f32.mrf.mxu2  ;;  %v4010_v22 = vpop.f32.mrf.mxu0 }
 0x71f   : > { %5836 = vst [vmem:[%s7907_s19 + $0x48] sm:$0xff] %v5708_v9  ;;  %v4346_v34 = vadd.f32 %v4345_v7, %v4177_v1  ;;  %v4179_v28 = vpop.f32.mrf.mxu1  ;;  %v9702_v9 = vld [vmem:[#allocation44_spill] sm:$0xff] }
 0x720   : > { %v4514_v14 = vpop.f32.mrf.mxu3  ;;  %v4180_v5 = vadd.f32 %v4179_v28, %v4010_v22  ;;  %v9703_v1 = vld [vmem:[#allocation48_spill] sm:$0xff]  ;;  %v9704_v22 = vld [vmem:[#allocation45_spill] sm:$0xff]  ;;  %v9705_v28 = vld [vmem:[#allocation46_spill] sm:$0xff] }
 0x721   : > { %v4515_v56 = vadd.f32 %v4514_v14, %v4346_v34  ;;  %4049 = vmatmul.bf16.gmra.mxu0 %v9696_v57  ;;  %v5473_v7 = vadd.f32 %v8651_v37, %v9703_v1 }
 0x722   : > { %4218 = vmatmul.bf16.gmra.mxu1 %v9698_v6 }
 0x723   : > { %v5466_v38 = vadd.f32 %v8653_v42, %v4515_v56  ;;  %4387 = vmatmul.bf16.gmra.mxu2 %v9699_v39  ;;  %v9706_v56 = vld [vmem:[#allocation47_spill] sm:$0xff] }
 0x725   : > { %4556 = vmatmul.bf16.gmra.mxu3 %v9700_v55  ;;  %v5710_v16 = vpack.c.bf16 %v5466_v38, %v5465_v59  ;;  %v9707_v55 = vld [vmem:[#allocation49_spill] sm:$0xff] }
 0x726   : > { %v4348_v18 = vpop.f32.mrf.mxu2  ;;  %v4012_v19 = vpop.f32.mrf.mxu0 }
 0x727   : > { %5838 = vst [vmem:[%s7907_s19 + $0x58] sm:$0xff] %v5710_v16  ;;  %v4349_v10 = vadd.f32 %v4348_v18, %v4180_v5  ;;  %v4181_v45 = vpop.f32.mrf.mxu1  ;;  %v5477_v16 = vadd.f32 %v8651_v37, %v9707_v55 }
 0x728   : > { %v4517_v41 = vpop.f32.mrf.mxu3  ;;  %v4182_v13 = vadd.f32 %v4181_v45, %v4012_v19 }
 0x729   : > { %v4518_v47 = vadd.f32 %v4517_v41, %v4349_v10 }
 0x72b   : > { %v5470_v3 = vadd.f32 %v8653_v42, %v4518_v47 }
 0x72d   : > { %v5712_v43 = vpack.c.bf16 %v5470_v3, %v5469_v44 }
 0x72e   : > { %v4350_v23 = vpop.f32.mrf.mxu2  ;;  %v4015_v49 = vpop.f32.mrf.mxu0 }
 0x72f   : > { %5840 = vst [vmem:[%s7907_s19 + $0x68] sm:$0xff] %v5712_v43  ;;  %v4351_v40 = vadd.f32 %v4350_v23, %v4182_v13  ;;  %v4184_v50 = vpop.f32.mrf.mxu1  ;;  %v9708_v43 = vld [vmem:[#allocation50_spill] sm:$0xff] }
 0x730   : > { %v4519_v63 = vpop.f32.mrf.mxu3  ;;  %v4185_v14 = vadd.f32 %v4184_v50, %v4015_v49  ;;  %v9709_v13 = vld [vmem:[#allocation54_spill] sm:$0xff]  ;;  %v9710_v49 = vld [vmem:[#allocation51_spill] sm:$0xff]  ;;  %v9711_v50 = vld [vmem:[#allocation52_spill] sm:$0xff] }
 0x731   : > { %v4520_v51 = vadd.f32 %v4519_v63, %v4351_v40  ;;  %4054 = vmatmul.bf16.gmra.mxu0 %v9702_v9  ;;  %v5481_v23 = vadd.f32 %v8651_v37, %v9709_v13 }
 0x732   : > { %4223 = vmatmul.bf16.gmra.mxu1 %v9704_v22 }
 0x733   : > { %v5474_v34 = vadd.f32 %v8653_v42, %v4520_v51  ;;  %4392 = vmatmul.bf16.gmra.mxu2 %v9705_v28  ;;  %v9712_v51 = vld [vmem:[#allocation53_spill] sm:$0xff] }
 0x735   : > { %4561 = vmatmul.bf16.gmra.mxu3 %v9706_v56  ;;  %v5714_v57 = vpack.c.bf16 %v5474_v34, %v5473_v7  ;;  %v9713_v56 = vld [vmem:[#allocation55_spill] sm:$0xff] }
 0x736   : > { %v4353_v58 = vpop.f32.mrf.mxu2  ;;  %v4017_v5 = vpop.f32.mrf.mxu0 }
 0x737   : > { %5842 = vst [vmem:[%s7907_s19 + $0x78] sm:$0xff] %v5714_v57  ;;  %v4354_v59 = vadd.f32 %v4353_v58, %v4185_v14  ;;  %v4186_v6 = vpop.f32.mrf.mxu1  ;;  %v5485_v57 = vadd.f32 %v8651_v37, %v9713_v56 }
 0x738   : > { %v4522_v38 = vpop.f32.mrf.mxu3  ;;  %v4187_v41 = vadd.f32 %v4186_v6, %v4017_v5 }
 0x739   : > { %v4523_v39 = vadd.f32 %v4522_v38, %v4354_v59 }
 0x73b   : > { %v5478_v18 = vadd.f32 %v8653_v42, %v4523_v39 }
 0x73d   : > { %v5716_v10 = vpack.c.bf16 %v5478_v18, %v5477_v16 }
 0x73e   : > { %v4355_v19 = vpop.f32.mrf.mxu2  ;;  %v4020_v30 = vpop.f32.mrf.mxu0 }
 0x73f   : > { %5844 = vst [vmem:[%s7907_s19 + $0x88] sm:$0xff] %v5716_v10  ;;  %v4356_v45 = vadd.f32 %v4355_v19, %v4187_v41  ;;  %v4189_v44 = vpop.f32.mrf.mxu1  ;;  %v9714_v10 = vld [vmem:[#allocation56_spill] sm:$0xff] }
 0x740   : > { %v4524_v47 = vpop.f32.mrf.mxu3  ;;  %v4190_v63 = vadd.f32 %v4189_v44, %v4020_v30  ;;  %v9715_v41 = vld [vmem:[#allocation60_spill] sm:$0xff]  ;;  %v9716_v30 = vld [vmem:[#allocation57_spill] sm:$0xff]  ;;  %v9717_v44 = vld [vmem:[#allocation58_spill] sm:$0xff] }
 0x741   : > { %v4525_v3 = vadd.f32 %v4524_v47, %v4356_v45  ;;  %4059 = vmatmul.bf16.gmra.mxu0 %v9708_v43  ;;  %v5489_v19 = vadd.f32 %v8651_v37, %v9715_v41 }
 0x742   : > { %4228 = vmatmul.bf16.gmra.mxu1 %v9710_v49 }
 0x743   : > { %v5482_v40 = vadd.f32 %v8653_v42, %v4525_v3  ;;  %4397 = vmatmul.bf16.gmra.mxu2 %v9711_v50  ;;  %v9718_v3 = vld [vmem:[#allocation59_spill] sm:$0xff] }
 0x745   : > { %4566 = vmatmul.bf16.gmra.mxu3 %v9712_v51  ;;  %v5718_v9 = vpack.c.bf16 %v5482_v40, %v5481_v23  ;;  %v9719_v51 = vld [vmem:[#allocation61_spill] sm:$0xff] }
 0x746   : > { %v4358_v1 = vpop.f32.mrf.mxu2  ;;  %v4022_v14 = vpop.f32.mrf.mxu0 }
 0x747   : > { %5846 = vst [vmem:[%s7907_s19 + $0x98] sm:$0xff] %v5718_v9  ;;  %v4359_v7 = vadd.f32 %v4358_v1, %v4190_v63  ;;  %v4191_v22 = vpop.f32.mrf.mxu1  ;;  %v5493_v9 = vadd.f32 %v8651_v37, %v9719_v51 }
 0x748   : > { %v4527_v34 = vpop.f32.mrf.mxu3  ;;  %v4192_v38 = vadd.f32 %v4191_v22, %v4022_v14 }
 0x749   : > { %v4528_v28 = vadd.f32 %v4527_v34, %v4359_v7 }
 0x74b   : > { %v5486_v58 = vadd.f32 %v8653_v42, %v4528_v28 }
 0x74d   : > { %v5720_v59 = vpack.c.bf16 %v5486_v58, %v5485_v57 }
 0x74e   : > { %v4360_v5 = vpop.f32.mrf.mxu2  ;;  %v4025_v55 = vpop.f32.mrf.mxu0 }
 0x74f   : > { %5848 = vst [vmem:[%s7907_s19 + $0xa8] sm:$0xff] %v5720_v59  ;;  %v4361_v6 = vadd.f32 %v4360_v5, %v4192_v38  ;;  %v4194_v16 = vpop.f32.mrf.mxu1  ;;  %v9720_v59 = vld [vmem:[#allocation62_spill] sm:$0xff] }
 0x750   : > { %v4529_v39 = vpop.f32.mrf.mxu3  ;;  %v4195_v47 = vadd.f32 %v4194_v16, %v4025_v55  ;;  %v9721_v38 = vld [vmem:[#allocation66_spill] sm:$0xff]  ;;  %v9722_v55 = vld [vmem:[#allocation63_spill] sm:$0xff]  ;;  %v9723_v16 = vld [vmem:[#allocation64_spill] sm:$0xff] }
 0x751   : > { %v4530_v18 = vadd.f32 %v4529_v39, %v4361_v6  ;;  %4064 = vmatmul.bf16.gmra.mxu0 %v9714_v10  ;;  %v5497_v5 = vadd.f32 %v8651_v37, %v9721_v38 }
 0x752   : > { %4233 = vmatmul.bf16.gmra.mxu1 %v9716_v30 }
 0x753   : > { %v5490_v45 = vadd.f32 %v8653_v42, %v4530_v18  ;;  %4402 = vmatmul.bf16.gmra.mxu2 %v9717_v44  ;;  %v9724_v18 = vld [vmem:[#allocation65_spill] sm:$0xff] }
 0x755   : > { %4571 = vmatmul.bf16.gmra.mxu3 %v9718_v3  ;;  %v5722_v43 = vpack.c.bf16 %v5490_v45, %v5489_v19  ;;  %v9725_v3 = vld [vmem:[#allocation67_spill] sm:$0xff] }
 0x756   : > { %v4363_v13 = vpop.f32.mrf.mxu2  ;;  %v4027_v63 = vpop.f32.mrf.mxu0 }
 0x757   : > { %5850 = vst [vmem:[%s7907_s19 + $0xb8] sm:$0xff] %v5722_v43  ;;  %v4364_v23 = vadd.f32 %v4363_v13, %v4195_v47  ;;  %v4196_v49 = vpop.f32.mrf.mxu1  ;;  %v5501_v43 = vadd.f32 %v8651_v37, %v9725_v3 }
 0x758   : > { %v4532_v40 = vpop.f32.mrf.mxu3  ;;  %v4197_v34 = vadd.f32 %v4196_v49, %v4027_v63 }
 0x759   : > { %v4533_v50 = vadd.f32 %v4532_v40, %v4364_v23 }
 0x75b   : > { %v5494_v1 = vadd.f32 %v8653_v42, %v4533_v50 }
 0x75d   : > { %v5724_v7 = vpack.c.bf16 %v5494_v1, %v5493_v9 }
 0x75e   : > { %v4365_v14 = vpop.f32.mrf.mxu2  ;;  %v4030_v56 = vpop.f32.mrf.mxu0 }
 0x75f   : > { %5852 = vst [vmem:[%s7907_s19 + $0xc8] sm:$0xff] %v5724_v7  ;;  %v4366_v22 = vadd.f32 %v4365_v14, %v4197_v34  ;;  %v4199_v57 = vpop.f32.mrf.mxu1  ;;  %v9726_v7 = vld [vmem:[#allocation68_spill] sm:$0xff] }
 0x760   : > { %v4534_v28 = vpop.f32.mrf.mxu3  ;;  %v4200_v39 = vadd.f32 %v4199_v57, %v4030_v56  ;;  %v9727_v34 = vld [vmem:[#allocation72_spill] sm:$0xff]  ;;  %v9728_v56 = vld [vmem:[#allocation69_spill] sm:$0xff]  ;;  %v9729_v57 = vld [vmem:[#allocation70_spill] sm:$0xff] }
 0x761   : > { %v4535_v58 = vadd.f32 %v4534_v28, %v4366_v22  ;;  %4069 = vmatmul.bf16.gmra.mxu0 %v9720_v59  ;;  %v5505_v14 = vadd.f32 %v8651_v37, %v9727_v34 }
 0x762   : > { %4238 = vmatmul.bf16.gmra.mxu1 %v9722_v55 }
 0x763   : > { %v5498_v6 = vadd.f32 %v8653_v42, %v4535_v58  ;;  %4407 = vmatmul.bf16.gmra.mxu2 %v9723_v16  ;;  %v9730_v58 = vld [vmem:[#allocation71_spill] sm:$0xff] }
 0x765   : > { %4576 = vmatmul.bf16.gmra.mxu3 %v9724_v18  ;;  %v5726_v10 = vpack.c.bf16 %v5498_v6, %v5497_v5  ;;  %v9731_v18 = vld [vmem:[#allocation73_spill] sm:$0xff] }
 0x766   : > { %v4368_v41 = vpop.f32.mrf.mxu2  ;;  %v4032_v47 = vpop.f32.mrf.mxu0 }
 0x767   : > { %5854 = vst [vmem:[%s7907_s19 + $0xd8] sm:$0xff] %v5726_v10  ;;  %v4369_v19 = vadd.f32 %v4368_v41, %v4200_v39  ;;  %v4201_v30 = vpop.f32.mrf.mxu1  ;;  %v5509_v10 = vadd.f32 %v8651_v37, %v9731_v18 }
 0x768   : > { %v4537_v45 = vpop.f32.mrf.mxu3  ;;  %v4202_v40 = vadd.f32 %v4201_v30, %v4032_v47 }
 0x769   : > { %v4538_v44 = vadd.f32 %v4537_v45, %v4369_v19 }
 0x76b   : > { %v5502_v13 = vadd.f32 %v8653_v42, %v4538_v44 }
 0x76d   : > { %v5728_v23 = vpack.c.bf16 %v5502_v13, %v5501_v43 }
 0x76e   : > { %v4370_v63 = vpop.f32.mrf.mxu2  ;;  %v4035_v51 = vpop.f32.mrf.mxu0 }
 0x76f   : > { %5856 = vst [vmem:[%s7907_s19 + $0xe8] sm:$0xff] %v5728_v23  ;;  %v4371_v49 = vadd.f32 %v4370_v63, %v4202_v40  ;;  %v4204_v9 = vpop.f32.mrf.mxu1  ;;  %v9732_v23 = vld [vmem:[#allocation74_spill] sm:$0xff] }
 0x770   : > { %v4539_v50 = vpop.f32.mrf.mxu3  ;;  %v4205_v28 = vadd.f32 %v4204_v9, %v4035_v51  ;;  %v9733_v40 = vld [vmem:[#allocation78_spill] sm:$0xff]  ;;  %v9734_v51 = vld [vmem:[#allocation75_spill] sm:$0xff]  ;;  %v9735_v9 = vld [vmem:[#allocation76_spill] sm:$0xff] }
 0x771   : > { %v4540_v1 = vadd.f32 %v4539_v50, %v4371_v49  ;;  %4074 = vmatmul.bf16.gmra.mxu0 %v9726_v7  ;;  %v5513_v63 = vadd.f32 %v8651_v37, %v9733_v40 }
 0x772   : > { %4243 = vmatmul.bf16.gmra.mxu1 %v9728_v56 }
 0x773   : > { %v5506_v22 = vadd.f32 %v8653_v42, %v4540_v1  ;;  %4412 = vmatmul.bf16.gmra.mxu2 %v9729_v57  ;;  %v9736_v1 = vld [vmem:[#allocation77_spill] sm:$0xff] }
 0x775   : > { %4581 = vmatmul.bf16.gmra.mxu3 %v9730_v58  ;;  %v5730_v59 = vpack.c.bf16 %v5506_v22, %v5505_v14  ;;  %v9737_v58 = vld [vmem:[#allocation79_spill] sm:$0xff] }
 0x776   : > { %v4373_v38 = vpop.f32.mrf.mxu2  ;;  %v4037_v39 = vpop.f32.mrf.mxu0 }
 0x777   : > { %5858 = vst [vmem:[%s7907_s19 + $0xf8] sm:$0xff] %v5730_v59  ;;  %v4374_v5 = vadd.f32 %v4373_v38, %v4205_v28  ;;  %v4206_v55 = vpop.f32.mrf.mxu1  ;;  %v5517_v59 = vadd.f32 %v8651_v37, %v9737_v58 }
 0x778   : > { %v4542_v6 = vpop.f32.mrf.mxu3  ;;  %v4207_v45 = vadd.f32 %v4206_v55, %v4037_v39 }
 0x779   : > { %v4543_v16 = vadd.f32 %v4542_v6, %v4374_v5 }
 0x77b   : > { %v5510_v41 = vadd.f32 %v8653_v42, %v4543_v16 }
 0x77d   : > { %v5732_v19 = vpack.c.bf16 %v5510_v41, %v5509_v10 }
 0x77e   : > { %v4375_v47 = vpop.f32.mrf.mxu2  ;;  %v4040_v3 = vpop.f32.mrf.mxu0 }
 0x77f   : > { %5860 = vst [vmem:[%s7907_s19 + $0x108] sm:$0xff] %v5732_v19  ;;  %v4376_v30 = vadd.f32 %v4375_v47, %v4207_v45  ;;  %v4209_v43 = vpop.f32.mrf.mxu1  ;;  %v9738_v19 = vld [vmem:[#allocation80_spill] sm:$0xff] }
 0x780   : > { %v4544_v44 = vpop.f32.mrf.mxu3  ;;  %v4210_v50 = vadd.f32 %v4209_v43, %v4040_v3  ;;  %v9739_v45 = vld [vmem:[#allocation84_spill] sm:$0xff]  ;;  %v9740_v3 = vld [vmem:[#allocation81_spill] sm:$0xff]  ;;  %v9741_v43 = vld [vmem:[#allocation82_spill] sm:$0xff] }
 0x781   : > { %v4545_v13 = vadd.f32 %v4544_v44, %v4376_v30  ;;  %4079 = vmatmul.bf16.gmra.mxu0 %v9732_v23  ;;  %v5521_v47 = vadd.f32 %v8651_v37, %v9739_v45 }
 0x782   : > { %4248 = vmatmul.bf16.gmra.mxu1 %v9734_v51 }
 0x783   : > { %v5514_v49 = vadd.f32 %v8653_v42, %v4545_v13  ;;  %4417 = vmatmul.bf16.gmra.mxu2 %v9735_v9  ;;  %v9742_v13 = vld [vmem:[#allocation83_spill] sm:$0xff] }
 0x785   : > { %4586 = vmatmul.bf16.gmra.mxu3 %v9736_v1  ;;  %v5734_v7 = vpack.c.bf16 %v5514_v49, %v5513_v63  ;;  %v9743_v1 = vld [vmem:[#allocation85_spill] sm:$0xff] }
 0x786   : > { %v4378_v34 = vpop.f32.mrf.mxu2  ;;  %v4042_v28 = vpop.f32.mrf.mxu0 }
 0x787   : > { %5862 = vst [vmem:[%s7907_s19 + $0x118] sm:$0xff] %v5734_v7  ;;  %v4379_v14 = vadd.f32 %v4378_v34, %v4210_v50  ;;  %v4211_v56 = vpop.f32.mrf.mxu1  ;;  %v5525_v7 = vadd.f32 %v8651_v37, %v9743_v1 }
 0x788   : > { %v4547_v22 = vpop.f32.mrf.mxu3  ;;  %v4212_v6 = vadd.f32 %v4211_v56, %v4042_v28 }
 0x789   : > { %v4548_v57 = vadd.f32 %v4547_v22, %v4379_v14 }
 0x78b   : > { %v5518_v38 = vadd.f32 %v8653_v42, %v4548_v57 }
 0x78d   : > { %v5736_v5 = vpack.c.bf16 %v5518_v38, %v5517_v59 }
 0x78e   : > { %v4380_v39 = vpop.f32.mrf.mxu2  ;;  %v4045_v18 = vpop.f32.mrf.mxu0 }
 0x78f   : > { %5864 = vst [vmem:[%s7907_s19 + $0x128] sm:$0xff] %v5736_v5  ;;  %v4381_v55 = vadd.f32 %v4380_v39, %v4212_v6  ;;  %v4214_v10 = vpop.f32.mrf.mxu1  ;;  %v9744_v5 = vld [vmem:[#allocation86_spill] sm:$0xff] }
 0x790   : > { %v4549_v16 = vpop.f32.mrf.mxu3  ;;  %v4215_v44 = vadd.f32 %v4214_v10, %v4045_v18  ;;  %v9745_v6 = vld [vmem:[#allocation90_spill] sm:$0xff]  ;;  %v9746_v18 = vld [vmem:[#allocation87_spill] sm:$0xff]  ;;  %v9747_v10 = vld [vmem:[#allocation88_spill] sm:$0xff] }
 0x791   : > { %v4550_v41 = vadd.f32 %v4549_v16, %v4381_v55  ;;  %4084 = vmatmul.bf16.gmra.mxu0 %v9738_v19  ;;  %v5529_v39 = vadd.f32 %v8651_v37, %v9745_v6 }
 0x792   : > { %4253 = vmatmul.bf16.gmra.mxu1 %v9740_v3 }
 0x793   : > { %v5522_v30 = vadd.f32 %v8653_v42, %v4550_v41  ;;  %4422 = vmatmul.bf16.gmra.mxu2 %v9741_v43  ;;  %v9748_v41 = vld [vmem:[#allocation89_spill] sm:$0xff] }
 0x795   : > { %4591 = vmatmul.bf16.gmra.mxu3 %v9742_v13  ;;  %v5738_v23 = vpack.c.bf16 %v5522_v30, %v5521_v47  ;;  %v9749_v13 = vld [vmem:[#allocation91_spill] sm:$0xff] }
 0x796   : > { %v4383_v40 = vpop.f32.mrf.mxu2  ;;  %v4047_v50 = vpop.f32.mrf.mxu0 }
 0x797   : > { %5866 = vst [vmem:[%s7907_s19 + $0x138] sm:$0xff] %v5738_v23  ;;  %v4384_v63 = vadd.f32 %v4383_v40, %v4215_v44  ;;  %v4216_v51 = vpop.f32.mrf.mxu1  ;;  %v5533_v23 = vadd.f32 %v8651_v37, %v9749_v13 }
 0x798   : > { %v4552_v49 = vpop.f32.mrf.mxu3  ;;  %v4217_v22 = vadd.f32 %v4216_v51, %v4047_v50 }
 0x799   : > { %v4553_v9 = vadd.f32 %v4552_v49, %v4384_v63 }
 0x79b   : > { %v5526_v34 = vadd.f32 %v8653_v42, %v4553_v9 }
 0x79d   : > { %v5740_v14 = vpack.c.bf16 %v5526_v34, %v5525_v7 }
 0x79e   : > { %v4385_v28 = vpop.f32.mrf.mxu2  ;;  %v4050_v58 = vpop.f32.mrf.mxu0 }
 0x79f   : > { %5868 = vst [vmem:[%s7907_s19 + $0x148] sm:$0xff] %v5740_v14  ;;  %v4386_v56 = vadd.f32 %v4385_v28, %v4217_v22  ;;  %v4219_v59 = vpop.f32.mrf.mxu1  ;;  %v9750_v14 = vld [vmem:[#allocation92_spill] sm:$0xff] }
 0x7a0   : > { %v4554_v57 = vpop.f32.mrf.mxu3  ;;  %v4220_v16 = vadd.f32 %v4219_v59, %v4050_v58  ;;  %v9751_v22 = vld [vmem:[#allocation96_spill] sm:$0xff]  ;;  %v9752_v58 = vld [vmem:[#allocation93_spill] sm:$0xff]  ;;  %v9753_v59 = vld [vmem:[#allocation94_spill] sm:$0xff] }
 0x7a1   : > { %v4555_v38 = vadd.f32 %v4554_v57, %v4386_v56  ;;  %4089 = vmatmul.bf16.gmra.mxu0 %v9744_v5  ;;  %v5537_v28 = vadd.f32 %v8651_v37, %v9751_v22 }
 0x7a2   : > { %4258 = vmatmul.bf16.gmra.mxu1 %v9746_v18 }
 0x7a3   : > { %v5530_v55 = vadd.f32 %v8653_v42, %v4555_v38  ;;  %4427 = vmatmul.bf16.gmra.mxu2 %v9747_v10  ;;  %v9754_v38 = vld [vmem:[#allocation95_spill] sm:$0xff] }
 0x7a5   : > { %4596 = vmatmul.bf16.gmra.mxu3 %v9748_v41  ;;  %v5742_v19 = vpack.c.bf16 %v5530_v55, %v5529_v39  ;;  %v9755_v41 = vld [vmem:[#allocation97_spill] sm:$0xff] }
 0x7a6   : > { %v4388_v45 = vpop.f32.mrf.mxu2  ;;  %v4052_v44 = vpop.f32.mrf.mxu0 }
 0x7a7   : > { %5870 = vst [vmem:[%s7907_s19 + $0x158] sm:$0xff] %v5742_v19  ;;  %v4389_v47 = vadd.f32 %v4388_v45, %v4220_v16  ;;  %v4221_v3 = vpop.f32.mrf.mxu1  ;;  %v5541_v19 = vadd.f32 %v8651_v37, %v9755_v41 }
 0x7a8   : > { %v4557_v30 = vpop.f32.mrf.mxu3  ;;  %v4222_v49 = vadd.f32 %v4221_v3, %v4052_v44 }
 0x7a9   : > { %v4558_v43 = vadd.f32 %v4557_v30, %v4389_v47 }
 0x7ab   : > { %v5534_v40 = vadd.f32 %v8653_v42, %v4558_v43 }
 0x7ad   : > { %v5744_v63 = vpack.c.bf16 %v5534_v40, %v5533_v23 }
 0x7ae   : > { %v4390_v50 = vpop.f32.mrf.mxu2  ;;  %v4055_v1 = vpop.f32.mrf.mxu0 }
 0x7af   : > { %5872 = vst [vmem:[%s7907_s19 + $0x168] sm:$0xff] %v5744_v63  ;;  %v4391_v51 = vadd.f32 %v4390_v50, %v4222_v49  ;;  %v4224_v7 = vpop.f32.mrf.mxu1  ;;  %v9756_v63 = vld [vmem:[#allocation98_spill] sm:$0xff] }
 0x7b0   : > { %v4559_v9 = vpop.f32.mrf.mxu3  ;;  %v4225_v57 = vadd.f32 %v4224_v7, %v4055_v1  ;;  %v9757_v49 = vld [vmem:[#allocation102_spill] sm:$0xff]  ;;  %v9758_v1 = vld [vmem:[#allocation99_spill] sm:$0xff]  ;;  %v9759_v7 = vld [vmem:[#allocation100_spill] sm:$0xff] }
 0x7b1   : > { %v4560_v34 = vadd.f32 %v4559_v9, %v4391_v51  ;;  %4094 = vmatmul.bf16.gmra.mxu0 %v9750_v14  ;;  %v5545_v50 = vadd.f32 %v8651_v37, %v9757_v49 }
 0x7b2   : > { %4263 = vmatmul.bf16.gmra.mxu1 %v9752_v58 }
 0x7b3   : > { %v5538_v56 = vadd.f32 %v8653_v42, %v4560_v34  ;;  %4432 = vmatmul.bf16.gmra.mxu2 %v9753_v59  ;;  %v9760_v34 = vld [vmem:[#allocation101_spill] sm:$0xff] }
 0x7b5   : > { %4601 = vmatmul.bf16.gmra.mxu3 %v9754_v38  ;;  %v5746_v5 = vpack.c.bf16 %v5538_v56, %v5537_v28  ;;  %v9761_v38 = vld [vmem:[#allocation103_spill] sm:$0xff] }
 0x7b6   : > { %v4393_v6 = vpop.f32.mrf.mxu2  ;;  %v4057_v16 = vpop.f32.mrf.mxu0 }
 0x7b7   : > { %5874 = vst [vmem:[%s7907_s19 + $0x178] sm:$0xff] %v5746_v5  ;;  %v4394_v39 = vadd.f32 %v4393_v6, %v4225_v57  ;;  %v4226_v18 = vpop.f32.mrf.mxu1  ;;  %v5549_v5 = vadd.f32 %v8651_v37, %v9761_v38 }
 0x7b8   : > { %v4562_v55 = vpop.f32.mrf.mxu3  ;;  %v4227_v30 = vadd.f32 %v4226_v18, %v4057_v16 }
 0x7b9   : > { %v4563_v10 = vadd.f32 %v4562_v55, %v4394_v39 }
 0x7bb   : > { %v5542_v45 = vadd.f32 %v8653_v42, %v4563_v10 }
 0x7bd   : > { %v5748_v47 = vpack.c.bf16 %v5542_v45, %v5541_v19 }
 0x7be   : > { %v4395_v44 = vpop.f32.mrf.mxu2  ;;  %v4060_v13 = vpop.f32.mrf.mxu0 }
 0x7bf   : > { %5876 = vst [vmem:[%s7907_s19 + $0x188] sm:$0xff] %v5748_v47  ;;  %v4396_v3 = vadd.f32 %v4395_v44, %v4227_v30  ;;  %v4229_v23 = vpop.f32.mrf.mxu1  ;;  %v9762_v47 = vld [vmem:[#allocation104_spill] sm:$0xff] }
 0x7c0   : > { %v4564_v43 = vpop.f32.mrf.mxu3  ;;  %v4230_v9 = vadd.f32 %v4229_v23, %v4060_v13  ;;  %v9763_v30 = vld [vmem:[#allocation108_spill] sm:$0xff]  ;;  %v9764_v13 = vld [vmem:[#allocation105_spill] sm:$0xff]  ;;  %v9765_v23 = vld [vmem:[#allocation106_spill] sm:$0xff] }
 0x7c1   : > { %v4565_v40 = vadd.f32 %v4564_v43, %v4396_v3  ;;  %4099 = vmatmul.bf16.gmra.mxu0 %v9756_v63  ;;  %v5553_v44 = vadd.f32 %v8651_v37, %v9763_v30 }
 0x7c2   : > { %4268 = vmatmul.bf16.gmra.mxu1 %v9758_v1 }
 0x7c3   : > { %v5546_v51 = vadd.f32 %v8653_v42, %v4565_v40  ;;  %4437 = vmatmul.bf16.gmra.mxu2 %v9759_v7  ;;  %v9766_v40 = vld [vmem:[#allocation107_spill] sm:$0xff] }
 0x7c5   : > { %4606 = vmatmul.bf16.gmra.mxu3 %v9760_v34  ;;  %v5750_v14 = vpack.c.bf16 %v5546_v51, %v5545_v50  ;;  %v9767_v34 = vld [vmem:[#allocation109_spill] sm:$0xff] }
 0x7c6   : > { %v4398_v22 = vpop.f32.mrf.mxu2  ;;  %v4062_v57 = vpop.f32.mrf.mxu0 }
 0x7c7   : > { %5878 = vst [vmem:[%s7907_s19 + $0x198] sm:$0xff] %v5750_v14  ;;  %v4399_v28 = vadd.f32 %v4398_v22, %v4230_v9  ;;  %v4231_v58 = vpop.f32.mrf.mxu1  ;;  %v5557_v14 = vadd.f32 %v8651_v37, %v9767_v34 }
 0x7c8   : > { %v4567_v56 = vpop.f32.mrf.mxu3  ;;  %v4232_v55 = vadd.f32 %v4231_v58, %v4062_v57 }
 0x7c9   : > { %v4568_v59 = vadd.f32 %v4567_v56, %v4399_v28 }
 0x7cb   : > { %v5550_v6 = vadd.f32 %v8653_v42, %v4568_v59 }
 0x7cd   : > { %v5752_v39 = vpack.c.bf16 %v5550_v6, %v5549_v5 }
 0x7ce   : > { %v4400_v16 = vpop.f32.mrf.mxu2  ;;  %v4065_v41 = vpop.f32.mrf.mxu0 }
 0x7cf   : > { %5880 = vst [vmem:[%s7907_s19 + $0x1a8] sm:$0xff] %v5752_v39  ;;  %v4401_v18 = vadd.f32 %v4400_v16, %v4232_v55  ;;  %v4234_v19 = vpop.f32.mrf.mxu1  ;;  %v9768_v39 = vld [vmem:[#allocation110_spill] sm:$0xff] }
 0x7d0   : > { %v4569_v10 = vpop.f32.mrf.mxu3  ;;  %v4235_v43 = vadd.f32 %v4234_v19, %v4065_v41  ;;  %v9769_v55 = vld [vmem:[#allocation114_spill] sm:$0xff]  ;;  %v9770_v41 = vld [vmem:[#allocation111_spill] sm:$0xff]  ;;  %v9771_v19 = vld [vmem:[#allocation112_spill] sm:$0xff] }
 0x7d1   : > { %v4570_v45 = vadd.f32 %v4569_v10, %v4401_v18  ;;  %4104 = vmatmul.bf16.gmra.mxu0 %v9762_v47  ;;  %v5561_v16 = vadd.f32 %v8651_v37, %v9769_v55 }
 0x7d2   : > { %4273 = vmatmul.bf16.gmra.mxu1 %v9764_v13 }
 0x7d3   : > { %v5554_v3 = vadd.f32 %v8653_v42, %v4570_v45  ;;  %4442 = vmatmul.bf16.gmra.mxu2 %v9765_v23  ;;  %v9772_v45 = vld [vmem:[#allocation113_spill] sm:$0xff] }
 0x7d5   : > { %4611 = vmatmul.bf16.gmra.mxu3 %v9766_v40  ;;  %v5754_v63 = vpack.c.bf16 %v5554_v3, %v5553_v44  ;;  %v9773_v40 = vld [vmem:[#allocation115_spill] sm:$0xff] }
 0x7d6   : > { %v4403_v49 = vpop.f32.mrf.mxu2  ;;  %v4067_v9 = vpop.f32.mrf.mxu0 }
 0x7d7   : > { %5882 = vst [vmem:[%s7907_s19 + $0x1b8] sm:$0xff] %v5754_v63  ;;  %v4404_v50 = vadd.f32 %v4403_v49, %v4235_v43  ;;  %v4236_v1 = vpop.f32.mrf.mxu1  ;;  %v5565_v63 = vadd.f32 %v8651_v37, %v9773_v40 }
 0x7d8   : > { %v4572_v51 = vpop.f32.mrf.mxu3  ;;  %v4237_v56 = vadd.f32 %v4236_v1, %v4067_v9 }
 0x7d9   : > { %v4573_v7 = vadd.f32 %v4572_v51, %v4404_v50 }
 0x7db   : > { %v5558_v22 = vadd.f32 %v8653_v42, %v4573_v7 }
 0x7dd   : > { %v5756_v28 = vpack.c.bf16 %v5558_v22, %v5557_v14 }
 0x7de   : > { %v4405_v57 = vpop.f32.mrf.mxu2  ;;  %v4070_v38 = vpop.f32.mrf.mxu0 }
 0x7df   : > { %5884 = vst [vmem:[%s7907_s19 + $0x1c8] sm:$0xff] %v5756_v28  ;;  %v4406_v58 = vadd.f32 %v4405_v57, %v4237_v56  ;;  %v4239_v5 = vpop.f32.mrf.mxu1  ;;  %v9774_v28 = vld [vmem:[#allocation116_spill] sm:$0xff] }
 0x7e0   : > { %v4574_v59 = vpop.f32.mrf.mxu3  ;;  %v4240_v10 = vadd.f32 %v4239_v5, %v4070_v38  ;;  %v9775_v56 = vld [vmem:[#allocation120_spill] sm:$0xff]  ;;  %v9776_v38 = vld [vmem:[#allocation117_spill] sm:$0xff]  ;;  %v9777_v5 = vld [vmem:[#allocation118_spill] sm:$0xff] }
 0x7e1   : > { %v4575_v6 = vadd.f32 %v4574_v59, %v4406_v58  ;;  %4109 = vmatmul.bf16.gmra.mxu0 %v9768_v39  ;;  %v5569_v57 = vadd.f32 %v8651_v37, %v9775_v56 }
 0x7e2   : > { %4278 = vmatmul.bf16.gmra.mxu1 %v9770_v41 }
 0x7e3   : > { %v5562_v18 = vadd.f32 %v8653_v42, %v4575_v6  ;;  %4447 = vmatmul.bf16.gmra.mxu2 %v9771_v19  ;;  %v9778_v6 = vld [vmem:[#allocation119_spill] sm:$0xff] }
 0x7e5   : > { %4616 = vmatmul.bf16.gmra.mxu3 %v9772_v45  ;;  %v5758_v47 = vpack.c.bf16 %v5562_v18, %v5561_v16  ;;  %v9779_v45 = vld [vmem:[#allocation121_spill] sm:$0xff] }
 0x7e6   : > { %v4408_v30 = vpop.f32.mrf.mxu2  ;;  %v4072_v43 = vpop.f32.mrf.mxu0 }
 0x7e7   : > { %5886 = vst [vmem:[%s7907_s19 + $0x1d8] sm:$0xff] %v5758_v47  ;;  %v4409_v44 = vadd.f32 %v4408_v30, %v4240_v10  ;;  %v4241_v13 = vpop.f32.mrf.mxu1  ;;  %v5573_v47 = vadd.f32 %v8651_v37, %v9779_v45 }
 0x7e8   : > { %v4577_v3 = vpop.f32.mrf.mxu3  ;;  %v4242_v51 = vadd.f32 %v4241_v13, %v4072_v43 }
 0x7e9   : > { %v4578_v23 = vadd.f32 %v4577_v3, %v4409_v44 }
 0x7eb   : > { %v5566_v49 = vadd.f32 %v8653_v42, %v4578_v23 }
 0x7ed   : > { %v5760_v50 = vpack.c.bf16 %v5566_v49, %v5565_v63 }
 0x7ee   : > { %v4410_v9 = vpop.f32.mrf.mxu2  ;;  %v4075_v34 = vpop.f32.mrf.mxu0 }
 0x7ef   : > { %5888 = vst [vmem:[%s7907_s19 + $0x1e8] sm:$0xff] %v5760_v50  ;;  %v4411_v1 = vadd.f32 %v4410_v9, %v4242_v51  ;;  %v4244_v14 = vpop.f32.mrf.mxu1  ;;  %v9780_v50 = vld [vmem:[#allocation122_spill] sm:$0xff] }
 0x7f0   : > { %v4579_v7 = vpop.f32.mrf.mxu3  ;;  %v4245_v59 = vadd.f32 %v4244_v14, %v4075_v34  ;;  %v9781_v51 = vld [vmem:[#allocation126_spill] sm:$0xff]  ;;  %v9782_v34 = vld [vmem:[#allocation123_spill] sm:$0xff]  ;;  %v9783_v14 = vld [vmem:[#allocation124_spill] sm:$0xff] }
 0x7f1   : > { %v4580_v22 = vadd.f32 %v4579_v7, %v4411_v1  ;;  %4114 = vmatmul.bf16.gmra.mxu0 %v9774_v28  ;;  %v5577_v9 = vadd.f32 %v8651_v37, %v9781_v51 }
 0x7f2   : > { %4283 = vmatmul.bf16.gmra.mxu1 %v9776_v38 }
 0x7f3   : > { %v5570_v58 = vadd.f32 %v8653_v42, %v4580_v22  ;;  %4452 = vmatmul.bf16.gmra.mxu2 %v9777_v5  ;;  %v9784_v22 = vld [vmem:[#allocation125_spill] sm:$0xff] }
 0x7f5   : > { %4621 = vmatmul.bf16.gmra.mxu3 %v9778_v6  ;;  %v5762_v39 = vpack.c.bf16 %v5570_v58, %v5569_v57  ;;  %v9785_v6 = vld [vmem:[#allocation127_spill] sm:$0xff] }
 0x7f6   : > { %v4413_v55 = vpop.f32.mrf.mxu2  ;;  %v4077_v10 = vpop.f32.mrf.mxu0 }
 0x7f7   : > { %5890 = vst [vmem:[%s7907_s19 + $0x1f8] sm:$0xff] %v5762_v39  ;;  %v4414_v16 = vadd.f32 %v4413_v55, %v4245_v59  ;;  %v4246_v41 = vpop.f32.mrf.mxu1  ;;  %v5581_v39 = vadd.f32 %v8651_v37, %v9785_v6 }
 0x7f8   : > { %v4582_v18 = vpop.f32.mrf.mxu3  ;;  %v4247_v3 = vadd.f32 %v4246_v41, %v4077_v10 }
 0x7f9   : > { %v4583_v19 = vadd.f32 %v4582_v18, %v4414_v16 }
 0x7fb   : > { %v5574_v30 = vadd.f32 %v8653_v42, %v4583_v19 }
 0x7fd   : > { %v5764_v44 = vpack.c.bf16 %v5574_v30, %v5573_v47 }
 0x7fe   : > { %v4415_v43 = vpop.f32.mrf.mxu2  ;;  %v4080_v40 = vpop.f32.mrf.mxu0 }
 0x7ff   : > { %5892 = vst [vmem:[%s7907_s19 + $0x208] sm:$0xff] %v5764_v44  ;;  %v4416_v13 = vadd.f32 %v4415_v43, %v4247_v3  ;;  %v4249_v63 = vpop.f32.mrf.mxu1  ;;  %v9786_v44 = vld [vmem:[#allocation128_spill] sm:$0xff] }
 0x800   : > { %v4584_v23 = vpop.f32.mrf.mxu3  ;;  %v4250_v7 = vadd.f32 %v4249_v63, %v4080_v40  ;;  %v9787_v3 = vld [vmem:[#allocation132_spill] sm:$0xff]  ;;  %v9788_v40 = vld [vmem:[#allocation129_spill] sm:$0xff]  ;;  %v9789_v63 = vld [vmem:[#allocation130_spill] sm:$0xff] }
 0x801   : > { %v4585_v49 = vadd.f32 %v4584_v23, %v4416_v13  ;;  %4119 = vmatmul.bf16.gmra.mxu0 %v9780_v50  ;;  %v5585_v43 = vadd.f32 %v8651_v37, %v9787_v3 }
 0x802   : > { %4288 = vmatmul.bf16.gmra.mxu1 %v9782_v34 }
 0x803   : > { %v5578_v1 = vadd.f32 %v8653_v42, %v4585_v49  ;;  %4457 = vmatmul.bf16.gmra.mxu2 %v9783_v14  ;;  %v9790_v49 = vld [vmem:[#allocation131_spill] sm:$0xff] }
 0x805   : > { %4626 = vmatmul.bf16.gmra.mxu3 %v9784_v22  ;;  %v5766_v28 = vpack.c.bf16 %v5578_v1, %v5577_v9  ;;  %v5589_v22 = vadd.f32 %v8651_v37, %v8534_v2 }
 0x806   : > { %v4418_v56 = vpop.f32.mrf.mxu2  ;;  %v4082_v59 = vpop.f32.mrf.mxu0 }
 0x807   : > { %5894 = vst [vmem:[%s7907_s19 + $0x218] sm:$0xff] %v5766_v28  ;;  %v4419_v57 = vadd.f32 %v4418_v56, %v4250_v7  ;;  %v4251_v38 = vpop.f32.mrf.mxu1 }
 0x808   : > { %v4587_v58 = vpop.f32.mrf.mxu3  ;;  %v4252_v18 = vadd.f32 %v4251_v38, %v4082_v59 }
 0x809   : > { %v4588_v5 = vadd.f32 %v4587_v58, %v4419_v57 }
 0x80b   : > { %v5582_v55 = vadd.f32 %v8653_v42, %v4588_v5 }
 0x80d   : > { %v5768_v16 = vpack.c.bf16 %v5582_v55, %v5581_v39  ;;  %v5593_v55 = vadd.f32 %v8651_v37, %v8540_v21 }
 0x80e   : > { %v4420_v10 = vpop.f32.mrf.mxu2  ;;  %v4085_v45 = vpop.f32.mrf.mxu0 }
 0x80f   : > { %5896 = vst [vmem:[%s7907_s19 + $0x228] sm:$0xff] %v5768_v16  ;;  %v4421_v41 = vadd.f32 %v4420_v10, %v4252_v18  ;;  %v4254_v47 = vpop.f32.mrf.mxu1  ;;  %v9791_v18 = vld [vmem:[#allocation135_spill] sm:$0xff]  ;;  %v9792_v10 = vld [vmem:[#allocation136_spill] sm:$0xff] }
 0x810   : > { %v4589_v19 = vpop.f32.mrf.mxu3  ;;  %v4255_v23 = vadd.f32 %v4254_v47, %v4085_v45 }
 0x811   : > { %v4590_v30 = vadd.f32 %v4589_v19, %v4421_v41  ;;  %4124 = vmatmul.bf16.gmra.mxu0 %v9786_v44  ;;  %v9793_v41 = vld [vmem:[#allocation137_spill] sm:$0xff] }
 0x812   : > { %4293 = vmatmul.bf16.gmra.mxu1 %v9788_v40 }
 0x813   : > { %v5586_v13 = vadd.f32 %v8653_v42, %v4590_v30  ;;  %4462 = vmatmul.bf16.gmra.mxu2 %v9789_v63 }
 0x815   : > { %4631 = vmatmul.bf16.gmra.mxu3 %v9790_v49  ;;  %v5770_v50 = vpack.c.bf16 %v5586_v13, %v5585_v43  ;;  %v9794_v43 = vld [vmem:[#allocation133_spill] sm:$0xff] }
 0x816   : > { %v4423_v51 = vpop.f32.mrf.mxu2  ;;  %v4087_v7 = vpop.f32.mrf.mxu0  ;;  %v5597_v21 = vadd.f32 %v8651_v37, %v9794_v43  ;;  %v9801_v43 = vld [vmem:[#allocation146_spill] sm:$0xff] }
 0x817   : > { %5898 = vst [vmem:[%s7907_s19 + $0x238] sm:$0xff] %v5770_v50  ;;  %v4424_v9 = vadd.f32 %v4423_v51, %v4255_v23  ;;  %v4256_v34 = vpop.f32.mrf.mxu1 }
 0x818   : > { %v4592_v1 = vpop.f32.mrf.mxu3  ;;  %v4257_v57 = vadd.f32 %v4256_v34, %v4087_v7  ;;  %v9795_v7 = vld [vmem:[#allocation140_spill] sm:$0xff]  ;;  %v9796_v34 = vld [vmem:[#allocation138_spill] sm:$0xff] }
 0x819   : > { %v4593_v14 = vadd.f32 %v4592_v1, %v4424_v9 }
 0x81b   : > { %v5590_v28 = vadd.f32 %v8653_v42, %v4593_v14  ;;  %v5601_v14 = vadd.f32 %v8651_v37, %v9796_v34 }
 0x81d   : > { %v5772_v56 = vpack.c.bf16 %v5590_v28, %v5589_v22 }
 0x81e   : > { %v4425_v58 = vpop.f32.mrf.mxu2  ;;  %v4090_v5 = vpop.f32.mrf.mxu0 }
 0x81f   : > { %5900 = vst [vmem:[%s7907_s19 + $0x248] sm:$0xff] %v5772_v56  ;;  %v4426_v59 = vadd.f32 %v4425_v58, %v4257_v57  ;;  %v4259_v6 = vpop.f32.mrf.mxu1  ;;  %v9797_v56 = vld [vmem:[#allocation141_spill] sm:$0xff]  ;;  %v9798_v57 = vld [vmem:[#allocation142_spill] sm:$0xff]  ;;  %v9799_v58 = vld [vmem:[#allocation143_spill] sm:$0xff] }
 0x820   : > { %v4594_v38 = vpop.f32.mrf.mxu3  ;;  %v4260_v2 = vadd.f32 %v4259_v6, %v4090_v5 }
 0x821   : > { %v4595_v39 = vadd.f32 %v4594_v38, %v4426_v59  ;;  %4129 = vmatmul.bf16.gmra.mxu0 %v9663_v15 }
 0x822   : > { %4298 = vmatmul.bf16.gmra.mxu1 %v9791_v18 }
 0x823   : > { %v5594_v16 = vadd.f32 %v8653_v42, %v4595_v39  ;;  %4467 = vmatmul.bf16.gmra.mxu2 %v9792_v10 }
 0x825   : > { %4636 = vmatmul.bf16.gmra.mxu3 %v9793_v41  ;;  %v5774_v19 = vpack.c.bf16 %v5594_v16, %v5593_v55 }
 0x826   : > { %v4428_v45 = vpop.f32.mrf.mxu2  ;;  %v4092_v44 = vpop.f32.mrf.mxu0 }
 0x827   : > { %5902 = vst [vmem:[%s7907_s19 + $0x258] sm:$0xff] %v5774_v19  ;;  %v4429_v47 = vadd.f32 %v4428_v45, %v4260_v2  ;;  %v4261_v15 = vpop.f32.mrf.mxu1  ;;  %v9800_v2 = vld [vmem:[#allocation139_spill] sm:$0xff] }
 0x828   : > { %v4597_v30 = vpop.f32.mrf.mxu3  ;;  %v4262_v40 = vadd.f32 %v4261_v15, %v4092_v44  ;;  %v5605_v18 = vadd.f32 %v8651_v37, %v9800_v2  ;;  %v9807_v2 = vld [vmem:[#allocation150_spill] sm:$0xff] }
 0x829   : > { %v4598_v3 = vadd.f32 %v4597_v30, %v4429_v47 }
 0x82b   : > { %v5598_v13 = vadd.f32 %v8653_v42, %v4598_v3 }
 0x82d   : > { %v5776_v23 = vpack.c.bf16 %v5598_v13, %v5597_v21  ;;  %v9802_v21 = vld [vmem:[#allocation144_spill] sm:$0xff] }
 0x82e   : > { %v4430_v63 = vpop.f32.mrf.mxu2  ;;  %v4095_v51 = vpop.f32.mrf.mxu0  ;;  %v5609_v13 = vadd.f32 %v8651_v37, %v9802_v21 }
 0x82f   : > { %5904 = vst [vmem:[%s7907_s19 + $0x268] sm:$0xff] %v5776_v23  ;;  %v4431_v49 = vadd.f32 %v4430_v63, %v4262_v40  ;;  %v4264_v9 = vpop.f32.mrf.mxu1  ;;  %v9803_v63 = vld [vmem:[#allocation147_spill] sm:$0xff] }
 0x830   : > { %v4599_v50 = vpop.f32.mrf.mxu3  ;;  %v4265_v28 = vadd.f32 %v4264_v9, %v4095_v51 }
 0x831   : > { %v4600_v1 = vadd.f32 %v4599_v50, %v4431_v49  ;;  %4134 = vmatmul.bf16.gmra.mxu0 %v9795_v7  ;;  %v9804_v49 = vld [vmem:[#allocation148_spill] sm:$0xff]  ;;  %v9805_v50 = vld [vmem:[#allocation149_spill] sm:$0xff] }
 0x832   : > { %4303 = vmatmul.bf16.gmra.mxu1 %v9797_v56 }
 0x833   : > { %v5602_v22 = vadd.f32 %v8653_v42, %v4600_v1  ;;  %4472 = vmatmul.bf16.gmra.mxu2 %v9798_v57 }
 0x835   : > { %4641 = vmatmul.bf16.gmra.mxu3 %v9799_v58  ;;  %v5778_v59 = vpack.c.bf16 %v5602_v22, %v5601_v14 }
 0x836   : > { %v4433_v38 = vpop.f32.mrf.mxu2  ;;  %v4097_v39 = vpop.f32.mrf.mxu0 }
 0x837   : > { %5906 = vst [vmem:[%s7907_s19 + $0x278] sm:$0xff] %v5778_v59  ;;  %v4434_v5 = vadd.f32 %v4433_v38, %v4265_v28  ;;  %v4266_v55 = vpop.f32.mrf.mxu1  ;;  %v9806_v28 = vld [vmem:[#allocation145_spill] sm:$0xff] }
 0x838   : > { %v4602_v6 = vpop.f32.mrf.mxu3  ;;  %v4267_v19 = vadd.f32 %v4266_v55, %v4097_v39  ;;  %v5613_v56 = vadd.f32 %v8651_v37, %v9806_v28 }
 0x839   : > { %v4603_v16 = vadd.f32 %v4602_v6, %v4434_v5 }
 0x83b   : > { %v5606_v10 = vadd.f32 %v8653_v42, %v4603_v16 }
 0x83d   : > { %v5780_v41 = vpack.c.bf16 %v5606_v10, %v5605_v18  ;;  %v5617_v18 = vadd.f32 %v8651_v37, %v9807_v2  ;;  %v5633_v2 = vadd.f32 %v8651_v37, %v8580_v8 }
 0x83e   : > { %v4435_v45 = vpop.f32.mrf.mxu2  ;;  %v4100_v44 = vpop.f32.mrf.mxu0 }
 0x83f   : > { %5908 = vst [vmem:[%s7907_s19 + $0x288] sm:$0xff] %v5780_v41  ;;  %v4436_v47 = vadd.f32 %v4435_v45, %v4267_v19  ;;  %v4269_v15 = vpop.f32.mrf.mxu1  ;;  %v9808_v19 = vld [vmem:[#allocation153_spill] sm:$0xff] }
 0x840   : > { %v4604_v30 = vpop.f32.mrf.mxu3  ;;  %v4270_v40 = vadd.f32 %v4269_v15, %v4100_v44 }
 0x841   : > { %v4605_v3 = vadd.f32 %v4604_v30, %v4436_v47  ;;  %4139 = vmatmul.bf16.gmra.mxu0 %v9801_v43  ;;  %v5621_v43 = vadd.f32 %v8651_v37, %v8570_v27 }
 0x842   : > { %4308 = vmatmul.bf16.gmra.mxu1 %v9803_v63 }
 0x843   : > { %v5610_v23 = vadd.f32 %v8653_v42, %v4605_v3  ;;  %4477 = vmatmul.bf16.gmra.mxu2 %v9804_v49 }
 0x845   : > { %4646 = vmatmul.bf16.gmra.mxu3 %v9805_v50  ;;  %v5782_v51 = vpack.c.bf16 %v5610_v23, %v5609_v13 }
 0x846   : > { %v4438_v9 = vpop.f32.mrf.mxu2  ;;  %v4102_v34 = vpop.f32.mrf.mxu0 }
 0x847   : > { %5910 = vst [vmem:[%s7907_s19 + $0x298] sm:$0xff] %v5782_v51  ;;  %v4439_v1 = vadd.f32 %v4438_v9, %v4270_v40  ;;  %v4271_v14 = vpop.f32.mrf.mxu1  ;;  %v9809_v51 = vld [vmem:[#allocation151_spill] sm:$0xff] }
 0x848   : > { %v4607_v7 = vpop.f32.mrf.mxu3  ;;  %v4272_v59 = vadd.f32 %v4271_v14, %v4102_v34  ;;  %v5625_v9 = vadd.f32 %v8651_v37, %v9809_v51 }
 0x849   : > { %v4608_v22 = vadd.f32 %v4607_v7, %v4439_v1  ;;  %v9810_v7 = vld [vmem:[#allocation158_spill] sm:$0xff] }
 0x84b   : > { %v5614_v57 = vadd.f32 %v8653_v42, %v4608_v22 }
 0x84d   : > { %v5784_v58 = vpack.c.bf16 %v5614_v57, %v5613_v56 }
 0x84e   : > { %v4440_v38 = vpop.f32.mrf.mxu2  ;;  %v4105_v39 = vpop.f32.mrf.mxu0 }
 0x84f   : > { %5912 = vst [vmem:[%s7907_s19 + $0x2a8] sm:$0xff] %v5784_v58  ;;  %v4441_v5 = vadd.f32 %v4440_v38, %v4272_v59  ;;  %v4274_v55 = vpop.f32.mrf.mxu1  ;;  %v5629_v58 = vadd.f32 %v8651_v37, %v8578_v20 }
 0x850   : > { %v4609_v6 = vpop.f32.mrf.mxu3  ;;  %v4275_v41 = vadd.f32 %v4274_v55, %v4105_v39 }
 0x851   : > { %v4610_v16 = vadd.f32 %v4609_v6, %v4441_v5  ;;  %4144 = vmatmul.bf16.gmra.mxu0 %v9681_v62 }
 0x852   : > { %4313 = vmatmul.bf16.gmra.mxu1 %v9808_v19 }
 0x853   : > { %v5618_v10 = vadd.f32 %v8653_v42, %v4610_v16  ;;  %4482 = vmatmul.bf16.gmra.mxu2 %v9683_v12 }
 0x855   : > { %4651 = vmatmul.bf16.gmra.mxu3 %v9684_v11  ;;  %v5786_v45 = vpack.c.bf16 %v5618_v10, %v5617_v18 }
 0x856   : > { %v4443_v47 = vpop.f32.mrf.mxu2  ;;  %v4107_v15 = vpop.f32.mrf.mxu0 }
 0x857   : > { %5914 = vst [vmem:[%s7907_s19 + $0x2b8] sm:$0xff] %v5786_v45  ;;  %v4444_v30 = vadd.f32 %v4443_v47, %v4275_v41  ;;  %v4276_v62 = vpop.f32.mrf.mxu1 }
 0x858   : > { %v4612_v44 = vpop.f32.mrf.mxu3  ;;  %v4277_v23 = vadd.f32 %v4276_v62, %v4107_v15  ;;  %v5637_v15 = vadd.f32 %v8651_v37, %v8586_v32 }
 0x859   : > { %v4613_v3 = vadd.f32 %v4612_v44, %v4444_v30 }
 0x85b   : > { %v5622_v21 = vadd.f32 %v8653_v42, %v4613_v3 }
 0x85d   : > { %v5788_v13 = vpack.c.bf16 %v5622_v21, %v5621_v43 }
 0x85e   : > { %v4445_v40 = vpop.f32.mrf.mxu2  ;;  %v4110_v63 = vpop.f32.mrf.mxu0 }
 0x85f   : > { %5916 = vst [vmem:[%s7907_s19 + $0x2c8] sm:$0xff] %v5788_v13  ;;  %v4446_v12 = vadd.f32 %v4445_v40, %v4277_v23  ;;  %v4279_v49 = vpop.f32.mrf.mxu1 }
 0x860   : > { %v4614_v11 = vpop.f32.mrf.mxu3  ;;  %v4280_v27 = vadd.f32 %v4279_v49, %v4110_v63 }
 0x861   : > { %v4615_v50 = vadd.f32 %v4614_v11, %v4446_v12  ;;  %4149 = vmatmul.bf16.gmra.mxu0 %v7792_v61  ;;  %v5641_v11 = vadd.f32 %v8651_v37, %v8588_v52 }
 0x862   : > { %4318 = vmatmul.bf16.gmra.mxu1 %v9810_v7 }
 0x863   : > { %v5626_v1 = vadd.f32 %v8653_v42, %v4615_v50  ;;  %4487 = vmatmul.bf16.gmra.mxu2 %v7796_v60 }
 0x865   : > { %4656 = vmatmul.bf16.gmra.mxu3 %v7798_v35  ;;  %v5790_v34 = vpack.c.bf16 %v5626_v1, %v5625_v9 }
 0x866   : > { %v4448_v14 = vpop.f32.mrf.mxu2  ;;  %v4112_v56 = vpop.f32.mrf.mxu0 }
 0x867   : > { %5918 = vst [vmem:[%s7907_s19 + $0x2d8] sm:$0xff] %v5790_v34  ;;  %v4449_v22 = vadd.f32 %v4448_v14, %v4280_v27  ;;  %v4281_v61 = vpop.f32.mrf.mxu1  ;;  %v5645_v34 = vadd.f32 %v8651_v37, %v8594_v29 }
 0x868   : > { %v4617_v28 = vpop.f32.mrf.mxu3  ;;  %v4282_v5 = vadd.f32 %v4281_v61, %v4112_v56 }
 0x869   : > { %v4618_v57 = vadd.f32 %v4617_v28, %v4449_v22 }
 0x86b   : > { %v5630_v59 = vadd.f32 %v8653_v42, %v4618_v57 }
 0x86d   : > { %v5792_v38 = vpack.c.bf16 %v5630_v59, %v5629_v58 }
 0x86e   : > { %v4450_v6 = vpop.f32.mrf.mxu2  ;;  %v4115_v39 = vpop.f32.mrf.mxu0 }
 0x86f   : > { %5920 = vst [vmem:[%s7907_s19 + $0x2e8] sm:$0xff] %v5792_v38  ;;  %v4451_v60 = vadd.f32 %v4450_v6, %v4282_v5  ;;  %v4284_v55 = vpop.f32.mrf.mxu1  ;;  %v5649_v38 = vadd.f32 %v8651_v37, %v8596_v0 }
 0x870   : > { %v4619_v35 = vpop.f32.mrf.mxu3  ;;  %v4285_v10 = vadd.f32 %v4284_v55, %v4115_v39 }
 0x871   : > { %v4620_v16 = vadd.f32 %v4619_v35, %v4451_v60 }
 0x873   : > { %v5634_v18 = vadd.f32 %v8653_v42, %v4620_v16 }
 0x875   : > { %v5794_v20 = vpack.c.bf16 %v5634_v18, %v5633_v2  ;;  %v5653_v18 = vadd.f32 %v8651_v37, %v8602_v54 }
 0x876   : > { %v4453_v41 = vpop.f32.mrf.mxu2  ;;  %v4117_v47 = vpop.f32.mrf.mxu0 }
 0x877   : > { %5922 = vst [vmem:[%s7907_s19 + $0x2f8] sm:$0xff] %v5794_v20  ;;  %v4454_v19 = vadd.f32 %v4453_v41, %v4285_v10  ;;  %v4286_v30 = vpop.f32.mrf.mxu1 }
 0x878   : > { %v4622_v45 = vpop.f32.mrf.mxu3  ;;  %v4287_v8 = vadd.f32 %v4286_v30, %v4117_v47 }
 0x879   : > { %v4623_v44 = vadd.f32 %v4622_v45, %v4454_v19 }
 0x87b   : > { %v5638_v62 = vadd.f32 %v8653_v42, %v4623_v44 }
 0x87d   : > { %v5796_v3 = vpack.c.bf16 %v5638_v62, %v5637_v15  ;;  %v5657_v15 = vadd.f32 %v8651_v37, %v8604_v24 }
 0x87e   : > { %v4455_v43 = vpop.f32.mrf.mxu2  ;;  %v4120_v23 = vpop.f32.mrf.mxu0 }
 0x87f   : > { %5924 = vst [vmem:[%s7907_s19 + $0x308] sm:$0xff] %v5796_v3  ;;  %v4456_v21 = vadd.f32 %v4455_v43, %v4287_v8  ;;  %v4289_v40 = vpop.f32.mrf.mxu1 }
 0x880   : > { %v4624_v13 = vpop.f32.mrf.mxu3  ;;  %v4290_v49 = vadd.f32 %v4289_v40, %v4120_v23 }
 0x881   : > { %v4625_v12 = vadd.f32 %v4624_v13, %v4456_v21 }
 0x883   : > { %v5642_v63 = vadd.f32 %v8653_v42, %v4625_v12  ;;  %v5661_v12 = vadd.f32 %v8651_v37, %v8610_v17 }
 0x885   : > { %v5798_v32 = vpack.c.bf16 %v5642_v63, %v5641_v11 }
 0x886   : > { %v4458_v50 = vpop.f32.mrf.mxu2  ;;  %v4122_v1 = vpop.f32.mrf.mxu0 }
 0x887   : > { %5926 = vst [vmem:[%s7907_s19 + $0x318] sm:$0xff] %v5798_v32  ;;  %v4459_v51 = vadd.f32 %v4458_v50, %v4290_v49  ;;  %v4291_v27 = vpop.f32.mrf.mxu1 }
 0x888   : > { %v4627_v9 = vpop.f32.mrf.mxu3  ;;  %v4292_v52 = vadd.f32 %v4291_v27, %v4122_v1  ;;  %v5665_v27 = vadd.f32 %v8651_v37, %v8612_v36 }
 0x889   : > { %v4628_v7 = vadd.f32 %v4627_v9, %v4459_v51 }
 0x88b   : > { %v5646_v14 = vadd.f32 %v8653_v42, %v4628_v7 }
 0x88d   : > { %v5800_v22 = vpack.c.bf16 %v5646_v14, %v5645_v34 }
 0x88e   : > { %v4460_v28 = vpop.f32.mrf.mxu2  ;;  %v4125_v57 = vpop.f32.mrf.mxu0 }
 0x88f   : > { %5928 = vst [vmem:[%s7907_s19 + $0x328] sm:$0xff] %v5800_v22  ;;  %v4461_v56 = vadd.f32 %v4460_v28, %v4292_v52  ;;  %v4294_v58 = vpop.f32.mrf.mxu1 }
 0x890   : > { %v4629_v61 = vpop.f32.mrf.mxu3  ;;  %v4295_v6 = vadd.f32 %v4294_v58, %v4125_v57  ;;  %v5669_v57 = vadd.f32 %v8651_v37, %v8618_v33 }
 0x891   : > { %v4630_v59 = vadd.f32 %v4629_v61, %v4461_v56 }
 0x893   : > { %v5650_v5 = vadd.f32 %v8653_v42, %v4630_v59 }
 0x895   : > { %v5802_v29 = vpack.c.bf16 %v5650_v5, %v5649_v38 }
 0x896   : > { %v4463_v60 = vpop.f32.mrf.mxu2  ;;  %v4127_v55 = vpop.f32.mrf.mxu0 }
 0x897   : > { %5930 = vst [vmem:[%s7907_s19 + $0x338] sm:$0xff] %v5802_v29  ;;  %v4464_v35 = vadd.f32 %v4463_v60, %v4295_v6  ;;  %v4296_v16 = vpop.f32.mrf.mxu1 }
 0x898   : > { %v4632_v39 = vpop.f32.mrf.mxu3  ;;  %v4297_v0 = vadd.f32 %v4296_v16, %v4127_v55 }
 0x899   : > { %v4633_v2 = vadd.f32 %v4632_v39, %v4464_v35  ;;  %v5673_v39 = vadd.f32 %v8651_v37, %v8620_v48 }
 0x89b   : > { %v5654_v10 = vadd.f32 %v8653_v42, %v4633_v2 }
 0x89d   : > { %v5804_v20 = vpack.c.bf16 %v5654_v10, %v5653_v18 }
 0x89e   : > { %v4465_v41 = vpop.f32.mrf.mxu2  ;;  %v4130_v47 = vpop.f32.mrf.mxu0 }
 0x89f   : > { %5932 = vst [vmem:[%s7907_s19 + $0x348] sm:$0xff] %v5804_v20  ;;  %v4466_v19 = vadd.f32 %v4465_v41, %v4297_v0  ;;  %v4299_v30 = vpop.f32.mrf.mxu1 }
 0x8a0   : > { %v4634_v45 = vpop.f32.mrf.mxu3  ;;  %v4300_v3 = vadd.f32 %v4299_v30, %v4130_v47 }
 0x8a1   : > { %v4635_v44 = vadd.f32 %v4634_v45, %v4466_v19  ;;  %v5677_v19 = vadd.f32 %v8651_v37, %v8626_v25 }
 0x8a3   : > { %v5658_v62 = vadd.f32 %v8653_v42, %v4635_v44 }
 0x8a5   : > { %v5806_v54 = vpack.c.bf16 %v5658_v62, %v5657_v15 }
 0x8a6   : > { %v4468_v8 = vpop.f32.mrf.mxu2  ;;  %v4132_v13 = vpop.f32.mrf.mxu0 }
 0x8a7   : > { %5934 = vst [vmem:[%s7907_s19 + $0x358] sm:$0xff] %v5806_v54  ;;  %v4469_v43 = vadd.f32 %v4468_v8, %v4300_v3  ;;  %v4301_v23 = vpop.f32.mrf.mxu1  ;;  %v5681_v8 = vadd.f32 %v8651_v37, %v8628_v4 }
 0x8a8   : > { %v4637_v21 = vpop.f32.mrf.mxu3  ;;  %v4302_v24 = vadd.f32 %v4301_v23, %v4132_v13 }
 0x8a9   : > { %v4638_v40 = vadd.f32 %v4637_v21, %v4469_v43 }
 0x8ab   : > { %v5662_v11 = vadd.f32 %v8653_v42, %v4638_v40 }
 0x8ad   : > { %v5808_v63 = vpack.c.bf16 %v5662_v11, %v5661_v12 }
 0x8ae   : > { %v4470_v49 = vpop.f32.mrf.mxu2  ;;  %v4135_v51 = vpop.f32.mrf.mxu0 }
 0x8af   : > { %5936 = vst [vmem:[%s7907_s19 + $0x368] sm:$0xff] %v5808_v63  ;;  %v4471_v32 = vadd.f32 %v4470_v49, %v4302_v24  ;;  %v4304_v9 = vpop.f32.mrf.mxu1  ;;  %v5685_v24 = vadd.f32 %v8651_v37, %v8634_v31 }
 0x8b0   : > { %v4639_v50 = vpop.f32.mrf.mxu3  ;;  %v4305_v34 = vadd.f32 %v4304_v9, %v4135_v51 }
 0x8b1   : > { %v4640_v1 = vadd.f32 %v4639_v50, %v4471_v32 }
 0x8b3   : > { %v5666_v7 = vadd.f32 %v8653_v42, %v4640_v1 }
 0x8b5   : > { %v5810_v17 = vpack.c.bf16 %v5666_v7, %v5665_v27 }
 0x8b6   : > { %v4473_v14 = vpop.f32.mrf.mxu2  ;;  %v4137_v28 = vpop.f32.mrf.mxu0 }
 0x8b7   : > { %5938 = vst [vmem:[%s7907_s19 + $0x378] sm:$0xff] %v5810_v17  ;;  %v4474_v22 = vadd.f32 %v4473_v14, %v4305_v34  ;;  %v4306_v56 = vpop.f32.mrf.mxu1  ;;  %v5689_v34 = vadd.f32 %v8651_v37, %v8636_v26 }
 0x8b8   : > { %v4642_v52 = vpop.f32.mrf.mxu3  ;;  %v4307_v36 = vadd.f32 %v4306_v56, %v4137_v28 }
 0x8b9   : > { %v4643_v61 = vadd.f32 %v4642_v52, %v4474_v22 }
 0x8bb   : > { %v5670_v58 = vadd.f32 %v8653_v42, %v4643_v61 }
 0x8bd   : > { %v5812_v59 = vpack.c.bf16 %v5670_v58, %v5669_v57  ;;  %v5693_v58 = vadd.f32 %v8651_v37, %v8642_v46  ;;  %v5697_v46 = vadd.f32 %v8651_v37, %v8644_v53 }
 0x8be   : > { %v4475_v38 = vpop.f32.mrf.mxu2  ;;  %v4140_v29 = vpop.f32.mrf.mxu0 }
 0x8bf   : > { %5940 = vst [vmem:[%s7907_s19 + $0x388] sm:$0xff] %v5812_v59  ;;  %v4476_v5 = vadd.f32 %v4475_v38, %v4307_v36  ;;  %v4309_v60 = vpop.f32.mrf.mxu1 }
 0x8c0   : > { %v4644_v6 = vpop.f32.mrf.mxu3  ;;  %v4310_v16 = vadd.f32 %v4309_v60, %v4140_v29 }
 0x8c1   : > { %v4645_v35 = vadd.f32 %v4644_v6, %v4476_v5 }
 0x8c3   : > { %v5674_v55 = vadd.f32 %v8653_v42, %v4645_v35 }
 0x8c5   : > { %v5814_v33 = vpack.c.bf16 %v5674_v55, %v5673_v39 }
 0x8c6   : > { %v4478_v2 = vpop.f32.mrf.mxu2  ;;  %v4142_v20 = vpop.f32.mrf.mxu0 }
 0x8c7   : > { %5942 = vst [vmem:[%s7907_s19 + $0x398] sm:$0xff] %v5814_v33  ;;  %v4479_v18 = vadd.f32 %v4478_v2, %v4310_v16  ;;  %v4311_v0 = vpop.f32.mrf.mxu1 }
 0x8c8   : > { %v4647_v10 = vpop.f32.mrf.mxu3  ;;  %v4312_v48 = vadd.f32 %v4311_v0, %v4142_v20 }
 0x8c9   : > { %v4648_v41 = vadd.f32 %v4647_v10, %v4479_v18 }
 0x8cb   : > { %v5678_v45 = vadd.f32 %v8653_v42, %v4648_v41 }
 0x8cd   : > { %v5816_v47 = vpack.c.bf16 %v5678_v45, %v5677_v19 }
 0x8ce   : > { %v4480_v30 = vpop.f32.mrf.mxu2  ;;  %v4145_v62 = vpop.f32.mrf.mxu0 }
 0x8cf   : > { %5944 = vst [vmem:[%s7907_s19 + $0x3a8] sm:$0xff] %v5816_v47  ;;  %v4481_v44 = vadd.f32 %v4480_v30, %v4312_v48  ;;  %v4314_v3 = vpop.f32.mrf.mxu1 }
 0x8d0   : > { %v4649_v15 = vpop.f32.mrf.mxu3  ;;  %v4315_v21 = vadd.f32 %v4314_v3, %v4145_v62 }
 0x8d1   : > { %v4650_v54 = vadd.f32 %v4649_v15, %v4481_v44 }
 0x8d3   : > { %v5682_v43 = vadd.f32 %v8653_v42, %v4650_v54 }
 0x8d5   : > { %v5818_v25 = vpack.c.bf16 %v5682_v43, %v5681_v8 }
 0x8d6   : > { %v4483_v13 = vpop.f32.mrf.mxu2  ;;  %v4147_v12 = vpop.f32.mrf.mxu0 }
 0x8d7   : > { %5946 = vst [vmem:[%s7907_s19 + $0x3b8] sm:$0xff] %v5818_v25  ;;  %v4484_v23 = vadd.f32 %v4483_v13, %v4315_v21  ;;  %v4316_v11 = vpop.f32.mrf.mxu1 }
 0x8d8   : > { %v4652_v40 = vpop.f32.mrf.mxu3  ;;  %v4317_v4 = vadd.f32 %v4316_v11, %v4147_v12 }
 0x8d9   : > { %v4653_v63 = vadd.f32 %v4652_v40, %v4484_v23 }
 0x8db   : > { %v5686_v49 = vadd.f32 %v8653_v42, %v4653_v63 }
 0x8dd   : > { %v5820_v32 = vpack.c.bf16 %v5686_v49, %v5685_v24 }
 0x8de   : > { %v4485_v50 = vpop.f32.mrf.mxu2  ;;  %v4150_v1 = vpop.f32.mrf.mxu0 }
 0x8df   : > { %5948 = vst [vmem:[%s7907_s19 + $0x3c8] sm:$0xff] %v5820_v32  ;;  %v4486_v51 = vadd.f32 %v4485_v50, %v4317_v4  ;;  %v4319_v27 = vpop.f32.mrf.mxu1 }
 0x8e0   : > { %v4654_v9 = vpop.f32.mrf.mxu3  ;;  %v4320_v14 = vadd.f32 %v4319_v27, %v4150_v1 }
 0x8e1   : > { %v4655_v7 = vadd.f32 %v4654_v9, %v4486_v51 }
 0x8e3   : > { %v5690_v17 = vadd.f32 %v8653_v42, %v4655_v7 }
 0x8e5   : > { %v5822_v31 = vpack.c.bf16 %v5690_v17, %v5689_v34 }
 0x8e6   : > { %v4488_v22 = vpop.f32.mrf.mxu2  ;;  %v4152_v61 = vpop.f32.mrf.mxu0 }
 0x8e7   : > { %5950 = vst [vmem:[%s7907_s19 + $0x3d8] sm:$0xff] %v5822_v31  ;;  %v4489_v52 = vadd.f32 %v4488_v22, %v4320_v14  ;;  %v4321_v57 = vpop.f32.mrf.mxu1 }
 0x8e8   : > { %v4657_v28 = vpop.f32.mrf.mxu3  ;;  %v4322_v36 = vadd.f32 %v4321_v57, %v4152_v61 }
 0x8e9   : > { %v4658_v56 = vadd.f32 %v4657_v28, %v4489_v52 }
 0x8eb   : > { %v5694_v59 = vadd.f32 %v8653_v42, %v4658_v56 }
 0x8ed   : > { %v5824_v26 = vpack.c.bf16 %v5694_v59, %v5693_v58 }
 0x8ee   : > { %v4490_v38 = vpop.f32.mrf.mxu2 }
 0x8ef   : > { %5952 = vst [vmem:[%s7907_s19 + $0x3e8] sm:$0xff] %v5824_v26  ;;  %v4491_v5 = vadd.f32 %v4490_v38, %v4322_v36 }
 0x8f0   : > { %v4659_v6 = vpop.f32.mrf.mxu3 }
 0x8f1   : > { %v4660_v29 = vadd.f32 %v4659_v6, %v4491_v5 }
 0x8f3   : > { %v5698_v60 = vadd.f32 %v8653_v42, %v4660_v29 }
 0x8f5   : > { %v5826_v35 = vpack.c.bf16 %v5698_v60, %v5697_v46 }
 0x8f7   : > { %5954 = vst [vmem:[%s7907_s19 + $0x3f8] sm:$0xff] %v5826_v35 }
 0x8f8   : > { %6968 = shalt.err (!%p6965_p11)
}
 0x8f9   : > { %s7034_s26 = smov 256   ;;  %s7035_s6 = smov 768  }
 0x8fa   : > { %s7036_s1 = smov 16  }
 0x8fb   : > { %6773 = dma.vmem_to_hbm [thread:$0]  (%p7146_p13), %s5972_s4, 16384, %s5974_s5, %s5956_s15, %s7034_s26, %s7035_s6, %s7036_s1  }
 0x8fc PF: > { %p6793_p12 = scmp.ge.s32.totalorder %s7027_s17, 2  ;;  %s5988_s7 = sand.u32 1, %s7007_s12  }
 0x8fd   : > { %s5989_s10 = scalar_lea.sflag [#allocation5], %s5988_s7 }
 0x8fe   : > { %p6787_p2 = pnand %p6793_p12, %p7150_p0 }
 0x900   : > { %p6788_p3 = pneg %p6787_p2 }
 0x902   : > { %7002 = dma.done.wait (%p6788_p3), %s5989_s10, 16384  }
 0x903   : > { %7004 = vsyncadd (%p6788_p3), %s5989_s10, 4294950912  ;;  %s20_s17 = sadd.s32 1, %s7027_s17   ;;  %s9811_s12 = smov %s7011_s13 }
 0x904   : > { %p17_p1 = scmp.ge.s32.totalorder %s20_s17, 5   ;;  %s9812_s13 = smov %s7015_s14 }
 0x905   : > { %s9813_s14 = smov %s7108_s25  ;;  %s9814_s15 = smov %s7023_s16 }
 0x906   : > { %s9815_s16 = smov %s9817_s18  ;;  %19 = sbr.rel (!%p17_p1) target bundleno = 10 (0xa), region = 102 }
 0x90b   :  { %5995 = vsyncpa [#allocation4], 1 }
 0x90c   :  { %5997 = vsyncpa [#allocation4 + $0x1], 1 }
 0x90d   :  { %5998 = vsyncpa [#allocation7], 1 }
 0x90e   :  { %6000 = vsyncpa [#allocation7 + $0x1], 1 }
 0x90f   :  { %6001 = vsyncpa [#allocation5], 1 }
 0x910   :  { %6003 = vsyncpa [#allocation5 + $0x1], 1 }

</bundles_post_ra>
